<compile_context>
chip_gen: v5e
topology: v5e:2x2
jax: 0.10.0
libtpu: 0.0.40
codegen_flags: <defaults>
</compile_context>

<pallas_src>
import functools

import jax
import jax.numpy as jnp
from jax.experimental import pallas as pl
from jax.experimental.pallas import tpu as pltpu


HIDDEN = 768            # BERT hidden size (pooler / fc1 input)
FC1_OUT = 512
NUM_CLASSES = 2
PADDED_CLASSES = 128    # lane-dense fc2 / output width (multiple of 128)
NEG_PAD_BIAS = -1e30    # padded-class bias (f32) -> exp underflows to 0 exactly


def _cdiv(a, b):
    return -(-a // b)


def _round_up(x, m):
    return _cdiv(x, m) * m


def bert_arch_head_kernel(pooled_ref, pw_ref, pb_ref, w1_ref, b1_ref,
                          w2_ref, b2_ref, out_ref):
    """pooler(dense+tanh) -> fc1 -> ReLU -> (dropout, eval=identity)
       -> fc2(128-lane padded) -> LogSoftmax(dim=1).

    pooled_ref: [TILE_B, 768] bf16
    pw_ref:     [768, 768] bf16   pb_ref: [1, 768] f32
    w1_ref:     [768, 512] bf16   b1_ref: [1, 512] f32
    w2_ref:     [512, 128] bf16   b2_ref: [1, 128] f32  (lane-padded fc2)
    out_ref:    [TILE_B, 128] f32
    """
    x = pooled_ref[...]                                  # bf16

    # Fused BERT pooler: bf16 MXU dot, f32 accumulate; bias add + tanh in f32
    # (v5e EUP has no bf16 path), cls_hs stays in VMEM.
    pre = jnp.dot(x, pw_ref[...], preferred_element_type=jnp.float32) + pb_ref[...]
    cls_hs = jnp.tanh(pre)                               # f32

    # fc1 (bf16 MXU, f32 accumulate) + bias, ReLU.
    h = jnp.dot(cls_hs.astype(jnp.bfloat16), w1_ref[...],
                preferred_element_type=jnp.float32) + b1_ref[...]
    h = jnp.maximum(h, 0.0)

    # Dropout(p=0.1): identity in eval / inference mode.
    # TODO(synk): training-mode dropout would use pltpu.prng_seed + prng_random_bits.

    # fc2 + bias on the 128-lane padded width (dummy classes have bias -1e30,
    # so exp(z_pad - m) == 0 and the real-class log-probs are unchanged).
    logits = jnp.dot(h.astype(jnp.bfloat16), w2_ref[...],
                     preferred_element_type=jnp.float32) + b2_ref[...]

    # Numerically stable LogSoftmax along dim=1 (f32 throughout).
    m = jnp.max(logits, axis=1, keepdims=True)
    z = logits - m
    lse = jnp.log(jnp.sum(jnp.exp(z), axis=1, keepdims=True))
    out_ref[...] = (z - lse).astype(out_ref.dtype)


@functools.partial(jax.jit, static_argnames=("max_tile_b", "single_buffer_weights"))
def _bert_arch_head_jit(pooled, pooler_w, pooler_b, w1, b1, w2, b2,
                        *, max_tile_b, single_buffer_weights):
    B = pooled.shape[0]

    # Even tile split (rounded up to a multiple of 8) bounds padding to <8
    # rows per tile instead of padding up to the next multiple of max_tile_b.
    n_tiles = max(1, _cdiv(B, max_tile_b))
    tile_b = _round_up(_cdiv(B, n_tiles), 8)
    b_pad = _round_up(B, tile_b)
    if b_pad != B:
        pooled = jnp.pad(pooled, ((0, b_pad - B), (0, 0)))

    # bf16 weights + streamed activations (f32 accumulation in-kernel).
    pooled_bf = pooled.astype(jnp.bfloat16)
    pw_bf = pooler_w.astype(jnp.bfloat16)
    w1_bf = w1.astype(jnp.bfloat16)
    # Lane-dense fc2: zero-pad weights (bf16), -1e30-pad biases (f32) for the
    # 126 dummy classes.
    w2p = (jnp.zeros((FC1_OUT, PADDED_CLASSES), jnp.bfloat16)
           .at[:, :NUM_CLASSES].set(w2.astype(jnp.bfloat16)))
    b2p = (jnp.full((1, PADDED_CLASSES), NEG_PAD_BIAS, jnp.float32)
           .at[0, :NUM_CLASSES].set(b2.astype(jnp.float32)))
    pb = pooler_b.reshape(1, HIDDEN).astype(jnp.float32)
    b1r = b1.reshape(1, FC1_OUT).astype(jnp.float32)

    grid = (b_pad // tile_b,)

    # ---- VMEM budget -------------------------------------------------------
    weight_bytes = (2 * (HIDDEN * HIDDEN + HIDDEN * FC1_OUT + FC1_OUT * PADDED_CLASSES)
                    + 4 * (HIDDEN + FC1_OUT + PADDED_CLASSES))
    weight_buf = 1 if single_buffer_weights else 2
    # streamed tiles: bf16 input + f32 output, double-buffered
    tile_bytes = 2 * (2 * tile_b * HIDDEN) + 2 * (4 * tile_b * PADDED_CLASSES)
    # in-kernel intermediates: f32 dot outputs (pre/cls_hs, h, logits) plus
    # the bf16 casts of cls_hs and h.
    interm_bytes = (4 * tile_b * (HIDDEN + FC1_OUT + PADDED_CLASSES)
                    + 2 * tile_b * (HIDDEN + FC1_OUT))
    vmem_limit = weight_buf * weight_bytes + tile_bytes + interm_bytes + (8 << 20)
    vmem_limit = min(int(vmem_limit), 56 << 20)   # stay under v7x's 64 MiB VMEM

    # ---- cost estimate ------------------------------------------------------
    flops = 2 * b_pad * (HIDDEN * HIDDEN + HIDDEN * FC1_OUT
                         + FC1_OUT * PADDED_CLASSES)
    transcendentals = b_pad * (HIDDEN + PADDED_CLASSES)          # tanh + exp
    bytes_accessed = 2 * b_pad * HIDDEN + 4 * b_pad * PADDED_CLASSES + weight_bytes

    # ---- BlockSpecs ---------------------------------------------------------
    def resident_spec(shape):
        # Constant index_map -> DMA'd once, VMEM-resident across the grid.
        idx = lambda i: (0,) * len(shape)
        if single_buffer_weights:
            return pl.BlockSpec(shape, idx, pipeline_mode=pl.Buffered(1))
        return pl.BlockSpec(shape, idx)

    out_padded = pl.pallas_call(
        bert_arch_head_kernel,
        out_shape=jax.ShapeDtypeStruct((b_pad, PADDED_CLASSES), jnp.float32),
        grid_spec=pltpu.PrefetchScalarGridSpec(
            num_scalar_prefetch=0,
            grid=grid,
            in_specs=[
                # streamed activation tiles
                pl.BlockSpec((tile_b, HIDDEN), lambda i: (i, 0)),
                # VMEM-resident weights / biases
                resident_spec((HIDDEN, HIDDEN)),
                resident_spec((1, HIDDEN)),
                resident_spec((HIDDEN, FC1_OUT)),
                resident_spec((1, FC1_OUT)),
                resident_spec((FC1_OUT, PADDED_CLASSES)),
                resident_spec((1, PADDED_CLASSES)),
            ],
            out_specs=pl.BlockSpec((tile_b, PADDED_CLASSES), lambda i: (i, 0)),
        ),
        compiler_params=pltpu.CompilerParams(
            dimension_semantics=("parallel",),
            vmem_limit_bytes=vmem_limit,
        ),
        cost_estimate=pl.CostEstimate(
            flops=int(flops),
            transcendentals=int(transcendentals),
            bytes_accessed=int(bytes_accessed),
        ),
    )(pooled_bf, pw_bf, pb, w1_bf, b1r, w2p, b2p)

    return out_padded[:B, :NUM_CLASSES]


def bert_arch_head(pooled, pooler_w, pooler_b, w1, b1, w2, b2, *, max_tile_b=1024):
    """Batch-tiled Pallas wrapper. pooled: [B, 768]. Returns [B, 2] log-probs.

    Tries single-buffered resident weights first (saves ~2 MB VMEM); falls
    back to the default double-buffered specs if the installed JAX/Mosaic
    build rejects pipeline_mode=pl.Buffered(1).
    """
    try:
        out = _bert_arch_head_jit(pooled, pooler_w, pooler_b, w1, b1, w2, b2,
                                  max_tile_b=max_tile_b,
                                  single_buffer_weights=True)
        return jax.block_until_ready(out)
    except Exception:
        out = _bert_arch_head_jit(pooled, pooler_w, pooler_b, w1, b1, w2, b2,
                                  max_tile_b=max_tile_b,
                                  single_buffer_weights=False)
        return jax.block_until_ready(out)


def synthetic_bert_pooled_input(sent_id, mask, params):
    """Deterministic stand-in for the external `bert` backbone up to (but not
    including) the pooler dense: embedding lookup + attention-masked mean pool.
    The pooler dense + tanh is fused into the Pallas kernel. Plain-JAX glue."""
    emb = params["embedding"][sent_id]                       # [B, S, H]
    m = mask.astype(jnp.float32)[..., None]                  # [B, S, 1]
    pooled = jnp.sum(emb * m, axis=1) / jnp.maximum(jnp.sum(m, axis=1), 1.0)
    return pooled                                            # [B, H]


def init_params(key):
    k = jax.random.split(key, 6)
    vocab = 100
    scale = 0.02
    return {
        # synthetic-bert stand-in params
        "embedding": scale * jax.random.normal(k[0], (vocab, HIDDEN), jnp.float32),
        "pooler_w": scale * jax.random.normal(k[1], (HIDDEN, HIDDEN), jnp.float32),
        "pooler_b": jnp.zeros((HIDDEN,), jnp.float32),
        # BERT_Arch params (fc1: 768->512, fc2: 512->2)
        "fc1_w": scale * jax.random.normal(k[2], (HIDDEN, FC1_OUT), jnp.float32),
        "fc1_b": scale * jax.random.normal(k[3], (FC1_OUT,), jnp.float32),
        "fc2_w": scale * jax.random.normal(k[4], (FC1_OUT, NUM_CLASSES), jnp.float32),
        "fc2_b": scale * jax.random.normal(k[5], (NUM_CLASSES,), jnp.float32),
    }


def bert_arch_forward(sent_id, mask, params, *, max_tile_b=1024):
    pooled = synthetic_bert_pooled_input(sent_id, mask, params)
    return bert_arch_head(pooled, params["pooler_w"], params["pooler_b"],
                          params["fc1_w"], params["fc1_b"],
                          params["fc2_w"], params["fc2_b"],
                          max_tile_b=max_tile_b)


def _reference_forward(sent_id, mask, params):
    pooled = synthetic_bert_pooled_input(sent_id, mask, params)
    cls_hs = jnp.tanh(pooled @ params["pooler_w"] + params["pooler_b"])
    h = jnp.maximum(cls_hs @ params["fc1_w"] + params["fc1_b"], 0.0)
    logits = h @ params["fc2_w"] + params["fc2_b"]
    return jax.nn.log_softmax(logits, axis=1)


if __name__ == "__main__":
    key = jax.random.PRNGKey(0)
    pkey, ikey, jkey = jax.random.split(key, 3)

    params = init_params(pkey)

    # bf16 matmuls (f32 accumulate) vs. the f32 reference -> loosened tolerance.
    ATOL = RTOL = 2e-2

    # Small test: B=2 (not a multiple of 8 -> exercises batch padding).
    B, S = 2, 8
    sent_id = jax.random.randint(ikey, (B, S), 0, 100, dtype=jnp.int32)
    mask = jnp.ones((B, S), dtype=jnp.int32)

    out = bert_arch_forward(sent_id, mask, params)
    out = jax.block_until_ready(out)
    ref = _reference_forward(sent_id, mask, params)
    assert out.shape == (B, NUM_CLASSES)
    assert jnp.allclose(out, ref, atol=ATOL, rtol=RTOL), "mismatch vs reference (B=2)"

    # Multi-tile test: B=20 with max_tile_b=8 -> grid of 3 tiles + ragged edge pad.
    B2, S2 = 20, 8
    sent_id2 = jax.random.randint(jkey, (B2, S2), 0, 100, dtype=jnp.int32)
    mask2 = (jax.random.uniform(jkey, (B2, S2)) < 0.8).astype(jnp.int32)
    mask2 = mask2.at[:, 0].set(1)  # guarantee at least one valid token per row
    out2 = jax.block_until_ready(
        bert_arch_forward(sent_id2, mask2, params, max_tile_b=8))
    ref2 = _reference_forward(sent_id2, mask2, params)
    assert out2.shape == (B2, NUM_CLASSES)
    assert jnp.allclose(out2, ref2, atol=ATOL, rtol=RTOL), "mismatch vs reference (B=20)"

    print("KERNEL_OK")
</pallas_src>

<mosaic_0001>
module attributes {stable_mosaic.version = 11 : i64} {
  func.func @bert_arch_head_kernel(%arg0: i32, %arg1: memref<8x768xbf16, #tpu.memory_space<vmem>>, %arg2: memref<768x768xbf16, #tpu.memory_space<vmem>>, %arg3: memref<1x768xf32, #tpu.memory_space<vmem>>, %arg4: memref<768x512xbf16, #tpu.memory_space<vmem>>, %arg5: memref<1x512xf32, #tpu.memory_space<vmem>>, %arg6: memref<512x128xbf16, #tpu.memory_space<vmem>>, %arg7: memref<1x128xf32, #tpu.memory_space<vmem>>, %arg8: memref<8x128xf32, #tpu.memory_space<vmem>>) attributes {dimension_semantics = [#tpu.dimension_semantics<parallel>], iteration_bounds = array<i64: 1>, scalar_prefetch = 0 : i64, scratch_operands = 0 : i64, tpu.core_type = #tpu.core_type<tc>, window_params = [{transform_indices = @transform_0, window_bounds = array<i64: 8, 768>}, {pipeline_mode = #tpu.pipeline_mode<synchronous>, transform_indices = @transform_1, window_bounds = array<i64: 768, 768>}, {pipeline_mode = #tpu.pipeline_mode<synchronous>, transform_indices = @transform_2, window_bounds = array<i64: 1, 768>}, {pipeline_mode = #tpu.pipeline_mode<synchronous>, transform_indices = @transform_3, window_bounds = array<i64: 768, 512>}, {pipeline_mode = #tpu.pipeline_mode<synchronous>, transform_indices = @transform_4, window_bounds = array<i64: 1, 512>}, {pipeline_mode = #tpu.pipeline_mode<synchronous>, transform_indices = @transform_5, window_bounds = array<i64: 512, 128>}, {pipeline_mode = #tpu.pipeline_mode<synchronous>, transform_indices = @transform_6, window_bounds = array<i64: 1, 128>}, {transform_indices = @transform_7, window_bounds = array<i64: 8, 128>}]} {
    %c0 = arith.constant 0 : index
    %c0_0 = arith.constant 0 : index
    %0 = vector.load %arg1[%c0, %c0_0] : memref<8x768xbf16, #tpu.memory_space<vmem>>, vector<8x768xbf16>
    %c0_1 = arith.constant 0 : index
    %c0_2 = arith.constant 0 : index
    %1 = vector.load %arg2[%c0_1, %c0_2] : memref<768x768xbf16, #tpu.memory_space<vmem>>, vector<768x768xbf16>
    %cst = arith.constant dense<0.000000e+00> : vector<8x768xf32>
    %2 = tpu.matmul %0, %1, %cst {dimension_numbers = #tpu.dot_dimension_numbers<[1], [0], [0], [1], [0, 0, 1, 1], [], []>} : vector<8x768xbf16>, vector<768x768xbf16>, vector<8x768xf32> -> vector<8x768xf32>
    %c0_3 = arith.constant 0 : index
    %c0_4 = arith.constant 0 : index
    %3 = vector.load %arg3[%c0_3, %c0_4] : memref<1x768xf32, #tpu.memory_space<vmem>>, vector<1x768xf32>
    %4 = vector.broadcast %3 : vector<1x768xf32> to vector<8x768xf32>
    %5 = arith.addf %2, %4 : vector<8x768xf32>
    %6 = math.tanh %5 : vector<8x768xf32>
    %7 = arith.truncf %6 : vector<8x768xf32> to vector<8x768xbf16>
    %c0_5 = arith.constant 0 : index
    %c0_6 = arith.constant 0 : index
    %8 = vector.load %arg4[%c0_5, %c0_6] : memref<768x512xbf16, #tpu.memory_space<vmem>>, vector<768x512xbf16>
    %cst_7 = arith.constant dense<0.000000e+00> : vector<8x512xf32>
    %9 = tpu.matmul %7, %8, %cst_7 {dimension_numbers = #tpu.dot_dimension_numbers<[1], [0], [0], [1], [0, 0, 1, 1], [], []>} : vector<8x768xbf16>, vector<768x512xbf16>, vector<8x512xf32> -> vector<8x512xf32>
    %c0_8 = arith.constant 0 : index
    %c0_9 = arith.constant 0 : index
    %10 = vector.load %arg5[%c0_8, %c0_9] : memref<1x512xf32, #tpu.memory_space<vmem>>, vector<1x512xf32>
    %11 = vector.broadcast %10 : vector<1x512xf32> to vector<8x512xf32>
    %12 = arith.addf %9, %11 : vector<8x512xf32>
    %cst_10 = arith.constant 0.000000e+00 : f32
    %13 = vector.broadcast %cst_10 : f32 to vector<8x512xf32>
    %14 = arith.maximumf %12, %13 : vector<8x512xf32>
    %15 = arith.truncf %14 : vector<8x512xf32> to vector<8x512xbf16>
    %c0_11 = arith.constant 0 : index
    %c0_12 = arith.constant 0 : index
    %16 = vector.load %arg6[%c0_11, %c0_12] : memref<512x128xbf16, #tpu.memory_space<vmem>>, vector<512x128xbf16>
    %cst_13 = arith.constant dense<0.000000e+00> : vector<8x128xf32>
    %17 = tpu.matmul %15, %16, %cst_13 {dimension_numbers = #tpu.dot_dimension_numbers<[1], [0], [0], [1], [0, 0, 1, 1], [], []>} : vector<8x512xbf16>, vector<512x128xbf16>, vector<8x128xf32> -> vector<8x128xf32>
    %c0_14 = arith.constant 0 : index
    %c0_15 = arith.constant 0 : index
    %18 = vector.load %arg7[%c0_14, %c0_15] : memref<1x128xf32, #tpu.memory_space<vmem>>, vector<1x128xf32>
    %19 = vector.broadcast %18 : vector<1x128xf32> to vector<8x128xf32>
    %20 = arith.addf %17, %19 : vector<8x128xf32>
    %cst_16 = arith.constant dense<0xFF800000> : vector<8xf32>
    %21 = vector.multi_reduction <maximumf>, %20, %cst_16 [1] : vector<8x128xf32> to vector<8xf32>
    %22 = vector.shape_cast %21 : vector<8xf32> to vector<8x1xf32>
    %23 = vector.broadcast %22 : vector<8x1xf32> to vector<8x128xf32>
    %24 = arith.subf %20, %23 : vector<8x128xf32>
    %25 = math.exp %24 : vector<8x128xf32>
    %cst_17 = arith.constant dense<0.000000e+00> : vector<8xf32>
    %26 = vector.multi_reduction <add>, %25, %cst_17 [1] : vector<8x128xf32> to vector<8xf32>
    %27 = vector.shape_cast %26 : vector<8xf32> to vector<8x1xf32>
    %28 = math.log %27 : vector<8x1xf32>
    %29 = vector.broadcast %28 : vector<8x1xf32> to vector<8x128xf32>
    %30 = arith.subf %24, %29 : vector<8x128xf32>
    %c0_18 = arith.constant 0 : index
    %c0_19 = arith.constant 0 : index
    %31 = vector.load %arg8[%c0_18, %c0_19] : memref<8x128xf32, #tpu.memory_space<vmem>>, vector<8x128xf32>
    tpu.vector_store %arg8[%c0_18, %c0_19], %30 {strides = array<i32>} : memref<8x128xf32, #tpu.memory_space<vmem>>, vector<8x128xf32>,
    return
  }
  func.func @transform_0(%arg0: i32) -> (i32, i32) {
    %c0_i32 = arith.constant 0 : i32
    %c0_i32_0 = arith.constant 0 : i32
    return %arg0, %c0_i32 : i32, i32
  }
  func.func @transform_1(%arg0: i32) -> (i32, i32) {
    %c0_i32 = arith.constant 0 : i32
    %c0_i32_0 = arith.constant 0 : i32
    %c0_i32_1 = arith.constant 0 : i32
    return %c0_i32, %c0_i32_0 : i32, i32
  }
  func.func @transform_2(%arg0: i32) -> (i32, i32) {
    %c0_i32 = arith.constant 0 : i32
    %c0_i32_0 = arith.constant 0 : i32
    %c0_i32_1 = arith.constant 0 : i32
    return %c0_i32, %c0_i32_0 : i32, i32
  }
  func.func @transform_3(%arg0: i32) -> (i32, i32) {
    %c0_i32 = arith.constant 0 : i32
    %c0_i32_0 = arith.constant 0 : i32
    %c0_i32_1 = arith.constant 0 : i32
    return %c0_i32, %c0_i32_0 : i32, i32
  }
  func.func @transform_4(%arg0: i32) -> (i32, i32) {
    %c0_i32 = arith.constant 0 : i32
    %c0_i32_0 = arith.constant 0 : i32
    %c0_i32_1 = arith.constant 0 : i32
    return %c0_i32, %c0_i32_0 : i32, i32
  }
  func.func @transform_5(%arg0: i32) -> (i32, i32) {
    %c0_i32 = arith.constant 0 : i32
    %c0_i32_0 = arith.constant 0 : i32
    %c0_i32_1 = arith.constant 0 : i32
    return %c0_i32, %c0_i32_0 : i32, i32
  }
  func.func @transform_6(%arg0: i32) -> (i32, i32) {
    %c0_i32 = arith.constant 0 : i32
    %c0_i32_0 = arith.constant 0 : i32
    %c0_i32_1 = arith.constant 0 : i32
    return %c0_i32, %c0_i32_0 : i32, i32
  }
  func.func @transform_7(%arg0: i32) -> (i32, i32) {
    %c0_i32 = arith.constant 0 : i32
    %c0_i32_0 = arith.constant 0 : i32
    return %arg0, %c0_i32 : i32, i32
  }
}

module attributes {stable_mosaic.version = 11 : i64} {
  func.func @bert_arch_head_kernel(%arg0: i32, %arg1: memref<8x768xbf16, #tpu.memory_space<vmem>>, %arg2: memref<768x768xbf16, #tpu.memory_space<vmem>>, %arg3: memref<1x768xf32, #tpu.memory_space<vmem>>, %arg4: memref<768x512xbf16, #tpu.memory_space<vmem>>, %arg5: memref<1x512xf32, #tpu.memory_space<vmem>>, %arg6: memref<512x128xbf16, #tpu.memory_space<vmem>>, %arg7: memref<1x128xf32, #tpu.memory_space<vmem>>, %arg8: memref<8x128xf32, #tpu.memory_space<vmem>>) attributes {dimension_semantics = [#tpu.dimension_semantics<parallel>], iteration_bounds = array<i64: 1>, scalar_prefetch = 0 : i64, scratch_operands = 0 : i64, tpu.core_type = #tpu.core_type<tc>, window_params = [{transform_indices = @transform_0, window_bounds = array<i64: 8, 768>}, {pipeline_mode = #tpu.pipeline_mode<synchronous>, transform_indices = @transform_1, window_bounds = array<i64: 768, 768>}, {pipeline_mode = #tpu.pipeline_mode<synchronous>, transform_indices = @transform_2, window_bounds = array<i64: 1, 768>}, {pipeline_mode = #tpu.pipeline_mode<synchronous>, transform_indices = @transform_3, window_bounds = array<i64: 768, 512>}, {pipeline_mode = #tpu.pipeline_mode<synchronous>, transform_indices = @transform_4, window_bounds = array<i64: 1, 512>}, {pipeline_mode = #tpu.pipeline_mode<synchronous>, transform_indices = @transform_5, window_bounds = array<i64: 512, 128>}, {pipeline_mode = #tpu.pipeline_mode<synchronous>, transform_indices = @transform_6, window_bounds = array<i64: 1, 128>}, {transform_indices = @transform_7, window_bounds = array<i64: 8, 128>}]} {
    %c0 = arith.constant 0 : index
    %c0_0 = arith.constant 0 : index
    %0 = vector.load %arg1[%c0, %c0_0] : memref<8x768xbf16, #tpu.memory_space<vmem>>, vector<8x768xbf16>
    %c0_1 = arith.constant 0 : index
    %c0_2 = arith.constant 0 : index
    %1 = vector.load %arg2[%c0_1, %c0_2] : memref<768x768xbf16, #tpu.memory_space<vmem>>, vector<768x768xbf16>
    %cst = arith.constant dense<0.000000e+00> : vector<8x768xf32>
    %2 = tpu.matmul %0, %1, %cst {dimension_numbers = #tpu.dot_dimension_numbers<[1], [0], [0], [1], [0, 0, 1, 1], [], []>} : vector<8x768xbf16>, vector<768x768xbf16>, vector<8x768xf32> -> vector<8x768xf32>
    %c0_3 = arith.constant 0 : index
    %c0_4 = arith.constant 0 : index
    %3 = vector.load %arg3[%c0_3, %c0_4] : memref<1x768xf32, #tpu.memory_space<vmem>>, vector<1x768xf32>
    %4 = vector.broadcast %3 : vector<1x768xf32> to vector<8x768xf32>
    %5 = arith.addf %2, %4 : vector<8x768xf32>
    %6 = math.tanh %5 : vector<8x768xf32>
    %7 = arith.truncf %6 : vector<8x768xf32> to vector<8x768xbf16>
    %c0_5 = arith.constant 0 : index
    %c0_6 = arith.constant 0 : index
    %8 = vector.load %arg4[%c0_5, %c0_6] : memref<768x512xbf16, #tpu.memory_space<vmem>>, vector<768x512xbf16>
    %cst_7 = arith.constant dense<0.000000e+00> : vector<8x512xf32>
    %9 = tpu.matmul %7, %8, %cst_7 {dimension_numbers = #tpu.dot_dimension_numbers<[1], [0], [0], [1], [0, 0, 1, 1], [], []>} : vector<8x768xbf16>, vector<768x512xbf16>, vector<8x512xf32> -> vector<8x512xf32>
    %c0_8 = arith.constant 0 : index
    %c0_9 = arith.constant 0 : index
    %10 = vector.load %arg5[%c0_8, %c0_9] : memref<1x512xf32, #tpu.memory_space<vmem>>, vector<1x512xf32>
    %11 = vector.broadcast %10 : vector<1x512xf32> to vector<8x512xf32>
    %12 = arith.addf %9, %11 : vector<8x512xf32>
    %cst_10 = arith.constant 0.000000e+00 : f32
    %13 = vector.broadcast %cst_10 : f32 to vector<8x512xf32>
    %14 = arith.maximumf %12, %13 : vector<8x512xf32>
    %15 = arith.truncf %14 : vector<8x512xf32> to vector<8x512xbf16>
    %c0_11 = arith.constant 0 : index
    %c0_12 = arith.constant 0 : index
    %16 = vector.load %arg6[%c0_11, %c0_12] : memref<512x128xbf16, #tpu.memory_space<vmem>>, vector<512x128xbf16>
    %cst_13 = arith.constant dense<0.000000e+00> : vector<8x128xf32>
    %17 = tpu.matmul %15, %16, %cst_13 {dimension_numbers = #tpu.dot_dimension_numbers<[1], [0], [0], [1], [0, 0, 1, 1], [], []>} : vector<8x512xbf16>, vector<512x128xbf16>, vector<8x128xf32> -> vector<8x128xf32>
    %c0_14 = arith.constant 0 : index
    %c0_15 = arith.constant 0 : index
    %18 = vector.load %arg7[%c0_14, %c0_15] : memref<1x128xf32, #tpu.memory_space<vmem>>, vector<1x128xf32>
    %19 = vector.broadcast %18 : vector<1x128xf32> to vector<8x128xf32>
    %20 = arith.addf %17, %19 : vector<8x128xf32>
    %cst_16 = arith.constant dense<0xFF800000> : vector<8xf32>
    %21 = vector.multi_reduction <maximumf>, %20, %cst_16 [1] : vector<8x128xf32> to vector<8xf32>
    %22 = vector.shape_cast %21 : vector<8xf32> to vector<8x1xf32>
    %23 = vector.broadcast %22 : vector<8x1xf32> to vector<8x128xf32>
    %24 = arith.subf %20, %23 : vector<8x128xf32>
    %25 = math.exp %24 : vector<8x128xf32>
    %cst_17 = arith.constant dense<0.000000e+00> : vector<8xf32>
    %26 = vector.multi_reduction <add>, %25, %cst_17 [1] : vector<8x128xf32> to vector<8xf32>
    %27 = vector.shape_cast %26 : vector<8xf32> to vector<8x1xf32>
    %28 = math.log %27 : vector<8x1xf32>
    %29 = vector.broadcast %28 : vector<8x1xf32> to vector<8x128xf32>
    %30 = arith.subf %24, %29 : vector<8x128xf32>
    %c0_18 = arith.constant 0 : index
    %c0_19 = arith.constant 0 : index
    %31 = vector.load %arg8[%c0_18, %c0_19] : memref<8x128xf32, #tpu.memory_space<vmem>>, vector<8x128xf32>
    tpu.vector_store %arg8[%c0_18, %c0_19], %30 {strides = array<i32>} : memref<8x128xf32, #tpu.memory_space<vmem>>, vector<8x128xf32>,
    return
  }
  func.func @transform_0(%arg0: i32) -> (i32, i32) {
    %c0_i32 = arith.constant 0 : i32
    %c0_i32_0 = arith.constant 0 : i32
    return %arg0, %c0_i32 : i32, i32
  }
  func.func @transform_1(%arg0: i32) -> (i32, i32) {
    %c0_i32 = arith.constant 0 : i32
    %c0_i32_0 = arith.constant 0 : i32
    %c0_i32_1 = arith.constant 0 : i32
    return %c0_i32, %c0_i32_0 : i32, i32
  }
  func.func @transform_2(%arg0: i32) -> (i32, i32) {
    %c0_i32 = arith.constant 0 : i32
    %c0_i32_0 = arith.constant 0 : i32
    %c0_i32_1 = arith.constant 0 : i32
    return %c0_i32, %c0_i32_0 : i32, i32
  }
  func.func @transform_3(%arg0: i32) -> (i32, i32) {
    %c0_i32 = arith.constant 0 : i32
    %c0_i32_0 = arith.constant 0 : i32
    %c0_i32_1 = arith.constant 0 : i32
    return %c0_i32, %c0_i32_0 : i32, i32
  }
  func.func @transform_4(%arg0: i32) -> (i32, i32) {
    %c0_i32 = arith.constant 0 : i32
    %c0_i32_0 = arith.constant 0 : i32
    %c0_i32_1 = arith.constant 0 : i32
    return %c0_i32, %c0_i32_0 : i32, i32
  }
  func.func @transform_5(%arg0: i32) -> (i32, i32) {
    %c0_i32 = arith.constant 0 : i32
    %c0_i32_0 = arith.constant 0 : i32
    %c0_i32_1 = arith.constant 0 : i32
    return %c0_i32, %c0_i32_0 : i32, i32
  }
  func.func @transform_6(%arg0: i32) -> (i32, i32) {
    %c0_i32 = arith.constant 0 : i32
    %c0_i32_0 = arith.constant 0 : i32
    %c0_i32_1 = arith.constant 0 : i32
    return %c0_i32, %c0_i32_0 : i32, i32
  }
  func.func @transform_7(%arg0: i32) -> (i32, i32) {
    %c0_i32 = arith.constant 0 : i32
    %c0_i32_0 = arith.constant 0 : i32
    return %arg0, %c0_i32 : i32, i32
  }
}

</mosaic_0001>

<bundles_post_ra>
// kernel: _bert_arch_head_jit.1
= control target key start
LH: loop header
LB: loop body
LE: loop exit
PB: predicated region body
PF: predicated region fallthrough
CT: control target
= control target key end

     0   :  { %s9862_s1 = inlined_call_operand.vmem [shape: bf16[768,768], index: 1, kind: input, shape index: {}]   ;;  %s9863_s0 = inlined_call_operand.vmem [shape: bf16[8,768], index: 0, kind: input, shape index: {}]   ;;  %s9864_s2 = inlined_call_operand.vmem [shape: f32[1,768], index: 2, kind: input, shape index: {}]   ;;  %s9865_s3 = inlined_call_operand.vmem [shape: bf16[768,512], index: 3, kind: input, shape index: {}]   ;;  %s9866_s4 = inlined_call_operand.vmem [shape: f32[1,512], index: 4, kind: input, shape index: {}]   ;;  %s9867_s5 = inlined_call_operand.vmem [shape: bf16[512,128], index: 5, kind: input, shape index: {}]   ;;  %s9868_s6 = inlined_call_operand.vmem [shape: f32[1,128], index: 6, kind: input, shape index: {}]   ;;  %s9869_s7 = inlined_call_operand.vmem [shape: f32[8,128], index: 7, kind: output, shape index: {}]  }
   0x1   :  { %v4251_v0 = vld [vmem:[%s9862_s1 + $0x150] sm:$0xf]  ;;  %v6174_v1 = vld [vmem:[%s9862_s1 + $0x164] sm:$0xf0]  ;;  %v4227_v11 = vld [vmem:[%s9862_s1 + $0x120] sm:$0xf] }
   0x2   :  { %v4443_v2 = vld [vmem:[%s9862_s1 + $0x2d0] sm:$0xf]  ;;  %v4252_v3 = vor.u32 %v6174_v1, %v4251_v0  ;;  %v6222_v4 = vld [vmem:[%s9862_s1 + $0x2e4] sm:$0xf0]  ;;  %v6168_v13 = vld [vmem:[%s9862_s1 + $0x134] sm:$0xf0] }
   0x3   :  { %v4635_v5 = vld [vmem:[%s9862_s1 + $0x450] sm:$0xf]  ;;  %v6270_v6 = vld [vmem:[%s9862_s1 + $0x464] sm:$0xf0]  ;;  %v4444_v7 = vor.u32 %v6222_v4, %v4443_v2  ;;  %v4419_v14 = vld [vmem:[%s9862_s1 + $0x2a0] sm:$0xf]  ;;  %v4228_v16 = vor.u32 %v6168_v13, %v4227_v11 }
   0x4   :  { %v4636_v8 = vor.u32 %v6270_v6, %v4635_v5  ;;  %v4827_v9 = vld [vmem:[%s9862_s1 + $0x5d0] sm:$0xf]  ;;  %v6318_v10 = vld [vmem:[%s9862_s1 + $0x5e4] sm:$0xf0]  ;;  %1792 = vmatpush.bf16.msra.mxu0 %v4252_v3  ;;  %v6216_v15 = vld [vmem:[%s9862_s1 + $0x2b4] sm:$0xf0] }
   0x5   :  { %v4828_v12 = vor.u32 %v6318_v10, %v4827_v9  ;;  %1805 = vmatpush.bf16.msra.mxu1 %v4444_v7  ;;  %v4420_v17 = vor.u32 %v6216_v15, %v4419_v14  ;;  %v4611_v18 = vld [vmem:[%s9862_s1 + $0x420] sm:$0xf]  ;;  %v6264_v19 = vld [vmem:[%s9862_s1 + $0x434] sm:$0xf0]  ;;  %v4203_v23 = vld [vmem:[%s9862_s1 + $0xf0] sm:$0xf] }
   0x6   :  { %1818 = vmatpush.bf16.msra.mxu2 %v4636_v8  ;;  %v4803_v20 = vld [vmem:[%s9862_s1 + $0x5a0] sm:$0xf]  ;;  %v4612_v21 = vor.u32 %v6264_v19, %v4611_v18  ;;  %v6312_v22 = vld [vmem:[%s9862_s1 + $0x5b4] sm:$0xf0]  ;;  %v6162_v24 = vld [vmem:[%s9862_s1 + $0x104] sm:$0xf0] }
   0x7   :  { %1831 = vmatpush.bf16.msra.mxu3 %v4828_v12  ;;  %v4804_v25 = vor.u32 %v6312_v22, %v4803_v20  ;;  %v4395_v26 = vld [vmem:[%s9862_s1 + $0x270] sm:$0xf]  ;;  %v6210_v27 = vld [vmem:[%s9862_s1 + $0x284] sm:$0xf0]  ;;  %v4204_v29 = vor.u32 %v6162_v24, %v4203_v23  ;;  %v4179_v35 = vld [vmem:[%s9862_s1 + $0xc0] sm:$0xf] }
   0x8   :  { %v4587_v28 = vld [vmem:[%s9862_s1 + $0x3f0] sm:$0xf]  ;;  %1793 = vmatpush.bf16.msra.mxu0 %v4228_v16  ;;  %v6258_v30 = vld [vmem:[%s9862_s1 + $0x404] sm:$0xf0]  ;;  %v4396_v33 = vor.u32 %v6210_v27, %v4395_v26  ;;  %v6156_v36 = vld [vmem:[%s9862_s1 + $0xd4] sm:$0xf0] }
   0x9   :  { %v4779_v31 = vld [vmem:[%s9862_s1 + $0x570] sm:$0xf]  ;;  %v6306_v32 = vld [vmem:[%s9862_s1 + $0x584] sm:$0xf0]  ;;  %1806 = vmatpush.bf16.msra.mxu1 %v4420_v17  ;;  %v4588_v34 = vor.u32 %v6258_v30, %v4587_v28  ;;  %v4371_v37 = vld [vmem:[%s9862_s1 + $0x240] sm:$0xf]  ;;  %v4180_v44 = vor.u32 %v6156_v36, %v4179_v35 }
   0xa   :  { %1819 = vmatpush.bf16.msra.mxu2 %v4612_v21  ;;  %v4780_v38 = vor.u32 %v6306_v32, %v4779_v31  ;;  %v6204_v39 = vld [vmem:[%s9862_s1 + $0x254] sm:$0xf0]  ;;  %v4563_v40 = vld [vmem:[%s9862_s1 + $0x3c0] sm:$0xf]  ;;  %v4155_v47 = vld [vmem:[%s9862_s1 + $0x90] sm:$0xf] }
   0xb   :  { %1832 = vmatpush.bf16.msra.mxu3 %v4804_v25  ;;  %v6252_v41 = vld [vmem:[%s9862_s1 + $0x3d4] sm:$0xf0]  ;;  %v4755_v42 = vld [vmem:[%s9862_s1 + $0x540] sm:$0xf]  ;;  %v4372_v45 = vor.u32 %v6204_v39, %v4371_v37  ;;  %v6150_v48 = vld [vmem:[%s9862_s1 + $0xa4] sm:$0xf0] }
   0xc   :  { %v6300_v43 = vld [vmem:[%s9862_s1 + $0x554] sm:$0xf0]  ;;  %1794 = vmatpush.bf16.msra.mxu0 %v4204_v29  ;;  %v4564_v46 = vor.u32 %v6252_v41, %v4563_v40  ;;  %v4347_v49 = vld [vmem:[%s9862_s1 + $0x210] sm:$0xf]  ;;  %v6198_v51 = vld [vmem:[%s9862_s1 + $0x224] sm:$0xf0]  ;;  %v4156_v56 = vor.u32 %v6150_v48, %v4155_v47 }
   0xd   :  { %1807 = vmatpush.bf16.msra.mxu1 %v4396_v33  ;;  %v4756_v50 = vor.u32 %v6300_v43, %v4755_v42  ;;  %v4539_v52 = vld [vmem:[%s9862_s1 + $0x390] sm:$0xf]  ;;  %v6246_v53 = vld [vmem:[%s9862_s1 + $0x3a4] sm:$0xf0]  ;;  %v4348_v57 = vor.u32 %v6198_v51, %v4347_v49  ;;  %v4131_v59 = vld [vmem:[%s9862_s1 + $0x60] sm:$0xf] }
   0xe   :  { %1820 = vmatpush.bf16.msra.mxu2 %v4588_v34  ;;  %v4731_v54 = vld [vmem:[%s9862_s1 + $0x510] sm:$0xf]  ;;  %v6294_v55 = vld [vmem:[%s9862_s1 + $0x524] sm:$0xf0]  ;;  %v4540_v58 = vor.u32 %v6246_v53, %v4539_v52  ;;  %v6144_v60 = vld [vmem:[%s9862_s1 + $0x74] sm:$0xf0] }
   0xf   :  { %1833 = vmatpush.bf16.msra.mxu3 %v4780_v38  ;;  %v4323_v61 = vld [vmem:[%s9862_s1 + $0x1e0] sm:$0xf]  ;;  %v4732_v62 = vor.u32 %v6294_v55, %v4731_v54  ;;  %v6192_v63 = vld [vmem:[%s9862_s1 + $0x1f4] sm:$0xf0]  ;;  %v4132_v4 = vor.u32 %v6144_v60, %v4131_v59  ;;  %v4107_v7 = vld [vmem:[%s9862_s1 + $0x30] sm:$0xf] }
  0x10   :  { %1795 = vmatpush.bf16.msra.mxu0 %v4180_v44  ;;  %v4515_v0 = vld [vmem:[%s9862_s1 + $0x360] sm:$0xf]  ;;  %v6240_v1 = vld [vmem:[%s9862_s1 + $0x374] sm:$0xf0]  ;;  %v4324_v5 = vor.u32 %v6192_v63, %v4323_v61  ;;  %v6138_v8 = vld [vmem:[%s9862_s1 + $0x44] sm:$0xf0] }
  0x11   :  { %1808 = vmatpush.bf16.msra.mxu1 %v4372_v45  ;;  %v4707_v2 = vld [vmem:[%s9862_s1 + $0x4e0] sm:$0xf]  ;;  %v6288_v3 = vld [vmem:[%s9862_s1 + $0x4f4] sm:$0xf0]  ;;  %v4516_v6 = vor.u32 %v6240_v1, %v4515_v0  ;;  %v4299_v9 = vld [vmem:[%s9862_s1 + $0x1b0] sm:$0xf]  ;;  %v4108_v16 = vor.u32 %v6138_v8, %v4107_v7 }
  0x12   :  { %1821 = vmatpush.bf16.msra.mxu2 %v4564_v46  ;;  %v4708_v10 = vor.u32 %v6288_v3, %v4707_v2  ;;  %v6186_v11 = vld [vmem:[%s9862_s1 + $0x1c4] sm:$0xf0]  ;;  %v4491_v12 = vld [vmem:[%s9862_s1 + $0x330] sm:$0xf]  ;;  %v4083_v17 = vld [vmem:[%s9862_s1] sm:$0xf] }
  0x13   :  { %1834 = vmatpush.bf16.msra.mxu3 %v4756_v50  ;;  %v6234_v13 = vld [vmem:[%s9862_s1 + $0x344] sm:$0xf0]  ;;  %v4683_v14 = vld [vmem:[%s9862_s1 + $0x4b0] sm:$0xf]  ;;  %v6132_v18 = vld [vmem:[%s9862_s1 + $0x14] sm:$0xf0]  ;;  %v4300_v19 = vor.u32 %v6186_v11, %v4299_v9 }
  0x14   :  { %1796 = vmatpush.bf16.msra.mxu0 %v4156_v56  ;;  %v6282_v15 = vld [vmem:[%s9862_s1 + $0x4c4] sm:$0xf0]  ;;  %v4492_v20 = vor.u32 %v6234_v13, %v4491_v12  ;;  %v4275_v21 = vld [vmem:[%s9862_s1 + $0x180] sm:$0xf]  ;;  %v6180_v22 = vld [vmem:[%s9862_s1 + $0x194] sm:$0xf0]  ;;  %v4084_v31 = vor.u32 %v6132_v18, %v4083_v17 }
  0x15   :  { %1809 = vmatpush.bf16.msra.mxu1 %v4348_v57  ;;  %v4467_v23 = vld [vmem:[%s9862_s1 + $0x300] sm:$0xf]  ;;  %v4684_v24 = vor.u32 %v6282_v15, %v4683_v14  ;;  %v6228_v25 = vld [vmem:[%s9862_s1 + $0x314] sm:$0xf0]  ;;  %v5019_v28 = vld [vmem:[%s9862_s1 + $0x750] sm:$0xf]  ;;  %v4276_v35 = vor.u32 %v6180_v22, %v4275_v21 }
  0x16   :  { %1822 = vmatpush.bf16.msra.mxu2 %v4540_v58  ;;  %v4659_v26 = vld [vmem:[%s9862_s1 + $0x480] sm:$0xf]  ;;  %v6276_v27 = vld [vmem:[%s9862_s1 + $0x494] sm:$0xf0]  ;;  %v6366_v29 = vld [vmem:[%s9862_s1 + $0x764] sm:$0xf0]  ;;  %v4468_v36 = vor.u32 %v6228_v25, %v4467_v23 }
  0x17   :  { %1835 = vmatpush.bf16.msra.mxu3 %v4732_v62  ;;  %v5211_v30 = vld [vmem:[%s9862_s1 + $0x8d0] sm:$0xf]  ;;  %v6414_v32 = vld [vmem:[%s9862_s1 + $0x8e4] sm:$0xf0]  ;;  %v6171_v33 = vld [vmem:[%s9862_s1 + $0x154] sm:$0xf]  ;;  %v4660_v39 = vor.u32 %v6276_v27, %v4659_v26  ;;  %v5020_v40 = vor.u32 %v6366_v29, %v5019_v28 }
  0x18   :  { %1797 = vmatpush.bf16.msra.mxu0 %v4132_v4  ;;  %v4253_v34 = vld [vmem:[%s9862_s1 + $0x168] sm:$0xf0]  ;;  %v6219_v37 = vld [vmem:[%s9862_s1 + $0x2d4] sm:$0xf]  ;;  %v5212_v41 = vor.u32 %v6414_v32, %v5211_v30  ;;  %v4995_v43 = vld [vmem:[%s9862_s1 + $0x720] sm:$0xf] }
  0x19   :  { %1810 = vmatpush.bf16.msra.mxu1 %v4324_v5  ;;  %v4445_v38 = vld [vmem:[%s9862_s1 + $0x2e8] sm:$0xf0]  ;;  %v4256_v42 = vor.u32 %v6171_v33, %v4253_v34  ;;  %v6360_v44 = vld [vmem:[%s9862_s1 + $0x734] sm:$0xf0]  ;;  %v5187_v45 = vld [vmem:[%s9862_s1 + $0x8a0] sm:$0xf] }
  0x1a   :  { %1823 = vmatpush.bf16.msra.mxu2 %v4516_v6  ;;  %v4448_v46 = vor.u32 %v6219_v37, %v4445_v38  ;;  %v6408_v47 = vld [vmem:[%s9862_s1 + $0x8b4] sm:$0xf0]  ;;  %v6165_v48 = vld [vmem:[%s9862_s1 + $0x124] sm:$0xf]  ;;  %v4229_v49 = vld [vmem:[%s9862_s1 + $0x138] sm:$0xf0]  ;;  %v4996_v52 = vor.u32 %v6360_v44, %v4995_v43 }
  0x1b   :  { %1836 = vmatpush.bf16.msra.mxu3 %v4708_v10  ;;  %v6213_v50 = vld [vmem:[%s9862_s1 + $0x2a4] sm:$0xf]  ;;  %v4421_v51 = vld [vmem:[%s9862_s1 + $0x2b8] sm:$0xf0]  ;;  %v4971_v53 = vld [vmem:[%s9862_s1 + $0x6f0] sm:$0xf]  ;;  %v5188_v54 = vor.u32 %v6408_v47, %v5187_v45  ;;  %v4232_v55 = vor.u32 %v6165_v48, %v4229_v49 }
  0x1c   :  { %1798 = vmatpush.bf16.msra.mxu0 %v4108_v16  ;;  %v6354_v56 = vld [vmem:[%s9862_s1 + $0x704] sm:$0xf0]  ;;  %v5163_v57 = vld [vmem:[%s9862_s1 + $0x870] sm:$0xf]  ;;  %v4424_v59 = vor.u32 %v6213_v50, %v4421_v51  ;;  %v6159_v60 = vld [vmem:[%s9862_s1 + $0xf4] sm:$0xf] }
  0x1d   :  { %1811 = vmatpush.bf16.msra.mxu1 %v4300_v19  ;;  %v6402_v58 = vld [vmem:[%s9862_s1 + $0x884] sm:$0xf0]  ;;  %v4205_v61 = vld [vmem:[%s9862_s1 + $0x108] sm:$0xf0]  ;;  %v6207_v62 = vld [vmem:[%s9862_s1 + $0x274] sm:$0xf]  ;;  %v4972_v0 = vor.u32 %v6354_v56, %v4971_v53 }
  0x1e   :  { %1824 = vmatpush.bf16.msra.mxu2 %v4492_v20  ;;  %v4397_v63 = vld [vmem:[%s9862_s1 + $0x288] sm:$0xf0]  ;;  %v5164_v1 = vor.u32 %v6402_v58, %v5163_v57  ;;  %v26_v3 = vld [vmem:[%s9863_s0] sm:$0xff]  ;;  %v4208_v4 = vor.u32 %v6159_v60, %v4205_v61  ;;  %v6348_v6 = vld [vmem:[%s9862_s1 + $0x6d4] sm:$0xf0] }
  0x1f   :  { %1837 = vmatpush.bf16.msra.mxu3 %v4684_v24  ;;  %v27_v2 = vld [vmem:[%s9863_s0 + $0x8] sm:$0xff]  ;;  %v4947_v5 = vld [vmem:[%s9862_s1 + $0x6c0] sm:$0xf]  ;;  %v334_v9 = vunpack.c.l.b16 %v26_v3  ;;  %v4400_v11 = vor.u32 %v6207_v62, %v4397_v63  ;;  %v6396_v12 = vld [vmem:[%s9862_s1 + $0x854] sm:$0xf0]  ;;  %v335_v15 = vunpack.c.h.b16 %v26_v3 }
  0x20   :  { %1799 = vmatpush.bf16.msra.mxu0 %v4084_v31  ;;  %v5139_v7 = vld [vmem:[%s9862_s1 + $0x840] sm:$0xf]  ;;  %v336_v8 = vunpack.c.l.b16 %v27_v2  ;;  %v337_v10 = vunpack.c.h.b16 %v27_v2  ;;  %v6153_v13 = vld [vmem:[%s9862_s1 + $0xc4] sm:$0xf]  ;;  %v4181_v14 = vld [vmem:[%s9862_s1 + $0xd8] sm:$0xf0]  ;;  %v4948_v21 = vor.u32 %v6348_v6, %v4947_v5 }
  0x21   :  { %1812 = vmatpush.bf16.msra.mxu1 %v4276_v35  ;;  %v6201_v16 = vld [vmem:[%s9862_s1 + $0x244] sm:$0xf]  ;;  %v4373_v17 = vld [vmem:[%s9862_s1 + $0x258] sm:$0xf0]  ;;  %v6995_v19 = vpack.c.b16 %v334_v9, %v334_v9  ;;  %v6999_v22 = vpack.c.b16 %v335_v15, %v335_v15  ;;  %v5140_v23 = vor.u32 %v6396_v12, %v5139_v7  ;;  %v4184_v24 = vor.u32 %v6153_v13, %v4181_v14  ;;  %v4923_v25 = vld [vmem:[%s9862_s1 + $0x690] sm:$0xf] }
  0x22   :  { %1825 = vmatpush.bf16.msra.mxu2 %v4468_v36  ;;  %v6993_v18 = vpack.c.b16 %v336_v8, %v336_v8  ;;  %v6997_v20 = vpack.c.b16 %v337_v10, %v337_v10  ;;  %v6342_v26 = vld [vmem:[%s9862_s1 + $0x6a4] sm:$0xf0]  ;;  %v5115_v27 = vld [vmem:[%s9862_s1 + $0x810] sm:$0xf]  ;;  %v4376_v28 = vor.u32 %v6201_v16, %v4373_v17  ;;  %v6147_v30 = vld [vmem:[%s9862_s1 + $0x94] sm:$0xf] }
  0x23   :  { %1838 = vmatpush.bf16.msra.mxu3 %v4660_v39  ;;  %v6390_v29 = vld [vmem:[%s9862_s1 + $0x824] sm:$0xf0]  ;;  %v4157_v31 = vld [vmem:[%s9862_s1 + $0xa8] sm:$0xf0]  ;;  %v6195_v32 = vld [vmem:[%s9862_s1 + $0x214] sm:$0xf]  ;;  %1800 = vmatmul.bf16.vlgmr.msra.gmra.mxu0 %v6995_v19  ;;  %v4924_v34 = vor.u32 %v6342_v26, %v4923_v25 }
  0x24   :  { %1844 = vmatpush.bf16.msrb.mxu0 %v5020_v40  ;;  %v4349_v33 = vld [vmem:[%s9862_s1 + $0x228] sm:$0xf0]  ;;  %1813 = vmatmul.bf16.vlgmr.msra.gmra.mxu1 %v6999_v22  ;;  %v5116_v35 = vor.u32 %v6390_v29, %v5115_v27  ;;  %v4160_v36 = vor.u32 %v6147_v30, %v4157_v31  ;;  %v4899_v37 = vld [vmem:[%s9862_s1 + $0x660] sm:$0xf]  ;;  %v6336_v38 = vld [vmem:[%s9862_s1 + $0x674] sm:$0xf0] }
  0x25   :  { %1857 = vmatpush.bf16.msrb.mxu1 %v5212_v41  ;;  %1826 = vmatmul.bf16.vlgmr.msra.gmra.mxu2 %v6993_v18  ;;  %v5091_v39 = vld [vmem:[%s9862_s1 + $0x7e0] sm:$0xf]  ;;  %v4352_v40 = vor.u32 %v6195_v32, %v4349_v33  ;;  %v6384_v41 = vld [vmem:[%s9862_s1 + $0x7f4] sm:$0xf0]  ;;  %v4133_v43 = vld [vmem:[%s9862_s1 + $0x78] sm:$0xf0] }
  0x26   :  { %1870 = vmatpush.bf16.msrb.mxu2 %v4256_v42  ;;  %1839 = vmatmul.bf16.vlgmr.msra.gmra.mxu3 %v6997_v20  ;;  %v6141_v42 = vld [vmem:[%s9862_s1 + $0x64] sm:$0xf]  ;;  %v4325_v45 = vld [vmem:[%s9862_s1 + $0x1f8] sm:$0xf0]  ;;  %v5092_v47 = vor.u32 %v6384_v41, %v5091_v39  ;;  %v4875_v49 = vld [vmem:[%s9862_s1 + $0x630] sm:$0xf] }
  0x27   :  { %1883 = vmatpush.bf16.msrb.mxu3 %v4448_v46  ;;  %v6189_v44 = vld [vmem:[%s9862_s1 + $0x1e4] sm:$0xf]  ;;  %v4900_v46 = vor.u32 %v6336_v38, %v4899_v37  ;;  %v4136_v48 = vor.u32 %v6141_v42, %v4133_v43  ;;  %v6330_v50 = vld [vmem:[%s9862_s1 + $0x644] sm:$0xf0]  ;;  %v5067_v51 = vld [vmem:[%s9862_s1 + $0x7b0] sm:$0xf] }
  0x28   :  { %1845 = vmatpush.bf16.msrb.mxu0 %v4996_v52  ;;  %v4328_v52 = vor.u32 %v6189_v44, %v4325_v45  ;;  %v6378_v53 = vld [vmem:[%s9862_s1 + $0x7c4] sm:$0xf0]  ;;  %v6183_v56 = vld [vmem:[%s9862_s1 + $0x1b4] sm:$0xf]  ;;  %v4301_v57 = vld [vmem:[%s9862_s1 + $0x1c8] sm:$0xf0]  ;;  %v4876_v58 = vor.u32 %v6330_v50, %v4875_v49 }
  0x29   :  { %1858 = vmatpush.bf16.msrb.mxu1 %v5188_v54  ;;  %v6135_v54 = vld [vmem:[%s9862_s1 + $0x34] sm:$0xf]  ;;  %v6324_v60 = vld [vmem:[%s9862_s1 + $0x614] sm:$0xf0]  ;;  %v5043_v61 = vld [vmem:[%s9862_s1 + $0x780] sm:$0xf]  ;;  %v5068_v62 = vor.u32 %v6378_v53, %v5067_v51  ;;  %v4304_v3 = vor.u32 %v6183_v56, %v4301_v57 }
  0x2a   :  { %1871 = vmatpush.bf16.msrb.mxu2 %v4232_v55  ;;  %v4109_v55 = vld [vmem:[%s9862_s1 + $0x48] sm:$0xf0]  ;;  %v28_v2 = vld [vmem:[%s9863_s0 + $0x10] sm:$0xff]  ;;  %v6177_v5 = vld [vmem:[%s9862_s1 + $0x184] sm:$0xf] }
  0x2b   :  { %1884 = vmatpush.bf16.msrb.mxu3 %v4424_v59  ;;  %v4851_v59 = vld [vmem:[%s9862_s1 + $0x600] sm:$0xf]  ;;  %v4112_v63 = vor.u32 %v6135_v54, %v4109_v55  ;;  %v4277_v6 = vld [vmem:[%s9862_s1 + $0x198] sm:$0xf0]  ;;  %v6267_v7 = vld [vmem:[%s9862_s1 + $0x454] sm:$0xf]  ;;  %v338_v14 = vunpack.c.l.b16 %v28_v2 }
  0x2c   :  { %1846 = vmatpush.bf16.msrb.mxu0 %v4972_v0  ;;  %v6372_v0 = vld [vmem:[%s9862_s1 + $0x794] sm:$0xf0]  ;;  %v4637_v8 = vld [vmem:[%s9862_s1 + $0x468] sm:$0xf0]  ;;  %v6315_v9 = vld [vmem:[%s9862_s1 + $0x5d4] sm:$0xf]  ;;  %v4852_v10 = vor.u32 %v6324_v60, %v4851_v59 }
  0x2d   :  { %1859 = vmatpush.bf16.msrb.mxu1 %v5164_v1  ;;  %v6129_v1 = vld [vmem:[%s9862_s1 + $0x4] sm:$0xf]  ;;  %v6363_v12 = vld [vmem:[%s9862_s1 + $0x754] sm:$0xf]  ;;  %v5021_v13 = vld [vmem:[%s9862_s1 + $0x768] sm:$0xf0]  ;;  %v5044_v15 = vor.u32 %v6372_v0, %v5043_v61  ;;  %v4640_v25 = vor.u32 %v6267_v7, %v4637_v8 }
  0x2e   :  { %1872 = vmatpush.bf16.msrb.mxu2 %v4208_v4  ;;  %v4085_v4 = vld [vmem:[%s9862_s1 + $0x18] sm:$0xf0]  ;;  %v6411_v17 = vld [vmem:[%s9862_s1 + $0x8d4] sm:$0xf]  ;;  %v5024_v27 = vor.u32 %v6363_v12, %v5021_v13  ;;  %v6309_v30 = vld [vmem:[%s9862_s1 + $0x5a4] sm:$0xf] }
  0x2f   :  { %1885 = vmatpush.bf16.msrb.mxu3 %v4400_v11  ;;  %v4829_v11 = vld [vmem:[%s9862_s1 + $0x5e8] sm:$0xf0]  ;;  %v4088_v16 = vor.u32 %v6129_v1, %v4085_v4  ;;  %v4613_v29 = vld [vmem:[%s9862_s1 + $0x438] sm:$0xf0]  ;;  %v6357_v33 = vld [vmem:[%s9862_s1 + $0x724] sm:$0xf] }
  0x30   :  { %1847 = vmatpush.bf16.msrb.mxu0 %v4948_v21  ;;  %v5213_v21 = vld [vmem:[%s9862_s1 + $0x8e8] sm:$0xf0]  ;;  %v4832_v26 = vor.u32 %v6315_v9, %v4829_v11  ;;  %v4805_v32 = vld [vmem:[%s9862_s1 + $0x5b8] sm:$0xf0]  ;;  %v6255_v42 = vld [vmem:[%s9862_s1 + $0x3f4] sm:$0xf] }
  0x31   :  { %1860 = vmatpush.bf16.msrb.mxu1 %v5140_v23  ;;  %v339_v23 = vunpack.c.h.b16 %v28_v2  ;;  %v5216_v31 = vor.u32 %v6411_v17, %v5213_v21  ;;  %v5189_v37 = vld [vmem:[%s9862_s1 + $0x8b8] sm:$0xf0]  ;;  %v4589_v43 = vld [vmem:[%s9862_s1 + $0x408] sm:$0xf0]  ;;  %v6303_v44 = vld [vmem:[%s9862_s1 + $0x574] sm:$0xf] }
  0x32   :  { %1873 = vmatpush.bf16.msrb.mxu2 %v4184_v24  ;;  %v4280_v24 = vor.u32 %v6177_v5, %v4277_v6  ;;  %v6399_v49 = vld [vmem:[%s9862_s1 + $0x874] sm:$0xf]  ;;  %v5165_v50 = vld [vmem:[%s9862_s1 + $0x888] sm:$0xf0]  ;;  %v4592_v51 = vor.u32 %v6255_v42, %v4589_v43  ;;  %v6249_v54 = vld [vmem:[%s9862_s1 + $0x3c4] sm:$0xf] }
  0x33   :  { %1886 = vmatpush.bf16.msrb.mxu3 %v4376_v28  ;;  %v6261_v28 = vld [vmem:[%s9862_s1 + $0x424] sm:$0xf]  ;;  %v7154_v38 = vpack.c.b16 %v339_v23, %v339_v23  ;;  %v4565_v55 = vld [vmem:[%s9862_s1 + $0x3d8] sm:$0xf0]  ;;  %v5168_v57 = vor.u32 %v6399_v49, %v5165_v50  ;;  %v6243_v2 = vld [vmem:[%s9862_s1 + $0x394] sm:$0xf] }
  0x34   :  { %1848 = vmatpush.bf16.msrb.mxu0 %v4924_v34  ;;  %v4997_v34 = vld [vmem:[%s9862_s1 + $0x738] sm:$0xf0]  ;;  %v4616_v39 = vor.u32 %v6261_v28, %v4613_v29  ;;  %v6297_v56 = vld [vmem:[%s9862_s1 + $0x544] sm:$0xf]  ;;  %v6291_v4 = vld [vmem:[%s9862_s1 + $0x514] sm:$0xf] }
  0x35   :  { %1861 = vmatpush.bf16.msrb.mxu1 %v5116_v35  ;;  %v7146_v35 = vpack.c.b16 %v338_v14, %v338_v14  ;;  %v5000_v41 = vor.u32 %v6357_v33, %v4997_v34  ;;  %v6345_v59 = vld [vmem:[%s9862_s1 + $0x6c4] sm:$0xf]  ;;  %v4949_v60 = vld [vmem:[%s9862_s1 + $0x6d8] sm:$0xf0]  ;;  %v4733_v6 = vld [vmem:[%s9862_s1 + $0x528] sm:$0xf0] }
  0x36   :  { %1874 = vmatpush.bf16.msrb.mxu2 %v4160_v36  ;;  %v6405_v36 = vld [vmem:[%s9862_s1 + $0x8a4] sm:$0xf]  ;;  %v4952_v1 = vor.u32 %v6345_v59, %v4949_v60  ;;  %v6339_v7 = vld [vmem:[%s9862_s1 + $0x694] sm:$0xf]  ;;  %v4925_v8 = vld [vmem:[%s9862_s1 + $0x6a8] sm:$0xf0]  ;;  %v4736_v12 = vor.u32 %v6291_v4, %v4733_v6 }
  0x37   :  { %1887 = vmatpush.bf16.msrb.mxu3 %v4352_v40  ;;  %v4808_v40 = vor.u32 %v6309_v30, %v4805_v32  ;;  %v5192_v45 = vor.u32 %v6405_v36, %v5189_v37  ;;  %v6393_v61 = vld [vmem:[%s9862_s1 + $0x844] sm:$0xf]  ;;  %v6387_v9 = vld [vmem:[%s9862_s1 + $0x814] sm:$0xf]  ;;  %v4928_v13 = vor.u32 %v6339_v7, %v4925_v8  ;;  %v4709_v21 = vld [vmem:[%s9862_s1 + $0x4f8] sm:$0xf0] }
  0x38   :  { %1849 = vmatpush.bf16.msrb.mxu0 %v4900_v46  ;;  %v4781_v46 = vld [vmem:[%s9862_s1 + $0x588] sm:$0xf0]  ;;  %v6237_v14 = vld [vmem:[%s9862_s1 + $0x364] sm:$0xf]  ;;  %v6231_v30 = vld [vmem:[%s9862_s1 + $0x334] sm:$0xf] }
  0x39   :  { %1862 = vmatpush.bf16.msrb.mxu1 %v5092_v47  ;;  %v6351_v47 = vld [vmem:[%s9862_s1 + $0x6f4] sm:$0xf]  ;;  %v6333_v23 = vld [vmem:[%s9862_s1 + $0x664] sm:$0xf]  ;;  %v4685_v34 = vld [vmem:[%s9862_s1 + $0x4c8] sm:$0xf0] }
  0x3a   :  { %1875 = vmatpush.bf16.msrb.mxu2 %v4136_v48  ;;  %v4973_v48 = vld [vmem:[%s9862_s1 + $0x708] sm:$0xf0]  ;;  %v6279_v32 = vld [vmem:[%s9862_s1 + $0x4b4] sm:$0xf]  ;;  %v6225_v42 = vld [vmem:[%s9862_s1 + $0x304] sm:$0xf] }
  0x3b   :  { %1888 = vmatpush.bf16.msrb.mxu3 %v4328_v52  ;;  %v4784_v52 = vor.u32 %v6303_v44, %v4781_v46  ;;  %v4976_v53 = vor.u32 %v6351_v47, %v4973_v48  ;;  %v6327_v36 = vld [vmem:[%s9862_s1 + $0x634] sm:$0xf]  ;;  %v4877_v37 = vld [vmem:[%s9862_s1 + $0x648] sm:$0xf0]  ;;  %v4469_v43 = vld [vmem:[%s9862_s1 + $0x318] sm:$0xf0]  ;;  %v4688_v44 = vor.u32 %v6279_v32, %v4685_v34 }
  0x3c   :  { %1850 = vmatpush.bf16.msrb.mxu0 %v4876_v58  ;;  %v4757_v58 = vld [vmem:[%s9862_s1 + $0x558] sm:$0xf0]  ;;  %v6273_v46 = vld [vmem:[%s9862_s1 + $0x484] sm:$0xf]  ;;  %v6271_v59 = vld [vmem:[%s9862_s1 + $0x46c] sm:$0xf0] }
  0x3d   :  { %1863 = vmatpush.bf16.msrb.mxu1 %v5068_v62  ;;  %v5141_v62 = vld [vmem:[%s9862_s1 + $0x858] sm:$0xf0]  ;;  %v4760_v0 = vor.u32 %v6297_v56, %v4757_v58  ;;  %v6321_v48 = vld [vmem:[%s9862_s1 + $0x604] sm:$0xf]  ;;  %v4472_v56 = vor.u32 %v6225_v42, %v4469_v43  ;;  %v4643_v58 = vld [vmem:[%s9862_s1 + $0x458] sm:$0xf] }
  0x3e   :  { %1876 = vmatpush.bf16.msrb.mxu2 %v4112_v63  ;;  %v4568_v63 = vor.u32 %v6249_v54, %v4565_v55  ;;  %v5144_v5 = vor.u32 %v6393_v61, %v5141_v62  ;;  %v4661_v47 = vld [vmem:[%s9862_s1 + $0x498] sm:$0xf0]  ;;  %v6175_v54 = vld [vmem:[%s9862_s1 + $0x16c] sm:$0xf0]  ;;  %v4451_v55 = vld [vmem:[%s9862_s1 + $0x2d8] sm:$0xf] }
  0x3f   :  { %1889 = vmatpush.bf16.msrb.mxu3 %v4304_v3  ;;  %v4541_v3 = vld [vmem:[%s9862_s1 + $0x3a8] sm:$0xf0]  ;;  %v4853_v50 = vld [vmem:[%s9862_s1 + $0x618] sm:$0xf0]  ;;  %v4664_v60 = vor.u32 %v6273_v46, %v4661_v47  ;;  %v4835_v62 = vld [vmem:[%s9862_s1 + $0x5d8] sm:$0xf] }
  0x40   :  { %1851 = vmatpush.bf16.msrb.mxu0 %v4852_v10  ;;  %v5117_v10 = vld [vmem:[%s9862_s1 + $0x828] sm:$0xf0]  ;;  %v4544_v11 = vor.u32 %v6243_v2, %v4541_v3  ;;  %v4856_v61 = vor.u32 %v6321_v48, %v4853_v50  ;;  %v4644_v3 = vor.u32 %v6271_v59, %v4643_v58  ;;  %v4235_v4 = vld [vmem:[%s9862_s1 + $0x128] sm:$0xf]  ;;  %v6217_v8 = vld [vmem:[%s9862_s1 + $0x2bc] sm:$0xf0] }
  0x41   :  { %1864 = vmatpush.bf16.msrb.mxu1 %v5044_v15  ;;  %v4517_v15 = vld [vmem:[%s9862_s1 + $0x378] sm:$0xf0]  ;;  %v5120_v17 = vor.u32 %v6387_v9, %v5117_v10  ;;  %v4427_v6 = vld [vmem:[%s9862_s1 + $0x2a8] sm:$0xf]  ;;  %v6265_v10 = vld [vmem:[%s9862_s1 + $0x43c] sm:$0xf0] }
  0x42   :  { %1877 = vmatpush.bf16.msrb.mxu2 %v4088_v16  ;;  %v6285_v16 = vld [vmem:[%s9862_s1 + $0x4e4] sm:$0xf]  ;;  %v4619_v9 = vld [vmem:[%s9862_s1 + $0x428] sm:$0xf]  ;;  %v6301_v42 = vld [vmem:[%s9862_s1 + $0x55c] sm:$0xf0] }
  0x43   :  { %1890 = vmatpush.bf16.msrb.mxu3 %v4280_v24  ;;  %1852 = vmatmul.bf16.vlgmr.msrb.gmra.mxu0 %v7146_v35  ;;  %v4901_v24 = vld [vmem:[%s9862_s1 + $0x678] sm:$0xf0]  ;;  %v4712_v28 = vor.u32 %v6285_v16, %v4709_v21  ;;  %v4211_v16 = vld [vmem:[%s9862_s1 + $0xf8] sm:$0xf]  ;;  %v4187_v32 = vld [vmem:[%s9862_s1 + $0xc8] sm:$0xf] }
  0x44   :  { %1896 = vmatpush.bf16.msra.mxu0 %v4640_v25  ;;  %1865 = vmatmul.bf16.vlgmr.msrb.gmra.mxu1 %v7154_v38  ;;  %v6381_v25 = vld [vmem:[%s9862_s1 + $0x7e4] sm:$0xf]  ;;  %v4904_v29 = vor.u32 %v6333_v23, %v4901_v24  ;;  %v4403_v21 = vld [vmem:[%s9862_s1 + $0x278] sm:$0xf]  ;;  %v6211_v24 = vld [vmem:[%s9862_s1 + $0x28c] sm:$0xf0] }
  0x45   :  { %1909 = vmatpush.bf16.msra.mxu1 %v4832_v26  ;;  %1878 = vmatmul.bf16.vlgmr.msrb.gmra.mxu2 %v6995_v19  ;;  %v5093_v26 = vld [vmem:[%s9862_s1 + $0x7f8] sm:$0xf0]  ;;  %v4379_v34 = vld [vmem:[%s9862_s1 + $0x248] sm:$0xf]  ;;  %v4163_v46 = vld [vmem:[%s9862_s1 + $0x98] sm:$0xf] }
  0x46   :  { %1922 = vmatpush.bf16.msra.mxu2 %v5024_v27  ;;  %1891 = vmatmul.bf16.vlgmr.msrb.gmra.mxu3 %v6999_v22  ;;  %v4520_v27 = vor.u32 %v6237_v14, %v4517_v15  ;;  %v5096_v33 = vor.u32 %v6381_v25, %v5093_v26  ;;  %v4428_v14 = vor.u32 %v6217_v8, %v4427_v6  ;;  %v4595_v25 = vld [vmem:[%s9862_s1 + $0x3f8] sm:$0xf]  ;;  %v6259_v26 = vld [vmem:[%s9862_s1 + $0x40c] sm:$0xf0]  ;;  %v4139_v58 = vld [vmem:[%s9862_s1 + $0x68] sm:$0xf] }
  0x47   :  { %1935 = vmatpush.bf16.msra.mxu3 %v5216_v31  ;;  %v4493_v31 = vld [vmem:[%s9862_s1 + $0x348] sm:$0xf0]  ;;  %v4620_v15 = vor.u32 %v6265_v10, %v4619_v9  ;;  %v6151_v47 = vld [vmem:[%s9862_s1 + $0xac] sm:$0xf0]  ;;  %v4355_v48 = vld [vmem:[%s9862_s1 + $0x218] sm:$0xf] }
  0x48   :  { %1897 = vmatpush.bf16.msra.mxu0 %v4616_v39  ;;  %v6375_v39 = vld [vmem:[%s9862_s1 + $0x7b4] sm:$0xf]  ;;  %v6199_v50 = vld [vmem:[%s9862_s1 + $0x22c] sm:$0xf0]  ;;  %v6145_v59 = vld [vmem:[%s9862_s1 + $0x7c] sm:$0xf0] }
  0x49   :  { %1910 = vmatpush.bf16.msra.mxu1 %v4808_v40  ;;  %v5069_v40 = vld [vmem:[%s9862_s1 + $0x7c8] sm:$0xf0]  ;;  %v4115_v6 = vld [vmem:[%s9862_s1 + $0x38] sm:$0xf]  ;;  %v6187_v10 = vld [vmem:[%s9862_s1 + $0x1cc] sm:$0xf0] }
  0x4a   :  { %1923 = vmatpush.bf16.msra.mxu2 %v5000_v41  ;;  %v4496_v41 = vor.u32 %v6231_v30, %v4493_v31  ;;  %v5072_v49 = vor.u32 %v6375_v39, %v5069_v40  ;;  %v4404_v30 = vor.u32 %v6211_v24, %v4403_v21  ;;  %v4596_v31 = vor.u32 %v6259_v26, %v4595_v25  ;;  %v4571_v39 = vld [vmem:[%s9862_s1 + $0x3c8] sm:$0xf]  ;;  %v6253_v40 = vld [vmem:[%s9862_s1 + $0x3dc] sm:$0xf0]  ;;  %v4307_v8 = vld [vmem:[%s9862_s1 + $0x1b8] sm:$0xf] }
  0x4b   :  { %1936 = vmatpush.bf16.msra.mxu3 %v5192_v45  ;;  %v4880_v45 = vor.u32 %v6327_v36, %v4877_v37  ;;  %v6205_v37 = vld [vmem:[%s9862_s1 + $0x25c] sm:$0xf0]  ;;  %v4308_v21 = vor.u32 %v6187_v10, %v4307_v8  ;;  %v4283_v24 = vld [vmem:[%s9862_s1 + $0x188] sm:$0xf] }
  0x4c   :  { %1898 = vmatpush.bf16.msra.mxu0 %v4592_v51  ;;  %v6369_v51 = vld [vmem:[%s9862_s1 + $0x784] sm:$0xf]  ;;  %v6181_v25 = vld [vmem:[%s9862_s1 + $0x19c] sm:$0xf0]  ;;  %v4475_v26 = vld [vmem:[%s9862_s1 + $0x308] sm:$0xf] }
  0x4d   :  { %1911 = vmatpush.bf16.msra.mxu1 %v4784_v52  ;;  %v5045_v52 = vld [vmem:[%s9862_s1 + $0x798] sm:$0xf0]  ;;  %v4955_v8 = vld [vmem:[%s9862_s1 + $0x6c8] sm:$0xf] }
  0x4e   :  { %1924 = vmatpush.bf16.msra.mxu2 %v4976_v53  ;;  %v4259_v53 = vld [vmem:[%s9862_s1 + $0x158] sm:$0xf]  ;;  %v5147_v10 = vld [vmem:[%s9862_s1 + $0x848] sm:$0xf] }
  0x4f   :  { %1937 = vmatpush.bf16.msra.mxu3 %v5168_v57  ;;  %v6223_v57 = vld [vmem:[%s9862_s1 + $0x2ec] sm:$0xf0] }
  0x50   :  { %1899 = vmatpush.bf16.msra.mxu0 %v4568_v63  ;;  %v6319_v63 = vld [vmem:[%s9862_s1 + $0x5ec] sm:$0xf0]  ;;  %v4452_v2 = vor.u32 %v6223_v57, %v4451_v55  ;;  %v4164_v55 = vor.u32 %v6151_v47, %v4163_v46 }
  0x51   :  { %1912 = vmatpush.bf16.msra.mxu1 %v4760_v0  ;;  %v5048_v0 = vor.u32 %v6369_v51, %v5045_v52  ;;  %v4836_v7 = vor.u32 %v6319_v63, %v4835_v62  ;;  %v4547_v51 = vld [vmem:[%s9862_s1 + $0x398] sm:$0xf]  ;;  %v6247_v52 = vld [vmem:[%s9862_s1 + $0x3ac] sm:$0xf0]  ;;  %v6193_v62 = vld [vmem:[%s9862_s1 + $0x1fc] sm:$0xf0] }
  0x52   :  { %1925 = vmatpush.bf16.msra.mxu2 %v4952_v1  ;;  %v4260_v1 = vor.u32 %v6175_v54, %v4259_v53  ;;  %v4739_v53 = vld [vmem:[%s9862_s1 + $0x518] sm:$0xf]  ;;  %v6295_v54 = vld [vmem:[%s9862_s1 + $0x52c] sm:$0xf0]  ;;  %v4548_v57 = vor.u32 %v6247_v52, %v4547_v51  ;;  %v4523_v63 = vld [vmem:[%s9862_s1 + $0x368] sm:$0xf] }
  0x53   :  { %1938 = vmatpush.bf16.msra.mxu3 %v5144_v5  ;;  %v6169_v5 = vld [vmem:[%s9862_s1 + $0x13c] sm:$0xf0] }
  0x54   :  { %1900 = vmatpush.bf16.msra.mxu0 %v4544_v11  ;;  %v4811_v11 = vld [vmem:[%s9862_s1 + $0x5a8] sm:$0xf]  ;;  %v6409_v52 = vld [vmem:[%s9862_s1 + $0x8bc] sm:$0xf0] }
  0x55   :  { %1913 = vmatpush.bf16.msra.mxu1 %v4736_v12  ;;  %v6313_v12 = vld [vmem:[%s9862_s1 + $0x5bc] sm:$0xf0] }
  0x56   :  { %1926 = vmatpush.bf16.msra.mxu2 %v4928_v13  ;;  %v4236_v13 = vor.u32 %v6169_v5, %v4235_v4  ;;  %v4812_v23 = vor.u32 %v6313_v12, %v4811_v11  ;;  %v4499_v11 = vld [vmem:[%s9862_s1 + $0x338] sm:$0xf]  ;;  %v6235_v12 = vld [vmem:[%s9862_s1 + $0x34c] sm:$0xf0] }
  0x57   :  { %1939 = vmatpush.bf16.msra.mxu3 %v5120_v17  ;;  %v6163_v17 = vld [vmem:[%s9862_s1 + $0x10c] sm:$0xf0] }
  0x58   :  { %1901 = vmatpush.bf16.msra.mxu0 %v4520_v27  ;;  %v4787_v27 = vld [vmem:[%s9862_s1 + $0x578] sm:$0xf] }
  0x59   :  { %1914 = vmatpush.bf16.msra.mxu1 %v4712_v28  ;;  %v6307_v28 = vld [vmem:[%s9862_s1 + $0x58c] sm:$0xf0] }
  0x5a   :  { %1927 = vmatpush.bf16.msra.mxu2 %v4904_v29  ;;  %v4212_v29 = vor.u32 %v6163_v17, %v4211_v16  ;;  %v4788_v36 = vor.u32 %v6307_v28, %v4787_v27  ;;  %v4091_v16 = vld [vmem:[%s9862_s1 + $0x8] sm:$0xf]  ;;  %v6133_v17 = vld [vmem:[%s9862_s1 + $0x1c] sm:$0xf0] }
  0x5b   :  { %1940 = vmatpush.bf16.msra.mxu3 %v5096_v33  ;;  %v6157_v33 = vld [vmem:[%s9862_s1 + $0xdc] sm:$0xf0] }
  0x5c   :  { %1902 = vmatpush.bf16.msra.mxu0 %v4496_v41  ;;  %v4763_v41 = vld [vmem:[%s9862_s1 + $0x548] sm:$0xf]  ;;  %v4188_v43 = vor.u32 %v6157_v33, %v4187_v32  ;;  %v6229_v28 = vld [vmem:[%s9862_s1 + $0x31c] sm:$0xf0]  ;;  %v6367_v32 = vld [vmem:[%s9862_s1 + $0x76c] sm:$0xf0] }
  0x5d   :  { %1915 = vmatpush.bf16.msra.mxu1 %v4688_v44  ;;  %v4380_v44 = vor.u32 %v6205_v37, %v4379_v34  ;;  %v5219_v33 = vld [vmem:[%s9862_s1 + $0x8d8] sm:$0xf]  ;;  %v4092_v34 = vor.u32 %v6133_v17, %v4091_v16  ;;  %v6172_v37 = vld [vmem:[%s9862_s1 + $0x15c] sm:$0xf]  ;;  %v4381_v16 = vld [vmem:[%s9862_s1 + $0x260] sm:$0xf0] }
  0x5e   :  { %1928 = vmatpush.bf16.msra.mxu2 %v4880_v45  ;;  %v4572_v45 = vor.u32 %v6253_v40, %v4571_v39  ;;  %v4261_v39 = vld [vmem:[%s9862_s1 + $0x170] sm:$0xf0]  ;;  %v4284_v40 = vor.u32 %v6181_v25, %v4283_v24  ;;  %v4931_v24 = vld [vmem:[%s9862_s1 + $0x698] sm:$0xf]  ;;  %v6343_v25 = vld [vmem:[%s9862_s1 + $0x6ac] sm:$0xf0] }
  0x5f   :  { %1941 = vmatpush.bf16.msra.mxu3 %v5072_v49  ;;  %v4764_v49 = vor.u32 %v6301_v42, %v4763_v41  ;;  %v4476_v41 = vor.u32 %v6229_v28, %v4475_v26  ;;  %v6220_v42 = vld [vmem:[%s9862_s1 + $0x2dc] sm:$0xf]  ;;  %v4264_v47 = vor.u32 %v6172_v37, %v4261_v39  ;;  %v5123_v26 = vld [vmem:[%s9862_s1 + $0x818] sm:$0xf]  ;;  %v6391_v28 = vld [vmem:[%s9862_s1 + $0x82c] sm:$0xf0] }
  0x60   :  { %1903 = vmatpush.bf16.msra.mxu0 %v4472_v56  ;;  %v4356_v56 = vor.u32 %v6199_v50, %v4355_v48  ;;  %v5003_v48 = vld [vmem:[%s9862_s1 + $0x728] sm:$0xf]  ;;  %v6337_v39 = vld [vmem:[%s9862_s1 + $0x67c] sm:$0xf0] }
  0x61   :  { %1916 = vmatpush.bf16.msra.mxu1 %v4664_v60  ;;  %v4331_v60 = vld [vmem:[%s9862_s1 + $0x1e8] sm:$0xf] }
  0x62   :  { %1929 = vmatpush.bf16.msra.mxu2 %v4856_v61  ;;  %v4740_v61 = vor.u32 %v6295_v54, %v4739_v53  ;;  %v4332_v4 = vor.u32 %v6193_v62, %v4331_v60  ;;  %v5195_v50 = vld [vmem:[%s9862_s1 + $0x8a8] sm:$0xf]  ;;  %v6166_v53 = vld [vmem:[%s9862_s1 + $0x12c] sm:$0xf]  ;;  %v4237_v54 = vld [vmem:[%s9862_s1 + $0x140] sm:$0xf0] }
  0x63   :  { %1942 = vmatpush.bf16.msra.mxu3 %v5048_v0  ;;  %1904 = vmatmul.bf16.vlgmr.msra.gmra.mxu0 %v6993_v18  ;;  %v6241_v0 = vld [vmem:[%s9862_s1 + $0x37c] sm:$0xf0]  ;;  %v4979_v60 = vld [vmem:[%s9862_s1 + $0x6f8] sm:$0xf]  ;;  %v4907_v37 = vld [vmem:[%s9862_s1 + $0x668] sm:$0xf] }
  0x64   :  { %1948 = vmatpush.bf16.msrb.mxu0 %v4260_v1  ;;  %1917 = vmatmul.bf16.vlgmr.msra.gmra.mxu1 %v6997_v20  ;;  %v4715_v1 = vld [vmem:[%s9862_s1 + $0x4e8] sm:$0xf]  ;;  %v4524_v5 = vor.u32 %v6241_v0, %v4523_v63  ;;  %v5171_v62 = vld [vmem:[%s9862_s1 + $0x878] sm:$0xf]  ;;  %v6403_v0 = vld [vmem:[%s9862_s1 + $0x88c] sm:$0xf0] }
  0x65   :  { %1961 = vmatpush.bf16.msrb.mxu1 %v4452_v2  ;;  %1930 = vmatmul.bf16.vlgmr.msra.gmra.mxu2 %v7146_v35  ;;  %v6289_v2 = vld [vmem:[%s9862_s1 + $0x4fc] sm:$0xf0] }
  0x66   :  { %1974 = vmatpush.bf16.msrb.mxu2 %v4644_v3  ;;  %1943 = vmatmul.bf16.vlgmr.msra.gmra.mxu3 %v7154_v38  ;;  %v4140_v3 = vor.u32 %v6145_v59, %v4139_v58  ;;  %v4716_v9 = vor.u32 %v6289_v2, %v4715_v1  ;;  %v5196_v58 = vor.u32 %v6409_v52, %v5195_v50  ;;  %v6160_v1 = vld [vmem:[%s9862_s1 + $0xfc] sm:$0xf]  ;;  %v4213_v2 = vld [vmem:[%s9862_s1 + $0x110] sm:$0xf0]  ;;  %v4883_v50 = vld [vmem:[%s9862_s1 + $0x638] sm:$0xf] }
  0x67   :  { %1987 = vmatpush.bf16.msrb.mxu3 %v4836_v7  ;;  %v6139_v7 = vld [vmem:[%s9862_s1 + $0x4c] sm:$0xf0]  ;;  %v4240_v59 = vor.u32 %v6166_v53, %v4237_v54  ;;  %v5075_v52 = vld [vmem:[%s9862_s1 + $0x7b8] sm:$0xf] }
  0x68   :  { %1949 = vmatpush.bf16.msrb.mxu0 %v4236_v13  ;;  %v4691_v13 = vld [vmem:[%s9862_s1 + $0x4b8] sm:$0xf]  ;;  %v6379_v54 = vld [vmem:[%s9862_s1 + $0x7cc] sm:$0xf0] }
  0x69   :  { %1962 = vmatpush.bf16.msrb.mxu1 %v4428_v14  ;;  %v6283_v14 = vld [vmem:[%s9862_s1 + $0x4cc] sm:$0xf0] }
  0x6a   :  { %1975 = vmatpush.bf16.msrb.mxu2 %v4620_v15  ;;  %v4116_v15 = vor.u32 %v6139_v7, %v4115_v6  ;;  %v4692_v27 = vor.u32 %v6283_v14, %v4691_v13  ;;  %v5172_v6 = vor.u32 %v6403_v0, %v5171_v62  ;;  %v4216_v7 = vor.u32 %v6160_v1, %v4213_v2  ;;  %v6154_v13 = vld [vmem:[%s9862_s1 + $0xcc] sm:$0xf]  ;;  %v4189_v14 = vld [vmem:[%s9862_s1 + $0xe0] sm:$0xf0]  ;;  %v5051_v0 = vld [vmem:[%s9862_s1 + $0x788] sm:$0xf] }
  0x6b   :  { %1988 = vmatpush.bf16.msrb.mxu3 %v4812_v23  ;;  %v4500_v23 = vor.u32 %v6235_v12, %v4499_v11  ;;  %v6397_v12 = vld [vmem:[%s9862_s1 + $0x85c] sm:$0xf0]  ;;  %v5076_v62 = vor.u32 %v6379_v54, %v5075_v52  ;;  %v6130_v2 = vld [vmem:[%s9862_s1 + $0xc] sm:$0xf] }
  0x6c   :  { %1950 = vmatpush.bf16.msrb.mxu0 %v4212_v29  ;;  %v4667_v29 = vld [vmem:[%s9862_s1 + $0x488] sm:$0xf]  ;;  %v6373_v1 = vld [vmem:[%s9862_s1 + $0x79c] sm:$0xf0]  ;;  %v6250_v52 = vld [vmem:[%s9862_s1 + $0x3cc] sm:$0xf] }
  0x6d   :  { %1963 = vmatpush.bf16.msrb.mxu1 %v4404_v30  ;;  %v6277_v30 = vld [vmem:[%s9862_s1 + $0x49c] sm:$0xf0]  ;;  %v6298_v54 = vld [vmem:[%s9862_s1 + $0x54c] sm:$0xf] }
  0x6e   :  { %1976 = vmatpush.bf16.msrb.mxu2 %v4596_v31  ;;  %v5027_v31 = vld [vmem:[%s9862_s1 + $0x758] sm:$0xf] }
  0x6f   :  { %1989 = vmatpush.bf16.msrb.mxu3 %v4788_v36  ;;  %v6415_v36 = vld [vmem:[%s9862_s1 + $0x8ec] sm:$0xf0] }
  0x70   :  { %1951 = vmatpush.bf16.msrb.mxu0 %v4188_v43  ;;  %v4453_v43 = vld [vmem:[%s9862_s1 + $0x2f0] sm:$0xf0]  ;;  %v5220_v46 = vor.u32 %v6415_v36, %v5219_v33  ;;  %v4932_v33 = vor.u32 %v6343_v25, %v4931_v24 }
  0x71   :  { %1964 = vmatpush.bf16.msrb.mxu1 %v4380_v44  ;;  %v4668_v44 = vor.u32 %v6277_v30, %v4667_v29  ;;  %v4456_v51 = vor.u32 %v6220_v42, %v4453_v43  ;;  %v6148_v29 = vld [vmem:[%s9862_s1 + $0x9c] sm:$0xf]  ;;  %v4165_v30 = vld [vmem:[%s9862_s1 + $0xb0] sm:$0xf0]  ;;  %v6385_v42 = vld [vmem:[%s9862_s1 + $0x7fc] sm:$0xf0] }
  0x72   :  { %1977 = vmatpush.bf16.msrb.mxu2 %v4572_v45  ;;  %v5028_v45 = vor.u32 %v6367_v32, %v5027_v31  ;;  %v6196_v31 = vld [vmem:[%s9862_s1 + $0x21c] sm:$0xf]  ;;  %v4357_v32 = vld [vmem:[%s9862_s1 + $0x230] sm:$0xf0]  ;;  %v4168_v36 = vor.u32 %v6148_v29, %v4165_v30  ;;  %v6142_v43 = vld [vmem:[%s9862_s1 + $0x6c] sm:$0xf] }
  0x73   :  { %1990 = vmatpush.bf16.msrb.mxu3 %v4764_v49  ;;  %v6361_v49 = vld [vmem:[%s9862_s1 + $0x73c] sm:$0xf0]  ;;  %v4813_v30 = vld [vmem:[%s9862_s1 + $0x5c0] sm:$0xf0] }
  0x74   :  { %1952 = vmatpush.bf16.msrb.mxu0 %v4164_v55  ;;  %v6214_v55 = vld [vmem:[%s9862_s1 + $0x2ac] sm:$0xf] }
  0x75   :  { %1965 = vmatpush.bf16.msrb.mxu1 %v4356_v56  ;;  %v4429_v56 = vld [vmem:[%s9862_s1 + $0x2c0] sm:$0xf0] }
  0x76   :  { %1978 = vmatpush.bf16.msrb.mxu2 %v4548_v57  ;;  %v5004_v57 = vor.u32 %v6361_v49, %v5003_v48  ;;  %v4432_v63 = vor.u32 %v6214_v55, %v4429_v56  ;;  %v6136_v55 = vld [vmem:[%s9862_s1 + $0x3c] sm:$0xf]  ;;  %v4117_v56 = vld [vmem:[%s9862_s1 + $0x50] sm:$0xf0] }
  0x77   :  { %1991 = vmatpush.bf16.msrb.mxu3 %v4740_v61  ;;  %v6355_v61 = vld [vmem:[%s9862_s1 + $0x70c] sm:$0xf0] }
  0x78   :  { %1953 = vmatpush.bf16.msrb.mxu0 %v4140_v3  ;;  %v6208_v3 = vld [vmem:[%s9862_s1 + $0x27c] sm:$0xf] }
  0x79   :  { %1966 = vmatpush.bf16.msrb.mxu1 %v4332_v4  ;;  %v4405_v4 = vld [vmem:[%s9862_s1 + $0x290] sm:$0xf0] }
  0x7a   :  { %1979 = vmatpush.bf16.msrb.mxu2 %v4524_v5  ;;  %v4980_v5 = vor.u32 %v6355_v61, %v4979_v60  ;;  %v4408_v11 = vor.u32 %v6208_v3, %v4405_v4  ;;  %v4859_v60 = vld [vmem:[%s9862_s1 + $0x608] sm:$0xf]  ;;  %v6325_v61 = vld [vmem:[%s9862_s1 + $0x61c] sm:$0xf0]  ;;  %v4093_v4 = vld [vmem:[%s9862_s1 + $0x20] sm:$0xf0] }
  0x7b   :  { %1992 = vmatpush.bf16.msrb.mxu3 %v4716_v9  ;;  %v6349_v9 = vld [vmem:[%s9862_s1 + $0x6dc] sm:$0xf0] }
  0x7c   :  { %1954 = vmatpush.bf16.msrb.mxu0 %v4116_v15  ;;  %v6202_v15 = vld [vmem:[%s9862_s1 + $0x24c] sm:$0xf]  ;;  %v4956_v17 = vor.u32 %v6349_v9, %v4955_v8  ;;  %v4645_v8 = vld [vmem:[%s9862_s1 + $0x470] sm:$0xf0]  ;;  %v6316_v9 = vld [vmem:[%s9862_s1 + $0x5dc] sm:$0xf] }
  0x7d   :  { %1967 = vmatpush.bf16.msrb.mxu1 %v4308_v21  ;;  %v5148_v21 = vor.u32 %v6397_v12, %v5147_v10  ;;  %v4860_v10 = vor.u32 %v6325_v61, %v4859_v60  ;;  %v6364_v12 = vld [vmem:[%s9862_s1 + $0x75c] sm:$0xf]  ;;  %v5149_v60 = vld [vmem:[%s9862_s1 + $0x860] sm:$0xf0] }
  0x7e   :  { %1980 = vmatpush.bf16.msrb.mxu2 %v4500_v23  ;;  %v4192_v23 = vor.u32 %v6154_v13, %v4189_v14  ;;  %v5029_v13 = vld [vmem:[%s9862_s1 + $0x770] sm:$0xf0]  ;;  %v5052_v14 = vor.u32 %v6373_v1, %v5051_v0 }
  0x7f   :  { %1993 = vmatpush.bf16.msrb.mxu3 %v4692_v27  ;;  %v4384_v27 = vor.u32 %v6202_v15, %v4381_v16  ;;  %v4096_v15 = vor.u32 %v6130_v2, %v4093_v4  ;;  %v6412_v16 = vld [vmem:[%s9862_s1 + $0x8dc] sm:$0xf]  ;;  %v5032_v25 = vor.u32 %v6364_v12, %v5029_v13  ;;  %v4549_v1 = vld [vmem:[%s9862_s1 + $0x3b0] sm:$0xf0] }
  0x80   :  { %1955 = vmatpush.bf16.msrb.mxu0 %v4092_v34  ;;  %v5124_v34 = vor.u32 %v6391_v28, %v5123_v26  ;;  %v6262_v26 = vld [vmem:[%s9862_s1 + $0x42c] sm:$0xf]  ;;  %v6292_v2 = vld [vmem:[%s9862_s1 + $0x51c] sm:$0xf] }
  0x81   :  { %1968 = vmatpush.bf16.msrb.mxu1 %v4284_v40  ;;  %v5099_v40 = vld [vmem:[%s9862_s1 + $0x7e8] sm:$0xf]  ;;  %v6310_v28 = vld [vmem:[%s9862_s1 + $0x5ac] sm:$0xf] }
  0x82   :  { %1981 = vmatpush.bf16.msrb.mxu2 %v4476_v41  ;;  %v4360_v41 = vor.u32 %v6196_v31, %v4357_v32  ;;  %v5100_v48 = vor.u32 %v6385_v42, %v5099_v40  ;;  %v6358_v31 = vld [vmem:[%s9862_s1 + $0x72c] sm:$0xf]  ;;  %v5005_v32 = vld [vmem:[%s9862_s1 + $0x740] sm:$0xf0]  ;;  %v6256_v40 = vld [vmem:[%s9862_s1 + $0x3fc] sm:$0xf] }
  0x83   :  { %1994 = vmatpush.bf16.msrb.mxu3 %v4668_v44  ;;  %1956 = vmatmul.bf16.vlgmr.msrb.gmra.mxu0 %v6995_v19  ;;  %v4141_v44 = vld [vmem:[%s9862_s1 + $0x80] sm:$0xf0]  ;;  %v6304_v42 = vld [vmem:[%s9862_s1 + $0x57c] sm:$0xf] }
  0x84   :  { %2000 = vmatpush.bf16.msra.mxu0 %v5028_v45  ;;  %1969 = vmatmul.bf16.vlgmr.msrb.gmra.mxu1 %v6999_v22  ;;  %v6190_v45 = vld [vmem:[%s9862_s1 + $0x1ec] sm:$0xf]  ;;  %v4144_v49 = vor.u32 %v6142_v43, %v4141_v44  ;;  %v4789_v44 = vld [vmem:[%s9862_s1 + $0x590] sm:$0xf0] }
  0x85   :  { %2013 = vmatpush.bf16.msra.mxu1 %v5220_v46  ;;  %1982 = vmatmul.bf16.vlgmr.msrb.gmra.mxu2 %v6993_v18  ;;  %v4333_v46 = vld [vmem:[%s9862_s1 + $0x200] sm:$0xf0] }
  0x86   :  { %2026 = vmatpush.bf16.msra.mxu2 %v4264_v47  ;;  %1995 = vmatmul.bf16.vlgmr.msrb.gmra.mxu3 %v6997_v20  ;;  %v4908_v47 = vor.u32 %v6337_v39, %v4907_v37  ;;  %v4336_v53 = vor.u32 %v6190_v45, %v4333_v46  ;;  %v4816_v37 = vor.u32 %v6310_v28, %v4813_v30  ;;  %v6352_v45 = vld [vmem:[%s9862_s1 + $0x6fc] sm:$0xf]  ;;  %v4981_v46 = vld [vmem:[%s9862_s1 + $0x710] sm:$0xf0] }
  0x87   :  { %2039 = vmatpush.bf16.msra.mxu3 %v4456_v51  ;;  %v6331_v51 = vld [vmem:[%s9862_s1 + $0x64c] sm:$0xf0]  ;;  %v5008_v39 = vor.u32 %v6358_v31, %v5005_v32  ;;  %v6232_v31 = vld [vmem:[%s9862_s1 + $0x33c] sm:$0xf]  ;;  %v4501_v32 = vld [vmem:[%s9862_s1 + $0x350] sm:$0xf0] }
  0x88   :  { %2001 = vmatpush.bf16.msra.mxu0 %v5004_v57  ;;  %v6184_v57 = vld [vmem:[%s9862_s1 + $0x1bc] sm:$0xf] }
  0x89   :  { %2014 = vmatpush.bf16.msra.mxu1 %v5196_v58  ;;  %v4309_v58 = vld [vmem:[%s9862_s1 + $0x1d0] sm:$0xf0] }
  0x8a   :  { %2027 = vmatpush.bf16.msra.mxu2 %v4240_v59  ;;  %v4884_v59 = vor.u32 %v6331_v51, %v4883_v50  ;;  %v4312_v3 = vor.u32 %v6184_v57, %v4309_v58  ;;  %v4792_v50 = vor.u32 %v6304_v42, %v4789_v44  ;;  %v4984_v51 = vor.u32 %v6352_v45, %v4981_v46  ;;  %v6346_v57 = vld [vmem:[%s9862_s1 + $0x6cc] sm:$0xf]  ;;  %v4957_v58 = vld [vmem:[%s9862_s1 + $0x6e0] sm:$0xf0]  ;;  %v6376_v42 = vld [vmem:[%s9862_s1 + $0x7bc] sm:$0xf] }
  0x8b   :  { %2040 = vmatpush.bf16.msra.mxu3 %v4432_v63  ;;  %v4120_v63 = vor.u32 %v6136_v55, %v4117_v56  ;;  %v4765_v56 = vld [vmem:[%s9862_s1 + $0x560] sm:$0xf0]  ;;  %v4960_v0 = vor.u32 %v6346_v57, %v4957_v58  ;;  %v4504_v45 = vor.u32 %v6232_v31, %v4501_v32  ;;  %v6226_v46 = vld [vmem:[%s9862_s1 + $0x30c] sm:$0xf] }
  0x8c   :  { %2002 = vmatpush.bf16.msra.mxu0 %v4980_v5  ;;  %v6178_v5 = vld [vmem:[%s9862_s1 + $0x18c] sm:$0xf]  ;;  %v5053_v57 = vld [vmem:[%s9862_s1 + $0x7a0] sm:$0xf0] }
  0x8d   :  { %2015 = vmatpush.bf16.msra.mxu1 %v5172_v6  ;;  %v4285_v6 = vld [vmem:[%s9862_s1 + $0x1a0] sm:$0xf0] }
  0x8e   :  { %2028 = vmatpush.bf16.msra.mxu2 %v4216_v7  ;;  %v6268_v7 = vld [vmem:[%s9862_s1 + $0x45c] sm:$0xf] }
  0x8f   :  { %2041 = vmatpush.bf16.msra.mxu3 %v4408_v11  ;;  %v4837_v11 = vld [vmem:[%s9862_s1 + $0x5f0] sm:$0xf0] }
  0x90   :  { %2003 = vmatpush.bf16.msra.mxu0 %v4956_v17  ;;  %v5221_v17 = vld [vmem:[%s9862_s1 + $0x8f0] sm:$0xf0]  ;;  %v4840_v24 = vor.u32 %v6316_v9, %v4837_v11  ;;  %v6238_v11 = vld [vmem:[%s9862_s1 + $0x36c] sm:$0xf] }
  0x91   :  { %2016 = vmatpush.bf16.msra.mxu1 %v5148_v21  ;;  %v4288_v21 = vor.u32 %v6178_v5, %v4285_v6  ;;  %v5224_v29 = vor.u32 %v6412_v16, %v5221_v17  ;;  %v6340_v5 = vld [vmem:[%s9862_s1 + $0x69c] sm:$0xf]  ;;  %v4933_v6 = vld [vmem:[%s9862_s1 + $0x6b0] sm:$0xf0] }
  0x92   :  { %2029 = vmatpush.bf16.msra.mxu2 %v4192_v23  ;;  %v4648_v23 = vor.u32 %v6268_v7, %v4645_v8  ;;  %v7817_v7 = vld [vmem:[%s9864_s2] sm:$0x3f]  ;;  %v6388_v8 = vld [vmem:[%s9862_s1 + $0x81c] sm:$0xf]  ;;  %v5125_v9 = vld [vmem:[%s9862_s1 + $0x830] sm:$0xf0]  ;;  %v4936_v13 = vor.u32 %v6340_v5, %v4933_v6 }
  0x93   :  { %2042 = vmatpush.bf16.msra.mxu3 %v4384_v27  ;;  %v4621_v27 = vld [vmem:[%s9862_s1 + $0x440] sm:$0xf0]  ;;  %v319_v16 = vperm.slane %v7817_v7, 0  ;;  %v5128_v17 = vor.u32 %v6388_v8, %v5125_v9  ;;  %v4843_v8 = vld [vmem:[%s9862_s1 + $0x5e0] sm:$0xf] }
  0x94   :  { %2004 = vmatpush.bf16.msra.mxu0 %v4932_v33  ;;  %v6406_v33 = vld [vmem:[%s9862_s1 + $0x8ac] sm:$0xf]  ;;  %v6320_v9 = vld [vmem:[%s9862_s1 + $0x5f4] sm:$0xf0] }
  0x95   :  { %2017 = vmatpush.bf16.msra.mxu1 %v5124_v34  ;;  %v5197_v34 = vld [vmem:[%s9862_s1 + $0x8c0] sm:$0xf0] }
  0x96   :  { %2030 = vmatpush.bf16.msra.mxu2 %v4168_v36  ;;  %v4624_v36 = vor.u32 %v6262_v26, %v4621_v27  ;;  %v5200_v43 = vor.u32 %v6406_v33, %v5197_v34  ;;  %v5101_v26 = vld [vmem:[%s9862_s1 + $0x800] sm:$0xf0]  ;;  %v6280_v33 = vld [vmem:[%s9862_s1 + $0x4bc] sm:$0xf] }
  0x97   :  { %2043 = vmatpush.bf16.msra.mxu3 %v4360_v41  ;;  %v4597_v41 = vld [vmem:[%s9862_s1 + $0x410] sm:$0xf0] }
  0x98   :  { %2005 = vmatpush.bf16.msra.mxu0 %v4908_v47  ;;  %v6400_v47 = vld [vmem:[%s9862_s1 + $0x87c] sm:$0xf] }
  0x99   :  { %2018 = vmatpush.bf16.msra.mxu1 %v5100_v48  ;;  %v5173_v48 = vld [vmem:[%s9862_s1 + $0x890] sm:$0xf0] }
  0x9a   :  { %2031 = vmatpush.bf16.msra.mxu2 %v4144_v49  ;;  %v4600_v49 = vor.u32 %v6256_v40, %v4597_v41  ;;  %v5176_v55 = vor.u32 %v6400_v47, %v5173_v48  ;;  %v6328_v40 = vld [vmem:[%s9862_s1 + $0x63c] sm:$0xf]  ;;  %v4885_v41 = vld [vmem:[%s9862_s1 + $0x650] sm:$0xf0]  ;;  %v4477_v47 = vld [vmem:[%s9862_s1 + $0x320] sm:$0xf0] }
  0x9b   :  { %2044 = vmatpush.bf16.msra.mxu3 %v4336_v53  ;;  %v4573_v53 = vld [vmem:[%s9862_s1 + $0x3e0] sm:$0xf0] }
  0x9c   :  { %2006 = vmatpush.bf16.msra.mxu0 %v4884_v59  ;;  %v6394_v59 = vld [vmem:[%s9862_s1 + $0x84c] sm:$0xf]  ;;  %v4576_v61 = vor.u32 %v6250_v52, %v4573_v53 }
  0x9d   :  { %2019 = vmatpush.bf16.msra.mxu1 %v5076_v62  ;;  %v6244_v62 = vld [vmem:[%s9862_s1 + $0x39c] sm:$0xf]  ;;  %v5152_v4 = vor.u32 %v6394_v59, %v5149_v60  ;;  %v6322_v52 = vld [vmem:[%s9862_s1 + $0x60c] sm:$0xf]  ;;  %v4267_v60 = vld [vmem:[%s9862_s1 + $0x160] sm:$0xf] }
  0x9e   :  { %2032 = vmatpush.bf16.msra.mxu2 %v4120_v63  ;;  %v4768_v63 = vor.u32 %v6298_v54, %v4765_v56  ;;  %v6370_v56 = vld [vmem:[%s9862_s1 + $0x78c] sm:$0xf] }
  0x9f   :  { %2045 = vmatpush.bf16.msra.mxu3 %v4312_v3  ;;  %v4741_v3 = vld [vmem:[%s9862_s1 + $0x530] sm:$0xf0] }
  0xa0   :  { %2007 = vmatpush.bf16.msra.mxu0 %v4860_v10  ;;  %v4552_v10 = vor.u32 %v6244_v62, %v4549_v1  ;;  %v4744_v12 = vor.u32 %v6292_v2, %v4741_v3  ;;  %v1801_v28 = vpop.f32.mrf.mxu0  ;;  %v4459_v62 = vld [vmem:[%s9862_s1 + $0x2e0] sm:$0xf]  ;;  %v6272_v2 = vld [vmem:[%s9862_s1 + $0x474] sm:$0xf0] }
  0xa1   :  { %2020 = vmatpush.bf16.msra.mxu1 %v5052_v14  ;;  %v4525_v14 = vld [vmem:[%s9862_s1 + $0x380] sm:$0xf0]  ;;  %v1802_v34 = vadd.f32 %v1801_v28, %v319_v16  ;;  %v4651_v1 = vld [vmem:[%s9862_s1 + $0x460] sm:$0xf]  ;;  %v6170_v16 = vld [vmem:[%s9862_s1 + $0x144] sm:$0xf0] }
  0xa2   :  { %2033 = vmatpush.bf16.msra.mxu2 %v4096_v15  ;;  %v6286_v15 = vld [vmem:[%s9862_s1 + $0x4ec] sm:$0xf]  ;;  %v4528_v27 = vor.u32 %v6238_v11, %v4525_v14  ;;  %v5056_v11 = vor.u32 %v6370_v56, %v5053_v57  ;;  %v4652_v14 = vor.u32 %v6272_v2, %v4651_v1  ;;  %v6200_v2 = vld [vmem:[%s9862_s1 + $0x234] sm:$0xf0] }
  0xa3   :  { %2046 = vmatpush.bf16.msra.mxu3 %v4288_v21  ;;  %2008 = vmatmul.bf16.vlgmr.msra.gmra.mxu0 %v7146_v35  ;;  %v4717_v21 = vld [vmem:[%s9862_s1 + $0x500] sm:$0xf0] }
  0xa4   :  { %2052 = vmatpush.bf16.msrb.mxu0 %v4648_v23  ;;  %2021 = vmatmul.bf16.vlgmr.msra.gmra.mxu1 %v7154_v38  ;;  %v6334_v23 = vld [vmem:[%s9862_s1 + $0x66c] sm:$0xf] }
  0xa5   :  { %2065 = vmatpush.bf16.msrb.mxu1 %v4840_v24  ;;  %2034 = vmatmul.bf16.vlgmr.msra.gmra.mxu2 %v6995_v19  ;;  %v4909_v24 = vld [vmem:[%s9862_s1 + $0x680] sm:$0xf0] }
  0xa6   :  { %2078 = vmatpush.bf16.msrb.mxu2 %v5032_v25  ;;  %2047 = vmatmul.bf16.vlgmr.msra.gmra.mxu3 %v6999_v22  ;;  %v6382_v25 = vld [vmem:[%s9862_s1 + $0x7ec] sm:$0xf]  ;;  %v4912_v30 = vor.u32 %v6334_v23, %v4909_v24  ;;  %v6218_v23 = vld [vmem:[%s9862_s1 + $0x2c4] sm:$0xf0]  ;;  %v4627_v24 = vld [vmem:[%s9862_s1 + $0x430] sm:$0xf] }
  0xa7   :  { %2091 = vmatpush.bf16.msrb.mxu3 %v5224_v29  ;;  %v4720_v29 = vor.u32 %v6286_v15, %v4717_v21  ;;  %v4243_v15 = vld [vmem:[%s9862_s1 + $0x130] sm:$0xf]  ;;  %v4844_v21 = vor.u32 %v6320_v9, %v4843_v8  ;;  %v6296_v8 = vld [vmem:[%s9862_s1 + $0x534] sm:$0xf0]  ;;  %v320_v9 = vperm.slane %v7817_v7, 1 }
  0xa8   :  { %2053 = vmatpush.bf16.msrb.mxu0 %v4624_v36  ;;  %v1814_v36 = vpop.f32.mrf.mxu1  ;;  %v1827_v53 = vpop.f32.mrf.mxu2 }
  0xa9   :  { %2066 = vmatpush.bf16.msrb.mxu1 %v4816_v37  ;;  %v5104_v37 = vor.u32 %v6382_v25, %v5101_v26  ;;  %v1815_v44 = vadd.f32 %v1814_v36, %v1802_v34  ;;  %v1840_v59 = vpop.f32.mrf.mxu3  ;;  %v6266_v25 = vld [vmem:[%s9862_s1 + $0x444] sm:$0xf0]  ;;  %v4819_v26 = vld [vmem:[%s9862_s1 + $0x5b0] sm:$0xf]  ;;  %v6164_v34 = vld [vmem:[%s9862_s1 + $0x114] sm:$0xf0] }
  0xaa   :  { %2079 = vmatpush.bf16.msrb.mxu2 %v5008_v39  ;;  %v4693_v39 = vld [vmem:[%s9862_s1 + $0x4d0] sm:$0xf0]  ;;  %v4628_v32 = vor.u32 %v6266_v25, %v4627_v24  ;;  %v4411_v36 = vld [vmem:[%s9862_s1 + $0x280] sm:$0xf]  ;;  %v4723_v25 = vld [vmem:[%s9862_s1 + $0x4f0] sm:$0xf] }
  0xab   :  { %2092 = vmatpush.bf16.msrb.mxu3 %v5200_v43  ;;  %v5077_v43 = vld [vmem:[%s9862_s1 + $0x7d0] sm:$0xf0]  ;;  %v4696_v48 = vor.u32 %v6280_v33, %v4693_v39  ;;  %v1828_v58 = vadd.f32 %v1827_v53, %v1815_v44  ;;  %v4219_v33 = vld [vmem:[%s9862_s1 + $0x100] sm:$0xf]  ;;  %v6212_v39 = vld [vmem:[%s9862_s1 + $0x294] sm:$0xf0] }
  0xac   :  { %2054 = vmatpush.bf16.msrb.mxu0 %v4600_v49  ;;  %v4888_v49 = vor.u32 %v6328_v40, %v4885_v41  ;;  %v5080_v54 = vor.u32 %v6376_v42, %v5077_v43  ;;  %v4603_v40 = vld [vmem:[%s9862_s1 + $0x400] sm:$0xf]  ;;  %v6260_v41 = vld [vmem:[%s9862_s1 + $0x414] sm:$0xf0]  ;;  %v4220_v44 = vor.u32 %v6164_v34, %v4219_v33  ;;  %v6254_v53 = vld [vmem:[%s9862_s1 + $0x3e4] sm:$0xf0] }
  0xad   :  { %2067 = vmatpush.bf16.msrb.mxu1 %v4792_v50  ;;  %v6274_v50 = vld [vmem:[%s9862_s1 + $0x48c] sm:$0xf]  ;;  %v7916_v3 = vadd.f32 %v1840_v59, %v1828_v58  ;;  %v4795_v42 = vld [vmem:[%s9862_s1 + $0x580] sm:$0xf]  ;;  %v6308_v43 = vld [vmem:[%s9862_s1 + $0x594] sm:$0xf0] }
  0xae   :  { %2080 = vmatpush.bf16.msrb.mxu2 %v4984_v51  ;;  %v4669_v51 = vld [vmem:[%s9862_s1 + $0x4a0] sm:$0xf0]  ;;  %v4123_v34 = vld [vmem:[%s9862_s1 + $0x40] sm:$0xf] }
  0xaf   :  { %2093 = vmatpush.bf16.msrb.mxu3 %v5176_v55  ;;  %v4861_v55 = vld [vmem:[%s9862_s1 + $0x620] sm:$0xf0]  ;;  %v4672_v5 = vor.u32 %v6274_v50, %v4669_v51  ;;  %v4796_v50 = vor.u32 %v6308_v43, %v4795_v42  ;;  %v6206_v51 = vld [vmem:[%s9862_s1 + $0x264] sm:$0xf0]  ;;  %v4507_v42 = vld [vmem:[%s9862_s1 + $0x340] sm:$0xf] }
  0xb0   :  { %2055 = vmatpush.bf16.msrb.mxu0 %v4576_v61  ;;  %v6176_v61 = vld [vmem:[%s9862_s1 + $0x174] sm:$0xf0]  ;;  %v4864_v6 = vor.u32 %v6322_v52, %v4861_v55  ;;  %v1829_v28 = vpop.f32.mrf.mxu2  ;;  %v4579_v52 = vld [vmem:[%s9862_s1 + $0x3d0] sm:$0xf]  ;;  %v6302_v55 = vld [vmem:[%s9862_s1 + $0x564] sm:$0xf0] }
  0xb1   :  { %2068 = vmatpush.bf16.msrb.mxu1 %v4768_v63  ;;  %v4480_v63 = vor.u32 %v6226_v46, %v4477_v47  ;;  %v4604_v46 = vor.u32 %v6260_v41, %v4603_v40  ;;  %v4195_v47 = vld [vmem:[%s9862_s1 + $0xd0] sm:$0xf]  ;;  %v6188_v41 = vld [vmem:[%s9862_s1 + $0x1d4] sm:$0xf0] }
  0xb2   :  { %2081 = vmatpush.bf16.msrb.mxu2 %v4960_v0  ;;  %v6224_v0 = vld [vmem:[%s9862_s1 + $0x2f4] sm:$0xf0] }
  0xb3   :  { %2094 = vmatpush.bf16.msrb.mxu3 %v5152_v4  ;;  %v1803_v4 = vpop.f32.mrf.mxu0  ;;  %v6236_v43 = vld [vmem:[%s9862_s1 + $0x354] sm:$0xf0] }
  0xb4   :  { %2056 = vmatpush.bf16.msrb.mxu0 %v4552_v10  ;;  %v1816_v10 = vpop.f32.mrf.mxu1  ;;  %v6248_v4 = vld [vmem:[%s9862_s1 + $0x3b4] sm:$0xf0] }
  0xb5   :  { %2069 = vmatpush.bf16.msrb.mxu1 %v4744_v12  ;;  %v4268_v12 = vor.u32 %v6176_v61, %v4267_v60  ;;  %v4580_v61 = vor.u32 %v6254_v53, %v4579_v52  ;;  %v6182_v52 = vld [vmem:[%s9862_s1 + $0x1a4] sm:$0xf0]  ;;  %v4483_v53 = vld [vmem:[%s9862_s1 + $0x310] sm:$0xf] }
  0xb6   :  { %2082 = vmatpush.bf16.msrb.mxu2 %v4936_v13  ;;  %v4460_v13 = vor.u32 %v6224_v0, %v4459_v62  ;;  %v4171_v62 = vld [vmem:[%s9862_s1 + $0xa0] sm:$0xf] }
  0xb7   :  { %2095 = vmatpush.bf16.msrb.mxu3 %v5128_v17  ;;  %v4435_v17 = vld [vmem:[%s9862_s1 + $0x2b0] sm:$0xf]  ;;  %v4363_v0 = vld [vmem:[%s9862_s1 + $0x220] sm:$0xf] }
  0xb8   :  { %2057 = vmatpush.bf16.msrb.mxu0 %v4528_v27  ;;  %v6314_v27 = vld [vmem:[%s9862_s1 + $0x5c4] sm:$0xf0]  ;;  %v4436_v31 = vor.u32 %v6218_v23, %v4435_v17 }
  0xb9   :  { %2070 = vmatpush.bf16.msrb.mxu1 %v4720_v29  ;;  %v4244_v29 = vor.u32 %v6170_v16, %v4243_v15  ;;  %v4339_v15 = vld [vmem:[%s9862_s1 + $0x1f0] sm:$0xf]  ;;  %v6194_v17 = vld [vmem:[%s9862_s1 + $0x204] sm:$0xf0] }
  0xba   :  { %2083 = vmatpush.bf16.msrb.mxu2 %v4912_v30  ;;  %v1842_v30 = vpop.f32.mrf.mxu3  ;;  %v6242_v23 = vld [vmem:[%s9862_s1 + $0x384] sm:$0xf0] }
  0xbb   :  { %2096 = vmatpush.bf16.msrb.mxu3 %v5104_v37  ;;  %v4820_v37 = vor.u32 %v6314_v27, %v4819_v26  ;;  %v6290_v26 = vld [vmem:[%s9862_s1 + $0x504] sm:$0xf0] }
  0xbc   :  { %2058 = vmatpush.bf16.msrb.mxu0 %v4504_v45  ;;  %v4412_v45 = vor.u32 %v6212_v39, %v4411_v36  ;;  %v6140_v36 = vld [vmem:[%s9862_s1 + $0x54] sm:$0xf0]  ;;  %v4724_v40 = vor.u32 %v6290_v26, %v4723_v25  ;;  %v4437_v25 = vld [vmem:[%s9862_s1 + $0x2c8] sm:$0xf0] }
  0xbd   :  { %2071 = vmatpush.bf16.msrb.mxu1 %v4696_v48  ;;  %v6158_v48 = vld [vmem:[%s9862_s1 + $0xe4] sm:$0xf0] }
  0xbe   :  { %2084 = vmatpush.bf16.msrb.mxu2 %v4888_v49  ;;  %v4387_v49 = vld [vmem:[%s9862_s1 + $0x250] sm:$0xf]  ;;  %v4196_v57 = vor.u32 %v6158_v48, %v4195_v47  ;;  %v6134_v48 = vld [vmem:[%s9862_s1 + $0x24] sm:$0xf0] }
  0xbf   :  { %2097 = vmatpush.bf16.msrb.mxu3 %v5080_v54  ;;  %v4771_v54 = vld [vmem:[%s9862_s1 + $0x550] sm:$0xf]  ;;  %v4388_v60 = vor.u32 %v6206_v51, %v4387_v49 }
  0xc0   :  { %2059 = vmatpush.bf16.msrb.mxu0 %v4480_v63  ;;  %v1853_v56 = vpop.f32.mrf.mxu0  ;;  %v6152_v63 = vld [vmem:[%s9862_s1 + $0xb4] sm:$0xf0]  ;;  %v4772_v1 = vor.u32 %v6302_v55, %v4771_v54  ;;  %v4099_v47 = vld [vmem:[%s9862_s1 + $0x10] sm:$0xf]  ;;  %v6230_v55 = vld [vmem:[%s9862_s1 + $0x324] sm:$0xf0] }
  0xc1   :  { %2072 = vmatpush.bf16.msrb.mxu1 %v4672_v5  ;;  %v1854_v58 = vadd.f32 %v1853_v56, %v7916_v3  ;;  %v1866_v59 = vpop.f32.mrf.mxu1  ;;  %v4555_v3 = vld [vmem:[%s9862_s1 + $0x3a0] sm:$0xf]  ;;  %v4172_v10 = vor.u32 %v6152_v63, %v4171_v62  ;;  %v4291_v51 = vld [vmem:[%s9862_s1 + $0x190] sm:$0xf]  ;;  %v4100_v63 = vor.u32 %v6134_v48, %v4099_v47  ;;  %v6398_v48 = vld [vmem:[%s9862_s1 + $0x864] sm:$0xf0] }
  0xc2   :  { %2085 = vmatpush.bf16.msrb.mxu2 %v4864_v6  ;;  %v4747_v6 = vld [vmem:[%s9862_s1 + $0x520] sm:$0xf]  ;;  %v4675_v56 = vld [vmem:[%s9862_s1 + $0x490] sm:$0xf] }
  0xc3   :  { %2098 = vmatpush.bf16.msrb.mxu3 %v5056_v11  ;;  %2060 = vmatmul.bf16.vlgmr.msrb.gmra.mxu0 %v6993_v18  ;;  %v8019_v5 = vadd.f32 %v1866_v59, %v1854_v58  ;;  %v4364_v11 = vor.u32 %v6200_v2, %v4363_v0  ;;  %v4748_v16 = vor.u32 %v6296_v8, %v4747_v6  ;;  %v5035_v59 = vld [vmem:[%s9862_s1 + $0x760] sm:$0xf]  ;;  %v6416_v0 = vld [vmem:[%s9862_s1 + $0x8f4] sm:$0xf0]  ;;  %v4269_v2 = vld [vmem:[%s9862_s1 + $0x178] sm:$0xf0] }
  0xc4   :  { %2104 = vmatpush.bf16.msra.mxu0 %v4268_v12  ;;  %2073 = vmatmul.bf16.vlgmr.msrb.gmra.mxu1 %v6997_v20  ;;  %v4556_v12 = vor.u32 %v6248_v4, %v4555_v3  ;;  %v4292_v3 = vor.u32 %v6182_v52, %v4291_v51  ;;  %v4484_v4 = vor.u32 %v6230_v55, %v4483_v53  ;;  %v6221_v6 = vld [vmem:[%s9862_s1 + $0x2e4] sm:$0xf]  ;;  %v4461_v8 = vld [vmem:[%s9862_s1 + $0x2f8] sm:$0xf0]  ;;  %v6203_v51 = vld [vmem:[%s9862_s1 + $0x254] sm:$0xf] }
  0xc5   :  { %2117 = vmatpush.bf16.msra.mxu1 %v4460_v13  ;;  %2086 = vmatmul.bf16.vlgmr.msrb.gmra.mxu2 %v7146_v35  ;;  %v4147_v13 = vld [vmem:[%s9862_s1 + $0x70] sm:$0xf]  ;;  %v4389_v52 = vld [vmem:[%s9862_s1 + $0x268] sm:$0xf0] }
  0xc6   :  { %2130 = vmatpush.bf16.msra.mxu2 %v4652_v14  ;;  %2099 = vmatmul.bf16.vlgmr.msrb.gmra.mxu3 %v7154_v38  ;;  %v6146_v14 = vld [vmem:[%s9862_s1 + $0x84] sm:$0xf0] }
  0xc7   :  { %2143 = vmatpush.bf16.msra.mxu3 %v4844_v21  ;;  %v4531_v21 = vld [vmem:[%s9862_s1 + $0x370] sm:$0xf]  ;;  %v4148_v30 = vor.u32 %v6146_v14, %v4147_v13  ;;  %v6362_v14 = vld [vmem:[%s9862_s1 + $0x744] sm:$0xf0] }
  0xc8   :  { %2105 = vmatpush.bf16.msra.mxu0 %v4244_v29  ;;  %v1879_v24 = vpop.f32.mrf.mxu2  ;;  %v1855_v29 = vpop.f32.mrf.mxu0  ;;  %v4532_v33 = vor.u32 %v6242_v23, %v4531_v21  ;;  %v5011_v13 = vld [vmem:[%s9862_s1 + $0x730] sm:$0xf]  ;;  %v6167_v21 = vld [vmem:[%s9862_s1 + $0x134] sm:$0xf]  ;;  %v4245_v23 = vld [vmem:[%s9862_s1 + $0x148] sm:$0xf0] }
  0xc9   :  { %2118 = vmatpush.bf16.msra.mxu1 %v4436_v31  ;;  %v1880_v27 = vadd.f32 %v1879_v24, %v320_v9  ;;  %v1892_v28 = vpop.f32.mrf.mxu3  ;;  %v1868_v31 = vpop.f32.mrf.mxu1  ;;  %v6215_v24 = vld [vmem:[%s9862_s1 + $0x2b4] sm:$0xf]  ;;  %v5012_v26 = vor.u32 %v6362_v14, %v5011_v13  ;;  %v4987_v29 = vld [vmem:[%s9862_s1 + $0x700] sm:$0xf]  ;;  %v6386_v14 = vld [vmem:[%s9862_s1 + $0x804] sm:$0xf0] }
  0xca   :  { %2131 = vmatpush.bf16.msra.mxu2 %v4628_v32  ;;  %v4340_v32 = vor.u32 %v6194_v17, %v4339_v15  ;;  %v5203_v15 = vld [vmem:[%s9862_s1 + $0x8b0] sm:$0xf]  ;;  %v6410_v17 = vld [vmem:[%s9862_s1 + $0x8c4] sm:$0xf0]  ;;  %v5179_v31 = vld [vmem:[%s9862_s1 + $0x880] sm:$0xf] }
  0xcb   :  { %2144 = vmatpush.bf16.msra.mxu3 %v4820_v37  ;;  %v4315_v37 = vld [vmem:[%s9862_s1 + $0x1c0] sm:$0xf]  ;;  %v8061_v39 = vadd.f32 %v1892_v28, %v1880_v27  ;;  %v5204_v27 = vor.u32 %v6410_v17, %v5203_v15  ;;  %v4248_v28 = vor.u32 %v6167_v21, %v4245_v23  ;;  %v6143_v15 = vld [vmem:[%s9862_s1 + $0x74] sm:$0xf] }
  0xcc   :  { %2106 = vmatpush.bf16.msra.mxu0 %v4220_v44  ;;  %v4699_v44 = vld [vmem:[%s9862_s1 + $0x4c0] sm:$0xf]  ;;  %v4316_v49 = vor.u32 %v6188_v41, %v4315_v37  ;;  %v6209_v37 = vld [vmem:[%s9862_s1 + $0x284] sm:$0xf]  ;;  %v6191_v23 = vld [vmem:[%s9862_s1 + $0x1f4] sm:$0xf] }
  0xcd   :  { %2119 = vmatpush.bf16.msra.mxu1 %v4412_v45  ;;  %v6284_v45 = vld [vmem:[%s9862_s1 + $0x4d4] sm:$0xf0] }
  0xce   :  { %2132 = vmatpush.bf16.msra.mxu2 %v4604_v46  ;;  %v4124_v46 = vor.u32 %v6140_v36, %v4123_v34  ;;  %v4700_v54 = vor.u32 %v6284_v45, %v4699_v44  ;;  %v6161_v34 = vld [vmem:[%s9862_s1 + $0x104] sm:$0xf]  ;;  %v4221_v36 = vld [vmem:[%s9862_s1 + $0x118] sm:$0xf0]  ;;  %v4963_v44 = vld [vmem:[%s9862_s1 + $0x6d0] sm:$0xf] }
  0xcf   :  { %2145 = vmatpush.bf16.msra.mxu3 %v4796_v50  ;;  %v4508_v50 = vor.u32 %v6236_v43, %v4507_v42  ;;  %v4224_v43 = vor.u32 %v6161_v34, %v4221_v36  ;;  %v6350_v45 = vld [vmem:[%s9862_s1 + $0x6e4] sm:$0xf0]  ;;  %v6380_v36 = vld [vmem:[%s9862_s1 + $0x7d4] sm:$0xf0] }
  0xd0   :  { %2107 = vmatpush.bf16.msra.mxu0 %v4196_v57  ;;  %v6278_v57 = vld [vmem:[%s9862_s1 + $0x4a4] sm:$0xf0]  ;;  %v1881_v58 = vpop.f32.mrf.mxu2  ;;  %v4964_v53 = vor.u32 %v6350_v45, %v4963_v44  ;;  %v4867_v44 = vld [vmem:[%s9862_s1 + $0x610] sm:$0xf] }
  0xd1   :  { %2120 = vmatpush.bf16.msra.mxu1 %v4388_v60  ;;  %v6368_v60 = vld [vmem:[%s9862_s1 + $0x774] sm:$0xf0]  ;;  %v1894_v62 = vpop.f32.mrf.mxu3  ;;  %v4676_v9 = vor.u32 %v6278_v57, %v4675_v56  ;;  %v4939_v57 = vld [vmem:[%s9862_s1 + $0x6a0] sm:$0xf]  ;;  %v6326_v45 = vld [vmem:[%s9862_s1 + $0x624] sm:$0xf0] }
  0xd2   :  { %2133 = vmatpush.bf16.msra.mxu2 %v4580_v61  ;;  %v5227_v61 = vld [vmem:[%s9862_s1 + $0x8e0] sm:$0xf]  ;;  %v6344_v58 = vld [vmem:[%s9862_s1 + $0x6b4] sm:$0xf0]  ;;  %v4392_v62 = vor.u32 %v6203_v51, %v4389_v52 }
  0xd3   :  { %2146 = vmatpush.bf16.msra.mxu3 %v4772_v1  ;;  %v6173_v1 = vld [vmem:[%s9862_s1 + $0x164] sm:$0xf] }
  0xd4   :  { %2108 = vmatpush.bf16.msra.mxu0 %v4172_v10  ;;  %v5036_v10 = vor.u32 %v6368_v60, %v5035_v59  ;;  %v5131_v59 = vld [vmem:[%s9862_s1 + $0x820] sm:$0xf] }
  0xd5   :  { %2121 = vmatpush.bf16.msra.mxu1 %v4364_v11  ;;  %v5228_v11 = vor.u32 %v6416_v0, %v5227_v61  ;;  %v6149_v0 = vld [vmem:[%s9862_s1 + $0xa4] sm:$0xf] }
  0xd6   :  { %2134 = vmatpush.bf16.msra.mxu2 %v4556_v12  ;;  %v4272_v12 = vor.u32 %v6173_v1, %v4269_v2  ;;  %v4173_v1 = vld [vmem:[%s9862_s1 + $0xb8] sm:$0xf0]  ;;  %v6197_v2 = vld [vmem:[%s9862_s1 + $0x224] sm:$0xf] }
  0xd7   :  { %2147 = vmatpush.bf16.msra.mxu3 %v4748_v16  ;;  %v4464_v16 = vor.u32 %v6221_v6, %v4461_v8  ;;  %v4176_v8 = vor.u32 %v6149_v0, %v4173_v1 }
  0xd8   :  { %2109 = vmatpush.bf16.msra.mxu0 %v4148_v30  ;;  %v6356_v30 = vld [vmem:[%s9862_s1 + $0x714] sm:$0xf0] }
  0xd9   :  { %2122 = vmatpush.bf16.msra.mxu1 %v4340_v32  ;;  %v4440_v32 = vor.u32 %v6215_v24, %v4437_v25  ;;  %v4988_v41 = vor.u32 %v6356_v30, %v4987_v29  ;;  %v4341_v24 = vld [vmem:[%s9862_s1 + $0x208] sm:$0xf0]  ;;  %v4891_v30 = vld [vmem:[%s9862_s1 + $0x640] sm:$0xf] }
  0xda   :  { %2135 = vmatpush.bf16.msra.mxu2 %v4532_v33  ;;  %v6404_v33 = vld [vmem:[%s9862_s1 + $0x894] sm:$0xf0]  ;;  %v4344_v34 = vor.u32 %v6191_v23, %v4341_v24 }
  0xdb   :  { %2148 = vmatpush.bf16.msra.mxu3 %v4724_v40  ;;  %v4413_v40 = vld [vmem:[%s9862_s1 + $0x298] sm:$0xf0]  ;;  %v5180_v42 = vor.u32 %v6404_v33, %v5179_v31  ;;  %v6332_v31 = vld [vmem:[%s9862_s1 + $0x654] sm:$0xf0] }
  0xdc   :  { %2110 = vmatpush.bf16.msra.mxu0 %v4124_v46  ;;  %v5155_v46 = vld [vmem:[%s9862_s1 + $0x850] sm:$0xf]  ;;  %v4416_v47 = vor.u32 %v6209_v37, %v4413_v40  ;;  %v6137_v37 = vld [vmem:[%s9862_s1 + $0x44] sm:$0xf]  ;;  %v4125_v40 = vld [vmem:[%s9862_s1 + $0x58] sm:$0xf0] }
  0xdd   :  { %2123 = vmatpush.bf16.msra.mxu1 %v4316_v49  ;;  %v6155_v49 = vld [vmem:[%s9862_s1 + $0xd4] sm:$0xf]  ;;  %v5156_v55 = vor.u32 %v6398_v48, %v5155_v46  ;;  %v5059_v48 = vld [vmem:[%s9862_s1 + $0x790] sm:$0xf] }
  0xde   :  { %2136 = vmatpush.bf16.msra.mxu2 %v4508_v50  ;;  %v4197_v50 = vld [vmem:[%s9862_s1 + $0xe8] sm:$0xf0] }
  0xdf   :  { %2149 = vmatpush.bf16.msra.mxu3 %v4700_v54  ;;  %v4200_v56 = vor.u32 %v6155_v49, %v4197_v50  ;;  %v6374_v49 = vld [vmem:[%s9862_s1 + $0x7a4] sm:$0xf0]  ;;  %v6131_v50 = vld [vmem:[%s9862_s1 + $0x14] sm:$0xf] }
  0xe0   :  { %2111 = vmatpush.bf16.msra.mxu0 %v4100_v63  ;;  %v1905_v54 = vpop.f32.mrf.mxu0  ;;  %v6392_v63 = vld [vmem:[%s9862_s1 + $0x834] sm:$0xf0]  ;;  %v5060_v0 = vor.u32 %v6374_v49, %v5059_v48 }
  0xe1   :  { %2124 = vmatpush.bf16.msra.mxu1 %v4292_v3  ;;  %v1906_v60 = vadd.f32 %v1905_v54, %v8061_v39  ;;  %v1918_v61 = vpop.f32.mrf.mxu1  ;;  %v4365_v39 = vld [vmem:[%s9862_s1 + $0x238] sm:$0xf0]  ;;  %v5132_v6 = vor.u32 %v6392_v63, %v5131_v59  ;;  %v6179_v54 = vld [vmem:[%s9862_s1 + $0x194] sm:$0xf]  ;;  %v6317_v59 = vld [vmem:[%s9862_s1 + $0x5e4] sm:$0xf] }
  0xe2   :  { %2137 = vmatpush.bf16.msra.mxu2 %v4484_v4  ;;  %v4940_v4 = vor.u32 %v6344_v58, %v4939_v57  ;;  %v4368_v13 = vor.u32 %v6197_v2, %v4365_v39  ;;  %v6269_v57 = vld [vmem:[%s9862_s1 + $0x464] sm:$0xf]  ;;  %v4653_v58 = vld [vmem:[%s9862_s1 + $0x478] sm:$0xf0] }
  0xe3   :  { %2150 = vmatpush.bf16.msra.mxu3 %v4676_v9  ;;  %2112 = vmatmul.bf16.vlgmr.msra.gmra.mxu0 %v6995_v19  ;;  %v1919_v3 = vadd.f32 %v1918_v61, %v1906_v60  ;;  %v4915_v9 = vld [vmem:[%s9862_s1 + $0x670] sm:$0xf]  ;;  %v4868_v60 = vor.u32 %v6326_v45, %v4867_v44  ;;  %v4845_v61 = vld [vmem:[%s9862_s1 + $0x5f8] sm:$0xf0]  ;;  %v6413_v2 = vld [vmem:[%s9862_s1 + $0x8e4] sm:$0xf] }
  0xe4   :  { %2156 = vmatpush.bf16.msrb.mxu0 %v5036_v10  ;;  %2125 = vmatmul.bf16.vlgmr.msra.gmra.mxu1 %v6999_v22  ;;  %v6338_v10 = vld [vmem:[%s9862_s1 + $0x684] sm:$0xf0]  ;;  %v5037_v63 = vld [vmem:[%s9862_s1 + $0x778] sm:$0xf0]  ;;  %v6347_v44 = vld [vmem:[%s9862_s1 + $0x6d4] sm:$0xf] }
  0xe5   :  { %2169 = vmatpush.bf16.msrb.mxu1 %v5228_v11  ;;  %2138 = vmatmul.bf16.vlgmr.msra.gmra.mxu2 %v6993_v18  ;;  %v5107_v11 = vld [vmem:[%s9862_s1 + $0x7f0] sm:$0xf]  ;;  %v4916_v25 = vor.u32 %v6338_v10, %v4915_v9  ;;  %v5229_v39 = vld [vmem:[%s9862_s1 + $0x8f8] sm:$0xf0]  ;;  %v6263_v9 = vld [vmem:[%s9862_s1 + $0x434] sm:$0xf] }
  0xe6   :  { %2182 = vmatpush.bf16.msrb.mxu2 %v4272_v12  ;;  %2151 = vmatmul.bf16.vlgmr.msra.gmra.mxu3 %v6997_v20  ;;  %v4629_v10 = vld [vmem:[%s9862_s1 + $0x448] sm:$0xf0] }
  0xe7   :  { %2195 = vmatpush.bf16.msrb.mxu3 %v4464_v16  ;;  %v4149_v16 = vld [vmem:[%s9862_s1 + $0x88] sm:$0xf0] }
  0xe8   :  { %2157 = vmatpush.bf16.msrb.mxu0 %v5012_v26  ;;  %v1931_v12 = vpop.f32.mrf.mxu2  ;;  %v4152_v29 = vor.u32 %v6143_v15, %v4149_v16  ;;  %v5013_v15 = vld [vmem:[%s9862_s1 + $0x748] sm:$0xf0]  ;;  %v6407_v16 = vld [vmem:[%s9862_s1 + $0x8b4] sm:$0xf] }
  0xe9   :  { %2170 = vmatpush.bf16.msrb.mxu1 %v5204_v27  ;;  %v1932_v17 = vadd.f32 %v1931_v12, %v1919_v3  ;;  %v1944_v21 = vpop.f32.mrf.mxu3  ;;  %v1907_v27 = vpop.f32.mrf.mxu0  ;;  %v5232_v12 = vor.u32 %v6413_v2, %v5229_v39  ;;  %v4965_v45 = vld [vmem:[%s9862_s1 + $0x6e8] sm:$0xf0]  ;;  %v6287_v39 = vld [vmem:[%s9862_s1 + $0x4f4] sm:$0xf] }
  0xea   :  { %2183 = vmatpush.bf16.msrb.mxu2 %v4248_v28  ;;  %v5108_v28 = vor.u32 %v6386_v14, %v5107_v11  ;;  %v1920_v33 = vpop.f32.mrf.mxu1  ;;  %v6311_v11 = vld [vmem:[%s9862_s1 + $0x5b4] sm:$0xf]  ;;  %v4605_v27 = vld [vmem:[%s9862_s1 + $0x418] sm:$0xf0]  ;;  %v4533_v2 = vld [vmem:[%s9862_s1 + $0x388] sm:$0xf0] }
  0xeb   :  { %2196 = vmatpush.bf16.msrb.mxu3 %v4440_v32  ;;  %v8251_v26 = vadd.f32 %v1944_v21, %v1932_v17  ;;  %v5083_v32 = vld [vmem:[%s9862_s1 + $0x7c0] sm:$0xf]  ;;  %v6359_v14 = vld [vmem:[%s9862_s1 + $0x734] sm:$0xf]  ;;  %v5205_v17 = vld [vmem:[%s9862_s1 + $0x8c8] sm:$0xf0]  ;;  %v4632_v21 = vor.u32 %v6263_v9, %v4629_v10 }
  0xec   :  { %2158 = vmatpush.bf16.msrb.mxu0 %v4988_v41  ;;  %v6185_v41 = vld [vmem:[%s9862_s1 + $0x1c4] sm:$0xf]  ;;  %v5084_v46 = vor.u32 %v6380_v36, %v5083_v32  ;;  %v5016_v24 = vor.u32 %v6359_v14, %v5013_v15  ;;  %v4989_v32 = vld [vmem:[%s9862_s1 + $0x718] sm:$0xf0]  ;;  %v6383_v10 = vld [vmem:[%s9862_s1 + $0x7f4] sm:$0xf] }
  0xed   :  { %2171 = vmatpush.bf16.msrb.mxu1 %v5180_v42  ;;  %v4317_v42 = vld [vmem:[%s9862_s1 + $0x1d8] sm:$0xf0]  ;;  %v6401_v33 = vld [vmem:[%s9862_s1 + $0x884] sm:$0xf] }
  0xee   :  { %2184 = vmatpush.bf16.msrb.mxu2 %v4224_v43  ;;  %v4892_v43 = vor.u32 %v6332_v31, %v4891_v30  ;;  %v4320_v52 = vor.u32 %v6185_v41, %v4317_v42  ;;  %v4797_v30 = vld [vmem:[%s9862_s1 + $0x598] sm:$0xf0]  ;;  %v6353_v31 = vld [vmem:[%s9862_s1 + $0x704] sm:$0xf]  ;;  %v4581_v41 = vld [vmem:[%s9862_s1 + $0x3e8] sm:$0xf0] }
  0xef   :  { %2197 = vmatpush.bf16.msrb.mxu3 %v4416_v47  ;;  %v4128_v47 = vor.u32 %v6137_v37, %v4125_v40  ;;  %v4992_v40 = vor.u32 %v6353_v31, %v4989_v32  ;;  %v6299_v42 = vld [vmem:[%s9862_s1 + $0x554] sm:$0xf]  ;;  %v5085_v31 = vld [vmem:[%s9862_s1 + $0x7d8] sm:$0xf0] }
  0xf0   :  { %2159 = vmatpush.bf16.msrb.mxu0 %v4964_v53  ;;  %v1933_v51 = vpop.f32.mrf.mxu2  ;;  %v4101_v53 = vld [vmem:[%s9862_s1 + $0x28] sm:$0xf0] }
  0xf1   :  { %2172 = vmatpush.bf16.msrb.mxu1 %v5156_v55  ;;  %v4293_v55 = vld [vmem:[%s9862_s1 + $0x1a8] sm:$0xf0]  ;;  %v4104_v1 = vor.u32 %v6131_v50, %v4101_v53  ;;  %v6245_v53 = vld [vmem:[%s9862_s1 + $0x3a4] sm:$0xf] }
  0xf2   :  { %2185 = vmatpush.bf16.msrb.mxu2 %v4200_v56  ;;  %v1946_v56 = vpop.f32.mrf.mxu3  ;;  %v4296_v3 = vor.u32 %v6179_v54, %v4293_v55  ;;  %v4557_v54 = vld [vmem:[%s9862_s1 + $0x3b8] sm:$0xf0]  ;;  %v6293_v55 = vld [vmem:[%s9862_s1 + $0x524] sm:$0xf] }
  0xf3   :  { %2198 = vmatpush.bf16.msrb.mxu3 %v4392_v62  ;;  %v6365_v62 = vld [vmem:[%s9862_s1 + $0x764] sm:$0xf] }
  0xf4   :  { %2160 = vmatpush.bf16.msrb.mxu0 %v4940_v4  ;;  %v4656_v4 = vor.u32 %v6269_v57, %v4653_v58  ;;  %v4749_v57 = vld [vmem:[%s9862_s1 + $0x538] sm:$0xf0]  ;;  %v6341_v58 = vld [vmem:[%s9862_s1 + $0x6a4] sm:$0xf] }
  0xf5   :  { %2173 = vmatpush.bf16.msrb.mxu1 %v5132_v6  ;;  %v4848_v6 = vor.u32 %v6317_v59, %v4845_v61  ;;  %v4941_v59 = vld [vmem:[%s9862_s1 + $0x6b8] sm:$0xf0] }
  0xf6   :  { %2186 = vmatpush.bf16.msrb.mxu2 %v4176_v8  ;;  %v5040_v8 = vor.u32 %v6365_v62, %v5037_v63  ;;  %v5133_v61 = vld [vmem:[%s9862_s1 + $0x838] sm:$0xf0]  ;;  %v4560_v62 = vor.u32 %v6245_v53, %v4557_v54  ;;  %v4752_v63 = vor.u32 %v6293_v55, %v4749_v57  ;;  %v6479_v53 = vld [vmem:[%s9865_s3 + $0x1ec] sm:$0xf0]  ;;  %v5603_v54 = vld [vmem:[%s9865_s3 + $0x2e0] sm:$0xf] }
  0xf7   :  { %2199 = vmatpush.bf16.msrb.mxu3 %v4368_v13  ;;  %v4821_v13 = vld [vmem:[%s9862_s1 + $0x5c8] sm:$0xf0]  ;;  %v6511_v55 = vld [vmem:[%s9865_s3 + $0x2ec] sm:$0xf0] }
  0xf8   :  { %2161 = vmatpush.bf16.msrb.mxu0 %v4916_v25  ;;  %v4824_v23 = vor.u32 %v6311_v11, %v4821_v13  ;;  %v6257_v25 = vld [vmem:[%s9862_s1 + $0x404] sm:$0xf]  ;;  %v5109_v11 = vld [vmem:[%s9862_s1 + $0x808] sm:$0xf0] }
  0xf9   :  { %2174 = vmatpush.bf16.msrb.mxu1 %v5108_v28  ;;  %v6305_v28 = vld [vmem:[%s9862_s1 + $0x584] sm:$0xf]  ;;  %v4608_v36 = vor.u32 %v6257_v25, %v4605_v27  ;;  %v5112_v25 = vor.u32 %v6383_v10, %v5109_v11  ;;  %v4701_v27 = vld [vmem:[%s9862_s1 + $0x4d8] sm:$0xf0]  ;;  %v5315_v10 = vld [vmem:[%s9865_s3 + $0xa0] sm:$0xf] }
  0xfa   :  { %2187 = vmatpush.bf16.msrb.mxu2 %v4152_v29  ;;  %v5208_v29 = vor.u32 %v6407_v16, %v5205_v17  ;;  %v4800_v37 = vor.u32 %v6305_v28, %v4797_v30  ;;  %v6329_v28 = vld [vmem:[%s9862_s1 + $0x644] sm:$0xf]  ;;  %v6439_v11 = vld [vmem:[%s9865_s3 + $0xac] sm:$0xf0] }
  0xfb   :  { %2200 = vmatpush.bf16.msrb.mxu3 %v4344_v34  ;;  %v5181_v34 = vld [vmem:[%s9862_s1 + $0x898] sm:$0xf0]  ;;  %v6377_v30 = vld [vmem:[%s9862_s1 + $0x7c4] sm:$0xf] }
  0xfc   :  { %2162 = vmatpush.bf16.msrb.mxu0 %v4892_v43  ;;  %v5184_v43 = vor.u32 %v6401_v33, %v5181_v34  ;;  %v6227_v33 = vld [vmem:[%s9862_s1 + $0x314] sm:$0xf]  ;;  %v4485_v34 = vld [vmem:[%s9862_s1 + $0x328] sm:$0xf0] }
  0xfd   :  { %2175 = vmatpush.bf16.msrb.mxu1 %v5084_v46  ;;  %v6395_v46 = vld [vmem:[%s9862_s1 + $0x854] sm:$0xf] }
  0xfe   :  { %2188 = vmatpush.bf16.msrb.mxu2 %v4128_v47  ;;  %v5157_v47 = vld [vmem:[%s9862_s1 + $0x868] sm:$0xf0] }
  0xff   :  { %2201 = vmatpush.bf16.msrb.mxu3 %v4320_v52  ;;  %v4968_v52 = vor.u32 %v6347_v44, %v4965_v45  ;;  %v5160_v56 = vor.u32 %v6395_v46, %v5157_v47  ;;  %v6371_v44 = vld [vmem:[%s9862_s1 + $0x794] sm:$0xf]  ;;  %v5061_v45 = vld [vmem:[%s9862_s1 + $0x7a8] sm:$0xf0]  ;;  %v5347_v47 = vld [vmem:[%s9865_s3 + $0xe0] sm:$0xf] }
 0x100   :  { %2163 = vmatpush.bf16.msrb.mxu0 %v4868_v60  ;;  %v8401_v48 = vpop.f32.mrf.mxu0  ;;  %v6389_v60 = vld [vmem:[%s9862_s1 + $0x824] sm:$0xf] }
 0x101   :  { %2176 = vmatpush.bf16.msrb.mxu1 %v5060_v0  ;;  %v8403_v50 = vpop.f32.mrf.mxu1  ;;  %v4944_v0 = vor.u32 %v6341_v58, %v4941_v59  ;;  %v5064_v59 = vor.u32 %v6371_v44, %v5061_v45  ;;  %v5683_v44 = vld [vmem:[%s9865_s3 + $0x380] sm:$0xf]  ;;  %v6531_v45 = vld [vmem:[%s9865_s3 + $0x38c] sm:$0xf0] }
 0x102   :  { %2189 = vmatpush.bf16.msrb.mxu2 %v4104_v1  ;;  %v6239_v1 = vld [vmem:[%s9862_s1 + $0x374] sm:$0xf] }
 0x103   :  { %2202 = vmatpush.bf16.msrb.mxu3 %v4296_v3  ;;  %2164 = vmatmul.bf16.vlgmr.msrb.gmra.mxu0 %v7146_v35  ;;  %v5136_v3 = vor.u32 %v6389_v60, %v5133_v61  ;;  %v4536_v14 = vor.u32 %v6239_v1, %v4533_v2  ;;  %v5331_v61 = vld [vmem:[%s9865_s3 + $0xc0] sm:$0xf]  ;;  %v6543_v2 = vld [vmem:[%s9865_s3 + $0x3ec] sm:$0xf0] }
 0x104   :  { %2208 = vmatpush.bf16.msra.mxu0 %v4656_v4  ;;  %2177 = vmatmul.bf16.vlgmr.msrb.gmra.mxu1 %v7154_v38  ;;  %v4725_v4 = vld [vmem:[%s9862_s1 + $0x508] sm:$0xf0]  ;;  %v5459_v1 = vld [vmem:[%s9865_s3 + $0x1c0] sm:$0xf] }
 0x105   :  { %2221 = vmatpush.bf16.msra.mxu1 %v4848_v6  ;;  %2190 = vmatmul.bf16.vlgmr.msrb.gmra.mxu2 %v6995_v19  ;;  %v6251_v19 = vld [vmem:[%s9862_s1 + $0x3d4] sm:$0xf]  ;;  %v4728_v16 = vor.u32 %v6287_v39, %v4725_v4  ;;  %v6475_v39 = vld [vmem:[%s9865_s3 + $0x1cc] sm:$0xf0] }
 0x106   :  { %2234 = vmatpush.bf16.msra.mxu2 %v5040_v8  ;;  %2203 = vmatmul.bf16.vlgmr.msrb.gmra.mxu3 %v6999_v22  ;;  %v4773_v22 = vld [vmem:[%s9862_s1 + $0x568] sm:$0xf0]  ;;  %v4584_v49 = vor.u32 %v6251_v19, %v4581_v41  ;;  %v6335_v6 = vld [vmem:[%s9862_s1 + $0x674] sm:$0xf]  ;;  %v6507_v4 = vld [vmem:[%s9865_s3 + $0x2cc] sm:$0xf0] }
 0x107   :  { %2247 = vmatpush.bf16.msra.mxu3 %v5232_v12  ;;  %v4776_v51 = vor.u32 %v6299_v42, %v4773_v22  ;;  %v4917_v8 = vld [vmem:[%s9862_s1 + $0x688] sm:$0xf0]  ;;  %v6323_v41 = vld [vmem:[%s9862_s1 + $0x614] sm:$0xf]  ;;  %v321_v42 = vperm.slane %v7817_v7, 2 }
 0x108   :  { %2209 = vmatpush.bf16.msra.mxu0 %v4632_v21  ;;  %v8447_v9 = vpop.f32.mrf.mxu2  ;;  %v1959_v12 = vpop.f32.mrf.mxu0  ;;  %v4920_v17 = vor.u32 %v6335_v6, %v4917_v8  ;;  %v6233_v21 = vld [vmem:[%s9862_s1 + $0x344] sm:$0xf]  ;;  %v4677_v19 = vld [vmem:[%s9862_s1 + $0x4a8] sm:$0xf0]  ;;  %v6447_v7 = vld [vmem:[%s9865_s3 + $0xec] sm:$0xf0] }
 0x109   :  { %2222 = vmatpush.bf16.msra.mxu1 %v4824_v23  ;;  %v8455_v13 = vpop.f32.mrf.mxu3  ;;  %v1972_v15 = vpop.f32.mrf.mxu1  ;;  %v4509_v23 = vld [vmem:[%s9862_s1 + $0x358] sm:$0xf0]  ;;  %v4869_v22 = vld [vmem:[%s9862_s1 + $0x628] sm:$0xf0]  ;;  %v1958_v58 = vadd.f32 %v8401_v48, %v321_v42  ;;  %v5348_v60 = vor.u32 %v6447_v7, %v5347_v47  ;;  %v5731_v48 = vld [vmem:[%s9865_s3 + $0x3e0] sm:$0xf] }
 0x10a   :  { %2235 = vmatpush.bf16.msra.mxu2 %v5016_v24  ;;  %v6281_v24 = vld [vmem:[%s9862_s1 + $0x4c4] sm:$0xf]  ;;  %v4512_v32 = vor.u32 %v6233_v21, %v4509_v23  ;;  %v4872_v57 = vor.u32 %v6323_v41, %v4869_v22  ;;  %v5732_v12 = vor.u32 %v6543_v2, %v5731_v48  ;;  %v6471_v21 = vld [vmem:[%s9865_s3 + $0x1ac] sm:$0xf0]  ;;  %v5571_v23 = vld [vmem:[%s9865_s3 + $0x2a0] sm:$0xf] }
 0x10b   :  { %2248 = vmatpush.bf16.msra.mxu3 %v5208_v29  ;;  %v4893_v29 = vld [vmem:[%s9862_s1 + $0x658] sm:$0xf0]  ;;  %v1971_v6 = vadd.f32 %v8403_v50, %v1958_v58  ;;  %v5443_v50 = vld [vmem:[%s9865_s3 + $0x1a0] sm:$0xf]  ;;  %v6495_v7 = vld [vmem:[%s9865_s3 + $0x26c] sm:$0xf0] }
 0x10c   :  { %2210 = vmatpush.bf16.msra.mxu0 %v4608_v36  ;;  %v6275_v36 = vld [vmem:[%s9862_s1 + $0x494] sm:$0xf]  ;;  %v5539_v47 = vld [vmem:[%s9865_s3 + $0x260] sm:$0xf] }
 0x10d   :  { %2223 = vmatpush.bf16.msra.mxu1 %v4800_v37  ;;  %v4704_v37 = vor.u32 %v6281_v24, %v4701_v27  ;;  %v6503_v24 = vld [vmem:[%s9865_s3 + $0x2ac] sm:$0xf0]  ;;  %v5667_v58 = vld [vmem:[%s9865_s3 + $0x360] sm:$0xf] }
 0x10e   :  { %2236 = vmatpush.bf16.msra.mxu2 %v4992_v40  ;;  %v4896_v40 = vor.u32 %v6329_v28, %v4893_v29  ;;  %v6435_v27 = vld [vmem:[%s9865_s3 + $0x8c] sm:$0xf0]  ;;  %v5444_v29 = vor.u32 %v6471_v21, %v5443_v50  ;;  %v5507_v50 = vld [vmem:[%s9865_s3 + $0x220] sm:$0xf] }
 0x10f   :  { %2249 = vmatpush.bf16.msra.mxu3 %v5184_v43  ;;  %v5088_v43 = vor.u32 %v6377_v30, %v5085_v31  ;;  %v6535_v30 = vld [vmem:[%s9865_s3 + $0x3ac] sm:$0xf0]  ;;  %v5235_v21 = vld [vmem:[%s9865_s3] sm:$0xf] }
 0x110   :  { %2211 = vmatpush.bf16.msra.mxu0 %v4584_v49  ;;  %v1985_v46 = vpop.f32.mrf.mxu2  ;;  %v5475_v49 = vld [vmem:[%s9865_s3 + $0x1e0] sm:$0xf]  ;;  %v6467_v31 = vld [vmem:[%s9865_s3 + $0x18c] sm:$0xf0] }
 0x111   :  { %2224 = vmatpush.bf16.msra.mxu1 %v4776_v51  ;;  %v1998_v51 = vpop.f32.mrf.mxu3  ;;  %v6463_v46 = vld [vmem:[%s9865_s3 + $0x16c] sm:$0xf0] }
 0x112   :  { %2237 = vmatpush.bf16.msra.mxu2 %v4968_v52  ;;  %v4488_v52 = vor.u32 %v6227_v33, %v4485_v34  ;;  %v6499_v33 = vld [vmem:[%s9865_s3 + $0x28c] sm:$0xf0] }
 0x113   :  { %2250 = vmatpush.bf16.msra.mxu3 %v5160_v56  ;;  %v4680_v56 = vor.u32 %v6275_v36, %v4677_v19  ;;  %v6431_v19 = vld [vmem:[%s9865_s3 + $0x6c] sm:$0xf0] }
 0x114   :  { %2212 = vmatpush.bf16.msra.mxu0 %v4560_v62  ;;  %v6443_v62 = vld [vmem:[%s9865_s3 + $0xcc] sm:$0xf0] }
 0x115   :  { %2225 = vmatpush.bf16.msra.mxu1 %v4752_v63  ;;  %v5476_v63 = vor.u32 %v6479_v53, %v5475_v49  ;;  %v5332_v8 = vor.u32 %v6443_v62, %v5331_v61  ;;  %v6427_v53 = vld [vmem:[%s9865_s3 + $0x4c] sm:$0xf0]  ;;  %v5523_v61 = vld [vmem:[%s9865_s3 + $0x240] sm:$0xf] }
 0x116   :  { %2238 = vmatpush.bf16.msra.mxu2 %v4944_v0  ;;  %v5604_v0 = vor.u32 %v6511_v55, %v5603_v54  ;;  %v5684_v54 = vor.u32 %v6531_v45, %v5683_v44  ;;  %v6491_v62 = vld [vmem:[%s9865_s3 + $0x24c] sm:$0xf0] }
 0x117   :  { %2251 = vmatpush.bf16.msra.mxu3 %v5136_v3  ;;  %v5587_v3 = vld [vmem:[%s9865_s3 + $0x2c0] sm:$0xf]  ;;  %v6515_v44 = vld [vmem:[%s9865_s3 + $0x30c] sm:$0xf0] }
 0x118   :  { %2213 = vmatpush.bf16.msra.mxu0 %v4536_v14  ;;  %v5460_v14 = vor.u32 %v6475_v39, %v5459_v1  ;;  %v5588_v15 = vor.u32 %v6507_v4, %v5587_v3  ;;  %v5251_v39 = vld [vmem:[%s9865_s3 + $0x20] sm:$0xf]  ;;  %v6423_v3 = vld [vmem:[%s9865_s3 + $0x2c] sm:$0xf0] }
 0x119   :  { %2226 = vmatpush.bf16.msra.mxu1 %v4728_v16  ;;  %v5715_v16 = vld [vmem:[%s9865_s3 + $0x3c0] sm:$0xf] }
 0x11a   :  { %2239 = vmatpush.bf16.msra.mxu2 %v4920_v17  ;;  %v6539_v17 = vld [vmem:[%s9865_s3 + $0x3cc] sm:$0xf0] }
 0x11b   :  { %2252 = vmatpush.bf16.msra.mxu3 %v5112_v25  ;;  %v5299_v25 = vld [vmem:[%s9865_s3 + $0x80] sm:$0xf]  ;;  %v5716_v28 = vor.u32 %v6539_v17, %v5715_v16  ;;  %v6487_v16 = vld [vmem:[%s9865_s3 + $0x22c] sm:$0xf0]  ;;  %v5252_v17 = vor.u32 %v6423_v3, %v5251_v39  ;;  %v6433_v3 = vld [vmem:[%s9865_s3 + $0x84] sm:$0xf] }
 0x11c   :  { %2214 = vmatpush.bf16.msra.mxu0 %v4512_v32  ;;  %v5555_v32 = vld [vmem:[%s9865_s3 + $0x280] sm:$0xf] }
 0x11d   :  { %2227 = vmatpush.bf16.msra.mxu1 %v4704_v37  ;;  %v5300_v37 = vor.u32 %v6435_v27, %v5299_v25  ;;  %v5556_v22 = vor.u32 %v6499_v33, %v5555_v32  ;;  %v6451_v25 = vld [vmem:[%s9865_s3 + $0x10c] sm:$0xf0]  ;;  %v5635_v27 = vld [vmem:[%s9865_s3 + $0x320] sm:$0xf] }
 0x11e   :  { %2240 = vmatpush.bf16.msra.mxu2 %v4896_v40  ;;  %v5283_v40 = vld [vmem:[%s9865_s3 + $0x60] sm:$0xf]  ;;  %v6575_v32 = vld [vmem:[%s9865_s3 + $0x4ec] sm:$0xf0] }
 0x11f   :  { %2253 = vmatpush.bf16.msra.mxu3 %v5088_v43  ;;  %v5284_v51 = vor.u32 %v6431_v19, %v5283_v40  ;;  %v8721_v19 = vld [vmem:[%s9864_s2] sm:$0x3f] }
 0x120   :  { %2215 = vmatpush.bf16.msra.mxu0 %v4488_v52  ;;  %v2009_v36 = vpop.f32.mrf.mxu0  ;;  %v5267_v52 = vld [vmem:[%s9865_s3 + $0x40] sm:$0xf] }
 0x121   :  { %2228 = vmatpush.bf16.msra.mxu1 %v4680_v56  ;;  %v2022_v41 = vpop.f32.mrf.mxu1  ;;  %v5540_v56 = vor.u32 %v6495_v7, %v5539_v47  ;;  %v5268_v2 = vor.u32 %v6427_v53, %v5267_v52  ;;  %v5333_v47 = vld [vmem:[%s9865_s3 + $0xd0] sm:$0xf0]  ;;  %v6477_v7 = vld [vmem:[%s9865_s3 + $0x1e4] sm:$0xf]  ;;  %v5843_v52 = vld [vmem:[%s9865_s3 + $0x4c0] sm:$0xf] }
 0x122   :  { %2241 = vmatpush.bf16.msra.mxu2 %v4872_v57  ;;  %v5395_v57 = vld [vmem:[%s9865_s3 + $0x140] sm:$0xf]  ;;  %v6571_v53 = vld [vmem:[%s9865_s3 + $0x4cc] sm:$0xf0] }
 0x123   :  { %2254 = vmatpush.bf16.msra.mxu3 %v5064_v59  ;;  %2216 = vmatmul.bf16.vlgmr.msra.gmra.mxu0 %v6993_v18  ;;  %v1984_v18 = vadd.f32 %v8447_v9, %v1971_v6  ;;  %v5699_v9 = vld [vmem:[%s9865_s3 + $0x3a0] sm:$0xf]  ;;  %v6527_v59 = vld [vmem:[%s9865_s3 + $0x36c] sm:$0xf0] }
 0x124   :  { %3434 = vmatpush.bf16.msrb.mxu0 %v5348_v60  ;;  %2229 = vmatmul.bf16.vlgmr.msra.gmra.mxu1 %v6997_v20  ;;  %v5316_v20 = vor.u32 %v6439_v11, %v5315_v10  ;;  %v5700_v42 = vor.u32 %v6535_v30, %v5699_v9  ;;  %v6459_v60 = vld [vmem:[%s9865_s3 + $0x14c] sm:$0xf0]  ;;  %v5668_v4 = vor.u32 %v6527_v59, %v5667_v58  ;;  %v5379_v11 = vld [vmem:[%s9865_s3 + $0x120] sm:$0xf]  ;;  %v5349_v9 = vld [vmem:[%s9865_s3 + $0xf0] sm:$0xf0] }
 0x125   :  { %3447 = vmatpush.bf16.msrb.mxu1 %v5476_v63  ;;  %2242 = vmatmul.bf16.vlgmr.msra.gmra.mxu2 %v7146_v35  ;;  %v5572_v35 = vor.u32 %v6503_v24, %v5571_v23  ;;  %v1997_v34 = vadd.f32 %v8455_v13, %v1984_v18  ;;  %v5411_v13 = vld [vmem:[%s9865_s3 + $0x160] sm:$0xf]  ;;  %v5524_v10 = vor.u32 %v6491_v62, %v5523_v61  ;;  %v6419_v23 = vld [vmem:[%s9865_s3 + $0xc] sm:$0xf0]  ;;  %v6437_v58 = vld [vmem:[%s9865_s3 + $0xa4] sm:$0xf] }
 0x126   :  { %3460 = vmatpush.bf16.msrb.mxu2 %v5604_v0  ;;  %2255 = vmatmul.bf16.vlgmr.msra.gmra.mxu3 %v7154_v38  ;;  %v5427_v38 = vld [vmem:[%s9865_s3 + $0x180] sm:$0xf]  ;;  %v5412_v55 = vor.u32 %v6463_v46, %v5411_v13  ;;  %v5236_v33 = vor.u32 %v6419_v23, %v5235_v21  ;;  %v5317_v61 = vld [vmem:[%s9865_s3 + $0xb0] sm:$0xf0]  ;;  %v6473_v62 = vld [vmem:[%s9865_s3 + $0x1c4] sm:$0xf] }
 0x127   :  { %3473 = vmatpush.bf16.msrb.mxu3 %v5732_v12  ;;  %v5428_v43 = vor.u32 %v6467_v31, %v5427_v38  ;;  %v2010_v49 = vadd.f32 %v2009_v36, %v1997_v34  ;;  %v5651_v12 = vld [vmem:[%s9865_s3 + $0x340] sm:$0xf]  ;;  %v5320_v39 = vor.u32 %v6437_v58, %v5317_v61  ;;  %v6573_v58 = vld [vmem:[%s9865_s3 + $0x4e4] sm:$0xf] }
 0x128   :  { %3435 = vmatpush.bf16.msrb.mxu0 %v5332_v8  ;;  %v8652_v63 = vpop.f32.mrf.mxu2  ;;  %v2011_v48 = vpop.f32.mrf.mxu0  ;;  %v5396_v8 = vor.u32 %v6459_v60, %v5395_v57  ;;  %v5363_v24 = vld [vmem:[%s9865_s3 + $0x100] sm:$0xf] }
 0x129   :  { %3448 = vmatpush.bf16.msrb.mxu1 %v5460_v14  ;;  %v2023_v0 = vadd.f32 %v2022_v41, %v2010_v49  ;;  %v8654_v1 = vpop.f32.mrf.mxu3  ;;  %v2024_v6 = vpop.f32.mrf.mxu1  ;;  %v6523_v14 = vld [vmem:[%s9865_s3 + $0x34c] sm:$0xf0]  ;;  %v5859_v31 = vld [vmem:[%s9865_s3 + $0x4e0] sm:$0xf]  ;;  %v322_v41 = vperm.slane %v8721_v19, 3  ;;  %v5844_v48 = vor.u32 %v6571_v53, %v5843_v52 }
 0x12a   :  { %3461 = vmatpush.bf16.msrb.mxu2 %v5588_v15  ;;  %v6455_v15 = vld [vmem:[%s9865_s3 + $0x12c] sm:$0xf0]  ;;  %v5652_v18 = vor.u32 %v6523_v14, %v5651_v12  ;;  %v5619_v13 = vld [vmem:[%s9865_s3 + $0x300] sm:$0xf]  ;;  %v5860_v45 = vor.u32 %v6575_v32, %v5859_v31  ;;  %v5477_v49 = vld [vmem:[%s9865_s3 + $0x1f0] sm:$0xf0] }
 0x12b   :  { %3474 = vmatpush.bf16.msrb.mxu3 %v5716_v28  ;;  %6642 = vtanh.f32 %v2023_v0  ;;  %v6519_v28 = vld [vmem:[%s9865_s3 + $0x32c] sm:$0xf0]  ;;  %v5480_v59 = vor.u32 %v6477_v7, %v5477_v49  ;;  %v2036_v60 = vadd.f32 %v8652_v63, %v322_v41  ;;  %v5461_v0 = vld [vmem:[%s9865_s3 + $0x1d0] sm:$0xf0]  ;;  %v5827_v63 = vld [vmem:[%s9865_s3 + $0x4a0] sm:$0xf] }
 0x12c   :  { %3436 = vmatpush.bf16.msrb.mxu0 %v5316_v20  ;;  %6644 = vtanh.f32 %v8019_v5  ;;  %v5380_v5 = vor.u32 %v6455_v15, %v5379_v11  ;;  %v5508_v20 = vor.u32 %v6487_v16, %v5507_v50  ;;  %v5636_v34 = vor.u32 %v6519_v28, %v5635_v27  ;;  %v5445_v11 = vld [vmem:[%s9865_s3 + $0x1b0] sm:$0xf0]  ;;  %v5811_v14 = vld [vmem:[%s9865_s3 + $0x480] sm:$0xf]  ;;  %v6429_v16 = vld [vmem:[%s9865_s3 + $0x64] sm:$0xf] }
 0x12d   :  { %3449 = vmatpush.bf16.msrb.mxu1 %v5444_v29  ;;  %6646 = vtanh.f32 %v8251_v26  ;;  %v5491_v26 = vld [vmem:[%s9865_s3 + $0x200] sm:$0xf]  ;;  %v6483_v29 = vld [vmem:[%s9865_s3 + $0x20c] sm:$0xf0]  ;;  %v2049_v6 = vadd.f32 %v8654_v1, %v2036_v60  ;;  %v5413_v31 = vld [vmem:[%s9865_s3 + $0x170] sm:$0xf0] }
 0x12e   :  { %3462 = vmatpush.bf16.msrb.mxu2 %v5572_v35  ;;  %v6445_v35 = vld [vmem:[%s9865_s3 + $0xe4] sm:$0xf]  ;;  %v5492_v40 = vor.u32 %v6483_v29, %v5491_v26  ;;  %v6563_v1 = vld [vmem:[%s9865_s3 + $0x48c] sm:$0xf0]  ;;  %v5763_v7 = vld [vmem:[%s9865_s3 + $0x420] sm:$0xf] }
 0x12f   :  { %3475 = vmatpush.bf16.msrb.mxu3 %v5700_v42  ;;  %v6559_v27 = vld [vmem:[%s9865_s3 + $0x46c] sm:$0xf0]  ;;  %v6425_v29 = vld [vmem:[%s9865_s3 + $0x44] sm:$0xf]  ;;  %v5381_v60 = vld [vmem:[%s9865_s3 + $0x130] sm:$0xf0] }
 0x130   :  { %3437 = vmatpush.bf16.msrb.mxu0 %v5300_v37  ;;  %v2037_v38 = vpop.f32.mrf.mxu2  ;;  %v5364_v37 = vor.u32 %v6451_v25, %v5363_v24  ;;  %v5285_v24 = vld [vmem:[%s9865_s3 + $0x70] sm:$0xf0]  ;;  %v5795_v25 = vld [vmem:[%s9865_s3 + $0x460] sm:$0xf]  ;;  %v6551_v49 = vld [vmem:[%s9865_s3 + $0x42c] sm:$0xf0] }
 0x131   :  { %3450 = vmatpush.bf16.msrb.mxu1 %v5428_v43  ;;  %v2050_v30 = vpop.f32.mrf.mxu3  ;;  %v6643_v36 = vpop.eup %6642  ;;  %v5352_v43 = vor.u32 %v6445_v35, %v5349_v9  ;;  %v5288_v26 = vor.u32 %v6429_v16, %v5285_v24  ;;  %v5269_v9 = vld [vmem:[%s9865_s3 + $0x50] sm:$0xf0]  ;;  %v5796_v32 = vor.u32 %v6559_v27, %v5795_v25  ;;  %v6417_v53 = vld [vmem:[%s9865_s3 + $0x4] sm:$0xf]  ;;  %v6607_v16 = vld [vmem:[%s9865_s3 + $0x5ec] sm:$0xf0] }
 0x132   :  { %3463 = vmatpush.bf16.msrb.mxu2 %v5556_v22  ;;  %v6645_v42 = vpop.eup %6644  ;;  %v6441_v22 = vld [vmem:[%s9865_s3 + $0xc4] sm:$0xf]  ;;  %v5272_v41 = vor.u32 %v6425_v29, %v5269_v9  ;;  %v5971_v29 = vld [vmem:[%s9865_s3 + $0x5c0] sm:$0xf] }
 0x133   :  { %3476 = vmatpush.bf16.msrb.mxu3 %v5684_v54  ;;  %v6647_v46 = vpop.eup %6646  ;;  %v8750_v54 = vpack.c.bf16 %v6645_v42, %v6645_v42  ;;  %v5336_v57 = vor.u32 %v6441_v22, %v5333_v47  ;;  %v6461_v30 = vld [vmem:[%s9865_s3 + $0x164] sm:$0xf] }
 0x134   :  { %3438 = vmatpush.bf16.msrb.mxu0 %v5284_v51  ;;  %v8742_v51 = vpack.c.bf16 %v6643_v36, %v6643_v36  ;;  %v5779_v36 = vld [vmem:[%s9865_s3 + $0x440] sm:$0xf]  ;;  %v6421_v42 = vld [vmem:[%s9865_s3 + $0x24] sm:$0xf] }
 0x135   :  { %3451 = vmatpush.bf16.msrb.mxu1 %v5412_v55  ;;  %v5620_v55 = vor.u32 %v6515_v44, %v5619_v13  ;;  %v5253_v13 = vld [vmem:[%s9865_s3 + $0x30] sm:$0xf0]  ;;  %v6457_v44 = vld [vmem:[%s9865_s3 + $0x144] sm:$0xf] }
 0x136   :  { %3464 = vmatpush.bf16.msrb.mxu2 %v5540_v56  ;;  %v8752_v56 = vpack.c.bf16 %v6647_v46, %v6647_v46  ;;  %v5256_v52 = vor.u32 %v6421_v42, %v5253_v13  ;;  %v6605_v24 = vld [vmem:[%s9865_s3 + $0x5e4] sm:$0xf]  ;;  %v6599_v42 = vld [vmem:[%s9865_s3 + $0x5ac] sm:$0xf0] }
 0x137   :  { %3477 = vmatpush.bf16.msrb.mxu3 %v5668_v4  ;;  %v5464_v4 = vor.u32 %v6473_v62, %v5461_v0  ;;  %v5764_v62 = vor.u32 %v6551_v49, %v5763_v7  ;;  %v5861_v0 = vld [vmem:[%s9865_s3 + $0x4f0] sm:$0xf0]  ;;  %v6557_v49 = vld [vmem:[%s9865_s3 + $0x464] sm:$0xf] }
 0x138   :  { %3439 = vmatpush.bf16.msrb.mxu0 %v5268_v2  ;;  %v6567_v2 = vld [vmem:[%s9865_s3 + $0x4ac] sm:$0xf0] }
 0x139   :  { %3452 = vmatpush.bf16.msrb.mxu1 %v5396_v8  ;;  %v5301_v8 = vld [vmem:[%s9865_s3 + $0x90] sm:$0xf0]  ;;  %v5828_v12 = vor.u32 %v6567_v2, %v5827_v63  ;;  %v5747_v63 = vld [vmem:[%s9865_s3 + $0x400] sm:$0xf]  ;;  %v6547_v2 = vld [vmem:[%s9865_s3 + $0x40c] sm:$0xf0] }
 0x13a   :  { %3465 = vmatpush.bf16.msrb.mxu2 %v5524_v10  ;;  %v6469_v10 = vld [vmem:[%s9865_s3 + $0x1a4] sm:$0xf]  ;;  %v5304_v15 = vor.u32 %v6433_v3, %v5301_v8  ;;  %v5605_v3 = vld [vmem:[%s9865_s3 + $0x2f0] sm:$0xf0] }
 0x13b   :  { %3478 = vmatpush.bf16.msrb.mxu3 %v5652_v18  ;;  %v6465_v18 = vld [vmem:[%s9865_s3 + $0x184] sm:$0xf] }
 0x13c   :  { %3440 = vmatpush.bf16.msrb.mxu0 %v5252_v17  ;;  %v5448_v17 = vor.u32 %v6469_v10, %v5445_v11  ;;  %v6569_v8 = vld [vmem:[%s9865_s3 + $0x4c4] sm:$0xf] }
 0x13d   :  { %3453 = vmatpush.bf16.msrb.mxu1 %v5380_v5  ;;  %v5429_v5 = vld [vmem:[%s9865_s3 + $0x190] sm:$0xf0]  ;;  %v6449_v11 = vld [vmem:[%s9865_s3 + $0x104] sm:$0xf] }
 0x13e   :  { %3466 = vmatpush.bf16.msrb.mxu2 %v5508_v20  ;;  %v5812_v20 = vor.u32 %v6563_v1, %v5811_v14  ;;  %v5432_v35 = vor.u32 %v6465_v18, %v5429_v5  ;;  %v5864_v14 = vor.u32 %v6573_v58, %v5861_v0  ;;  %v5365_v1 = vld [vmem:[%s9865_s3 + $0x110] sm:$0xf0]  ;;  %v6505_v5 = vld [vmem:[%s9865_s3 + $0x2c4] sm:$0xf] }
 0x13f   :  { %3479 = vmatpush.bf16.msrb.mxu3 %v5636_v34  ;;  %v5989_v18 = vld [vmem:[%s9865_s3 + $0x5f0] sm:$0xf0]  ;;  %v5368_v25 = vor.u32 %v6449_v11, %v5365_v1 }
 0x140   :  { %3441 = vmatpush.bf16.msrb.mxu0 %v5236_v33  ;;  %v2061_v50 = vpop.f32.mrf.mxu0  ;;  %v5797_v58 = vld [vmem:[%s9865_s3 + $0x470] sm:$0xf0] }
 0x141   :  { %3454 = vmatpush.bf16.msrb.mxu1 %v5364_v37  ;;  %v2062_v21 = vadd.f32 %v2061_v50, %v2049_v6  ;;  %v2074_v23 = vpop.f32.mrf.mxu1  ;;  %v6555_v37 = vld [vmem:[%s9865_s3 + $0x44c] sm:$0xf0]  ;;  %v5987_v50 = vld [vmem:[%s9865_s3 + $0x5e0] sm:$0xf]  ;;  %v5941_v0 = vld [vmem:[%s9865_s3 + $0x590] sm:$0xf0] }
 0x142   :  { %3467 = vmatpush.bf16.msrb.mxu2 %v5492_v40  ;;  %v5780_v47 = vor.u32 %v6555_v37, %v5779_v36  ;;  %v6561_v37 = vld [vmem:[%s9865_s3 + $0x484] sm:$0xf]  ;;  %v5925_v1 = vld [vmem:[%s9865_s3 + $0x570] sm:$0xf0] }
 0x143   :  { %3442 = vmatmul.bf16.vlgmr.msrb.gmra.mxu0 %v8750_v54  ;;  %3480 = vmatpush.bf16.msrb.mxu3 %v5620_v55  ;;  %v2075_v28 = vadd.f32 %v2074_v23, %v2062_v21  ;;  %v5237_v55 = vld [vmem:[%s9865_s3 + $0x10] sm:$0xf0]  ;;  %v5988_v23 = vor.u32 %v6607_v16, %v5987_v50 }
 0x144   :  { %3486 = vmatpush.bf16.msra.mxu0 %v5860_v45  ;;  %3455 = vmatmul.bf16.vlgmr.msrb.gmra.mxu1 %v8752_v56  ;;  %v5397_v45 = vld [vmem:[%s9865_s3 + $0x150] sm:$0xf0]  ;;  %v5240_v6 = vor.u32 %v6417_v53, %v5237_v55  ;;  %v5939_v55 = vld [vmem:[%s9865_s3 + $0x580] sm:$0xf] }
 0x145   :  { %3468 = vmatmul.bf16.vlgmr.msrb.gmra.mxu2 %v8742_v51  ;;  %3499 = vmatpush.bf16.msra.mxu1 %v5988_v23  ;;  %v5525_v50 = vld [vmem:[%s9865_s3 + $0x250] sm:$0xf0] }
 0x146   :  { %3512 = vmatpush.bf16.msra.mxu2 %v5352_v43  ;;  %v5416_v43 = vor.u32 %v6461_v30, %v5413_v31  ;;  %v6601_v31 = vld [vmem:[%s9865_s3 + $0x5c4] sm:$0xf] }
 0x147   :  { %3525 = vmatpush.bf16.msra.mxu3 %v5480_v59  ;;  %v6453_v59 = vld [vmem:[%s9865_s3 + $0x124] sm:$0xf] }
 0x148   :  { %3487 = vmatpush.bf16.msra.mxu0 %v5844_v48  ;;  %v2087_v38 = vpop.f32.mrf.mxu2  ;;  %v2063_v22 = vpop.f32.mrf.mxu0  ;;  %v5384_v10 = vor.u32 %v6453_v59, %v5381_v60 }
 0x149   :  { %v2088_v33 = vadd.f32 %v2087_v38, %v2075_v28  ;;  %v2100_v34 = vpop.f32.mrf.mxu3  ;;  %v2076_v46 = vpop.f32.mrf.mxu1  ;;  %v6565_v28 = vld [vmem:[%s9865_s3 + $0x4a4] sm:$0xf]  ;;  %v5829_v38 = vld [vmem:[%s9865_s3 + $0x4b0] sm:$0xf0] }
 0x14a   :  { %3513 = vmatpush.bf16.msra.mxu2 %v5336_v57  ;;  %v5400_v57 = vor.u32 %v6457_v44, %v5397_v45  ;;  %v5832_v36 = vor.u32 %v6565_v28, %v5829_v38  ;;  %v6597_v44 = vld [vmem:[%s9865_s3 + $0x5a4] sm:$0xf]  ;;  %v5957_v45 = vld [vmem:[%s9865_s3 + $0x5b0] sm:$0xf0] }
 0x14b   :  { %3526 = vmatpush.bf16.msra.mxu3 %v5464_v4  ;;  %v2101_v40 = vadd.f32 %v2100_v34, %v2088_v33  ;;  %v6501_v33 = vld [vmem:[%s9865_s3 + $0x2a4] sm:$0xf]  ;;  %v5573_v34 = vld [vmem:[%s9865_s3 + $0x2b0] sm:$0xf0]  ;;  %v5960_v53 = vor.u32 %v6597_v44, %v5957_v45 }
 0x14c   :  { %3488 = vmatpush.bf16.msra.mxu0 %v5828_v12  ;;  %v5576_v22 = vor.u32 %v6501_v33, %v5573_v34  ;;  %v6497_v46 = vld [vmem:[%s9865_s3 + $0x284] sm:$0xf]  ;;  %v5749_v33 = vld [vmem:[%s9865_s3 + $0x410] sm:$0xf0] }
 0x14d   :  { %6648 = vtanh.f32 %v2101_v40  ;;  %v6485_v38 = vld [vmem:[%s9865_s3 + $0x224] sm:$0xf]  ;;  %v5493_v45 = vld [vmem:[%s9865_s3 + $0x210] sm:$0xf0] }
 0x14e   :  { %3514 = vmatpush.bf16.msra.mxu2 %v5320_v39  ;;  %v6509_v39 = vld [vmem:[%s9865_s3 + $0x2e4] sm:$0xf] }
 0x14f   :  { %3527 = vmatpush.bf16.msra.mxu3 %v5448_v17  ;;  %v5845_v17 = vld [vmem:[%s9865_s3 + $0x4d0] sm:$0xf0]  ;;  %v5608_v21 = vor.u32 %v6509_v39, %v5605_v3  ;;  %v6553_v39 = vld [vmem:[%s9865_s3 + $0x444] sm:$0xf] }
 0x150   :  { %3489 = vmatpush.bf16.msra.mxu0 %v5812_v20  ;;  %v2089_v61 = vpop.f32.mrf.mxu2  ;;  %v5589_v20 = vld [vmem:[%s9865_s3 + $0x2d0] sm:$0xf0]  ;;  %v5848_v27 = vor.u32 %v6569_v8, %v5845_v17  ;;  %v6481_v44 = vld [vmem:[%s9865_s3 + $0x204] sm:$0xf] }
 0x151   :  { %v2102_v48 = vpop.f32.mrf.mxu3  ;;  %v5592_v9 = vor.u32 %v6505_v5, %v5589_v20  ;;  %v5781_v8 = vld [vmem:[%s9865_s3 + $0x450] sm:$0xf0]  ;;  %v5907_v5 = vld [vmem:[%s9865_s3 + $0x540] sm:$0xf]  ;;  %v6587_v20 = vld [vmem:[%s9865_s3 + $0x54c] sm:$0xf0] }
 0x152   :  { %3515 = vmatpush.bf16.msra.mxu2 %v5304_v15  ;;  %v5748_v15 = vor.u32 %v6547_v2, %v5747_v63  ;;  %v6493_v48 = vld [vmem:[%s9865_s3 + $0x264] sm:$0xf]  ;;  %v5541_v63 = vld [vmem:[%s9865_s3 + $0x270] sm:$0xf0]  ;;  %v5800_v2 = vor.u32 %v6557_v49, %v5797_v58  ;;  %v5784_v17 = vor.u32 %v6553_v39, %v5781_v8  ;;  %v5595_v49 = vld [vmem:[%s9865_s3 + $0x2c8] sm:$0xf] }
 0x153   :  { %3528 = vmatpush.bf16.msra.mxu3 %v5432_v35  ;;  %v6649_v4 = vpop.eup %6648  ;;  %v6603_v35 = vld [vmem:[%s9865_s3 + $0x5cc] sm:$0xf0]  ;;  %v5875_v58 = vld [vmem:[%s9865_s3 + $0x500] sm:$0xf]  ;;  %v5739_v39 = vld [vmem:[%s9865_s3 + $0x3e8] sm:$0xf] }
 0x154   :  { %3490 = vmatpush.bf16.msra.mxu0 %v5796_v32  ;;  %v8885_v12 = vpack.c.bf16 %v6649_v4, %v6649_v4  ;;  %v5972_v30 = vor.u32 %v6603_v35, %v5971_v29  ;;  %v5973_v32 = vld [vmem:[%s9865_s3 + $0x5d0] sm:$0xf0]  ;;  %v5923_v4 = vld [vmem:[%s9865_s3 + $0x560] sm:$0xf]  ;;  %v6585_v29 = vld [vmem:[%s9865_s3 + $0x544] sm:$0xf] }
 0x155   :  { %v5976_v40 = vor.u32 %v6601_v31, %v5973_v32  ;;  %v5909_v35 = vld [vmem:[%s9865_s3 + $0x550] sm:$0xf0]  ;;  %v6545_v31 = vld [vmem:[%s9865_s3 + $0x404] sm:$0xf] }
 0x156   :  { %3516 = vmatpush.bf16.msra.mxu2 %v5288_v26  ;;  %3481 = vmatmul.bf16.vlgmr.msrb.gmra.mxu3 %v8885_v12  ;;  %v5992_v26 = vor.u32 %v6605_v24, %v5989_v18  ;;  %v5912_v34 = vor.u32 %v6585_v29, %v5909_v35 }
 0x157   :  { %3529 = vmatpush.bf16.msra.mxu3 %v5416_v43  ;;  %v5813_v43 = vld [vmem:[%s9865_s3 + $0x490] sm:$0xf0]  ;;  %3500 = vmatpush.bf16.msra.mxu1 %v5972_v30  ;;  %v323_v30 = vperm.slane %v8721_v19, 4 }
 0x158   :  { %3491 = vmatpush.bf16.msra.mxu0 %v5780_v47  ;;  %v5557_v47 = vld [vmem:[%s9865_s3 + $0x290] sm:$0xf0]  ;;  %v5816_v7 = vor.u32 %v6561_v37, %v5813_v43  ;;  %v6583_v37 = vld [vmem:[%s9865_s3 + $0x52c] sm:$0xf0]  ;;  %v6581_v43 = vld [vmem:[%s9865_s3 + $0x524] sm:$0xf] }
 0x159   :  { %v5560_v60 = vor.u32 %v6497_v46, %v5557_v47 }
 0x15a   :  { %3517 = vmatpush.bf16.msra.mxu2 %v5272_v41  ;;  %v5955_v41 = vld [vmem:[%s9865_s3 + $0x5a0] sm:$0xf] }
 0x15b   :  { %3530 = vmatpush.bf16.msra.mxu3 %v5400_v57  ;;  %v5956_v13 = vor.u32 %v6599_v42, %v5955_v41  ;;  %v6595_v57 = vld [vmem:[%s9865_s3 + $0x58c] sm:$0xf0] }
 0x15c   :  { %3492 = vmatpush.bf16.msra.mxu0 %v5764_v62  ;;  %v5940_v61 = vor.u32 %v6595_v57, %v5939_v55  ;;  %v6593_v62 = vld [vmem:[%s9865_s3 + $0x584] sm:$0xf] }
 0x15d   :  { %3501 = vmatpush.bf16.msra.mxu1 %v5956_v13  ;;  %v5944_v3 = vor.u32 %v6593_v62, %v5941_v0  ;;  %v6512_v13 = vld [vmem:[%s9865_s3 + $0x2f4] sm:$0xf0]  ;;  %v6577_v62 = vld [vmem:[%s9865_s3 + $0x504] sm:$0xf]  ;;  %v5877_v0 = vld [vmem:[%s9865_s3 + $0x510] sm:$0xf0] }
 0x15e   :  { %3518 = vmatpush.bf16.msra.mxu2 %v5256_v52  ;;  %v5880_v8 = vor.u32 %v6577_v62, %v5877_v0  ;;  %v6488_v62 = vld [vmem:[%s9865_s3 + $0x234] sm:$0xf0]  ;;  %v5355_v0 = vld [vmem:[%s9865_s3 + $0xe8] sm:$0xf] }
 0x15f   :  { %3531 = vmatpush.bf16.msra.mxu3 %v5384_v10  ;;  %v5544_v10 = vor.u32 %v6493_v48, %v5541_v63  ;;  %v6541_v48 = vld [vmem:[%s9865_s3 + $0x3e4] sm:$0xf] }
 0x160   :  { %3493 = vmatpush.bf16.msra.mxu0 %v5748_v15  ;;  %v8964_v52 = vpop.f32.mrf.mxu0  ;;  %v6489_v15 = vld [vmem:[%s9865_s3 + $0x244] sm:$0xf] }
 0x161   :  { %v8975_v59 = vpop.f32.mrf.mxu1  ;;  %3502 = vmatpush.bf16.msra.mxu1 %v5940_v61  ;;  %v5528_v28 = vor.u32 %v6489_v15, %v5525_v50  ;;  %v2114_v46 = vadd.f32 %v8964_v52, %v323_v30  ;;  %v6579_v52 = vld [vmem:[%s9865_s3 + $0x50c] sm:$0xf0]  ;;  %v5496_v61 = vor.u32 %v6481_v44, %v5493_v45  ;;  %v6504_v15 = vld [vmem:[%s9865_s3 + $0x2b4] sm:$0xf0]  ;;  %v5723_v50 = vld [vmem:[%s9865_s3 + $0x3c8] sm:$0xf] }
 0x162   :  { %3519 = vmatpush.bf16.msra.mxu2 %v5240_v6  ;;  %v6591_v6 = vld [vmem:[%s9865_s3 + $0x56c] sm:$0xf0]  ;;  %v5876_v63 = vor.u32 %v6579_v52, %v5875_v58  ;;  %v6525_v44 = vld [vmem:[%s9865_s3 + $0x364] sm:$0xf]  ;;  %v5669_v45 = vld [vmem:[%s9865_s3 + $0x370] sm:$0xf0] }
 0x163   :  { %3532 = vmatpush.bf16.msra.mxu3 %v5368_v25  ;;  %v5924_v11 = vor.u32 %v6591_v6, %v5923_v4  ;;  %v5765_v25 = vld [vmem:[%s9865_s3 + $0x430] sm:$0xf0]  ;;  %v2127_v4 = vadd.f32 %v8975_v59, %v2114_v46  ;;  %v6492_v46 = vld [vmem:[%s9865_s3 + $0x254] sm:$0xf0]  ;;  %v6521_v52 = vld [vmem:[%s9865_s3 + $0x344] sm:$0xf] }
 0x164   :  { %3538 = vmatpush.bf16.msrb.mxu0 %v5608_v21  ;;  %v6549_v21 = vld [vmem:[%s9865_s3 + $0x424] sm:$0xf]  ;;  %v5717_v59 = vld [vmem:[%s9865_s3 + $0x3d0] sm:$0xf0] }
 0x165   :  { %3520 = vmatmul.bf16.vlgmr.msra.gmra.mxu2 %v8750_v54  ;;  %3503 = vmatpush.bf16.msra.mxu1 %v5924_v11  ;;  %v5768_v32 = vor.u32 %v6549_v21, %v5765_v25  ;;  %v5579_v11 = vld [vmem:[%s9865_s3 + $0x2a8] sm:$0xf]  ;;  %v6533_v25 = vld [vmem:[%s9865_s3 + $0x3a4] sm:$0xf] }
 0x166   :  { %3564 = vmatpush.bf16.msrb.mxu2 %v5864_v14  ;;  %v6589_v14 = vld [vmem:[%s9865_s3 + $0x564] sm:$0xf]  ;;  %3533 = vmatmul.bf16.vlgmr.msra.gmra.mxu3 %v8752_v56 }
 0x167   :  { %3577 = vmatpush.bf16.msrb.mxu3 %v5992_v26  ;;  %v5928_v18 = vor.u32 %v6589_v14, %v5925_v1  ;;  %v5908_v26 = vor.u32 %v6587_v20, %v5907_v5  ;;  %v6537_v1 = vld [vmem:[%s9865_s3 + $0x3c4] sm:$0xf]  ;;  %v5563_v5 = vld [vmem:[%s9865_s3 + $0x288] sm:$0xf] }
 0x168   :  { %3539 = vmatpush.bf16.msrb.mxu0 %v5592_v9  ;;  %v9014_v16 = vpop.f32.mrf.mxu2  ;;  %v2115_v23 = vpop.f32.mrf.mxu0  ;;  %v5509_v9 = vld [vmem:[%s9865_s3 + $0x230] sm:$0xf0] }
 0x169   :  { %v9019_v24 = vpop.f32.mrf.mxu3  ;;  %v5512_v41 = vor.u32 %v6485_v38, %v5509_v9  ;;  %3504 = vmatpush.bf16.msra.mxu1 %v5908_v26  ;;  %v2140_v21 = vadd.f32 %v9014_v16, %v2127_v4  ;;  %v5720_v23 = vor.u32 %v6537_v1, %v5717_v59  ;;  %v6500_v16 = vld [vmem:[%s9865_s3 + $0x294] sm:$0xf0]  ;;  %v5547_v9 = vld [vmem:[%s9865_s3 + $0x268] sm:$0xf]  ;;  %v6517_v1 = vld [vmem:[%s9865_s3 + $0x324] sm:$0xf] }
 0x16a   :  { %3565 = vmatpush.bf16.msrb.mxu2 %v5848_v27  ;;  %v2128_v27 = vpop.f32.mrf.mxu1  ;;  %v6536_v26 = vld [vmem:[%s9865_s3 + $0x3b4] sm:$0xf0]  ;;  %v5564_v38 = vor.u32 %v6500_v16, %v5563_v5  ;;  %v5637_v59 = vld [vmem:[%s9865_s3 + $0x330] sm:$0xf0] }
 0x16b   :  { %3578 = vmatpush.bf16.msrb.mxu3 %v5976_v40  ;;  %v5611_v40 = vld [vmem:[%s9865_s3 + $0x2e8] sm:$0xf]  ;;  %v5701_v27 = vld [vmem:[%s9865_s3 + $0x3b0] sm:$0xf0]  ;;  %v2153_v29 = vadd.f32 %v9019_v24, %v2140_v21  ;;  %v6496_v24 = vld [vmem:[%s9865_s3 + $0x274] sm:$0xf0]  ;;  %v5640_v5 = vor.u32 %v6517_v1, %v5637_v59 }
 0x16c   :  { %3540 = vmatpush.bf16.msrb.mxu0 %v5576_v22  ;;  %v5893_v22 = vld [vmem:[%s9865_s3 + $0x530] sm:$0xf0]  ;;  %v5704_v35 = vor.u32 %v6533_v25, %v5701_v27  ;;  %v6524_v4 = vld [vmem:[%s9865_s3 + $0x354] sm:$0xf0]  ;;  %v6446_v21 = vld [vmem:[%s9865_s3 + $0xec] sm:$0xf] }
 0x16d   :  { %v5896_v57 = vor.u32 %v6581_v43, %v5893_v22  ;;  %v5548_v43 = vor.u32 %v6496_v24, %v5547_v9  ;;  %v5531_v22 = vld [vmem:[%s9865_s3 + $0x248] sm:$0xf]  ;;  %v6520_v25 = vld [vmem:[%s9865_s3 + $0x334] sm:$0xf0] }
 0x16e   :  { %3566 = vmatpush.bf16.msrb.mxu2 %v5832_v36  ;;  %v5891_v36 = vld [vmem:[%s9865_s3 + $0x520] sm:$0xf]  ;;  %v5323_v9 = vld [vmem:[%s9865_s3 + $0xa8] sm:$0xf]  ;;  %v6420_v59 = vld [vmem:[%s9865_s3 + $0x14] sm:$0xf0] }
 0x16f   :  { %3579 = vmatpush.bf16.msrb.mxu3 %v5960_v53  ;;  %v5892_v42 = vor.u32 %v6583_v37, %v5891_v36  ;;  %v6508_v53 = vld [vmem:[%s9865_s3 + $0x2d4] sm:$0xf0]  ;;  %v5243_v1 = vld [vmem:[%s9865_s3 + $0x8] sm:$0xf] }
 0x170   :  { %3541 = vmatpush.bf16.msrb.mxu0 %v5560_v60  ;;  %v2141_v47 = vpop.f32.mrf.mxu2  ;;  %v5612_v60 = vor.u32 %v6512_v13, %v5611_v40  ;;  %v6532_v36 = vld [vmem:[%s9865_s3 + $0x394] sm:$0xf0] }
 0x171   :  { %v2154_v55 = vpop.f32.mrf.mxu3  ;;  %3505 = vmatpush.bf16.msra.mxu1 %v5892_v42  ;;  %v5675_v47 = vld [vmem:[%s9865_s3 + $0x368] sm:$0xf] }
 0x172   :  { %3567 = vmatpush.bf16.msrb.mxu2 %v5816_v7  ;;  %v5752_v7 = vor.u32 %v6545_v31, %v5749_v33  ;;  %v6529_v31 = vld [vmem:[%s9865_s3 + $0x384] sm:$0xf] }
 0x173   :  { %3580 = vmatpush.bf16.msrb.mxu3 %v5944_v3  ;;  %v6544_v3 = vld [vmem:[%s9865_s3 + $0x3f4] sm:$0xf0] }
 0x174   :  { %3542 = vmatpush.bf16.msrb.mxu0 %v5544_v10  ;;  %v5596_v10 = vor.u32 %v6508_v53, %v5595_v49  ;;  %v5740_v14 = vor.u32 %v6544_v3, %v5739_v39  ;;  %v5672_v49 = vor.u32 %v6525_v44, %v5669_v45  ;;  %v5532_v53 = vor.u32 %v6492_v46, %v5531_v22  ;;  %v5659_v3 = vld [vmem:[%s9865_s3 + $0x348] sm:$0xf]  ;;  %v6438_v22 = vld [vmem:[%s9865_s3 + $0xac] sm:$0xf] }
 0x175   :  { %3506 = vmatpush.bf16.msra.mxu1 %v5876_v63  ;;  %v324_v44 = vperm.slane %v8721_v19, 5  ;;  %v5309_v19 = vld [vmem:[%s9865_s3 + $0x98] sm:$0xf0] }
 0x176   :  { %3568 = vmatpush.bf16.msrb.mxu2 %v5800_v2  ;;  %v5733_v2 = vld [vmem:[%s9865_s3 + $0x3f0] sm:$0xf0] }
 0x177   :  { %3581 = vmatpush.bf16.msrb.mxu3 %v5928_v18  ;;  %v5736_v6 = vor.u32 %v6541_v48, %v5733_v2  ;;  %v5580_v18 = vor.u32 %v6504_v15, %v5579_v11  ;;  %v6448_v48 = vld [vmem:[%s9865_s3 + $0xf4] sm:$0xf0] }
 0x178   :  { %3543 = vmatpush.bf16.msrb.mxu0 %v5528_v28  ;;  %v5707_v28 = vld [vmem:[%s9865_s3 + $0x3a8] sm:$0xf]  ;;  %v5356_v11 = vor.u32 %v6448_v48, %v5355_v0 }
 0x179   :  { %3551 = vmatpush.bf16.msrb.mxu1 %v5736_v6  ;;  %v5708_v30 = vor.u32 %v6536_v26, %v5707_v28  ;;  %v5499_v6 = vld [vmem:[%s9865_s3 + $0x208] sm:$0xf]  ;;  %v6513_v26 = vld [vmem:[%s9865_s3 + $0x304] sm:$0xf] }
 0x17a   :  { %3569 = vmatpush.bf16.msrb.mxu2 %v5784_v17  ;;  %v6540_v17 = vld [vmem:[%s9865_s3 + $0x3d4] sm:$0xf0] }
 0x17b   :  { %3582 = vmatpush.bf16.msrb.mxu3 %v5912_v34  ;;  %v5724_v20 = vor.u32 %v6540_v17, %v5723_v50  ;;  %v5691_v34 = vld [vmem:[%s9865_s3 + $0x388] sm:$0xf]  ;;  %v6444_v17 = vld [vmem:[%s9865_s3 + $0xd4] sm:$0xf0] }
 0x17c   :  { %3544 = vmatpush.bf16.msrb.mxu0 %v5512_v41  ;;  %v5692_v13 = vor.u32 %v6532_v36, %v5691_v34  ;;  %v5339_v50 = vld [vmem:[%s9865_s3 + $0xc8] sm:$0xf]  ;;  %v6516_v36 = vld [vmem:[%s9865_s3 + $0x314] sm:$0xf0] }
 0x17d   :  { %3552 = vmatpush.bf16.msrb.mxu1 %v5720_v23  ;;  %v5660_v23 = vor.u32 %v6524_v4, %v5659_v3  ;;  %v5340_v16 = vor.u32 %v6444_v17, %v5339_v50  ;;  %v5627_v34 = vld [vmem:[%s9865_s3 + $0x308] sm:$0xf]  ;;  %v6422_v50 = vld [vmem:[%s9865_s3 + $0x2c] sm:$0xf] }
 0x17e   :  { %3570 = vmatpush.bf16.msrb.mxu2 %v5768_v32  ;;  %v5685_v32 = vld [vmem:[%s9865_s3 + $0x390] sm:$0xf0]  ;;  %v5259_v4 = vld [vmem:[%s9865_s3 + $0x28] sm:$0xf] }
 0x17f   :  { %3583 = vmatpush.bf16.msrb.mxu3 %v5896_v57  ;;  %v5688_v41 = vor.u32 %v6529_v31, %v5685_v32  ;;  %v5515_v57 = vld [vmem:[%s9865_s3 + $0x228] sm:$0xf]  ;;  %v6442_v31 = vld [vmem:[%s9865_s3 + $0xcc] sm:$0xf] }
 0x180   :  { %3545 = vmatpush.bf16.msrb.mxu0 %v5496_v61  ;;  %v2165_v33 = vpop.f32.mrf.mxu0 }
 0x181   :  { %v2166_v37 = vadd.f32 %v2165_v33, %v2153_v29  ;;  %v2178_v40 = vpop.f32.mrf.mxu1  ;;  %3553 = vmatpush.bf16.msrb.mxu1 %v5704_v35  ;;  %v5621_v29 = vld [vmem:[%s9865_s3 + $0x310] sm:$0xf0]  ;;  %v5341_v33 = vld [vmem:[%s9865_s3 + $0xd8] sm:$0xf0] }
 0x182   :  { %3571 = vmatpush.bf16.msrb.mxu2 %v5752_v7  ;;  %v6528_v7 = vld [vmem:[%s9865_s3 + $0x374] sm:$0xf0]  ;;  %v5624_v24 = vor.u32 %v6513_v26, %v5621_v29 }
 0x183   :  { %3584 = vmatpush.bf16.msrb.mxu3 %v5880_v8  ;;  %v2179_v42 = vadd.f32 %v2178_v40, %v2166_v37  ;;  %v5676_v58 = vor.u32 %v6528_v7, %v5675_v47  ;;  %v5344_v40 = vor.u32 %v6442_v31, %v5341_v33  ;;  %v5291_v47 = vld [vmem:[%s9865_s3 + $0x68] sm:$0xf]  ;;  %v6432_v7 = vld [vmem:[%s9865_s3 + $0x74] sm:$0xf0]  ;;  %v6574_v31 = vld [vmem:[%s9865_s3 + $0x4ec] sm:$0xf] }
 0x185   :  { %6650 = vtanh.f32 %v2179_v42  ;;  %3554 = vmatpush.bf16.msrb.mxu1 %v5688_v41  ;;  %v5307_v41 = vld [vmem:[%s9865_s3 + $0x88] sm:$0xf]  ;;  %v6436_v42 = vld [vmem:[%s9865_s3 + $0x94] sm:$0xf0] }
 0x186   :  { %3616 = vmatpush.bf16.msra.mxu2 %v5612_v60  ;;  %v5653_v60 = vld [vmem:[%s9865_s3 + $0x350] sm:$0xf0]  ;;  %v5308_v45 = vor.u32 %v6436_v42, %v5307_v41  ;;  %v6480_v41 = vld [vmem:[%s9865_s3 + $0x1f4] sm:$0xf0]  ;;  %v6478_v42 = vld [vmem:[%s9865_s3 + $0x1ec] sm:$0xf] }
 0x187   :  { %3629 = vmatpush.bf16.msra.mxu3 %v5740_v14  ;;  %v5656_v39 = vor.u32 %v6521_v52, %v5653_v60  ;;  %v6484_v14 = vld [vmem:[%s9865_s3 + $0x214] sm:$0xf0]  ;;  %v5275_v52 = vld [vmem:[%s9865_s3 + $0x48] sm:$0xf] }
 0x188   :  { %v9179_v55 = vpop.f32.mrf.mxu2  ;;  %v2167_v63 = vpop.f32.mrf.mxu0  ;;  %v5500_v27 = vor.u32 %v6484_v14, %v5499_v6  ;;  %v6428_v60 = vld [vmem:[%s9865_s3 + $0x54] sm:$0xf0] }
 0x189   :  { %v9190_v61 = vpop.f32.mrf.mxu3  ;;  %v2180_v2 = vpop.f32.mrf.mxu1  ;;  %3555 = vmatpush.bf16.msrb.mxu1 %v5672_v49  ;;  %v6434_v49 = vld [vmem:[%s9865_s3 + $0x8c] sm:$0xf]  ;;  %v6424_v6 = vld [vmem:[%s9865_s3 + $0x34] sm:$0xf0] }
 0x18a   :  { %3617 = vmatpush.bf16.msra.mxu2 %v5596_v10  ;;  %v5516_v10 = vor.u32 %v6488_v62, %v5515_v57  ;;  %v5292_v57 = vor.u32 %v6432_v7, %v5291_v47  ;;  %v6430_v62 = vld [vmem:[%s9865_s3 + $0x6c] sm:$0xf]  ;;  %v5276_v2 = vor.u32 %v6428_v60, %v5275_v52  ;;  %v5469_v60 = vld [vmem:[%s9865_s3 + $0x1d8] sm:$0xf0] }
 0x18b   :  { %3630 = vmatpush.bf16.msra.mxu3 %v5724_v20  ;;  %v6651_v8 = vpop.eup %6650  ;;  %v5643_v20 = vld [vmem:[%s9865_s3 + $0x328] sm:$0xf] }
 0x18c   :  { %v9219_v15 = vpack.c.bf16 %v6651_v8, %v6651_v8  ;;  %v5644_v32 = vor.u32 %v6520_v25, %v5643_v20  ;;  %v5277_v8 = vld [vmem:[%s9865_s3 + $0x58] sm:$0xf0] }
 0x18d   :  { %3556 = vmatpush.bf16.msrb.mxu1 %v5656_v39 }
 0x18e   :  { %3618 = vmatpush.bf16.msra.mxu2 %v5580_v18  ;;  %v5357_v18 = vld [vmem:[%s9865_s3 + $0xf8] sm:$0xf0]  ;;  %3494 = vmatmul.bf16.vlgmr.msra.gmra.mxu0 %v9219_v15 }
 0x18f   :  { %3631 = vmatpush.bf16.msra.mxu3 %v5708_v30  ;;  %3572 = vmatmul.bf16.vlgmr.msrb.gmra.mxu2 %v9219_v15  ;;  %v5360_v35 = vor.u32 %v6446_v21, %v5357_v18  ;;  %v6440_v30 = vld [vmem:[%s9865_s3 + $0xb4] sm:$0xf0]  ;;  %v5867_v18 = vld [vmem:[%s9865_s3 + $0x4e8] sm:$0xf] }
 0x190   :  { %3590 = vmatpush.bf16.msra.mxu0 %v5356_v11  ;;  %v2193_v28 = vpop.f32.mrf.mxu2  ;;  %v5324_v37 = vor.u32 %v6440_v30, %v5323_v9  ;;  %v5851_v9 = vld [vmem:[%s9865_s3 + $0x4c8] sm:$0xf]  ;;  %v6572_v30 = vld [vmem:[%s9865_s3 + $0x4d4] sm:$0xf0] }
 0x191   :  { %3557 = vmatpush.bf16.msrb.mxu1 %v5640_v5  ;;  %v6576_v5 = vld [vmem:[%s9865_s3 + $0x4f4] sm:$0xf0] }
 0x192   :  { %3619 = vmatpush.bf16.msra.mxu2 %v5564_v38  ;;  %v2206_v38 = vpop.f32.mrf.mxu3  ;;  %v5868_v29 = vor.u32 %v6576_v5, %v5867_v18  ;;  %v6468_v18 = vld [vmem:[%s9865_s3 + $0x194] sm:$0xf0]  ;;  %v6466_v5 = vld [vmem:[%s9865_s3 + $0x18c] sm:$0xf] }
 0x193   :  { %3632 = vmatpush.bf16.msra.mxu3 %v5692_v13  ;;  %v5325_v13 = vld [vmem:[%s9865_s3 + $0xb8] sm:$0xf0] }
 0x194   :  { %3591 = vmatpush.bf16.msra.mxu0 %v5340_v16  ;;  %v5328_v46 = vor.u32 %v6438_v22, %v5325_v13  ;;  %v5244_v16 = vor.u32 %v6420_v59, %v5243_v1  ;;  %v5245_v38 = vld [vmem:[%s9865_s3 + $0x18] sm:$0xf0]  ;;  %v5835_v22 = vld [vmem:[%s9865_s3 + $0x4a8] sm:$0xf]  ;;  %v6568_v13 = vld [vmem:[%s9865_s3 + $0x4b4] sm:$0xf0] }
 0x195   :  { %3558 = vmatpush.bf16.msrb.mxu1 %v5624_v24  ;;  %v5852_v24 = vor.u32 %v6572_v30, %v5851_v9  ;;  %v5821_v1 = vld [vmem:[%s9865_s3 + $0x498] sm:$0xf0] }
 0x196   :  { %3620 = vmatpush.bf16.msra.mxu2 %v5548_v43  ;;  %v5628_v43 = vor.u32 %v6516_v36, %v5627_v34 }
 0x197   :  { %3633 = vmatpush.bf16.msra.mxu3 %v5676_v58  ;;  %v5312_v58 = vor.u32 %v6434_v49, %v5309_v19  ;;  %v5836_v19 = vor.u32 %v6568_v13, %v5835_v22  ;;  %v5403_v13 = vld [vmem:[%s9865_s3 + $0x148] sm:$0xf] }
 0x198   :  { %3592 = vmatpush.bf16.msra.mxu0 %v5324_v37 }
 0x19a   :  { %3621 = vmatpush.bf16.msra.mxu2 %v5532_v53  ;;  %v2192_v53 = vadd.f32 %v9179_v55, %v324_v44  ;;  %v5293_v55 = vld [vmem:[%s9865_s3 + $0x78] sm:$0xf0]  ;;  %v6570_v44 = vld [vmem:[%s9865_s3 + $0x4cc] sm:$0xf] }
 0x19b   :  { %3634 = vmatpush.bf16.msra.mxu3 %v5660_v23  ;;  %v5296_v3 = vor.u32 %v6430_v62, %v5293_v55  ;;  %v5261_v23 = vld [vmem:[%s9865_s3 + $0x38] sm:$0xf0]  ;;  %v5819_v62 = vld [vmem:[%s9865_s3 + $0x488] sm:$0xf]  ;;  %v6564_v55 = vld [vmem:[%s9865_s3 + $0x494] sm:$0xf0] }
 0x19c   :  { %3593 = vmatpush.bf16.msra.mxu0 %v5308_v45  ;;  %v2205_v0 = vadd.f32 %v9190_v61, %v2192_v53  ;;  %v6426_v61 = vld [vmem:[%s9865_s3 + $0x4c] sm:$0xf]  ;;  %v5264_v26 = vor.u32 %v6422_v50, %v5261_v23  ;;  %v5853_v45 = vld [vmem:[%s9865_s3 + $0x4d8] sm:$0xf0]  ;;  %v5467_v53 = vld [vmem:[%s9865_s3 + $0x1c8] sm:$0xf] }
 0x19d   :  { %v5280_v14 = vor.u32 %v6426_v61, %v5277_v8  ;;  %v5856_v52 = vor.u32 %v6570_v44, %v5853_v45  ;;  %v5453_v8 = vld [vmem:[%s9865_s3 + $0x1b8] sm:$0xf0]  ;;  %v5435_v23 = vld [vmem:[%s9865_s3 + $0x188] sm:$0xf] }
 0x19e   :  { %3622 = vmatpush.bf16.msra.mxu2 %v5516_v10  ;;  %3546 = vmatmul.bf16.vlgmr.msrb.gmra.mxu0 %v8742_v51  ;;  %v5260_v10 = vor.u32 %v6424_v6, %v5259_v4  ;;  %v6472_v4 = vld [vmem:[%s9865_s3 + $0x1b4] sm:$0xf0]  ;;  %v6470_v6 = vld [vmem:[%s9865_s3 + $0x1ac] sm:$0xf]  ;;  %v5436_v9 = vor.u32 %v6468_v18, %v5435_v23  ;;  %v5371_v23 = vld [vmem:[%s9865_s3 + $0x108] sm:$0xf] }
 0x19f   :  { %3635 = vmatpush.bf16.msra.mxu3 %v5644_v32  ;;  %v5869_v32 = vld [vmem:[%s9865_s3 + $0x4f8] sm:$0xf0]  ;;  %v6452_v18 = vld [vmem:[%s9865_s3 + $0x114] sm:$0xf0] }
 0x1a0   :  { %v2217_v48 = vpop.f32.mrf.mxu0  ;;  %3594 = vmatpush.bf16.msra.mxu0 %v5292_v57  ;;  %v5872_v37 = vor.u32 %v6574_v31, %v5869_v32  ;;  %v6476_v57 = vld [vmem:[%s9865_s3 + $0x1d4] sm:$0xf0]  ;;  %v5419_v32 = vld [vmem:[%s9865_s3 + $0x168] sm:$0xf] }
 0x1a1   :  { %v2230_v63 = vpop.f32.mrf.mxu1  ;;  %v2218_v39 = vadd.f32 %v2217_v48, %v2205_v0  ;;  %v6566_v0 = vld [vmem:[%s9865_s3 + $0x4ac] sm:$0xf]  ;;  %v5837_v48 = vld [vmem:[%s9865_s3 + $0x4b8] sm:$0xf0] }
 0x1a2   :  { %3623 = vmatpush.bf16.msra.mxu2 %v5500_v27  ;;  %v5840_v61 = vor.u32 %v6566_v0, %v5837_v48  ;;  %v6510_v0 = vld [vmem:[%s9865_s3 + $0x2ec] sm:$0xf]  ;;  %v5613_v48 = vld [vmem:[%s9865_s3 + $0x2f8] sm:$0xf0] }
 0x1a3   :  { %3636 = vmatpush.bf16.msra.mxu3 %v5628_v43  ;;  %v2231_v11 = vadd.f32 %v2230_v63, %v2218_v39  ;;  %v5485_v43 = vld [vmem:[%s9865_s3 + $0x1f8] sm:$0xf0]  ;;  %v5468_v63 = vor.u32 %v6476_v57, %v5467_v53  ;;  %v5755_v57 = vld [vmem:[%s9865_s3 + $0x408] sm:$0xf] }
 0x1a4   :  { %3595 = vmatpush.bf16.msra.mxu0 %v5276_v2  ;;  %v5488_v49 = vor.u32 %v6478_v42, %v5485_v43  ;;  %v5451_v2 = vld [vmem:[%s9865_s3 + $0x1a8] sm:$0xf]  ;;  %v6554_v42 = vld [vmem:[%s9865_s3 + $0x44c] sm:$0xf]  ;;  %v5789_v43 = vld [vmem:[%s9865_s3 + $0x458] sm:$0xf0] }
 0x1a5   :  { %3624 = vmatmul.bf16.vlgmr.msra.gmra.mxu2 %v8742_v51  ;;  %v5452_v59 = vor.u32 %v6472_v4, %v5451_v2  ;;  %v5792_v53 = vor.u32 %v6554_v42, %v5789_v43  ;;  %v5387_v4 = vld [vmem:[%s9865_s3 + $0x128] sm:$0xf]  ;;  %v5565_v42 = vld [vmem:[%s9865_s3 + $0x298] sm:$0xf0] }
 0x1a6   :  { %3668 = vmatpush.bf16.msrb.mxu2 %v5360_v35  ;;  %v6418_v35 = vld [vmem:[%s9865_s3 + $0xc] sm:$0xf] }
 0x1a7   :  { %v5248_v33 = vor.u32 %v6418_v35, %v5245_v38 }
 0x1a8   :  { %v2243_v17 = vpop.f32.mrf.mxu2  ;;  %v2219_v25 = vpop.f32.mrf.mxu0  ;;  %3596 = vmatpush.bf16.msra.mxu0 %v5260_v10  ;;  %v5803_v10 = vld [vmem:[%s9865_s3 + $0x468] sm:$0xf] }
 0x1a9   :  { %v2256_v21 = vpop.f32.mrf.mxu3  ;;  %v2244_v20 = vadd.f32 %v2243_v17, %v2231_v11  ;;  %v2232_v27 = vpop.f32.mrf.mxu1  ;;  %v6560_v11 = vld [vmem:[%s9865_s3 + $0x474] sm:$0xf0]  ;;  %v5456_v17 = vor.u32 %v6470_v6, %v5453_v8  ;;  %v5437_v25 = vld [vmem:[%s9865_s3 + $0x198] sm:$0xf0]  ;;  %v5616_v8 = vor.u32 %v6510_v0, %v5613_v48 }
 0x1aa   :  { %3669 = vmatpush.bf16.msrb.mxu2 %v5344_v40  ;;  %v5483_v40 = vld [vmem:[%s9865_s3 + $0x1e8] sm:$0xf]  ;;  %v5440_v30 = vor.u32 %v6466_v5, %v5437_v25  ;;  %v6456_v6 = vld [vmem:[%s9865_s3 + $0x134] sm:$0xf0]  ;;  %v6450_v5 = vld [vmem:[%s9865_s3 + $0x10c] sm:$0xf] }
 0x1ab   :  { %v2257_v28 = vadd.f32 %v2256_v21, %v2244_v20  ;;  %v5484_v47 = vor.u32 %v6480_v41, %v5483_v40  ;;  %v5804_v21 = vor.u32 %v6560_v11, %v5803_v10  ;;  %v5787_v27 = vld [vmem:[%s9865_s3 + $0x448] sm:$0xf]  ;;  %v6552_v41 = vld [vmem:[%s9865_s3 + $0x434] sm:$0xf0]  ;;  %v6454_v10 = vld [vmem:[%s9865_s3 + $0x12c] sm:$0xf] }
 0x1ac   :  { %3597 = vmatpush.bf16.msra.mxu0 %v5244_v16  ;;  %v6556_v16 = vld [vmem:[%s9865_s3 + $0x454] sm:$0xf0]  ;;  %v5771_v40 = vld [vmem:[%s9865_s3 + $0x428] sm:$0xf]  ;;  %v5389_v11 = vld [vmem:[%s9865_s3 + $0x138] sm:$0xf0] }
 0x1ad   :  { %6652 = vtanh.f32 %v2257_v28  ;;  %v5788_v31 = vor.u32 %v6556_v16, %v5787_v27  ;;  %v5772_v45 = vor.u32 %v6552_v41, %v5771_v40  ;;  %v5373_v16 = vld [vmem:[%s9865_s3 + $0x118] sm:$0xf0]  ;;  %v6498_v41 = vld [vmem:[%s9865_s3 + $0x28c] sm:$0xf] }
 0x1ae   :  { %3670 = vmatpush.bf16.msrb.mxu2 %v5328_v46  ;;  %v5981_v40 = vld [vmem:[%s9865_s3 + $0x5d8] sm:$0xf0] }
 0x1af   :  { %3598 = vmatmul.bf16.vlgmr.msra.gmra.mxu0 %v8750_v54  ;;  %v5533_v0 = vld [vmem:[%s9865_s3 + $0x258] sm:$0xf0] }
 0x1b0   :  { %3642 = vmatpush.bf16.msrb.mxu0 %v5868_v29  ;;  %v2245_v34 = vpop.f32.mrf.mxu2  ;;  %v5805_v29 = vld [vmem:[%s9865_s3 + $0x478] sm:$0xf0] }
 0x1b1   :  { %v2258_v36 = vpop.f32.mrf.mxu3 }
 0x1b2   :  { %3671 = vmatpush.bf16.msrb.mxu2 %v5312_v58  ;;  %v6474_v58 = vld [vmem:[%s9865_s3 + $0x1cc] sm:$0xf] }
 0x1b3   :  { %v6653_v46 = vpop.eup %6652  ;;  %v5472_v39 = vor.u32 %v6474_v58, %v5469_v60  ;;  %v6548_v58 = vld [vmem:[%s9865_s3 + $0x414] sm:$0xf0] }
 0x1b4   :  { %3643 = vmatpush.bf16.msrb.mxu0 %v5852_v24  ;;  %v9379_v7 = vpack.c.bf16 %v6653_v46, %v6653_v46  ;;  %v6462_v24 = vld [vmem:[%s9865_s3 + $0x16c] sm:$0xf]  ;;  %v6460_v46 = vld [vmem:[%s9865_s3 + $0x154] sm:$0xf0] }
 0x1b5   :  { %v5404_v2 = vor.u32 %v6460_v46, %v5403_v13  ;;  %v5963_v13 = vld [vmem:[%s9865_s3 + $0x5a8] sm:$0xf]  ;;  %v6598_v46 = vld [vmem:[%s9865_s3 + $0x5ac] sm:$0xf] }
 0x1b6   :  { %3672 = vmatpush.bf16.msrb.mxu2 %v5296_v3  ;;  %3507 = vmatmul.bf16.vlgmr.msra.gmra.mxu1 %v9379_v7  ;;  %v5820_v3 = vor.u32 %v6564_v55, %v5819_v62  ;;  %v5773_v55 = vld [vmem:[%s9865_s3 + $0x438] sm:$0xf0] }
 0x1b7   :  { %3585 = vmatmul.bf16.vlgmr.msrb.gmra.mxu3 %v9379_v7  ;;  %3603 = vmatpush.bf16.msra.mxu1 %v5484_v47  ;;  %v6458_v47 = vld [vmem:[%s9865_s3 + $0x14c] sm:$0xf] }
 0x1b8   :  { %3681 = vmatpush.bf16.msrb.mxu3 %v5488_v49  ;;  %3644 = vmatpush.bf16.msrb.mxu0 %v5836_v19  ;;  %v5405_v49 = vld [vmem:[%s9865_s3 + $0x158] sm:$0xf0] }
 0x1ba   :  { %3673 = vmatpush.bf16.msrb.mxu2 %v5280_v14  ;;  %v6562_v14 = vld [vmem:[%s9865_s3 + $0x48c] sm:$0xf] }
 0x1bb   :  { %3604 = vmatpush.bf16.msra.mxu1 %v5468_v63  ;;  %v5824_v20 = vor.u32 %v6562_v14, %v5821_v1  ;;  %v6546_v14 = vld [vmem:[%s9865_s3 + $0x40c] sm:$0xf]  ;;  %v5757_v1 = vld [vmem:[%s9865_s3 + $0x418] sm:$0xf0] }
 0x1bc   :  { %3682 = vmatpush.bf16.msrb.mxu3 %v5472_v39  ;;  %3645 = vmatpush.bf16.msrb.mxu0 %v5820_v3  ;;  %v5408_v39 = vor.u32 %v6458_v47, %v5405_v49  ;;  %v5756_v3 = vor.u32 %v6548_v58, %v5755_v57  ;;  %v5760_v25 = vor.u32 %v6546_v14, %v5757_v1  ;;  %v6494_v47 = vld [vmem:[%s9865_s3 + $0x26c] sm:$0xf]  ;;  %v5549_v49 = vld [vmem:[%s9865_s3 + $0x278] sm:$0xf0]  ;;  %v5947_v57 = vld [vmem:[%s9865_s3 + $0x588] sm:$0xf] }
 0x1bd   :  { %v5552_v58 = vor.u32 %v6494_v47, %v5549_v49 }
 0x1be   :  { %3674 = vmatpush.bf16.msrb.mxu2 %v5264_v26  ;;  %v6558_v26 = vld [vmem:[%s9865_s3 + $0x46c] sm:$0xf] }
 0x1bf   :  { %3605 = vmatpush.bf16.msra.mxu1 %v5452_v59  ;;  %v5808_v36 = vor.u32 %v6558_v26, %v5805_v29  ;;  %v6506_v59 = vld [vmem:[%s9865_s3 + $0x2cc] sm:$0xf]  ;;  %v6608_v26 = vld [vmem:[%s9865_s3 + $0x5f4] sm:$0xf0] }
 0x1c0   :  { %v3443_v28 = vpop.f32.mrf.mxu0  ;;  %3683 = vmatpush.bf16.msrb.mxu3 %v5456_v17  ;;  %3646 = vmatpush.bf16.msrb.mxu0 %v5804_v21  ;;  %v5388_v17 = vor.u32 %v6456_v6, %v5387_v4  ;;  %v5392_v21 = vor.u32 %v6454_v10, %v5389_v11  ;;  %v6606_v29 = vld [vmem:[%s9865_s3 + $0x5ec] sm:$0xf]  ;;  %v5517_v11 = vld [vmem:[%s9865_s3 + $0x238] sm:$0xf0] }
 0x1c1   :  { %v3456_v38 = vpop.f32.mrf.mxu1  ;;  %v6590_v6 = vld [vmem:[%s9865_s3 + $0x56c] sm:$0xf] }
 0x1c2   :  { %3675 = vmatpush.bf16.msrb.mxu2 %v5248_v33  ;;  %v6464_v33 = vld [vmem:[%s9865_s3 + $0x174] sm:$0xf0]  ;;  %v6486_v10 = vld [vmem:[%s9865_s3 + $0x22c] sm:$0xf] }
 0x1c3   :  { %3606 = vmatpush.bf16.msra.mxu1 %v5436_v9  ;;  %v5420_v22 = vor.u32 %v6464_v33, %v5419_v32  ;;  %v6502_v9 = vld [vmem:[%s9865_s3 + $0x2ac] sm:$0xf] }
 0x1c4   :  { %3684 = vmatpush.bf16.msrb.mxu3 %v5440_v30  ;;  %3647 = vmatpush.bf16.msrb.mxu0 %v5788_v31  ;;  %v5581_v30 = vld [vmem:[%s9865_s3 + $0x2b8] sm:$0xf0]  ;;  %v5376_v31 = vor.u32 %v6450_v5, %v5373_v16  ;;  %v6584_v16 = vld [vmem:[%s9865_s3 + $0x534] sm:$0xf0] }
 0x1c5   :  { %3676 = vmatmul.bf16.vlgmr.msrb.gmra.mxu2 %v8750_v54  ;;  %v9420_v54 = vld [vmem:[%s9866_s4] sm:$0xf]  ;;  %v5501_v5 = vld [vmem:[%s9865_s3 + $0x218] sm:$0xf0] }
 0x1c6   :  { %3720 = vmatpush.bf16.msra.mxu2 %v5872_v37  ;;  %v2466_v50 = vperm.slane %v9420_v54, 0  ;;  %v5421_v37 = vld [vmem:[%s9865_s3 + $0x178] sm:$0xf0]  ;;  %3559 = vmatmul.bf16.vlgmr.msrb.gmra.mxu1 %v8885_v12 }
 0x1c7   :  { %v5424_v44 = vor.u32 %v6462_v24, %v5421_v37  ;;  %3637 = vmatmul.bf16.vlgmr.msra.gmra.mxu3 %v8885_v12  ;;  %3607 = vmatpush.bf16.msra.mxu1 %v5420_v22  ;;  %v5979_v24 = vld [vmem:[%s9865_s3 + $0x5c8] sm:$0xf]  ;;  %v6602_v37 = vld [vmem:[%s9865_s3 + $0x5cc] sm:$0xf] }
 0x1c8   :  { %v3444_v35 = vadd.f32 %v3443_v28, %v2466_v50  ;;  %v3469_v19 = vpop.f32.mrf.mxu2  ;;  %v3445_v62 = vpop.f32.mrf.mxu0  ;;  %3648 = vmatpush.bf16.msrb.mxu0 %v5772_v45  ;;  %v5597_v50 = vld [vmem:[%s9865_s3 + $0x2d8] sm:$0xf0]  ;;  %v5995_v28 = vld [vmem:[%s9865_s3 + $0x5e8] sm:$0xf]  ;;  %v5984_v22 = vor.u32 %v6602_v37, %v5981_v40  ;;  %v5568_v45 = vor.u32 %v6498_v41, %v5565_v42 }
 0x1c9   :  { %v3458_v63 = vpop.f32.mrf.mxu1  ;;  %3685 = vmatpush.bf16.msrb.mxu3 %v5424_v44  ;;  %v5600_v27 = vor.u32 %v6506_v59, %v5597_v50  ;;  %v5996_v32 = vor.u32 %v6608_v26, %v5995_v28  ;;  %v6600_v44 = vld [vmem:[%s9865_s3 + $0x5b4] sm:$0xf0]  ;;  %v5949_v62 = vld [vmem:[%s9865_s3 + $0x598] sm:$0xf0]  ;;  %v5915_v59 = vld [vmem:[%s9865_s3 + $0x548] sm:$0xf] }
 0x1ca   :  { %3721 = vmatpush.bf16.msra.mxu2 %v5856_v52  ;;  %v3457_v34 = vadd.f32 %v3456_v38, %v3444_v35  ;;  %v6550_v52 = vld [vmem:[%s9865_s3 + $0x42c] sm:$0xf]  ;;  %v5997_v35 = vld [vmem:[%s9865_s3 + $0x5f8] sm:$0xf0]  ;;  %v5372_v38 = vor.u32 %v6452_v18, %v5371_v23 }
 0x1cb   :  { %3608 = vmatpush.bf16.msra.mxu1 %v5404_v2  ;;  %v6000_v33 = vor.u32 %v6606_v29, %v5997_v35  ;;  %v5931_v2 = vld [vmem:[%s9865_s3 + $0x568] sm:$0xf]  ;;  %v5917_v23 = vld [vmem:[%s9865_s3 + $0x558] sm:$0xf0]  ;;  %v6482_v18 = vld [vmem:[%s9865_s3 + $0x20c] sm:$0xf] }
 0x1cc   :  { %v9507_v60 = vadd.f32 %v3469_v19, %v3457_v34  ;;  %3649 = vmatpush.bf16.msrb.mxu0 %v5756_v3  ;;  %v6604_v34 = vld [vmem:[%s9865_s3 + $0x5d4] sm:$0xf0]  ;;  %v5964_v19 = vor.u32 %v6600_v44, %v5963_v13  ;;  %v5504_v28 = vor.u32 %v6482_v18, %v5501_v5  ;;  %v6582_v29 = vld [vmem:[%s9865_s3 + $0x52c] sm:$0xf]  ;;  %v5901_v35 = vld [vmem:[%s9865_s3 + $0x538] sm:$0xf0] }
 0x1cd   :  { %3686 = vmatpush.bf16.msrb.mxu3 %v5408_v39  ;;  %v5980_v43 = vor.u32 %v6604_v34, %v5979_v24  ;;  %v6592_v39 = vld [vmem:[%s9865_s3 + $0x574] sm:$0xf0]  ;;  %v5885_v34 = vld [vmem:[%s9865_s3 + $0x518] sm:$0xf0]  ;;  %v6538_v13 = vld [vmem:[%s9865_s3 + $0x3cc] sm:$0xf] }
 0x1ce   :  { %3722 = vmatpush.bf16.msra.mxu2 %v5840_v61  ;;  %v5776_v61 = vor.u32 %v6550_v52, %v5773_v55  ;;  %v6594_v52 = vld [vmem:[%s9865_s3 + $0x58c] sm:$0xf]  ;;  %v5932_v14 = vor.u32 %v6592_v39, %v5931_v2  ;;  %v5741_v37 = vld [vmem:[%s9865_s3 + $0x3f8] sm:$0xf0]  ;;  %v6621_v18 = vld [vmem:[%s9867_s5 + $0x60] sm:$0xff] }
 0x1cf   :  { %3609 = vmatpush.bf16.msra.mxu1 %v5388_v17  ;;  %3650 = vmatmul.bf16.vlgmr.msrb.gmra.mxu0 %v9219_v15  ;;  %v6490_v55 = vld [vmem:[%s9865_s3 + $0x24c] sm:$0xf]  ;;  %v5952_v63 = vor.u32 %v6594_v52, %v5949_v62  ;;  %v5520_v17 = vor.u32 %v6486_v10, %v5517_v11  ;;  %v5725_v44 = vld [vmem:[%s9865_s3 + $0x3d8] sm:$0xf0]  ;;  %v6615_v52 = vld [vmem:[%s9867_s5 + $0x30] sm:$0xff] }
 0x1d0   :  { %3694 = vmatpush.bf16.msra.mxu0 %v5616_v8  ;;  %v5536_v3 = vor.u32 %v6490_v55, %v5533_v0  ;;  %v6522_v55 = vld [vmem:[%s9865_s3 + $0x34c] sm:$0xf]  ;;  %v5661_v0 = vld [vmem:[%s9865_s3 + $0x358] sm:$0xf0] }
 0x1d1   :  { %3687 = vmatpush.bf16.msrb.mxu3 %v5392_v21  ;;  %v6586_v21 = vld [vmem:[%s9865_s3 + $0x54c] sm:$0xf]  ;;  %v5645_v39 = vld [vmem:[%s9865_s3 + $0x338] sm:$0xf0] }
 0x1d2   :  { %3723 = vmatpush.bf16.msra.mxu2 %v5824_v20  ;;  %v3471_v20 = vpop.f32.mrf.mxu2  ;;  %v6518_v2 = vld [vmem:[%s9865_s3 + $0x32c] sm:$0xf]  ;;  %v6612_v10 = vld [vmem:[%s9867_s5 + $0x18] sm:$0xff] }
 0x1d3   :  { %3610 = vmatpush.bf16.msra.mxu1 %v5372_v38  ;;  %v2467_v38 = vperm.slane %v9420_v54, 1 }
 0x1d4   :  { %3695 = vmatpush.bf16.msra.mxu0 %v5600_v27  ;;  %v5899_v27 = vld [vmem:[%s9865_s3 + $0x528] sm:$0xf] }
 0x1d5   :  { %3688 = vmatpush.bf16.msrb.mxu3 %v5376_v31  ;;  %v5883_v31 = vld [vmem:[%s9865_s3 + $0x508] sm:$0xf] }
 0x1d6   :  { %3724 = vmatpush.bf16.msra.mxu2 %v5808_v36  ;;  %v5584_v36 = vor.u32 %v6502_v9, %v5581_v30  ;;  %3611 = vmatmul.bf16.vlgmr.msra.gmra.mxu1 %v8752_v56  ;;  %v5900_v9 = vor.u32 %v6584_v16, %v5899_v27  ;;  %v5904_v30 = vor.u32 %v6582_v29, %v5901_v35  ;;  %v6619_v27 = vld [vmem:[%s9867_s5 + $0x50] sm:$0xff]  ;;  %v6617_v29 = vld [vmem:[%s9867_s5 + $0x40] sm:$0xff] }
 0x1d7   :  { %3655 = vmatpush.bf16.msrb.mxu1 %v5996_v32  ;;  %v6580_v32 = vld [vmem:[%s9865_s3 + $0x514] sm:$0xf0] }
 0x1d8   :  { %3696 = vmatpush.bf16.msra.mxu0 %v5584_v36  ;;  %3689 = vmatmul.bf16.vlgmr.msrb.gmra.mxu3 %v8752_v56  ;;  %v6596_v56 = vld [vmem:[%s9865_s3 + $0x594] sm:$0xf0]  ;;  %v6542_v36 = vld [vmem:[%s9865_s3 + $0x3ec] sm:$0xf]  ;;  %v5884_v40 = vor.u32 %v6580_v32, %v5883_v31 }
 0x1d9   :  { %3733 = vmatpush.bf16.msra.mxu3 %v6000_v33  ;;  %v5948_v48 = vor.u32 %v6596_v56, %v5947_v57  ;;  %v3482_v4 = vpop.f32.mrf.mxu3  ;;  %v6578_v33 = vld [vmem:[%s9865_s3 + $0x50c] sm:$0xf]  ;;  %v6616_v57 = vld [vmem:[%s9867_s5 + $0x38] sm:$0xff] }
 0x1da   :  { %3725 = vmatpush.bf16.msra.mxu2 %v5792_v53  ;;  %v9645_v8 = vadd.f32 %v3482_v4, %v9507_v60  ;;  %v6588_v60 = vld [vmem:[%s9865_s3 + $0x554] sm:$0xf0]  ;;  %v5888_v42 = vor.u32 %v6578_v33, %v5885_v34  ;;  %v5648_v4 = vor.u32 %v6518_v2, %v5645_v39  ;;  %v6639_v2 = vld [vmem:[%s9867_s5 + $0xf0] sm:$0xff] }
 0x1db   :  { %3656 = vmatpush.bf16.msrb.mxu1 %v5980_v43  ;;  %v5916_v20 = vor.u32 %v6588_v60, %v5915_v59  ;;  %v5744_v43 = vor.u32 %v6542_v36, %v5741_v37  ;;  %v6610_v60 = vld [vmem:[%s9867_s5 + $0x8] sm:$0xff] }
 0x1dc   :  { %3697 = vmatpush.bf16.msra.mxu0 %v5568_v45 }
 0x1dd   :  { %3734 = vmatpush.bf16.msra.mxu3 %v5984_v22 }
 0x1de   :  { %3726 = vmatpush.bf16.msra.mxu2 %v5776_v61  ;;  %v5933_v61 = vld [vmem:[%s9865_s3 + $0x578] sm:$0xf0] }
 0x1df   :  { %3657 = vmatpush.bf16.msrb.mxu1 %v5964_v19  ;;  %v5936_v1 = vor.u32 %v6590_v6, %v5933_v61  ;;  %v6530_v19 = vld [vmem:[%s9865_s3 + $0x38c] sm:$0xf]  ;;  %v5629_v61 = vld [vmem:[%s9865_s3 + $0x318] sm:$0xf0] }
 0x1e0   :  { %3698 = vmatpush.bf16.msra.mxu0 %v5552_v58  ;;  %v5677_v58 = vld [vmem:[%s9865_s3 + $0x378] sm:$0xf0]  ;;  %v6514_v6 = vld [vmem:[%s9865_s3 + $0x30c] sm:$0xf] }
 0x1e1   :  { %v3484_v26 = vpop.f32.mrf.mxu3  ;;  %v5632_v11 = vor.u32 %v6514_v6, %v5629_v61 }
 0x1e2   :  { %3727 = vmatpush.bf16.msra.mxu2 %v5760_v25  ;;  %v5920_v25 = vor.u32 %v6586_v21, %v5917_v23  ;;  %v6609_v23 = vld [vmem:[%s9867_s5] sm:$0xff]  ;;  %v6618_v26 = vld [vmem:[%s9867_s5 + $0x48] sm:$0xff] }
 0x1e3   :  { %3658 = vmatpush.bf16.msrb.mxu1 %v5948_v48  ;;  %v6614_v48 = vld [vmem:[%s9867_s5 + $0x28] sm:$0xff] }
 0x1e4   :  { %3699 = vmatpush.bf16.msra.mxu0 %v5536_v3  ;;  %v6613_v3 = vld [vmem:[%s9867_s5 + $0x20] sm:$0xff] }
 0x1e5   :  { %3728 = vmatmul.bf16.vlgmr.msra.gmra.mxu2 %v9219_v15  ;;  %v5965_v15 = vld [vmem:[%s9865_s3 + $0x5b8] sm:$0xf0] }
 0x1e6   :  { %v5968_v53 = vor.u32 %v6598_v46, %v5965_v15  ;;  %v5728_v46 = vor.u32 %v6538_v13, %v5725_v44  ;;  %v5709_v15 = vld [vmem:[%s9865_s3 + $0x3b8] sm:$0xf0]  ;;  %v6629_v13 = vld [vmem:[%s9867_s5 + $0xa0] sm:$0xff] }
 0x1e7   :  { %3659 = vmatpush.bf16.msrb.mxu1 %v5932_v14  ;;  %v6611_v14 = vld [vmem:[%s9867_s5 + $0x10] sm:$0xff] }
 0x1e8   :  { %3735 = vmatpush.bf16.msra.mxu3 %v5968_v53  ;;  %v3521_v50 = vpop.f32.mrf.mxu2  ;;  %3700 = vmatpush.bf16.msra.mxu0 %v5520_v17  ;;  %v5693_v53 = vld [vmem:[%s9865_s3 + $0x398] sm:$0xf0] }
 0x1e9   :  { %v3522_v41 = vadd.f32 %v3521_v50, %v2467_v38  ;;  %v3534_v22 = vpop.f32.mrf.mxu3  ;;  %v5696_v56 = vor.u32 %v6530_v19, %v5693_v53  ;;  %v6623_v50 = vld [vmem:[%s9867_s5 + $0x70] sm:$0xff] }
 0x1eb   :  { %3660 = vmatpush.bf16.msrb.mxu1 %v5916_v20  ;;  %v9709_v45 = vadd.f32 %v3534_v22, %v3522_v41  ;;  %v6620_v20 = vld [vmem:[%s9867_s5 + $0x58] sm:$0xff]  ;;  %v6631_v41 = vld [vmem:[%s9867_s5 + $0xb0] sm:$0xff] }
 0x1ec   :  { %3736 = vmatpush.bf16.msra.mxu3 %v5952_v63  ;;  %3701 = vmatpush.bf16.msra.mxu0 %v5504_v28  ;;  %v5664_v63 = vor.u32 %v6522_v55, %v5661_v0 }
 0x1ef   :  { %3661 = vmatpush.bf16.msrb.mxu1 %v5900_v9  ;;  %3702 = vmatmul.bf16.vlgmr.msra.gmra.mxu0 %v8742_v51  ;;  %v6534_v51 = vld [vmem:[%s9865_s3 + $0x3ac] sm:$0xf] }
 0x1f0   :  { %3737 = vmatpush.bf16.msra.mxu3 %v5936_v1  ;;  %v3523_v24 = vpop.f32.mrf.mxu2  ;;  %v5712_v47 = vor.u32 %v6534_v51, %v5709_v15  ;;  %4014 = vmatpush.bf16.msrb.mxu0 %v6616_v57  ;;  %v6624_v1 = vld [vmem:[%s9867_s5 + $0x78] sm:$0xff] }
 0x1f1   :  { %v3536_v49 = vpop.f32.mrf.mxu3  ;;  %v6632_v24 = vld [vmem:[%s9867_s5 + $0xb8] sm:$0xff] }
 0x1f2   :  { %4040 = vmatpush.bf16.msrb.mxu2 %v6632_v24  ;;  %v6628_v51 = vld [vmem:[%s9867_s5 + $0x98] sm:$0xff] }
 0x1f3   :  { %3662 = vmatpush.bf16.msrb.mxu1 %v5884_v40 }
 0x1f4   :  { %3738 = vmatpush.bf16.msra.mxu3 %v5920_v25  ;;  %4015 = vmatpush.bf16.msrb.mxu0 %v6615_v52 }
 0x1f6   :  { %3663 = vmatmul.bf16.vlgmr.msrb.gmra.mxu1 %v9379_v7  ;;  %4041 = vmatpush.bf16.msrb.mxu2 %v6631_v41 }
 0x1f7   :  { %3707 = vmatpush.bf16.msra.mxu1 %v5744_v43 }
 0x1f8   :  { %3739 = vmatpush.bf16.msra.mxu3 %v5904_v30  ;;  %4016 = vmatpush.bf16.msrb.mxu0 %v6614_v48  ;;  %v6640_v48 = vld [vmem:[%s9867_s5 + $0xf8] sm:$0xff] }
 0x1fb   :  { %3708 = vmatpush.bf16.msra.mxu1 %v5728_v46 }
 0x1fc   :  { %3740 = vmatpush.bf16.msra.mxu3 %v5888_v42  ;;  %4017 = vmatpush.bf16.msrb.mxu0 %v6613_v3  ;;  %v2468_v3 = vperm.slane %v9420_v54, 2 }
 0x1ff   :  { %3741 = vmatmul.bf16.vlgmr.msra.gmra.mxu3 %v9379_v7  ;;  %3709 = vmatpush.bf16.msra.mxu1 %v5712_v47  ;;  %v6526_v7 = vld [vmem:[%s9865_s3 + $0x36c] sm:$0xf] }
 0x200   :  { %v5680_v62 = vor.u32 %v6526_v7, %v5677_v58  ;;  %4018 = vmatpush.bf16.msrb.mxu0 %v6612_v10  ;;  %v6626_v7 = vld [vmem:[%s9867_s5 + $0x88] sm:$0xff]  ;;  %4053 = vmatpush.bf16.msrb.mxu3 %v6640_v48 }
 0x203   :  { %3710 = vmatpush.bf16.msra.mxu1 %v5696_v56 }
 0x204   :  { %4019 = vmatpush.bf16.msrb.mxu0 %v6611_v14  ;;  %4054 = vmatpush.bf16.msrb.mxu3 %v6639_v2 }
 0x207   :  { %3711 = vmatpush.bf16.msra.mxu1 %v5680_v62  ;;  %v6625_v62 = vld [vmem:[%s9867_s5 + $0x80] sm:$0xff] }
 0x208   :  { %4020 = vmatpush.bf16.msrb.mxu0 %v6610_v60 }
 0x20b   :  { %3712 = vmatpush.bf16.msra.mxu1 %v5664_v63  ;;  %v3495_v59 = vpop.f32.mrf.mxu0 }
 0x20c   :  { %4021 = vmatpush.bf16.msrb.mxu0 %v6609_v23  ;;  %v3496_v9 = vadd.f32 %v3495_v59, %v9645_v8  ;;  %v6630_v8 = vld [vmem:[%s9867_s5 + $0xa8] sm:$0xff] }
 0x20d   :  { %4042 = vmatpush.bf16.msrb.mxu2 %v6630_v8  ;;  %v6641_v8 = vld [vmem:[%s9868_s6] ss:$0 sm:$0xff] }
 0x20f   :  { %3713 = vmatpush.bf16.msra.mxu1 %v5648_v4  ;;  %v6638_v4 = vld [vmem:[%s9867_s5 + $0xe8] sm:$0xff] }
 0x210   :  { %4055 = vmatpush.bf16.msrb.mxu3 %v6638_v4 }
 0x211   :  { %4043 = vmatpush.bf16.msrb.mxu2 %v6629_v13 }
 0x212   :  { %v3573_v17 = vpop.f32.mrf.mxu2 }
 0x213   :  { %3714 = vmatpush.bf16.msra.mxu1 %v5632_v11  ;;  %v3497_v21 = vpop.f32.mrf.mxu0  ;;  %v6637_v11 = vld [vmem:[%s9867_s5 + $0xe0] sm:$0xff] }
 0x214   :  { %4056 = vmatpush.bf16.msrb.mxu3 %v6637_v11 }
 0x215   :  { %4044 = vmatpush.bf16.msrb.mxu2 %v6628_v51 }
 0x216   :  { %3715 = vmatmul.bf16.vlgmr.msra.gmra.mxu1 %v8885_v12  ;;  %v6622_v12 = vld [vmem:[%s9867_s5 + $0x68] sm:$0xff] }
 0x217   :  { %4027 = vmatpush.bf16.msrb.mxu1 %v6624_v1  ;;  %v6636_v1 = vld [vmem:[%s9867_s5 + $0xd8] sm:$0xff] }
 0x218   :  { %4057 = vmatpush.bf16.msrb.mxu3 %v6636_v1 }
 0x21a   :  { %v3575_v5 = vpop.f32.mrf.mxu2 }
 0x21b   :  { %4028 = vmatpush.bf16.msrb.mxu1 %v6623_v50  ;;  %v3547_v25 = vpop.f32.mrf.mxu0 }
 0x21c   :  { %v3548_v43 = vadd.f32 %v3547_v25, %v9709_v45  ;;  %v6627_v45 = vld [vmem:[%s9867_s5 + $0x90] sm:$0xff]  ;;  %v6633_v25 = vld [vmem:[%s9867_s5 + $0xc0] sm:$0xff] }
 0x21d   :  { %4045 = vmatpush.bf16.msrb.mxu2 %v6627_v45 }
 0x21f   :  { %4029 = vmatpush.bf16.msrb.mxu1 %v6622_v12  ;;  %v6634_v12 = vld [vmem:[%s9867_s5 + $0xc8] sm:$0xff] }
 0x221   :  { %4046 = vmatpush.bf16.msrb.mxu2 %v6626_v7 }
 0x223   :  { %4030 = vmatpush.bf16.msrb.mxu1 %v6621_v18  ;;  %v3549_v28 = vpop.f32.mrf.mxu0 }
 0x225   :  { %4047 = vmatpush.bf16.msrb.mxu2 %v6625_v62 }
 0x227   :  { %4031 = vmatpush.bf16.msrb.mxu1 %v6620_v20 }
 0x228   :  { %v9792_v16 = vpop.f32.mrf.mxu2 }
 0x22b   :  { %4032 = vmatpush.bf16.msrb.mxu1 %v6619_v27 }
 0x22c   :  { %v3599_v38 = vpop.f32.mrf.mxu0 }
 0x22d   :  { %v3600_v61 = vadd.f32 %v3599_v38, %v2468_v3 }
 0x22f   :  { %4033 = vmatpush.bf16.msrb.mxu1 %v6618_v26 }
 0x230   :  { %v3627_v35 = vpop.f32.mrf.mxu2 }
 0x233   :  { %4034 = vmatpush.bf16.msrb.mxu1 %v6617_v29  ;;  %v3508_v30 = vpop.f32.mrf.mxu1  ;;  %v2469_v29 = vperm.slane %v9420_v54, 3 }
 0x234   :  { %v3509_v31 = vadd.f32 %v3508_v30, %v3496_v9  ;;  %v3601_v33 = vpop.f32.mrf.mxu0 }
 0x236   :  { %v3746_v32 = vmax.f32 %v3509_v31, 0.0 }
 0x238   :  { %v3750_v34 = vpack.c.bf16 %v3746_v32, %v3746_v32 }
 0x23a   :  { %v3586_v36 = vpop.f32.mrf.mxu3  ;;  %4022 = vmatmul.bf16.vlgmr.msrb.gmra.mxu0 %v3750_v34 }
 0x23b   :  { %v3510_v40 = vpop.f32.mrf.mxu1 }
 0x242   :  { %v3588_v42 = vpop.f32.mrf.mxu3 }
 0x243   :  { %v3560_v44 = vpop.f32.mrf.mxu1 }
 0x244   :  { %v3561_v46 = vadd.f32 %v3560_v44, %v3548_v43 }
 0x246   :  { %v3574_v15 = vadd.f32 %v3573_v17, %v3561_v46  ;;  %v6635_v17 = vld [vmem:[%s9867_s5 + $0xd0] sm:$0xff] }
 0x247   :  { %4058 = vmatpush.bf16.msrb.mxu3 %v6635_v17 }
 0x248   :  { %v9804_v37 = vpop.f32.mrf.mxu2  ;;  %v3587_v47 = vadd.f32 %v3586_v36, %v3574_v15 }
 0x249   :  { %v3678_v35 = vadd.f32 %v9804_v37, %v2469_v29 }
 0x24a   :  { %v3638_v49 = vpop.f32.mrf.mxu3  ;;  %v3747_v19 = vmax.f32 %v3587_v47, 0.0 }
 0x24b   :  { %v3562_v53 = vpop.f32.mrf.mxu1  ;;  %4059 = vmatpush.bf16.msrb.mxu3 %v6634_v12 }
 0x24c   :  { %v3751_v57 = vpack.c.bf16 %v3747_v19, %v3747_v19  ;;  %v3651_v56 = vpop.f32.mrf.mxu0 }
 0x24e   :  { %4035 = vmatmul.bf16.vlgmr.msrb.gmra.mxu1 %v3751_v57 }
 0x24f   :  { %4060 = vmatpush.bf16.msrb.mxu3 %v6633_v25 }
 0x250   :  { %v3679_v22 = vpop.f32.mrf.mxu2 }
 0x252   :  { %v3640_v58 = vpop.f32.mrf.mxu3 }
 0x253   :  { %v3612_v52 = vpop.f32.mrf.mxu1 }
 0x254   :  { %v3653_v55 = vpop.f32.mrf.mxu0  ;;  %v3613_v14 = vadd.f32 %v3612_v52, %v3600_v61 }
 0x256   :  { %v3626_v59 = vadd.f32 %v9792_v16, %v3613_v14 }
 0x258   :  { %v3639_v50 = vadd.f32 %v3638_v49, %v3626_v59 }
 0x25a   :  { %v3652_v21 = vadd.f32 %v3651_v56, %v3639_v50 }
 0x25b   :  { %v3690_v63 = vpop.f32.mrf.mxu3  ;;  %v3614_v39 = vpop.f32.mrf.mxu1 }
 0x25c   :  { %v3691_v38 = vadd.f32 %v3690_v63, %v3678_v35 }
 0x263   :  { %v3692_v10 = vpop.f32.mrf.mxu3 }
 0x268   :  { %v3729_v0 = vpop.f32.mrf.mxu2 }
 0x26c   :  { %v3703_v60 = vpop.f32.mrf.mxu0 }
 0x26d   :  { %v3704_v9 = vadd.f32 %v3703_v60, %v3691_v38 }
 0x270   :  { %v3731_v6 = vpop.f32.mrf.mxu2 }
 0x273   :  { %v3664_v23 = vpop.f32.mrf.mxu1 }
 0x274   :  { %v3665_v18 = vadd.f32 %v3664_v23, %v3652_v21  ;;  %v3705_v5 = vpop.f32.mrf.mxu0 }
 0x276   :  { %v3748_v20 = vmax.f32 %v3665_v18, 0.0 }
 0x278   :  { %v3752_v27 = vpack.c.bf16 %v3748_v20, %v3748_v20 }
 0x27a   :  { %4048 = vmatmul.bf16.vlgmr.msrb.gmra.mxu2 %v3752_v27 }
 0x27b   :  { %v3666_v28 = vpop.f32.mrf.mxu1 }
 0x282   :  { %v3742_v16 = vpop.f32.mrf.mxu3 }
 0x28a   :  { %v3744_v26 = vpop.f32.mrf.mxu3 }
 0x293   :  { %v3716_v30 = vpop.f32.mrf.mxu1 }
 0x294   :  { %v3717_v31 = vadd.f32 %v3716_v30, %v3704_v9 }
 0x296   :  { %v3730_v32 = vadd.f32 %v3729_v0, %v3717_v31 }
 0x298   :  { %v3743_v33 = vadd.f32 %v3742_v16, %v3730_v32 }
 0x29a   :  { %v3749_v24 = vmax.f32 %v3743_v33, 0.0 }
 0x29b   :  { %v3718_v34 = vpop.f32.mrf.mxu1 }
 0x29c   :  { %v3753_v36 = vpack.c.bf16 %v3749_v24, %v3749_v24 }
 0x29e   :  { %4061 = vmatmul.bf16.vlgmr.msrb.gmra.mxu3 %v3753_v36 }
 0x2b7   :  { %v4023_v40 = vpop.f32.mrf.mxu0 }
 0x2b8   :  { %v4024_v42 = vadd.f32 %v6641_v8, %v4023_v40 }
 0x2bf   :  { %v4025_v41 = vpop.f32.mrf.mxu0 }
 0x2cb   :  { %v4036_v54 = vpop.f32.mrf.mxu1 }
 0x2cc   :  { %v4037_v43 = vadd.f32 %v4036_v54, %v4024_v42 }
 0x2d3   :  { %v4038_v37 = vpop.f32.mrf.mxu1 }
 0x2fd   :  { %v4049_v22 = vpop.f32.mrf.mxu2 }
 0x2fe   :  { %v4050_v44 = vadd.f32 %v4049_v22, %v4037_v43 }
 0x305   :  { %v4051_v13 = vpop.f32.mrf.mxu2 }
 0x321   :  { %v4062_v46 = vpop.f32.mrf.mxu3 }
 0x322   :  { %v4063_v51 = vadd.f32 %v4062_v46, %v4050_v44 }
 0x324   :  { %4066 = vmax.xlane.f32.xlu0 %v4063_v51 }
 0x329   :  { %v4064_v15 = vpop.f32.mrf.mxu3 }
 0x397   :  { %v4067_v47 = vpop.xlane.xlu0 %4066 }
 0x398   :  { %v4068_v49 = vsub.f32 %v4063_v51, %v4067_v47 }
 0x39a   :  { %v4069_v19 = vmul.f32 1.442695, %v4068_v49 }
 0x39c   :  { %6654 = vpow2.f32 %v4069_v19 }
 0x3a2   :  { %v6655_v53 = vpop.eup %6654 }
 0x3a3   :  { %4071 = vadd.xlane.f32.xlu0 %v6655_v53 }
 0x416   :  { %v4072_v45 = vpop.xlane.xlu0 %4071 }
 0x417   :  { %6656 = vlog2.f32 %v4072_v45 }
 0x41d   :  { %v6657_v57 = vpop.eup %6656 }
 0x41e   :  { %v4074_v56 = vmul.f32 0.6931472, %v6657_v57 }
 0x420   :  { %v4075_v7 = vsub.f32 %v4068_v49, %v4074_v56 }
 0x422   :  { %4076 = vst [vmem:[%s9869_s7] sm:$0xff] %v4075_v7 }

// kernel: _bert_arch_head_jit.1
= control target key start
LH: loop header
LB: loop body
LE: loop exit
PB: predicated region body
PF: predicated region fallthrough
CT: control target
= control target key end

     0   :  { %s9862_s1 = inlined_call_operand.vmem [shape: bf16[768,768], index: 1, kind: input, shape index: {}]   ;;  %s9863_s0 = inlined_call_operand.vmem [shape: bf16[8,768], index: 0, kind: input, shape index: {}]   ;;  %s9864_s2 = inlined_call_operand.vmem [shape: f32[1,768], index: 2, kind: input, shape index: {}]   ;;  %s9865_s3 = inlined_call_operand.vmem [shape: bf16[768,512], index: 3, kind: input, shape index: {}]   ;;  %s9866_s4 = inlined_call_operand.vmem [shape: f32[1,512], index: 4, kind: input, shape index: {}]   ;;  %s9867_s5 = inlined_call_operand.vmem [shape: bf16[512,128], index: 5, kind: input, shape index: {}]   ;;  %s9868_s6 = inlined_call_operand.vmem [shape: f32[1,128], index: 6, kind: input, shape index: {}]   ;;  %s9869_s7 = inlined_call_operand.vmem [shape: f32[8,128], index: 7, kind: output, shape index: {}]  }
   0x1   :  { %v4251_v0 = vld [vmem:[%s9862_s1 + $0x150] sm:$0xf]  ;;  %v6174_v1 = vld [vmem:[%s9862_s1 + $0x164] sm:$0xf0]  ;;  %v4227_v11 = vld [vmem:[%s9862_s1 + $0x120] sm:$0xf] }
   0x2   :  { %v4443_v2 = vld [vmem:[%s9862_s1 + $0x2d0] sm:$0xf]  ;;  %v4252_v3 = vor.u32 %v6174_v1, %v4251_v0  ;;  %v6222_v4 = vld [vmem:[%s9862_s1 + $0x2e4] sm:$0xf0]  ;;  %v6168_v13 = vld [vmem:[%s9862_s1 + $0x134] sm:$0xf0] }
   0x3   :  { %v4635_v5 = vld [vmem:[%s9862_s1 + $0x450] sm:$0xf]  ;;  %v6270_v6 = vld [vmem:[%s9862_s1 + $0x464] sm:$0xf0]  ;;  %v4444_v7 = vor.u32 %v6222_v4, %v4443_v2  ;;  %v4419_v14 = vld [vmem:[%s9862_s1 + $0x2a0] sm:$0xf]  ;;  %v4228_v16 = vor.u32 %v6168_v13, %v4227_v11 }
   0x4   :  { %v4636_v8 = vor.u32 %v6270_v6, %v4635_v5  ;;  %v4827_v9 = vld [vmem:[%s9862_s1 + $0x5d0] sm:$0xf]  ;;  %v6318_v10 = vld [vmem:[%s9862_s1 + $0x5e4] sm:$0xf0]  ;;  %1792 = vmatpush.bf16.msra.mxu0 %v4252_v3  ;;  %v6216_v15 = vld [vmem:[%s9862_s1 + $0x2b4] sm:$0xf0] }
   0x5   :  { %v4828_v12 = vor.u32 %v6318_v10, %v4827_v9  ;;  %1805 = vmatpush.bf16.msra.mxu1 %v4444_v7  ;;  %v4420_v17 = vor.u32 %v6216_v15, %v4419_v14  ;;  %v4611_v18 = vld [vmem:[%s9862_s1 + $0x420] sm:$0xf]  ;;  %v6264_v19 = vld [vmem:[%s9862_s1 + $0x434] sm:$0xf0]  ;;  %v4203_v23 = vld [vmem:[%s9862_s1 + $0xf0] sm:$0xf] }
   0x6   :  { %1818 = vmatpush.bf16.msra.mxu2 %v4636_v8  ;;  %v4803_v20 = vld [vmem:[%s9862_s1 + $0x5a0] sm:$0xf]  ;;  %v4612_v21 = vor.u32 %v6264_v19, %v4611_v18  ;;  %v6312_v22 = vld [vmem:[%s9862_s1 + $0x5b4] sm:$0xf0]  ;;  %v6162_v24 = vld [vmem:[%s9862_s1 + $0x104] sm:$0xf0] }
   0x7   :  { %1831 = vmatpush.bf16.msra.mxu3 %v4828_v12  ;;  %v4804_v25 = vor.u32 %v6312_v22, %v4803_v20  ;;  %v4395_v26 = vld [vmem:[%s9862_s1 + $0x270] sm:$0xf]  ;;  %v6210_v27 = vld [vmem:[%s9862_s1 + $0x284] sm:$0xf0]  ;;  %v4204_v29 = vor.u32 %v6162_v24, %v4203_v23  ;;  %v4179_v35 = vld [vmem:[%s9862_s1 + $0xc0] sm:$0xf] }
   0x8   :  { %v4587_v28 = vld [vmem:[%s9862_s1 + $0x3f0] sm:$0xf]  ;;  %1793 = vmatpush.bf16.msra.mxu0 %v4228_v16  ;;  %v6258_v30 = vld [vmem:[%s9862_s1 + $0x404] sm:$0xf0]  ;;  %v4396_v33 = vor.u32 %v6210_v27, %v4395_v26  ;;  %v6156_v36 = vld [vmem:[%s9862_s1 + $0xd4] sm:$0xf0] }
   0x9   :  { %v4779_v31 = vld [vmem:[%s9862_s1 + $0x570] sm:$0xf]  ;;  %v6306_v32 = vld [vmem:[%s9862_s1 + $0x584] sm:$0xf0]  ;;  %1806 = vmatpush.bf16.msra.mxu1 %v4420_v17  ;;  %v4588_v34 = vor.u32 %v6258_v30, %v4587_v28  ;;  %v4371_v37 = vld [vmem:[%s9862_s1 + $0x240] sm:$0xf]  ;;  %v4180_v44 = vor.u32 %v6156_v36, %v4179_v35 }
   0xa   :  { %1819 = vmatpush.bf16.msra.mxu2 %v4612_v21  ;;  %v4780_v38 = vor.u32 %v6306_v32, %v4779_v31  ;;  %v6204_v39 = vld [vmem:[%s9862_s1 + $0x254] sm:$0xf0]  ;;  %v4563_v40 = vld [vmem:[%s9862_s1 + $0x3c0] sm:$0xf]  ;;  %v4155_v47 = vld [vmem:[%s9862_s1 + $0x90] sm:$0xf] }
   0xb   :  { %1832 = vmatpush.bf16.msra.mxu3 %v4804_v25  ;;  %v6252_v41 = vld [vmem:[%s9862_s1 + $0x3d4] sm:$0xf0]  ;;  %v4755_v42 = vld [vmem:[%s9862_s1 + $0x540] sm:$0xf]  ;;  %v4372_v45 = vor.u32 %v6204_v39, %v4371_v37  ;;  %v6150_v48 = vld [vmem:[%s9862_s1 + $0xa4] sm:$0xf0] }
   0xc   :  { %v6300_v43 = vld [vmem:[%s9862_s1 + $0x554] sm:$0xf0]  ;;  %1794 = vmatpush.bf16.msra.mxu0 %v4204_v29  ;;  %v4564_v46 = vor.u32 %v6252_v41, %v4563_v40  ;;  %v4347_v49 = vld [vmem:[%s9862_s1 + $0x210] sm:$0xf]  ;;  %v6198_v51 = vld [vmem:[%s9862_s1 + $0x224] sm:$0xf0]  ;;  %v4156_v56 = vor.u32 %v6150_v48, %v4155_v47 }
   0xd   :  { %1807 = vmatpush.bf16.msra.mxu1 %v4396_v33  ;;  %v4756_v50 = vor.u32 %v6300_v43, %v4755_v42  ;;  %v4539_v52 = vld [vmem:[%s9862_s1 + $0x390] sm:$0xf]  ;;  %v6246_v53 = vld [vmem:[%s9862_s1 + $0x3a4] sm:$0xf0]  ;;  %v4348_v57 = vor.u32 %v6198_v51, %v4347_v49  ;;  %v4131_v59 = vld [vmem:[%s9862_s1 + $0x60] sm:$0xf] }
   0xe   :  { %1820 = vmatpush.bf16.msra.mxu2 %v4588_v34  ;;  %v4731_v54 = vld [vmem:[%s9862_s1 + $0x510] sm:$0xf]  ;;  %v6294_v55 = vld [vmem:[%s9862_s1 + $0x524] sm:$0xf0]  ;;  %v4540_v58 = vor.u32 %v6246_v53, %v4539_v52  ;;  %v6144_v60 = vld [vmem:[%s9862_s1 + $0x74] sm:$0xf0] }
   0xf   :  { %1833 = vmatpush.bf16.msra.mxu3 %v4780_v38  ;;  %v4323_v61 = vld [vmem:[%s9862_s1 + $0x1e0] sm:$0xf]  ;;  %v4732_v62 = vor.u32 %v6294_v55, %v4731_v54  ;;  %v6192_v63 = vld [vmem:[%s9862_s1 + $0x1f4] sm:$0xf0]  ;;  %v4132_v4 = vor.u32 %v6144_v60, %v4131_v59  ;;  %v4107_v7 = vld [vmem:[%s9862_s1 + $0x30] sm:$0xf] }
  0x10   :  { %1795 = vmatpush.bf16.msra.mxu0 %v4180_v44  ;;  %v4515_v0 = vld [vmem:[%s9862_s1 + $0x360] sm:$0xf]  ;;  %v6240_v1 = vld [vmem:[%s9862_s1 + $0x374] sm:$0xf0]  ;;  %v4324_v5 = vor.u32 %v6192_v63, %v4323_v61  ;;  %v6138_v8 = vld [vmem:[%s9862_s1 + $0x44] sm:$0xf0] }
  0x11   :  { %1808 = vmatpush.bf16.msra.mxu1 %v4372_v45  ;;  %v4707_v2 = vld [vmem:[%s9862_s1 + $0x4e0] sm:$0xf]  ;;  %v6288_v3 = vld [vmem:[%s9862_s1 + $0x4f4] sm:$0xf0]  ;;  %v4516_v6 = vor.u32 %v6240_v1, %v4515_v0  ;;  %v4299_v9 = vld [vmem:[%s9862_s1 + $0x1b0] sm:$0xf]  ;;  %v4108_v16 = vor.u32 %v6138_v8, %v4107_v7 }
  0x12   :  { %1821 = vmatpush.bf16.msra.mxu2 %v4564_v46  ;;  %v4708_v10 = vor.u32 %v6288_v3, %v4707_v2  ;;  %v6186_v11 = vld [vmem:[%s9862_s1 + $0x1c4] sm:$0xf0]  ;;  %v4491_v12 = vld [vmem:[%s9862_s1 + $0x330] sm:$0xf]  ;;  %v4083_v17 = vld [vmem:[%s9862_s1] sm:$0xf] }
  0x13   :  { %1834 = vmatpush.bf16.msra.mxu3 %v4756_v50  ;;  %v6234_v13 = vld [vmem:[%s9862_s1 + $0x344] sm:$0xf0]  ;;  %v4683_v14 = vld [vmem:[%s9862_s1 + $0x4b0] sm:$0xf]  ;;  %v6132_v18 = vld [vmem:[%s9862_s1 + $0x14] sm:$0xf0]  ;;  %v4300_v19 = vor.u32 %v6186_v11, %v4299_v9 }
  0x14   :  { %1796 = vmatpush.bf16.msra.mxu0 %v4156_v56  ;;  %v6282_v15 = vld [vmem:[%s9862_s1 + $0x4c4] sm:$0xf0]  ;;  %v4492_v20 = vor.u32 %v6234_v13, %v4491_v12  ;;  %v4275_v21 = vld [vmem:[%s9862_s1 + $0x180] sm:$0xf]  ;;  %v6180_v22 = vld [vmem:[%s9862_s1 + $0x194] sm:$0xf0]  ;;  %v4084_v31 = vor.u32 %v6132_v18, %v4083_v17 }
  0x15   :  { %1809 = vmatpush.bf16.msra.mxu1 %v4348_v57  ;;  %v4467_v23 = vld [vmem:[%s9862_s1 + $0x300] sm:$0xf]  ;;  %v4684_v24 = vor.u32 %v6282_v15, %v4683_v14  ;;  %v6228_v25 = vld [vmem:[%s9862_s1 + $0x314] sm:$0xf0]  ;;  %v5019_v28 = vld [vmem:[%s9862_s1 + $0x750] sm:$0xf]  ;;  %v4276_v35 = vor.u32 %v6180_v22, %v4275_v21 }
  0x16   :  { %1822 = vmatpush.bf16.msra.mxu2 %v4540_v58  ;;  %v4659_v26 = vld [vmem:[%s9862_s1 + $0x480] sm:$0xf]  ;;  %v6276_v27 = vld [vmem:[%s9862_s1 + $0x494] sm:$0xf0]  ;;  %v6366_v29 = vld [vmem:[%s9862_s1 + $0x764] sm:$0xf0]  ;;  %v4468_v36 = vor.u32 %v6228_v25, %v4467_v23 }
  0x17   :  { %1835 = vmatpush.bf16.msra.mxu3 %v4732_v62  ;;  %v5211_v30 = vld [vmem:[%s9862_s1 + $0x8d0] sm:$0xf]  ;;  %v6414_v32 = vld [vmem:[%s9862_s1 + $0x8e4] sm:$0xf0]  ;;  %v6171_v33 = vld [vmem:[%s9862_s1 + $0x154] sm:$0xf]  ;;  %v4660_v39 = vor.u32 %v6276_v27, %v4659_v26  ;;  %v5020_v40 = vor.u32 %v6366_v29, %v5019_v28 }
  0x18   :  { %1797 = vmatpush.bf16.msra.mxu0 %v4132_v4  ;;  %v4253_v34 = vld [vmem:[%s9862_s1 + $0x168] sm:$0xf0]  ;;  %v6219_v37 = vld [vmem:[%s9862_s1 + $0x2d4] sm:$0xf]  ;;  %v5212_v41 = vor.u32 %v6414_v32, %v5211_v30  ;;  %v4995_v43 = vld [vmem:[%s9862_s1 + $0x720] sm:$0xf] }
  0x19   :  { %1810 = vmatpush.bf16.msra.mxu1 %v4324_v5  ;;  %v4445_v38 = vld [vmem:[%s9862_s1 + $0x2e8] sm:$0xf0]  ;;  %v4256_v42 = vor.u32 %v6171_v33, %v4253_v34  ;;  %v6360_v44 = vld [vmem:[%s9862_s1 + $0x734] sm:$0xf0]  ;;  %v5187_v45 = vld [vmem:[%s9862_s1 + $0x8a0] sm:$0xf] }
  0x1a   :  { %1823 = vmatpush.bf16.msra.mxu2 %v4516_v6  ;;  %v4448_v46 = vor.u32 %v6219_v37, %v4445_v38  ;;  %v6408_v47 = vld [vmem:[%s9862_s1 + $0x8b4] sm:$0xf0]  ;;  %v6165_v48 = vld [vmem:[%s9862_s1 + $0x124] sm:$0xf]  ;;  %v4229_v49 = vld [vmem:[%s9862_s1 + $0x138] sm:$0xf0]  ;;  %v4996_v52 = vor.u32 %v6360_v44, %v4995_v43 }
  0x1b   :  { %1836 = vmatpush.bf16.msra.mxu3 %v4708_v10  ;;  %v6213_v50 = vld [vmem:[%s9862_s1 + $0x2a4] sm:$0xf]  ;;  %v4421_v51 = vld [vmem:[%s9862_s1 + $0x2b8] sm:$0xf0]  ;;  %v4971_v53 = vld [vmem:[%s9862_s1 + $0x6f0] sm:$0xf]  ;;  %v5188_v54 = vor.u32 %v6408_v47, %v5187_v45  ;;  %v4232_v55 = vor.u32 %v6165_v48, %v4229_v49 }
  0x1c   :  { %1798 = vmatpush.bf16.msra.mxu0 %v4108_v16  ;;  %v6354_v56 = vld [vmem:[%s9862_s1 + $0x704] sm:$0xf0]  ;;  %v5163_v57 = vld [vmem:[%s9862_s1 + $0x870] sm:$0xf]  ;;  %v4424_v59 = vor.u32 %v6213_v50, %v4421_v51  ;;  %v6159_v60 = vld [vmem:[%s9862_s1 + $0xf4] sm:$0xf] }
  0x1d   :  { %1811 = vmatpush.bf16.msra.mxu1 %v4300_v19  ;;  %v6402_v58 = vld [vmem:[%s9862_s1 + $0x884] sm:$0xf0]  ;;  %v4205_v61 = vld [vmem:[%s9862_s1 + $0x108] sm:$0xf0]  ;;  %v6207_v62 = vld [vmem:[%s9862_s1 + $0x274] sm:$0xf]  ;;  %v4972_v0 = vor.u32 %v6354_v56, %v4971_v53 }
  0x1e   :  { %1824 = vmatpush.bf16.msra.mxu2 %v4492_v20  ;;  %v4397_v63 = vld [vmem:[%s9862_s1 + $0x288] sm:$0xf0]  ;;  %v5164_v1 = vor.u32 %v6402_v58, %v5163_v57  ;;  %v26_v3 = vld [vmem:[%s9863_s0] sm:$0xff]  ;;  %v4208_v4 = vor.u32 %v6159_v60, %v4205_v61  ;;  %v6348_v6 = vld [vmem:[%s9862_s1 + $0x6d4] sm:$0xf0] }
  0x1f   :  { %1837 = vmatpush.bf16.msra.mxu3 %v4684_v24  ;;  %v27_v2 = vld [vmem:[%s9863_s0 + $0x8] sm:$0xff]  ;;  %v4947_v5 = vld [vmem:[%s9862_s1 + $0x6c0] sm:$0xf]  ;;  %v334_v9 = vunpack.c.l.b16 %v26_v3  ;;  %v4400_v11 = vor.u32 %v6207_v62, %v4397_v63  ;;  %v6396_v12 = vld [vmem:[%s9862_s1 + $0x854] sm:$0xf0]  ;;  %v335_v15 = vunpack.c.h.b16 %v26_v3 }
  0x20   :  { %1799 = vmatpush.bf16.msra.mxu0 %v4084_v31  ;;  %v5139_v7 = vld [vmem:[%s9862_s1 + $0x840] sm:$0xf]  ;;  %v336_v8 = vunpack.c.l.b16 %v27_v2  ;;  %v337_v10 = vunpack.c.h.b16 %v27_v2  ;;  %v6153_v13 = vld [vmem:[%s9862_s1 + $0xc4] sm:$0xf]  ;;  %v4181_v14 = vld [vmem:[%s9862_s1 + $0xd8] sm:$0xf0]  ;;  %v4948_v21 = vor.u32 %v6348_v6, %v4947_v5 }
  0x21   :  { %1812 = vmatpush.bf16.msra.mxu1 %v4276_v35  ;;  %v6201_v16 = vld [vmem:[%s9862_s1 + $0x244] sm:$0xf]  ;;  %v4373_v17 = vld [vmem:[%s9862_s1 + $0x258] sm:$0xf0]  ;;  %v6995_v19 = vpack.c.b16 %v334_v9, %v334_v9  ;;  %v6999_v22 = vpack.c.b16 %v335_v15, %v335_v15  ;;  %v5140_v23 = vor.u32 %v6396_v12, %v5139_v7  ;;  %v4184_v24 = vor.u32 %v6153_v13, %v4181_v14  ;;  %v4923_v25 = vld [vmem:[%s9862_s1 + $0x690] sm:$0xf] }
  0x22   :  { %1825 = vmatpush.bf16.msra.mxu2 %v4468_v36  ;;  %v6993_v18 = vpack.c.b16 %v336_v8, %v336_v8  ;;  %v6997_v20 = vpack.c.b16 %v337_v10, %v337_v10  ;;  %v6342_v26 = vld [vmem:[%s9862_s1 + $0x6a4] sm:$0xf0]  ;;  %v5115_v27 = vld [vmem:[%s9862_s1 + $0x810] sm:$0xf]  ;;  %v4376_v28 = vor.u32 %v6201_v16, %v4373_v17  ;;  %v6147_v30 = vld [vmem:[%s9862_s1 + $0x94] sm:$0xf] }
  0x23   :  { %1838 = vmatpush.bf16.msra.mxu3 %v4660_v39  ;;  %v6390_v29 = vld [vmem:[%s9862_s1 + $0x824] sm:$0xf0]  ;;  %v4157_v31 = vld [vmem:[%s9862_s1 + $0xa8] sm:$0xf0]  ;;  %v6195_v32 = vld [vmem:[%s9862_s1 + $0x214] sm:$0xf]  ;;  %1800 = vmatmul.bf16.vlgmr.msra.gmra.mxu0 %v6995_v19  ;;  %v4924_v34 = vor.u32 %v6342_v26, %v4923_v25 }
  0x24   :  { %1844 = vmatpush.bf16.msrb.mxu0 %v5020_v40  ;;  %v4349_v33 = vld [vmem:[%s9862_s1 + $0x228] sm:$0xf0]  ;;  %1813 = vmatmul.bf16.vlgmr.msra.gmra.mxu1 %v6999_v22  ;;  %v5116_v35 = vor.u32 %v6390_v29, %v5115_v27  ;;  %v4160_v36 = vor.u32 %v6147_v30, %v4157_v31  ;;  %v4899_v37 = vld [vmem:[%s9862_s1 + $0x660] sm:$0xf]  ;;  %v6336_v38 = vld [vmem:[%s9862_s1 + $0x674] sm:$0xf0] }
  0x25   :  { %1857 = vmatpush.bf16.msrb.mxu1 %v5212_v41  ;;  %1826 = vmatmul.bf16.vlgmr.msra.gmra.mxu2 %v6993_v18  ;;  %v5091_v39 = vld [vmem:[%s9862_s1 + $0x7e0] sm:$0xf]  ;;  %v4352_v40 = vor.u32 %v6195_v32, %v4349_v33  ;;  %v6384_v41 = vld [vmem:[%s9862_s1 + $0x7f4] sm:$0xf0]  ;;  %v4133_v43 = vld [vmem:[%s9862_s1 + $0x78] sm:$0xf0] }
  0x26   :  { %1870 = vmatpush.bf16.msrb.mxu2 %v4256_v42  ;;  %1839 = vmatmul.bf16.vlgmr.msra.gmra.mxu3 %v6997_v20  ;;  %v6141_v42 = vld [vmem:[%s9862_s1 + $0x64] sm:$0xf]  ;;  %v4325_v45 = vld [vmem:[%s9862_s1 + $0x1f8] sm:$0xf0]  ;;  %v5092_v47 = vor.u32 %v6384_v41, %v5091_v39  ;;  %v4875_v49 = vld [vmem:[%s9862_s1 + $0x630] sm:$0xf] }
  0x27   :  { %1883 = vmatpush.bf16.msrb.mxu3 %v4448_v46  ;;  %v6189_v44 = vld [vmem:[%s9862_s1 + $0x1e4] sm:$0xf]  ;;  %v4900_v46 = vor.u32 %v6336_v38, %v4899_v37  ;;  %v4136_v48 = vor.u32 %v6141_v42, %v4133_v43  ;;  %v6330_v50 = vld [vmem:[%s9862_s1 + $0x644] sm:$0xf0]  ;;  %v5067_v51 = vld [vmem:[%s9862_s1 + $0x7b0] sm:$0xf] }
  0x28   :  { %1845 = vmatpush.bf16.msrb.mxu0 %v4996_v52  ;;  %v4328_v52 = vor.u32 %v6189_v44, %v4325_v45  ;;  %v6378_v53 = vld [vmem:[%s9862_s1 + $0x7c4] sm:$0xf0]  ;;  %v6183_v56 = vld [vmem:[%s9862_s1 + $0x1b4] sm:$0xf]  ;;  %v4301_v57 = vld [vmem:[%s9862_s1 + $0x1c8] sm:$0xf0]  ;;  %v4876_v58 = vor.u32 %v6330_v50, %v4875_v49 }
  0x29   :  { %1858 = vmatpush.bf16.msrb.mxu1 %v5188_v54  ;;  %v6135_v54 = vld [vmem:[%s9862_s1 + $0x34] sm:$0xf]  ;;  %v6324_v60 = vld [vmem:[%s9862_s1 + $0x614] sm:$0xf0]  ;;  %v5043_v61 = vld [vmem:[%s9862_s1 + $0x780] sm:$0xf]  ;;  %v5068_v62 = vor.u32 %v6378_v53, %v5067_v51  ;;  %v4304_v3 = vor.u32 %v6183_v56, %v4301_v57 }
  0x2a   :  { %1871 = vmatpush.bf16.msrb.mxu2 %v4232_v55  ;;  %v4109_v55 = vld [vmem:[%s9862_s1 + $0x48] sm:$0xf0]  ;;  %v28_v2 = vld [vmem:[%s9863_s0 + $0x10] sm:$0xff]  ;;  %v6177_v5 = vld [vmem:[%s9862_s1 + $0x184] sm:$0xf] }
  0x2b   :  { %1884 = vmatpush.bf16.msrb.mxu3 %v4424_v59  ;;  %v4851_v59 = vld [vmem:[%s9862_s1 + $0x600] sm:$0xf]  ;;  %v4112_v63 = vor.u32 %v6135_v54, %v4109_v55  ;;  %v4277_v6 = vld [vmem:[%s9862_s1 + $0x198] sm:$0xf0]  ;;  %v6267_v7 = vld [vmem:[%s9862_s1 + $0x454] sm:$0xf]  ;;  %v338_v14 = vunpack.c.l.b16 %v28_v2 }
  0x2c   :  { %1846 = vmatpush.bf16.msrb.mxu0 %v4972_v0  ;;  %v6372_v0 = vld [vmem:[%s9862_s1 + $0x794] sm:$0xf0]  ;;  %v4637_v8 = vld [vmem:[%s9862_s1 + $0x468] sm:$0xf0]  ;;  %v6315_v9 = vld [vmem:[%s9862_s1 + $0x5d4] sm:$0xf]  ;;  %v4852_v10 = vor.u32 %v6324_v60, %v4851_v59 }
  0x2d   :  { %1859 = vmatpush.bf16.msrb.mxu1 %v5164_v1  ;;  %v6129_v1 = vld [vmem:[%s9862_s1 + $0x4] sm:$0xf]  ;;  %v6363_v12 = vld [vmem:[%s9862_s1 + $0x754] sm:$0xf]  ;;  %v5021_v13 = vld [vmem:[%s9862_s1 + $0x768] sm:$0xf0]  ;;  %v5044_v15 = vor.u32 %v6372_v0, %v5043_v61  ;;  %v4640_v25 = vor.u32 %v6267_v7, %v4637_v8 }
  0x2e   :  { %1872 = vmatpush.bf16.msrb.mxu2 %v4208_v4  ;;  %v4085_v4 = vld [vmem:[%s9862_s1 + $0x18] sm:$0xf0]  ;;  %v6411_v17 = vld [vmem:[%s9862_s1 + $0x8d4] sm:$0xf]  ;;  %v5024_v27 = vor.u32 %v6363_v12, %v5021_v13  ;;  %v6309_v30 = vld [vmem:[%s9862_s1 + $0x5a4] sm:$0xf] }
  0x2f   :  { %1885 = vmatpush.bf16.msrb.mxu3 %v4400_v11  ;;  %v4829_v11 = vld [vmem:[%s9862_s1 + $0x5e8] sm:$0xf0]  ;;  %v4088_v16 = vor.u32 %v6129_v1, %v4085_v4  ;;  %v4613_v29 = vld [vmem:[%s9862_s1 + $0x438] sm:$0xf0]  ;;  %v6357_v33 = vld [vmem:[%s9862_s1 + $0x724] sm:$0xf] }
  0x30   :  { %1847 = vmatpush.bf16.msrb.mxu0 %v4948_v21  ;;  %v5213_v21 = vld [vmem:[%s9862_s1 + $0x8e8] sm:$0xf0]  ;;  %v4832_v26 = vor.u32 %v6315_v9, %v4829_v11  ;;  %v4805_v32 = vld [vmem:[%s9862_s1 + $0x5b8] sm:$0xf0]  ;;  %v6255_v42 = vld [vmem:[%s9862_s1 + $0x3f4] sm:$0xf] }
  0x31   :  { %1860 = vmatpush.bf16.msrb.mxu1 %v5140_v23  ;;  %v339_v23 = vunpack.c.h.b16 %v28_v2  ;;  %v5216_v31 = vor.u32 %v6411_v17, %v5213_v21  ;;  %v5189_v37 = vld [vmem:[%s9862_s1 + $0x8b8] sm:$0xf0]  ;;  %v4589_v43 = vld [vmem:[%s9862_s1 + $0x408] sm:$0xf0]  ;;  %v6303_v44 = vld [vmem:[%s9862_s1 + $0x574] sm:$0xf] }
  0x32   :  { %1873 = vmatpush.bf16.msrb.mxu2 %v4184_v24  ;;  %v4280_v24 = vor.u32 %v6177_v5, %v4277_v6  ;;  %v6399_v49 = vld [vmem:[%s9862_s1 + $0x874] sm:$0xf]  ;;  %v5165_v50 = vld [vmem:[%s9862_s1 + $0x888] sm:$0xf0]  ;;  %v4592_v51 = vor.u32 %v6255_v42, %v4589_v43  ;;  %v6249_v54 = vld [vmem:[%s9862_s1 + $0x3c4] sm:$0xf] }
  0x33   :  { %1886 = vmatpush.bf16.msrb.mxu3 %v4376_v28  ;;  %v6261_v28 = vld [vmem:[%s9862_s1 + $0x424] sm:$0xf]  ;;  %v7154_v38 = vpack.c.b16 %v339_v23, %v339_v23  ;;  %v4565_v55 = vld [vmem:[%s9862_s1 + $0x3d8] sm:$0xf0]  ;;  %v5168_v57 = vor.u32 %v6399_v49, %v5165_v50  ;;  %v6243_v2 = vld [vmem:[%s9862_s1 + $0x394] sm:$0xf] }
  0x34   :  { %1848 = vmatpush.bf16.msrb.mxu0 %v4924_v34  ;;  %v4997_v34 = vld [vmem:[%s9862_s1 + $0x738] sm:$0xf0]  ;;  %v4616_v39 = vor.u32 %v6261_v28, %v4613_v29  ;;  %v6297_v56 = vld [vmem:[%s9862_s1 + $0x544] sm:$0xf]  ;;  %v6291_v4 = vld [vmem:[%s9862_s1 + $0x514] sm:$0xf] }
  0x35   :  { %1861 = vmatpush.bf16.msrb.mxu1 %v5116_v35  ;;  %v7146_v35 = vpack.c.b16 %v338_v14, %v338_v14  ;;  %v5000_v41 = vor.u32 %v6357_v33, %v4997_v34  ;;  %v6345_v59 = vld [vmem:[%s9862_s1 + $0x6c4] sm:$0xf]  ;;  %v4949_v60 = vld [vmem:[%s9862_s1 + $0x6d8] sm:$0xf0]  ;;  %v4733_v6 = vld [vmem:[%s9862_s1 + $0x528] sm:$0xf0] }
  0x36   :  { %1874 = vmatpush.bf16.msrb.mxu2 %v4160_v36  ;;  %v6405_v36 = vld [vmem:[%s9862_s1 + $0x8a4] sm:$0xf]  ;;  %v4952_v1 = vor.u32 %v6345_v59, %v4949_v60  ;;  %v6339_v7 = vld [vmem:[%s9862_s1 + $0x694] sm:$0xf]  ;;  %v4925_v8 = vld [vmem:[%s9862_s1 + $0x6a8] sm:$0xf0]  ;;  %v4736_v12 = vor.u32 %v6291_v4, %v4733_v6 }
  0x37   :  { %1887 = vmatpush.bf16.msrb.mxu3 %v4352_v40  ;;  %v4808_v40 = vor.u32 %v6309_v30, %v4805_v32  ;;  %v5192_v45 = vor.u32 %v6405_v36, %v5189_v37  ;;  %v6393_v61 = vld [vmem:[%s9862_s1 + $0x844] sm:$0xf]  ;;  %v6387_v9 = vld [vmem:[%s9862_s1 + $0x814] sm:$0xf]  ;;  %v4928_v13 = vor.u32 %v6339_v7, %v4925_v8  ;;  %v4709_v21 = vld [vmem:[%s9862_s1 + $0x4f8] sm:$0xf0] }
  0x38   :  { %1849 = vmatpush.bf16.msrb.mxu0 %v4900_v46  ;;  %v4781_v46 = vld [vmem:[%s9862_s1 + $0x588] sm:$0xf0]  ;;  %v6237_v14 = vld [vmem:[%s9862_s1 + $0x364] sm:$0xf]  ;;  %v6231_v30 = vld [vmem:[%s9862_s1 + $0x334] sm:$0xf] }
  0x39   :  { %1862 = vmatpush.bf16.msrb.mxu1 %v5092_v47  ;;  %v6351_v47 = vld [vmem:[%s9862_s1 + $0x6f4] sm:$0xf]  ;;  %v6333_v23 = vld [vmem:[%s9862_s1 + $0x664] sm:$0xf]  ;;  %v4685_v34 = vld [vmem:[%s9862_s1 + $0x4c8] sm:$0xf0] }
  0x3a   :  { %1875 = vmatpush.bf16.msrb.mxu2 %v4136_v48  ;;  %v4973_v48 = vld [vmem:[%s9862_s1 + $0x708] sm:$0xf0]  ;;  %v6279_v32 = vld [vmem:[%s9862_s1 + $0x4b4] sm:$0xf]  ;;  %v6225_v42 = vld [vmem:[%s9862_s1 + $0x304] sm:$0xf] }
  0x3b   :  { %1888 = vmatpush.bf16.msrb.mxu3 %v4328_v52  ;;  %v4784_v52 = vor.u32 %v6303_v44, %v4781_v46  ;;  %v4976_v53 = vor.u32 %v6351_v47, %v4973_v48  ;;  %v6327_v36 = vld [vmem:[%s9862_s1 + $0x634] sm:$0xf]  ;;  %v4877_v37 = vld [vmem:[%s9862_s1 + $0x648] sm:$0xf0]  ;;  %v4469_v43 = vld [vmem:[%s9862_s1 + $0x318] sm:$0xf0]  ;;  %v4688_v44 = vor.u32 %v6279_v32, %v4685_v34 }
  0x3c   :  { %1850 = vmatpush.bf16.msrb.mxu0 %v4876_v58  ;;  %v4757_v58 = vld [vmem:[%s9862_s1 + $0x558] sm:$0xf0]  ;;  %v6273_v46 = vld [vmem:[%s9862_s1 + $0x484] sm:$0xf]  ;;  %v6271_v59 = vld [vmem:[%s9862_s1 + $0x46c] sm:$0xf0] }
  0x3d   :  { %1863 = vmatpush.bf16.msrb.mxu1 %v5068_v62  ;;  %v5141_v62 = vld [vmem:[%s9862_s1 + $0x858] sm:$0xf0]  ;;  %v4760_v0 = vor.u32 %v6297_v56, %v4757_v58  ;;  %v6321_v48 = vld [vmem:[%s9862_s1 + $0x604] sm:$0xf]  ;;  %v4472_v56 = vor.u32 %v6225_v42, %v4469_v43  ;;  %v4643_v58 = vld [vmem:[%s9862_s1 + $0x458] sm:$0xf] }
  0x3e   :  { %1876 = vmatpush.bf16.msrb.mxu2 %v4112_v63  ;;  %v4568_v63 = vor.u32 %v6249_v54, %v4565_v55  ;;  %v5144_v5 = vor.u32 %v6393_v61, %v5141_v62  ;;  %v4661_v47 = vld [vmem:[%s9862_s1 + $0x498] sm:$0xf0]  ;;  %v6175_v54 = vld [vmem:[%s9862_s1 + $0x16c] sm:$0xf0]  ;;  %v4451_v55 = vld [vmem:[%s9862_s1 + $0x2d8] sm:$0xf] }
  0x3f   :  { %1889 = vmatpush.bf16.msrb.mxu3 %v4304_v3  ;;  %v4541_v3 = vld [vmem:[%s9862_s1 + $0x3a8] sm:$0xf0]  ;;  %v4853_v50 = vld [vmem:[%s9862_s1 + $0x618] sm:$0xf0]  ;;  %v4664_v60 = vor.u32 %v6273_v46, %v4661_v47  ;;  %v4835_v62 = vld [vmem:[%s9862_s1 + $0x5d8] sm:$0xf] }
  0x40   :  { %1851 = vmatpush.bf16.msrb.mxu0 %v4852_v10  ;;  %v5117_v10 = vld [vmem:[%s9862_s1 + $0x828] sm:$0xf0]  ;;  %v4544_v11 = vor.u32 %v6243_v2, %v4541_v3  ;;  %v4856_v61 = vor.u32 %v6321_v48, %v4853_v50  ;;  %v4644_v3 = vor.u32 %v6271_v59, %v4643_v58  ;;  %v4235_v4 = vld [vmem:[%s9862_s1 + $0x128] sm:$0xf]  ;;  %v6217_v8 = vld [vmem:[%s9862_s1 + $0x2bc] sm:$0xf0] }
  0x41   :  { %1864 = vmatpush.bf16.msrb.mxu1 %v5044_v15  ;;  %v4517_v15 = vld [vmem:[%s9862_s1 + $0x378] sm:$0xf0]  ;;  %v5120_v17 = vor.u32 %v6387_v9, %v5117_v10  ;;  %v4427_v6 = vld [vmem:[%s9862_s1 + $0x2a8] sm:$0xf]  ;;  %v6265_v10 = vld [vmem:[%s9862_s1 + $0x43c] sm:$0xf0] }
  0x42   :  { %1877 = vmatpush.bf16.msrb.mxu2 %v4088_v16  ;;  %v6285_v16 = vld [vmem:[%s9862_s1 + $0x4e4] sm:$0xf]  ;;  %v4619_v9 = vld [vmem:[%s9862_s1 + $0x428] sm:$0xf]  ;;  %v6301_v42 = vld [vmem:[%s9862_s1 + $0x55c] sm:$0xf0] }
  0x43   :  { %1890 = vmatpush.bf16.msrb.mxu3 %v4280_v24  ;;  %1852 = vmatmul.bf16.vlgmr.msrb.gmra.mxu0 %v7146_v35  ;;  %v4901_v24 = vld [vmem:[%s9862_s1 + $0x678] sm:$0xf0]  ;;  %v4712_v28 = vor.u32 %v6285_v16, %v4709_v21  ;;  %v4211_v16 = vld [vmem:[%s9862_s1 + $0xf8] sm:$0xf]  ;;  %v4187_v32 = vld [vmem:[%s9862_s1 + $0xc8] sm:$0xf] }
  0x44   :  { %1896 = vmatpush.bf16.msra.mxu0 %v4640_v25  ;;  %1865 = vmatmul.bf16.vlgmr.msrb.gmra.mxu1 %v7154_v38  ;;  %v6381_v25 = vld [vmem:[%s9862_s1 + $0x7e4] sm:$0xf]  ;;  %v4904_v29 = vor.u32 %v6333_v23, %v4901_v24  ;;  %v4403_v21 = vld [vmem:[%s9862_s1 + $0x278] sm:$0xf]  ;;  %v6211_v24 = vld [vmem:[%s9862_s1 + $0x28c] sm:$0xf0] }
  0x45   :  { %1909 = vmatpush.bf16.msra.mxu1 %v4832_v26  ;;  %1878 = vmatmul.bf16.vlgmr.msrb.gmra.mxu2 %v6995_v19  ;;  %v5093_v26 = vld [vmem:[%s9862_s1 + $0x7f8] sm:$0xf0]  ;;  %v4379_v34 = vld [vmem:[%s9862_s1 + $0x248] sm:$0xf]  ;;  %v4163_v46 = vld [vmem:[%s9862_s1 + $0x98] sm:$0xf] }
  0x46   :  { %1922 = vmatpush.bf16.msra.mxu2 %v5024_v27  ;;  %1891 = vmatmul.bf16.vlgmr.msrb.gmra.mxu3 %v6999_v22  ;;  %v4520_v27 = vor.u32 %v6237_v14, %v4517_v15  ;;  %v5096_v33 = vor.u32 %v6381_v25, %v5093_v26  ;;  %v4428_v14 = vor.u32 %v6217_v8, %v4427_v6  ;;  %v4595_v25 = vld [vmem:[%s9862_s1 + $0x3f8] sm:$0xf]  ;;  %v6259_v26 = vld [vmem:[%s9862_s1 + $0x40c] sm:$0xf0]  ;;  %v4139_v58 = vld [vmem:[%s9862_s1 + $0x68] sm:$0xf] }
  0x47   :  { %1935 = vmatpush.bf16.msra.mxu3 %v5216_v31  ;;  %v4493_v31 = vld [vmem:[%s9862_s1 + $0x348] sm:$0xf0]  ;;  %v4620_v15 = vor.u32 %v6265_v10, %v4619_v9  ;;  %v6151_v47 = vld [vmem:[%s9862_s1 + $0xac] sm:$0xf0]  ;;  %v4355_v48 = vld [vmem:[%s9862_s1 + $0x218] sm:$0xf] }
  0x48   :  { %1897 = vmatpush.bf16.msra.mxu0 %v4616_v39  ;;  %v6375_v39 = vld [vmem:[%s9862_s1 + $0x7b4] sm:$0xf]  ;;  %v6199_v50 = vld [vmem:[%s9862_s1 + $0x22c] sm:$0xf0]  ;;  %v6145_v59 = vld [vmem:[%s9862_s1 + $0x7c] sm:$0xf0] }
  0x49   :  { %1910 = vmatpush.bf16.msra.mxu1 %v4808_v40  ;;  %v5069_v40 = vld [vmem:[%s9862_s1 + $0x7c8] sm:$0xf0]  ;;  %v4115_v6 = vld [vmem:[%s9862_s1 + $0x38] sm:$0xf]  ;;  %v6187_v10 = vld [vmem:[%s9862_s1 + $0x1cc] sm:$0xf0] }
  0x4a   :  { %1923 = vmatpush.bf16.msra.mxu2 %v5000_v41  ;;  %v4496_v41 = vor.u32 %v6231_v30, %v4493_v31  ;;  %v5072_v49 = vor.u32 %v6375_v39, %v5069_v40  ;;  %v4404_v30 = vor.u32 %v6211_v24, %v4403_v21  ;;  %v4596_v31 = vor.u32 %v6259_v26, %v4595_v25  ;;  %v4571_v39 = vld [vmem:[%s9862_s1 + $0x3c8] sm:$0xf]  ;;  %v6253_v40 = vld [vmem:[%s9862_s1 + $0x3dc] sm:$0xf0]  ;;  %v4307_v8 = vld [vmem:[%s9862_s1 + $0x1b8] sm:$0xf] }
  0x4b   :  { %1936 = vmatpush.bf16.msra.mxu3 %v5192_v45  ;;  %v4880_v45 = vor.u32 %v6327_v36, %v4877_v37  ;;  %v6205_v37 = vld [vmem:[%s9862_s1 + $0x25c] sm:$0xf0]  ;;  %v4308_v21 = vor.u32 %v6187_v10, %v4307_v8  ;;  %v4283_v24 = vld [vmem:[%s9862_s1 + $0x188] sm:$0xf] }
  0x4c   :  { %1898 = vmatpush.bf16.msra.mxu0 %v4592_v51  ;;  %v6369_v51 = vld [vmem:[%s9862_s1 + $0x784] sm:$0xf]  ;;  %v6181_v25 = vld [vmem:[%s9862_s1 + $0x19c] sm:$0xf0]  ;;  %v4475_v26 = vld [vmem:[%s9862_s1 + $0x308] sm:$0xf] }
  0x4d   :  { %1911 = vmatpush.bf16.msra.mxu1 %v4784_v52  ;;  %v5045_v52 = vld [vmem:[%s9862_s1 + $0x798] sm:$0xf0]  ;;  %v4955_v8 = vld [vmem:[%s9862_s1 + $0x6c8] sm:$0xf] }
  0x4e   :  { %1924 = vmatpush.bf16.msra.mxu2 %v4976_v53  ;;  %v4259_v53 = vld [vmem:[%s9862_s1 + $0x158] sm:$0xf]  ;;  %v5147_v10 = vld [vmem:[%s9862_s1 + $0x848] sm:$0xf] }
  0x4f   :  { %1937 = vmatpush.bf16.msra.mxu3 %v5168_v57  ;;  %v6223_v57 = vld [vmem:[%s9862_s1 + $0x2ec] sm:$0xf0] }
  0x50   :  { %1899 = vmatpush.bf16.msra.mxu0 %v4568_v63  ;;  %v6319_v63 = vld [vmem:[%s9862_s1 + $0x5ec] sm:$0xf0]  ;;  %v4452_v2 = vor.u32 %v6223_v57, %v4451_v55  ;;  %v4164_v55 = vor.u32 %v6151_v47, %v4163_v46 }
  0x51   :  { %1912 = vmatpush.bf16.msra.mxu1 %v4760_v0  ;;  %v5048_v0 = vor.u32 %v6369_v51, %v5045_v52  ;;  %v4836_v7 = vor.u32 %v6319_v63, %v4835_v62  ;;  %v4547_v51 = vld [vmem:[%s9862_s1 + $0x398] sm:$0xf]  ;;  %v6247_v52 = vld [vmem:[%s9862_s1 + $0x3ac] sm:$0xf0]  ;;  %v6193_v62 = vld [vmem:[%s9862_s1 + $0x1fc] sm:$0xf0] }
  0x52   :  { %1925 = vmatpush.bf16.msra.mxu2 %v4952_v1  ;;  %v4260_v1 = vor.u32 %v6175_v54, %v4259_v53  ;;  %v4739_v53 = vld [vmem:[%s9862_s1 + $0x518] sm:$0xf]  ;;  %v6295_v54 = vld [vmem:[%s9862_s1 + $0x52c] sm:$0xf0]  ;;  %v4548_v57 = vor.u32 %v6247_v52, %v4547_v51  ;;  %v4523_v63 = vld [vmem:[%s9862_s1 + $0x368] sm:$0xf] }
  0x53   :  { %1938 = vmatpush.bf16.msra.mxu3 %v5144_v5  ;;  %v6169_v5 = vld [vmem:[%s9862_s1 + $0x13c] sm:$0xf0] }
  0x54   :  { %1900 = vmatpush.bf16.msra.mxu0 %v4544_v11  ;;  %v4811_v11 = vld [vmem:[%s9862_s1 + $0x5a8] sm:$0xf]  ;;  %v6409_v52 = vld [vmem:[%s9862_s1 + $0x8bc] sm:$0xf0] }
  0x55   :  { %1913 = vmatpush.bf16.msra.mxu1 %v4736_v12  ;;  %v6313_v12 = vld [vmem:[%s9862_s1 + $0x5bc] sm:$0xf0] }
  0x56   :  { %1926 = vmatpush.bf16.msra.mxu2 %v4928_v13  ;;  %v4236_v13 = vor.u32 %v6169_v5, %v4235_v4  ;;  %v4812_v23 = vor.u32 %v6313_v12, %v4811_v11  ;;  %v4499_v11 = vld [vmem:[%s9862_s1 + $0x338] sm:$0xf]  ;;  %v6235_v12 = vld [vmem:[%s9862_s1 + $0x34c] sm:$0xf0] }
  0x57   :  { %1939 = vmatpush.bf16.msra.mxu3 %v5120_v17  ;;  %v6163_v17 = vld [vmem:[%s9862_s1 + $0x10c] sm:$0xf0] }
  0x58   :  { %1901 = vmatpush.bf16.msra.mxu0 %v4520_v27  ;;  %v4787_v27 = vld [vmem:[%s9862_s1 + $0x578] sm:$0xf] }
  0x59   :  { %1914 = vmatpush.bf16.msra.mxu1 %v4712_v28  ;;  %v6307_v28 = vld [vmem:[%s9862_s1 + $0x58c] sm:$0xf0] }
  0x5a   :  { %1927 = vmatpush.bf16.msra.mxu2 %v4904_v29  ;;  %v4212_v29 = vor.u32 %v6163_v17, %v4211_v16  ;;  %v4788_v36 = vor.u32 %v6307_v28, %v4787_v27  ;;  %v4091_v16 = vld [vmem:[%s9862_s1 + $0x8] sm:$0xf]  ;;  %v6133_v17 = vld [vmem:[%s9862_s1 + $0x1c] sm:$0xf0] }
  0x5b   :  { %1940 = vmatpush.bf16.msra.mxu3 %v5096_v33  ;;  %v6157_v33 = vld [vmem:[%s9862_s1 + $0xdc] sm:$0xf0] }
  0x5c   :  { %1902 = vmatpush.bf16.msra.mxu0 %v4496_v41  ;;  %v4763_v41 = vld [vmem:[%s9862_s1 + $0x548] sm:$0xf]  ;;  %v4188_v43 = vor.u32 %v6157_v33, %v4187_v32  ;;  %v6229_v28 = vld [vmem:[%s9862_s1 + $0x31c] sm:$0xf0]  ;;  %v6367_v32 = vld [vmem:[%s9862_s1 + $0x76c] sm:$0xf0] }
  0x5d   :  { %1915 = vmatpush.bf16.msra.mxu1 %v4688_v44  ;;  %v4380_v44 = vor.u32 %v6205_v37, %v4379_v34  ;;  %v5219_v33 = vld [vmem:[%s9862_s1 + $0x8d8] sm:$0xf]  ;;  %v4092_v34 = vor.u32 %v6133_v17, %v4091_v16  ;;  %v6172_v37 = vld [vmem:[%s9862_s1 + $0x15c] sm:$0xf]  ;;  %v4381_v16 = vld [vmem:[%s9862_s1 + $0x260] sm:$0xf0] }
  0x5e   :  { %1928 = vmatpush.bf16.msra.mxu2 %v4880_v45  ;;  %v4572_v45 = vor.u32 %v6253_v40, %v4571_v39  ;;  %v4261_v39 = vld [vmem:[%s9862_s1 + $0x170] sm:$0xf0]  ;;  %v4284_v40 = vor.u32 %v6181_v25, %v4283_v24  ;;  %v4931_v24 = vld [vmem:[%s9862_s1 + $0x698] sm:$0xf]  ;;  %v6343_v25 = vld [vmem:[%s9862_s1 + $0x6ac] sm:$0xf0] }
  0x5f   :  { %1941 = vmatpush.bf16.msra.mxu3 %v5072_v49  ;;  %v4764_v49 = vor.u32 %v6301_v42, %v4763_v41  ;;  %v4476_v41 = vor.u32 %v6229_v28, %v4475_v26  ;;  %v6220_v42 = vld [vmem:[%s9862_s1 + $0x2dc] sm:$0xf]  ;;  %v4264_v47 = vor.u32 %v6172_v37, %v4261_v39  ;;  %v5123_v26 = vld [vmem:[%s9862_s1 + $0x818] sm:$0xf]  ;;  %v6391_v28 = vld [vmem:[%s9862_s1 + $0x82c] sm:$0xf0] }
  0x60   :  { %1903 = vmatpush.bf16.msra.mxu0 %v4472_v56  ;;  %v4356_v56 = vor.u32 %v6199_v50, %v4355_v48  ;;  %v5003_v48 = vld [vmem:[%s9862_s1 + $0x728] sm:$0xf]  ;;  %v6337_v39 = vld [vmem:[%s9862_s1 + $0x67c] sm:$0xf0] }
  0x61   :  { %1916 = vmatpush.bf16.msra.mxu1 %v4664_v60  ;;  %v4331_v60 = vld [vmem:[%s9862_s1 + $0x1e8] sm:$0xf] }
  0x62   :  { %1929 = vmatpush.bf16.msra.mxu2 %v4856_v61  ;;  %v4740_v61 = vor.u32 %v6295_v54, %v4739_v53  ;;  %v4332_v4 = vor.u32 %v6193_v62, %v4331_v60  ;;  %v5195_v50 = vld [vmem:[%s9862_s1 + $0x8a8] sm:$0xf]  ;;  %v6166_v53 = vld [vmem:[%s9862_s1 + $0x12c] sm:$0xf]  ;;  %v4237_v54 = vld [vmem:[%s9862_s1 + $0x140] sm:$0xf0] }
  0x63   :  { %1942 = vmatpush.bf16.msra.mxu3 %v5048_v0  ;;  %1904 = vmatmul.bf16.vlgmr.msra.gmra.mxu0 %v6993_v18  ;;  %v6241_v0 = vld [vmem:[%s9862_s1 + $0x37c] sm:$0xf0]  ;;  %v4979_v60 = vld [vmem:[%s9862_s1 + $0x6f8] sm:$0xf]  ;;  %v4907_v37 = vld [vmem:[%s9862_s1 + $0x668] sm:$0xf] }
  0x64   :  { %1948 = vmatpush.bf16.msrb.mxu0 %v4260_v1  ;;  %1917 = vmatmul.bf16.vlgmr.msra.gmra.mxu1 %v6997_v20  ;;  %v4715_v1 = vld [vmem:[%s9862_s1 + $0x4e8] sm:$0xf]  ;;  %v4524_v5 = vor.u32 %v6241_v0, %v4523_v63  ;;  %v5171_v62 = vld [vmem:[%s9862_s1 + $0x878] sm:$0xf]  ;;  %v6403_v0 = vld [vmem:[%s9862_s1 + $0x88c] sm:$0xf0] }
  0x65   :  { %1961 = vmatpush.bf16.msrb.mxu1 %v4452_v2  ;;  %1930 = vmatmul.bf16.vlgmr.msra.gmra.mxu2 %v7146_v35  ;;  %v6289_v2 = vld [vmem:[%s9862_s1 + $0x4fc] sm:$0xf0] }
  0x66   :  { %1974 = vmatpush.bf16.msrb.mxu2 %v4644_v3  ;;  %1943 = vmatmul.bf16.vlgmr.msra.gmra.mxu3 %v7154_v38  ;;  %v4140_v3 = vor.u32 %v6145_v59, %v4139_v58  ;;  %v4716_v9 = vor.u32 %v6289_v2, %v4715_v1  ;;  %v5196_v58 = vor.u32 %v6409_v52, %v5195_v50  ;;  %v6160_v1 = vld [vmem:[%s9862_s1 + $0xfc] sm:$0xf]  ;;  %v4213_v2 = vld [vmem:[%s9862_s1 + $0x110] sm:$0xf0]  ;;  %v4883_v50 = vld [vmem:[%s9862_s1 + $0x638] sm:$0xf] }
  0x67   :  { %1987 = vmatpush.bf16.msrb.mxu3 %v4836_v7  ;;  %v6139_v7 = vld [vmem:[%s9862_s1 + $0x4c] sm:$0xf0]  ;;  %v4240_v59 = vor.u32 %v6166_v53, %v4237_v54  ;;  %v5075_v52 = vld [vmem:[%s9862_s1 + $0x7b8] sm:$0xf] }
  0x68   :  { %1949 = vmatpush.bf16.msrb.mxu0 %v4236_v13  ;;  %v4691_v13 = vld [vmem:[%s9862_s1 + $0x4b8] sm:$0xf]  ;;  %v6379_v54 = vld [vmem:[%s9862_s1 + $0x7cc] sm:$0xf0] }
  0x69   :  { %1962 = vmatpush.bf16.msrb.mxu1 %v4428_v14  ;;  %v6283_v14 = vld [vmem:[%s9862_s1 + $0x4cc] sm:$0xf0] }
  0x6a   :  { %1975 = vmatpush.bf16.msrb.mxu2 %v4620_v15  ;;  %v4116_v15 = vor.u32 %v6139_v7, %v4115_v6  ;;  %v4692_v27 = vor.u32 %v6283_v14, %v4691_v13  ;;  %v5172_v6 = vor.u32 %v6403_v0, %v5171_v62  ;;  %v4216_v7 = vor.u32 %v6160_v1, %v4213_v2  ;;  %v6154_v13 = vld [vmem:[%s9862_s1 + $0xcc] sm:$0xf]  ;;  %v4189_v14 = vld [vmem:[%s9862_s1 + $0xe0] sm:$0xf0]  ;;  %v5051_v0 = vld [vmem:[%s9862_s1 + $0x788] sm:$0xf] }
  0x6b   :  { %1988 = vmatpush.bf16.msrb.mxu3 %v4812_v23  ;;  %v4500_v23 = vor.u32 %v6235_v12, %v4499_v11  ;;  %v6397_v12 = vld [vmem:[%s9862_s1 + $0x85c] sm:$0xf0]  ;;  %v5076_v62 = vor.u32 %v6379_v54, %v5075_v52  ;;  %v6130_v2 = vld [vmem:[%s9862_s1 + $0xc] sm:$0xf] }
  0x6c   :  { %1950 = vmatpush.bf16.msrb.mxu0 %v4212_v29  ;;  %v4667_v29 = vld [vmem:[%s9862_s1 + $0x488] sm:$0xf]  ;;  %v6373_v1 = vld [vmem:[%s9862_s1 + $0x79c] sm:$0xf0]  ;;  %v6250_v52 = vld [vmem:[%s9862_s1 + $0x3cc] sm:$0xf] }
  0x6d   :  { %1963 = vmatpush.bf16.msrb.mxu1 %v4404_v30  ;;  %v6277_v30 = vld [vmem:[%s9862_s1 + $0x49c] sm:$0xf0]  ;;  %v6298_v54 = vld [vmem:[%s9862_s1 + $0x54c] sm:$0xf] }
  0x6e   :  { %1976 = vmatpush.bf16.msrb.mxu2 %v4596_v31  ;;  %v5027_v31 = vld [vmem:[%s9862_s1 + $0x758] sm:$0xf] }
  0x6f   :  { %1989 = vmatpush.bf16.msrb.mxu3 %v4788_v36  ;;  %v6415_v36 = vld [vmem:[%s9862_s1 + $0x8ec] sm:$0xf0] }
  0x70   :  { %1951 = vmatpush.bf16.msrb.mxu0 %v4188_v43  ;;  %v4453_v43 = vld [vmem:[%s9862_s1 + $0x2f0] sm:$0xf0]  ;;  %v5220_v46 = vor.u32 %v6415_v36, %v5219_v33  ;;  %v4932_v33 = vor.u32 %v6343_v25, %v4931_v24 }
  0x71   :  { %1964 = vmatpush.bf16.msrb.mxu1 %v4380_v44  ;;  %v4668_v44 = vor.u32 %v6277_v30, %v4667_v29  ;;  %v4456_v51 = vor.u32 %v6220_v42, %v4453_v43  ;;  %v6148_v29 = vld [vmem:[%s9862_s1 + $0x9c] sm:$0xf]  ;;  %v4165_v30 = vld [vmem:[%s9862_s1 + $0xb0] sm:$0xf0]  ;;  %v6385_v42 = vld [vmem:[%s9862_s1 + $0x7fc] sm:$0xf0] }
  0x72   :  { %1977 = vmatpush.bf16.msrb.mxu2 %v4572_v45  ;;  %v5028_v45 = vor.u32 %v6367_v32, %v5027_v31  ;;  %v6196_v31 = vld [vmem:[%s9862_s1 + $0x21c] sm:$0xf]  ;;  %v4357_v32 = vld [vmem:[%s9862_s1 + $0x230] sm:$0xf0]  ;;  %v4168_v36 = vor.u32 %v6148_v29, %v4165_v30  ;;  %v6142_v43 = vld [vmem:[%s9862_s1 + $0x6c] sm:$0xf] }
  0x73   :  { %1990 = vmatpush.bf16.msrb.mxu3 %v4764_v49  ;;  %v6361_v49 = vld [vmem:[%s9862_s1 + $0x73c] sm:$0xf0]  ;;  %v4813_v30 = vld [vmem:[%s9862_s1 + $0x5c0] sm:$0xf0] }
  0x74   :  { %1952 = vmatpush.bf16.msrb.mxu0 %v4164_v55  ;;  %v6214_v55 = vld [vmem:[%s9862_s1 + $0x2ac] sm:$0xf] }
  0x75   :  { %1965 = vmatpush.bf16.msrb.mxu1 %v4356_v56  ;;  %v4429_v56 = vld [vmem:[%s9862_s1 + $0x2c0] sm:$0xf0] }
  0x76   :  { %1978 = vmatpush.bf16.msrb.mxu2 %v4548_v57  ;;  %v5004_v57 = vor.u32 %v6361_v49, %v5003_v48  ;;  %v4432_v63 = vor.u32 %v6214_v55, %v4429_v56  ;;  %v6136_v55 = vld [vmem:[%s9862_s1 + $0x3c] sm:$0xf]  ;;  %v4117_v56 = vld [vmem:[%s9862_s1 + $0x50] sm:$0xf0] }
  0x77   :  { %1991 = vmatpush.bf16.msrb.mxu3 %v4740_v61  ;;  %v6355_v61 = vld [vmem:[%s9862_s1 + $0x70c] sm:$0xf0] }
  0x78   :  { %1953 = vmatpush.bf16.msrb.mxu0 %v4140_v3  ;;  %v6208_v3 = vld [vmem:[%s9862_s1 + $0x27c] sm:$0xf] }
  0x79   :  { %1966 = vmatpush.bf16.msrb.mxu1 %v4332_v4  ;;  %v4405_v4 = vld [vmem:[%s9862_s1 + $0x290] sm:$0xf0] }
  0x7a   :  { %1979 = vmatpush.bf16.msrb.mxu2 %v4524_v5  ;;  %v4980_v5 = vor.u32 %v6355_v61, %v4979_v60  ;;  %v4408_v11 = vor.u32 %v6208_v3, %v4405_v4  ;;  %v4859_v60 = vld [vmem:[%s9862_s1 + $0x608] sm:$0xf]  ;;  %v6325_v61 = vld [vmem:[%s9862_s1 + $0x61c] sm:$0xf0]  ;;  %v4093_v4 = vld [vmem:[%s9862_s1 + $0x20] sm:$0xf0] }
  0x7b   :  { %1992 = vmatpush.bf16.msrb.mxu3 %v4716_v9  ;;  %v6349_v9 = vld [vmem:[%s9862_s1 + $0x6dc] sm:$0xf0] }
  0x7c   :  { %1954 = vmatpush.bf16.msrb.mxu0 %v4116_v15  ;;  %v6202_v15 = vld [vmem:[%s9862_s1 + $0x24c] sm:$0xf]  ;;  %v4956_v17 = vor.u32 %v6349_v9, %v4955_v8  ;;  %v4645_v8 = vld [vmem:[%s9862_s1 + $0x470] sm:$0xf0]  ;;  %v6316_v9 = vld [vmem:[%s9862_s1 + $0x5dc] sm:$0xf] }
  0x7d   :  { %1967 = vmatpush.bf16.msrb.mxu1 %v4308_v21  ;;  %v5148_v21 = vor.u32 %v6397_v12, %v5147_v10  ;;  %v4860_v10 = vor.u32 %v6325_v61, %v4859_v60  ;;  %v6364_v12 = vld [vmem:[%s9862_s1 + $0x75c] sm:$0xf]  ;;  %v5149_v60 = vld [vmem:[%s9862_s1 + $0x860] sm:$0xf0] }
  0x7e   :  { %1980 = vmatpush.bf16.msrb.mxu2 %v4500_v23  ;;  %v4192_v23 = vor.u32 %v6154_v13, %v4189_v14  ;;  %v5029_v13 = vld [vmem:[%s9862_s1 + $0x770] sm:$0xf0]  ;;  %v5052_v14 = vor.u32 %v6373_v1, %v5051_v0 }
  0x7f   :  { %1993 = vmatpush.bf16.msrb.mxu3 %v4692_v27  ;;  %v4384_v27 = vor.u32 %v6202_v15, %v4381_v16  ;;  %v4096_v15 = vor.u32 %v6130_v2, %v4093_v4  ;;  %v6412_v16 = vld [vmem:[%s9862_s1 + $0x8dc] sm:$0xf]  ;;  %v5032_v25 = vor.u32 %v6364_v12, %v5029_v13  ;;  %v4549_v1 = vld [vmem:[%s9862_s1 + $0x3b0] sm:$0xf0] }
  0x80   :  { %1955 = vmatpush.bf16.msrb.mxu0 %v4092_v34  ;;  %v5124_v34 = vor.u32 %v6391_v28, %v5123_v26  ;;  %v6262_v26 = vld [vmem:[%s9862_s1 + $0x42c] sm:$0xf]  ;;  %v6292_v2 = vld [vmem:[%s9862_s1 + $0x51c] sm:$0xf] }
  0x81   :  { %1968 = vmatpush.bf16.msrb.mxu1 %v4284_v40  ;;  %v5099_v40 = vld [vmem:[%s9862_s1 + $0x7e8] sm:$0xf]  ;;  %v6310_v28 = vld [vmem:[%s9862_s1 + $0x5ac] sm:$0xf] }
  0x82   :  { %1981 = vmatpush.bf16.msrb.mxu2 %v4476_v41  ;;  %v4360_v41 = vor.u32 %v6196_v31, %v4357_v32  ;;  %v5100_v48 = vor.u32 %v6385_v42, %v5099_v40  ;;  %v6358_v31 = vld [vmem:[%s9862_s1 + $0x72c] sm:$0xf]  ;;  %v5005_v32 = vld [vmem:[%s9862_s1 + $0x740] sm:$0xf0]  ;;  %v6256_v40 = vld [vmem:[%s9862_s1 + $0x3fc] sm:$0xf] }
  0x83   :  { %1994 = vmatpush.bf16.msrb.mxu3 %v4668_v44  ;;  %1956 = vmatmul.bf16.vlgmr.msrb.gmra.mxu0 %v6995_v19  ;;  %v4141_v44 = vld [vmem:[%s9862_s1 + $0x80] sm:$0xf0]  ;;  %v6304_v42 = vld [vmem:[%s9862_s1 + $0x57c] sm:$0xf] }
  0x84   :  { %2000 = vmatpush.bf16.msra.mxu0 %v5028_v45  ;;  %1969 = vmatmul.bf16.vlgmr.msrb.gmra.mxu1 %v6999_v22  ;;  %v6190_v45 = vld [vmem:[%s9862_s1 + $0x1ec] sm:$0xf]  ;;  %v4144_v49 = vor.u32 %v6142_v43, %v4141_v44  ;;  %v4789_v44 = vld [vmem:[%s9862_s1 + $0x590] sm:$0xf0] }
  0x85   :  { %2013 = vmatpush.bf16.msra.mxu1 %v5220_v46  ;;  %1982 = vmatmul.bf16.vlgmr.msrb.gmra.mxu2 %v6993_v18  ;;  %v4333_v46 = vld [vmem:[%s9862_s1 + $0x200] sm:$0xf0] }
  0x86   :  { %2026 = vmatpush.bf16.msra.mxu2 %v4264_v47  ;;  %1995 = vmatmul.bf16.vlgmr.msrb.gmra.mxu3 %v6997_v20  ;;  %v4908_v47 = vor.u32 %v6337_v39, %v4907_v37  ;;  %v4336_v53 = vor.u32 %v6190_v45, %v4333_v46  ;;  %v4816_v37 = vor.u32 %v6310_v28, %v4813_v30  ;;  %v6352_v45 = vld [vmem:[%s9862_s1 + $0x6fc] sm:$0xf]  ;;  %v4981_v46 = vld [vmem:[%s9862_s1 + $0x710] sm:$0xf0] }
  0x87   :  { %2039 = vmatpush.bf16.msra.mxu3 %v4456_v51  ;;  %v6331_v51 = vld [vmem:[%s9862_s1 + $0x64c] sm:$0xf0]  ;;  %v5008_v39 = vor.u32 %v6358_v31, %v5005_v32  ;;  %v6232_v31 = vld [vmem:[%s9862_s1 + $0x33c] sm:$0xf]  ;;  %v4501_v32 = vld [vmem:[%s9862_s1 + $0x350] sm:$0xf0] }
  0x88   :  { %2001 = vmatpush.bf16.msra.mxu0 %v5004_v57  ;;  %v6184_v57 = vld [vmem:[%s9862_s1 + $0x1bc] sm:$0xf] }
  0x89   :  { %2014 = vmatpush.bf16.msra.mxu1 %v5196_v58  ;;  %v4309_v58 = vld [vmem:[%s9862_s1 + $0x1d0] sm:$0xf0] }
  0x8a   :  { %2027 = vmatpush.bf16.msra.mxu2 %v4240_v59  ;;  %v4884_v59 = vor.u32 %v6331_v51, %v4883_v50  ;;  %v4312_v3 = vor.u32 %v6184_v57, %v4309_v58  ;;  %v4792_v50 = vor.u32 %v6304_v42, %v4789_v44  ;;  %v4984_v51 = vor.u32 %v6352_v45, %v4981_v46  ;;  %v6346_v57 = vld [vmem:[%s9862_s1 + $0x6cc] sm:$0xf]  ;;  %v4957_v58 = vld [vmem:[%s9862_s1 + $0x6e0] sm:$0xf0]  ;;  %v6376_v42 = vld [vmem:[%s9862_s1 + $0x7bc] sm:$0xf] }
  0x8b   :  { %2040 = vmatpush.bf16.msra.mxu3 %v4432_v63  ;;  %v4120_v63 = vor.u32 %v6136_v55, %v4117_v56  ;;  %v4765_v56 = vld [vmem:[%s9862_s1 + $0x560] sm:$0xf0]  ;;  %v4960_v0 = vor.u32 %v6346_v57, %v4957_v58  ;;  %v4504_v45 = vor.u32 %v6232_v31, %v4501_v32  ;;  %v6226_v46 = vld [vmem:[%s9862_s1 + $0x30c] sm:$0xf] }
  0x8c   :  { %2002 = vmatpush.bf16.msra.mxu0 %v4980_v5  ;;  %v6178_v5 = vld [vmem:[%s9862_s1 + $0x18c] sm:$0xf]  ;;  %v5053_v57 = vld [vmem:[%s9862_s1 + $0x7a0] sm:$0xf0] }
  0x8d   :  { %2015 = vmatpush.bf16.msra.mxu1 %v5172_v6  ;;  %v4285_v6 = vld [vmem:[%s9862_s1 + $0x1a0] sm:$0xf0] }
  0x8e   :  { %2028 = vmatpush.bf16.msra.mxu2 %v4216_v7  ;;  %v6268_v7 = vld [vmem:[%s9862_s1 + $0x45c] sm:$0xf] }
  0x8f   :  { %2041 = vmatpush.bf16.msra.mxu3 %v4408_v11  ;;  %v4837_v11 = vld [vmem:[%s9862_s1 + $0x5f0] sm:$0xf0] }
  0x90   :  { %2003 = vmatpush.bf16.msra.mxu0 %v4956_v17  ;;  %v5221_v17 = vld [vmem:[%s9862_s1 + $0x8f0] sm:$0xf0]  ;;  %v4840_v24 = vor.u32 %v6316_v9, %v4837_v11  ;;  %v6238_v11 = vld [vmem:[%s9862_s1 + $0x36c] sm:$0xf] }
  0x91   :  { %2016 = vmatpush.bf16.msra.mxu1 %v5148_v21  ;;  %v4288_v21 = vor.u32 %v6178_v5, %v4285_v6  ;;  %v5224_v29 = vor.u32 %v6412_v16, %v5221_v17  ;;  %v6340_v5 = vld [vmem:[%s9862_s1 + $0x69c] sm:$0xf]  ;;  %v4933_v6 = vld [vmem:[%s9862_s1 + $0x6b0] sm:$0xf0] }
  0x92   :  { %2029 = vmatpush.bf16.msra.mxu2 %v4192_v23  ;;  %v4648_v23 = vor.u32 %v6268_v7, %v4645_v8  ;;  %v7817_v7 = vld [vmem:[%s9864_s2] sm:$0x3f]  ;;  %v6388_v8 = vld [vmem:[%s9862_s1 + $0x81c] sm:$0xf]  ;;  %v5125_v9 = vld [vmem:[%s9862_s1 + $0x830] sm:$0xf0]  ;;  %v4936_v13 = vor.u32 %v6340_v5, %v4933_v6 }
  0x93   :  { %2042 = vmatpush.bf16.msra.mxu3 %v4384_v27  ;;  %v4621_v27 = vld [vmem:[%s9862_s1 + $0x440] sm:$0xf0]  ;;  %v319_v16 = vperm.slane %v7817_v7, 0  ;;  %v5128_v17 = vor.u32 %v6388_v8, %v5125_v9  ;;  %v4843_v8 = vld [vmem:[%s9862_s1 + $0x5e0] sm:$0xf] }
  0x94   :  { %2004 = vmatpush.bf16.msra.mxu0 %v4932_v33  ;;  %v6406_v33 = vld [vmem:[%s9862_s1 + $0x8ac] sm:$0xf]  ;;  %v6320_v9 = vld [vmem:[%s9862_s1 + $0x5f4] sm:$0xf0] }
  0x95   :  { %2017 = vmatpush.bf16.msra.mxu1 %v5124_v34  ;;  %v5197_v34 = vld [vmem:[%s9862_s1 + $0x8c0] sm:$0xf0] }
  0x96   :  { %2030 = vmatpush.bf16.msra.mxu2 %v4168_v36  ;;  %v4624_v36 = vor.u32 %v6262_v26, %v4621_v27  ;;  %v5200_v43 = vor.u32 %v6406_v33, %v5197_v34  ;;  %v5101_v26 = vld [vmem:[%s9862_s1 + $0x800] sm:$0xf0]  ;;  %v6280_v33 = vld [vmem:[%s9862_s1 + $0x4bc] sm:$0xf] }
  0x97   :  { %2043 = vmatpush.bf16.msra.mxu3 %v4360_v41  ;;  %v4597_v41 = vld [vmem:[%s9862_s1 + $0x410] sm:$0xf0] }
  0x98   :  { %2005 = vmatpush.bf16.msra.mxu0 %v4908_v47  ;;  %v6400_v47 = vld [vmem:[%s9862_s1 + $0x87c] sm:$0xf] }
  0x99   :  { %2018 = vmatpush.bf16.msra.mxu1 %v5100_v48  ;;  %v5173_v48 = vld [vmem:[%s9862_s1 + $0x890] sm:$0xf0] }
  0x9a   :  { %2031 = vmatpush.bf16.msra.mxu2 %v4144_v49  ;;  %v4600_v49 = vor.u32 %v6256_v40, %v4597_v41  ;;  %v5176_v55 = vor.u32 %v6400_v47, %v5173_v48  ;;  %v6328_v40 = vld [vmem:[%s9862_s1 + $0x63c] sm:$0xf]  ;;  %v4885_v41 = vld [vmem:[%s9862_s1 + $0x650] sm:$0xf0]  ;;  %v4477_v47 = vld [vmem:[%s9862_s1 + $0x320] sm:$0xf0] }
  0x9b   :  { %2044 = vmatpush.bf16.msra.mxu3 %v4336_v53  ;;  %v4573_v53 = vld [vmem:[%s9862_s1 + $0x3e0] sm:$0xf0] }
  0x9c   :  { %2006 = vmatpush.bf16.msra.mxu0 %v4884_v59  ;;  %v6394_v59 = vld [vmem:[%s9862_s1 + $0x84c] sm:$0xf]  ;;  %v4576_v61 = vor.u32 %v6250_v52, %v4573_v53 }
  0x9d   :  { %2019 = vmatpush.bf16.msra.mxu1 %v5076_v62  ;;  %v6244_v62 = vld [vmem:[%s9862_s1 + $0x39c] sm:$0xf]  ;;  %v5152_v4 = vor.u32 %v6394_v59, %v5149_v60  ;;  %v6322_v52 = vld [vmem:[%s9862_s1 + $0x60c] sm:$0xf]  ;;  %v4267_v60 = vld [vmem:[%s9862_s1 + $0x160] sm:$0xf] }
  0x9e   :  { %2032 = vmatpush.bf16.msra.mxu2 %v4120_v63  ;;  %v4768_v63 = vor.u32 %v6298_v54, %v4765_v56  ;;  %v6370_v56 = vld [vmem:[%s9862_s1 + $0x78c] sm:$0xf] }
  0x9f   :  { %2045 = vmatpush.bf16.msra.mxu3 %v4312_v3  ;;  %v4741_v3 = vld [vmem:[%s9862_s1 + $0x530] sm:$0xf0] }
  0xa0   :  { %2007 = vmatpush.bf16.msra.mxu0 %v4860_v10  ;;  %v4552_v10 = vor.u32 %v6244_v62, %v4549_v1  ;;  %v4744_v12 = vor.u32 %v6292_v2, %v4741_v3  ;;  %v1801_v28 = vpop.f32.mrf.mxu0  ;;  %v4459_v62 = vld [vmem:[%s9862_s1 + $0x2e0] sm:$0xf]  ;;  %v6272_v2 = vld [vmem:[%s9862_s1 + $0x474] sm:$0xf0] }
  0xa1   :  { %2020 = vmatpush.bf16.msra.mxu1 %v5052_v14  ;;  %v4525_v14 = vld [vmem:[%s9862_s1 + $0x380] sm:$0xf0]  ;;  %v1802_v34 = vadd.f32 %v1801_v28, %v319_v16  ;;  %v4651_v1 = vld [vmem:[%s9862_s1 + $0x460] sm:$0xf]  ;;  %v6170_v16 = vld [vmem:[%s9862_s1 + $0x144] sm:$0xf0] }
  0xa2   :  { %2033 = vmatpush.bf16.msra.mxu2 %v4096_v15  ;;  %v6286_v15 = vld [vmem:[%s9862_s1 + $0x4ec] sm:$0xf]  ;;  %v4528_v27 = vor.u32 %v6238_v11, %v4525_v14  ;;  %v5056_v11 = vor.u32 %v6370_v56, %v5053_v57  ;;  %v4652_v14 = vor.u32 %v6272_v2, %v4651_v1  ;;  %v6200_v2 = vld [vmem:[%s9862_s1 + $0x234] sm:$0xf0] }
  0xa3   :  { %2046 = vmatpush.bf16.msra.mxu3 %v4288_v21  ;;  %2008 = vmatmul.bf16.vlgmr.msra.gmra.mxu0 %v7146_v35  ;;  %v4717_v21 = vld [vmem:[%s9862_s1 + $0x500] sm:$0xf0] }
  0xa4   :  { %2052 = vmatpush.bf16.msrb.mxu0 %v4648_v23  ;;  %2021 = vmatmul.bf16.vlgmr.msra.gmra.mxu1 %v7154_v38  ;;  %v6334_v23 = vld [vmem:[%s9862_s1 + $0x66c] sm:$0xf] }
  0xa5   :  { %2065 = vmatpush.bf16.msrb.mxu1 %v4840_v24  ;;  %2034 = vmatmul.bf16.vlgmr.msra.gmra.mxu2 %v6995_v19  ;;  %v4909_v24 = vld [vmem:[%s9862_s1 + $0x680] sm:$0xf0] }
  0xa6   :  { %2078 = vmatpush.bf16.msrb.mxu2 %v5032_v25  ;;  %2047 = vmatmul.bf16.vlgmr.msra.gmra.mxu3 %v6999_v22  ;;  %v6382_v25 = vld [vmem:[%s9862_s1 + $0x7ec] sm:$0xf]  ;;  %v4912_v30 = vor.u32 %v6334_v23, %v4909_v24  ;;  %v6218_v23 = vld [vmem:[%s9862_s1 + $0x2c4] sm:$0xf0]  ;;  %v4627_v24 = vld [vmem:[%s9862_s1 + $0x430] sm:$0xf] }
  0xa7   :  { %2091 = vmatpush.bf16.msrb.mxu3 %v5224_v29  ;;  %v4720_v29 = vor.u32 %v6286_v15, %v4717_v21  ;;  %v4243_v15 = vld [vmem:[%s9862_s1 + $0x130] sm:$0xf]  ;;  %v4844_v21 = vor.u32 %v6320_v9, %v4843_v8  ;;  %v6296_v8 = vld [vmem:[%s9862_s1 + $0x534] sm:$0xf0]  ;;  %v320_v9 = vperm.slane %v7817_v7, 1 }
  0xa8   :  { %2053 = vmatpush.bf16.msrb.mxu0 %v4624_v36  ;;  %v1814_v36 = vpop.f32.mrf.mxu1  ;;  %v1827_v53 = vpop.f32.mrf.mxu2 }
  0xa9   :  { %2066 = vmatpush.bf16.msrb.mxu1 %v4816_v37  ;;  %v5104_v37 = vor.u32 %v6382_v25, %v5101_v26  ;;  %v1815_v44 = vadd.f32 %v1814_v36, %v1802_v34  ;;  %v1840_v59 = vpop.f32.mrf.mxu3  ;;  %v6266_v25 = vld [vmem:[%s9862_s1 + $0x444] sm:$0xf0]  ;;  %v4819_v26 = vld [vmem:[%s9862_s1 + $0x5b0] sm:$0xf]  ;;  %v6164_v34 = vld [vmem:[%s9862_s1 + $0x114] sm:$0xf0] }
  0xaa   :  { %2079 = vmatpush.bf16.msrb.mxu2 %v5008_v39  ;;  %v4693_v39 = vld [vmem:[%s9862_s1 + $0x4d0] sm:$0xf0]  ;;  %v4628_v32 = vor.u32 %v6266_v25, %v4627_v24  ;;  %v4411_v36 = vld [vmem:[%s9862_s1 + $0x280] sm:$0xf]  ;;  %v4723_v25 = vld [vmem:[%s9862_s1 + $0x4f0] sm:$0xf] }
  0xab   :  { %2092 = vmatpush.bf16.msrb.mxu3 %v5200_v43  ;;  %v5077_v43 = vld [vmem:[%s9862_s1 + $0x7d0] sm:$0xf0]  ;;  %v4696_v48 = vor.u32 %v6280_v33, %v4693_v39  ;;  %v1828_v58 = vadd.f32 %v1827_v53, %v1815_v44  ;;  %v4219_v33 = vld [vmem:[%s9862_s1 + $0x100] sm:$0xf]  ;;  %v6212_v39 = vld [vmem:[%s9862_s1 + $0x294] sm:$0xf0] }
  0xac   :  { %2054 = vmatpush.bf16.msrb.mxu0 %v4600_v49  ;;  %v4888_v49 = vor.u32 %v6328_v40, %v4885_v41  ;;  %v5080_v54 = vor.u32 %v6376_v42, %v5077_v43  ;;  %v4603_v40 = vld [vmem:[%s9862_s1 + $0x400] sm:$0xf]  ;;  %v6260_v41 = vld [vmem:[%s9862_s1 + $0x414] sm:$0xf0]  ;;  %v4220_v44 = vor.u32 %v6164_v34, %v4219_v33  ;;  %v6254_v53 = vld [vmem:[%s9862_s1 + $0x3e4] sm:$0xf0] }
  0xad   :  { %2067 = vmatpush.bf16.msrb.mxu1 %v4792_v50  ;;  %v6274_v50 = vld [vmem:[%s9862_s1 + $0x48c] sm:$0xf]  ;;  %v7916_v3 = vadd.f32 %v1840_v59, %v1828_v58  ;;  %v4795_v42 = vld [vmem:[%s9862_s1 + $0x580] sm:$0xf]  ;;  %v6308_v43 = vld [vmem:[%s9862_s1 + $0x594] sm:$0xf0] }
  0xae   :  { %2080 = vmatpush.bf16.msrb.mxu2 %v4984_v51  ;;  %v4669_v51 = vld [vmem:[%s9862_s1 + $0x4a0] sm:$0xf0]  ;;  %v4123_v34 = vld [vmem:[%s9862_s1 + $0x40] sm:$0xf] }
  0xaf   :  { %2093 = vmatpush.bf16.msrb.mxu3 %v5176_v55  ;;  %v4861_v55 = vld [vmem:[%s9862_s1 + $0x620] sm:$0xf0]  ;;  %v4672_v5 = vor.u32 %v6274_v50, %v4669_v51  ;;  %v4796_v50 = vor.u32 %v6308_v43, %v4795_v42  ;;  %v6206_v51 = vld [vmem:[%s9862_s1 + $0x264] sm:$0xf0]  ;;  %v4507_v42 = vld [vmem:[%s9862_s1 + $0x340] sm:$0xf] }
  0xb0   :  { %2055 = vmatpush.bf16.msrb.mxu0 %v4576_v61  ;;  %v6176_v61 = vld [vmem:[%s9862_s1 + $0x174] sm:$0xf0]  ;;  %v4864_v6 = vor.u32 %v6322_v52, %v4861_v55  ;;  %v1829_v28 = vpop.f32.mrf.mxu2  ;;  %v4579_v52 = vld [vmem:[%s9862_s1 + $0x3d0] sm:$0xf]  ;;  %v6302_v55 = vld [vmem:[%s9862_s1 + $0x564] sm:$0xf0] }
  0xb1   :  { %2068 = vmatpush.bf16.msrb.mxu1 %v4768_v63  ;;  %v4480_v63 = vor.u32 %v6226_v46, %v4477_v47  ;;  %v4604_v46 = vor.u32 %v6260_v41, %v4603_v40  ;;  %v4195_v47 = vld [vmem:[%s9862_s1 + $0xd0] sm:$0xf]  ;;  %v6188_v41 = vld [vmem:[%s9862_s1 + $0x1d4] sm:$0xf0] }
  0xb2   :  { %2081 = vmatpush.bf16.msrb.mxu2 %v4960_v0  ;;  %v6224_v0 = vld [vmem:[%s9862_s1 + $0x2f4] sm:$0xf0] }
  0xb3   :  { %2094 = vmatpush.bf16.msrb.mxu3 %v5152_v4  ;;  %v1803_v4 = vpop.f32.mrf.mxu0  ;;  %v6236_v43 = vld [vmem:[%s9862_s1 + $0x354] sm:$0xf0] }
  0xb4   :  { %2056 = vmatpush.bf16.msrb.mxu0 %v4552_v10  ;;  %v1816_v10 = vpop.f32.mrf.mxu1  ;;  %v6248_v4 = vld [vmem:[%s9862_s1 + $0x3b4] sm:$0xf0] }
  0xb5   :  { %2069 = vmatpush.bf16.msrb.mxu1 %v4744_v12  ;;  %v4268_v12 = vor.u32 %v6176_v61, %v4267_v60  ;;  %v4580_v61 = vor.u32 %v6254_v53, %v4579_v52  ;;  %v6182_v52 = vld [vmem:[%s9862_s1 + $0x1a4] sm:$0xf0]  ;;  %v4483_v53 = vld [vmem:[%s9862_s1 + $0x310] sm:$0xf] }
  0xb6   :  { %2082 = vmatpush.bf16.msrb.mxu2 %v4936_v13  ;;  %v4460_v13 = vor.u32 %v6224_v0, %v4459_v62  ;;  %v4171_v62 = vld [vmem:[%s9862_s1 + $0xa0] sm:$0xf] }
  0xb7   :  { %2095 = vmatpush.bf16.msrb.mxu3 %v5128_v17  ;;  %v4435_v17 = vld [vmem:[%s9862_s1 + $0x2b0] sm:$0xf]  ;;  %v4363_v0 = vld [vmem:[%s9862_s1 + $0x220] sm:$0xf] }
  0xb8   :  { %2057 = vmatpush.bf16.msrb.mxu0 %v4528_v27  ;;  %v6314_v27 = vld [vmem:[%s9862_s1 + $0x5c4] sm:$0xf0]  ;;  %v4436_v31 = vor.u32 %v6218_v23, %v4435_v17 }
  0xb9   :  { %2070 = vmatpush.bf16.msrb.mxu1 %v4720_v29  ;;  %v4244_v29 = vor.u32 %v6170_v16, %v4243_v15  ;;  %v4339_v15 = vld [vmem:[%s9862_s1 + $0x1f0] sm:$0xf]  ;;  %v6194_v17 = vld [vmem:[%s9862_s1 + $0x204] sm:$0xf0] }
  0xba   :  { %2083 = vmatpush.bf16.msrb.mxu2 %v4912_v30  ;;  %v1842_v30 = vpop.f32.mrf.mxu3  ;;  %v6242_v23 = vld [vmem:[%s9862_s1 + $0x384] sm:$0xf0] }
  0xbb   :  { %2096 = vmatpush.bf16.msrb.mxu3 %v5104_v37  ;;  %v4820_v37 = vor.u32 %v6314_v27, %v4819_v26  ;;  %v6290_v26 = vld [vmem:[%s9862_s1 + $0x504] sm:$0xf0] }
  0xbc   :  { %2058 = vmatpush.bf16.msrb.mxu0 %v4504_v45  ;;  %v4412_v45 = vor.u32 %v6212_v39, %v4411_v36  ;;  %v6140_v36 = vld [vmem:[%s9862_s1 + $0x54] sm:$0xf0]  ;;  %v4724_v40 = vor.u32 %v6290_v26, %v4723_v25  ;;  %v4437_v25 = vld [vmem:[%s9862_s1 + $0x2c8] sm:$0xf0] }
  0xbd   :  { %2071 = vmatpush.bf16.msrb.mxu1 %v4696_v48  ;;  %v6158_v48 = vld [vmem:[%s9862_s1 + $0xe4] sm:$0xf0] }
  0xbe   :  { %2084 = vmatpush.bf16.msrb.mxu2 %v4888_v49  ;;  %v4387_v49 = vld [vmem:[%s9862_s1 + $0x250] sm:$0xf]  ;;  %v4196_v57 = vor.u32 %v6158_v48, %v4195_v47  ;;  %v6134_v48 = vld [vmem:[%s9862_s1 + $0x24] sm:$0xf0] }
  0xbf   :  { %2097 = vmatpush.bf16.msrb.mxu3 %v5080_v54  ;;  %v4771_v54 = vld [vmem:[%s9862_s1 + $0x550] sm:$0xf]  ;;  %v4388_v60 = vor.u32 %v6206_v51, %v4387_v49 }
  0xc0   :  { %2059 = vmatpush.bf16.msrb.mxu0 %v4480_v63  ;;  %v1853_v56 = vpop.f32.mrf.mxu0  ;;  %v6152_v63 = vld [vmem:[%s9862_s1 + $0xb4] sm:$0xf0]  ;;  %v4772_v1 = vor.u32 %v6302_v55, %v4771_v54  ;;  %v4099_v47 = vld [vmem:[%s9862_s1 + $0x10] sm:$0xf]  ;;  %v6230_v55 = vld [vmem:[%s9862_s1 + $0x324] sm:$0xf0] }
  0xc1   :  { %2072 = vmatpush.bf16.msrb.mxu1 %v4672_v5  ;;  %v1854_v58 = vadd.f32 %v1853_v56, %v7916_v3  ;;  %v1866_v59 = vpop.f32.mrf.mxu1  ;;  %v4555_v3 = vld [vmem:[%s9862_s1 + $0x3a0] sm:$0xf]  ;;  %v4172_v10 = vor.u32 %v6152_v63, %v4171_v62  ;;  %v4291_v51 = vld [vmem:[%s9862_s1 + $0x190] sm:$0xf]  ;;  %v4100_v63 = vor.u32 %v6134_v48, %v4099_v47  ;;  %v6398_v48 = vld [vmem:[%s9862_s1 + $0x864] sm:$0xf0] }
  0xc2   :  { %2085 = vmatpush.bf16.msrb.mxu2 %v4864_v6  ;;  %v4747_v6 = vld [vmem:[%s9862_s1 + $0x520] sm:$0xf]  ;;  %v4675_v56 = vld [vmem:[%s9862_s1 + $0x490] sm:$0xf] }
  0xc3   :  { %2098 = vmatpush.bf16.msrb.mxu3 %v5056_v11  ;;  %2060 = vmatmul.bf16.vlgmr.msrb.gmra.mxu0 %v6993_v18  ;;  %v8019_v5 = vadd.f32 %v1866_v59, %v1854_v58  ;;  %v4364_v11 = vor.u32 %v6200_v2, %v4363_v0  ;;  %v4748_v16 = vor.u32 %v6296_v8, %v4747_v6  ;;  %v5035_v59 = vld [vmem:[%s9862_s1 + $0x760] sm:$0xf]  ;;  %v6416_v0 = vld [vmem:[%s9862_s1 + $0x8f4] sm:$0xf0]  ;;  %v4269_v2 = vld [vmem:[%s9862_s1 + $0x178] sm:$0xf0] }
  0xc4   :  { %2104 = vmatpush.bf16.msra.mxu0 %v4268_v12  ;;  %2073 = vmatmul.bf16.vlgmr.msrb.gmra.mxu1 %v6997_v20  ;;  %v4556_v12 = vor.u32 %v6248_v4, %v4555_v3  ;;  %v4292_v3 = vor.u32 %v6182_v52, %v4291_v51  ;;  %v4484_v4 = vor.u32 %v6230_v55, %v4483_v53  ;;  %v6221_v6 = vld [vmem:[%s9862_s1 + $0x2e4] sm:$0xf]  ;;  %v4461_v8 = vld [vmem:[%s9862_s1 + $0x2f8] sm:$0xf0]  ;;  %v6203_v51 = vld [vmem:[%s9862_s1 + $0x254] sm:$0xf] }
  0xc5   :  { %2117 = vmatpush.bf16.msra.mxu1 %v4460_v13  ;;  %2086 = vmatmul.bf16.vlgmr.msrb.gmra.mxu2 %v7146_v35  ;;  %v4147_v13 = vld [vmem:[%s9862_s1 + $0x70] sm:$0xf]  ;;  %v4389_v52 = vld [vmem:[%s9862_s1 + $0x268] sm:$0xf0] }
  0xc6   :  { %2130 = vmatpush.bf16.msra.mxu2 %v4652_v14  ;;  %2099 = vmatmul.bf16.vlgmr.msrb.gmra.mxu3 %v7154_v38  ;;  %v6146_v14 = vld [vmem:[%s9862_s1 + $0x84] sm:$0xf0] }
  0xc7   :  { %2143 = vmatpush.bf16.msra.mxu3 %v4844_v21  ;;  %v4531_v21 = vld [vmem:[%s9862_s1 + $0x370] sm:$0xf]  ;;  %v4148_v30 = vor.u32 %v6146_v14, %v4147_v13  ;;  %v6362_v14 = vld [vmem:[%s9862_s1 + $0x744] sm:$0xf0] }
  0xc8   :  { %2105 = vmatpush.bf16.msra.mxu0 %v4244_v29  ;;  %v1879_v24 = vpop.f32.mrf.mxu2  ;;  %v1855_v29 = vpop.f32.mrf.mxu0  ;;  %v4532_v33 = vor.u32 %v6242_v23, %v4531_v21  ;;  %v5011_v13 = vld [vmem:[%s9862_s1 + $0x730] sm:$0xf]  ;;  %v6167_v21 = vld [vmem:[%s9862_s1 + $0x134] sm:$0xf]  ;;  %v4245_v23 = vld [vmem:[%s9862_s1 + $0x148] sm:$0xf0] }
  0xc9   :  { %2118 = vmatpush.bf16.msra.mxu1 %v4436_v31  ;;  %v1880_v27 = vadd.f32 %v1879_v24, %v320_v9  ;;  %v1892_v28 = vpop.f32.mrf.mxu3  ;;  %v1868_v31 = vpop.f32.mrf.mxu1  ;;  %v6215_v24 = vld [vmem:[%s9862_s1 + $0x2b4] sm:$0xf]  ;;  %v5012_v26 = vor.u32 %v6362_v14, %v5011_v13  ;;  %v4987_v29 = vld [vmem:[%s9862_s1 + $0x700] sm:$0xf]  ;;  %v6386_v14 = vld [vmem:[%s9862_s1 + $0x804] sm:$0xf0] }
  0xca   :  { %2131 = vmatpush.bf16.msra.mxu2 %v4628_v32  ;;  %v4340_v32 = vor.u32 %v6194_v17, %v4339_v15  ;;  %v5203_v15 = vld [vmem:[%s9862_s1 + $0x8b0] sm:$0xf]  ;;  %v6410_v17 = vld [vmem:[%s9862_s1 + $0x8c4] sm:$0xf0]  ;;  %v5179_v31 = vld [vmem:[%s9862_s1 + $0x880] sm:$0xf] }
  0xcb   :  { %2144 = vmatpush.bf16.msra.mxu3 %v4820_v37  ;;  %v4315_v37 = vld [vmem:[%s9862_s1 + $0x1c0] sm:$0xf]  ;;  %v8061_v39 = vadd.f32 %v1892_v28, %v1880_v27  ;;  %v5204_v27 = vor.u32 %v6410_v17, %v5203_v15  ;;  %v4248_v28 = vor.u32 %v6167_v21, %v4245_v23  ;;  %v6143_v15 = vld [vmem:[%s9862_s1 + $0x74] sm:$0xf] }
  0xcc   :  { %2106 = vmatpush.bf16.msra.mxu0 %v4220_v44  ;;  %v4699_v44 = vld [vmem:[%s9862_s1 + $0x4c0] sm:$0xf]  ;;  %v4316_v49 = vor.u32 %v6188_v41, %v4315_v37  ;;  %v6209_v37 = vld [vmem:[%s9862_s1 + $0x284] sm:$0xf]  ;;  %v6191_v23 = vld [vmem:[%s9862_s1 + $0x1f4] sm:$0xf] }
  0xcd   :  { %2119 = vmatpush.bf16.msra.mxu1 %v4412_v45  ;;  %v6284_v45 = vld [vmem:[%s9862_s1 + $0x4d4] sm:$0xf0] }
  0xce   :  { %2132 = vmatpush.bf16.msra.mxu2 %v4604_v46  ;;  %v4124_v46 = vor.u32 %v6140_v36, %v4123_v34  ;;  %v4700_v54 = vor.u32 %v6284_v45, %v4699_v44  ;;  %v6161_v34 = vld [vmem:[%s9862_s1 + $0x104] sm:$0xf]  ;;  %v4221_v36 = vld [vmem:[%s9862_s1 + $0x118] sm:$0xf0]  ;;  %v4963_v44 = vld [vmem:[%s9862_s1 + $0x6d0] sm:$0xf] }
  0xcf   :  { %2145 = vmatpush.bf16.msra.mxu3 %v4796_v50  ;;  %v4508_v50 = vor.u32 %v6236_v43, %v4507_v42  ;;  %v4224_v43 = vor.u32 %v6161_v34, %v4221_v36  ;;  %v6350_v45 = vld [vmem:[%s9862_s1 + $0x6e4] sm:$0xf0]  ;;  %v6380_v36 = vld [vmem:[%s9862_s1 + $0x7d4] sm:$0xf0] }
  0xd0   :  { %2107 = vmatpush.bf16.msra.mxu0 %v4196_v57  ;;  %v6278_v57 = vld [vmem:[%s9862_s1 + $0x4a4] sm:$0xf0]  ;;  %v1881_v58 = vpop.f32.mrf.mxu2  ;;  %v4964_v53 = vor.u32 %v6350_v45, %v4963_v44  ;;  %v4867_v44 = vld [vmem:[%s9862_s1 + $0x610] sm:$0xf] }
  0xd1   :  { %2120 = vmatpush.bf16.msra.mxu1 %v4388_v60  ;;  %v6368_v60 = vld [vmem:[%s9862_s1 + $0x774] sm:$0xf0]  ;;  %v1894_v62 = vpop.f32.mrf.mxu3  ;;  %v4676_v9 = vor.u32 %v6278_v57, %v4675_v56  ;;  %v4939_v57 = vld [vmem:[%s9862_s1 + $0x6a0] sm:$0xf]  ;;  %v6326_v45 = vld [vmem:[%s9862_s1 + $0x624] sm:$0xf0] }
  0xd2   :  { %2133 = vmatpush.bf16.msra.mxu2 %v4580_v61  ;;  %v5227_v61 = vld [vmem:[%s9862_s1 + $0x8e0] sm:$0xf]  ;;  %v6344_v58 = vld [vmem:[%s9862_s1 + $0x6b4] sm:$0xf0]  ;;  %v4392_v62 = vor.u32 %v6203_v51, %v4389_v52 }
  0xd3   :  { %2146 = vmatpush.bf16.msra.mxu3 %v4772_v1  ;;  %v6173_v1 = vld [vmem:[%s9862_s1 + $0x164] sm:$0xf] }
  0xd4   :  { %2108 = vmatpush.bf16.msra.mxu0 %v4172_v10  ;;  %v5036_v10 = vor.u32 %v6368_v60, %v5035_v59  ;;  %v5131_v59 = vld [vmem:[%s9862_s1 + $0x820] sm:$0xf] }
  0xd5   :  { %2121 = vmatpush.bf16.msra.mxu1 %v4364_v11  ;;  %v5228_v11 = vor.u32 %v6416_v0, %v5227_v61  ;;  %v6149_v0 = vld [vmem:[%s9862_s1 + $0xa4] sm:$0xf] }
  0xd6   :  { %2134 = vmatpush.bf16.msra.mxu2 %v4556_v12  ;;  %v4272_v12 = vor.u32 %v6173_v1, %v4269_v2  ;;  %v4173_v1 = vld [vmem:[%s9862_s1 + $0xb8] sm:$0xf0]  ;;  %v6197_v2 = vld [vmem:[%s9862_s1 + $0x224] sm:$0xf] }
  0xd7   :  { %2147 = vmatpush.bf16.msra.mxu3 %v4748_v16  ;;  %v4464_v16 = vor.u32 %v6221_v6, %v4461_v8  ;;  %v4176_v8 = vor.u32 %v6149_v0, %v4173_v1 }
  0xd8   :  { %2109 = vmatpush.bf16.msra.mxu0 %v4148_v30  ;;  %v6356_v30 = vld [vmem:[%s9862_s1 + $0x714] sm:$0xf0] }
  0xd9   :  { %2122 = vmatpush.bf16.msra.mxu1 %v4340_v32  ;;  %v4440_v32 = vor.u32 %v6215_v24, %v4437_v25  ;;  %v4988_v41 = vor.u32 %v6356_v30, %v4987_v29  ;;  %v4341_v24 = vld [vmem:[%s9862_s1 + $0x208] sm:$0xf0]  ;;  %v4891_v30 = vld [vmem:[%s9862_s1 + $0x640] sm:$0xf] }
  0xda   :  { %2135 = vmatpush.bf16.msra.mxu2 %v4532_v33  ;;  %v6404_v33 = vld [vmem:[%s9862_s1 + $0x894] sm:$0xf0]  ;;  %v4344_v34 = vor.u32 %v6191_v23, %v4341_v24 }
  0xdb   :  { %2148 = vmatpush.bf16.msra.mxu3 %v4724_v40  ;;  %v4413_v40 = vld [vmem:[%s9862_s1 + $0x298] sm:$0xf0]  ;;  %v5180_v42 = vor.u32 %v6404_v33, %v5179_v31  ;;  %v6332_v31 = vld [vmem:[%s9862_s1 + $0x654] sm:$0xf0] }
  0xdc   :  { %2110 = vmatpush.bf16.msra.mxu0 %v4124_v46  ;;  %v5155_v46 = vld [vmem:[%s9862_s1 + $0x850] sm:$0xf]  ;;  %v4416_v47 = vor.u32 %v6209_v37, %v4413_v40  ;;  %v6137_v37 = vld [vmem:[%s9862_s1 + $0x44] sm:$0xf]  ;;  %v4125_v40 = vld [vmem:[%s9862_s1 + $0x58] sm:$0xf0] }
  0xdd   :  { %2123 = vmatpush.bf16.msra.mxu1 %v4316_v49  ;;  %v6155_v49 = vld [vmem:[%s9862_s1 + $0xd4] sm:$0xf]  ;;  %v5156_v55 = vor.u32 %v6398_v48, %v5155_v46  ;;  %v5059_v48 = vld [vmem:[%s9862_s1 + $0x790] sm:$0xf] }
  0xde   :  { %2136 = vmatpush.bf16.msra.mxu2 %v4508_v50  ;;  %v4197_v50 = vld [vmem:[%s9862_s1 + $0xe8] sm:$0xf0] }
  0xdf   :  { %2149 = vmatpush.bf16.msra.mxu3 %v4700_v54  ;;  %v4200_v56 = vor.u32 %v6155_v49, %v4197_v50  ;;  %v6374_v49 = vld [vmem:[%s9862_s1 + $0x7a4] sm:$0xf0]  ;;  %v6131_v50 = vld [vmem:[%s9862_s1 + $0x14] sm:$0xf] }
  0xe0   :  { %2111 = vmatpush.bf16.msra.mxu0 %v4100_v63  ;;  %v1905_v54 = vpop.f32.mrf.mxu0  ;;  %v6392_v63 = vld [vmem:[%s9862_s1 + $0x834] sm:$0xf0]  ;;  %v5060_v0 = vor.u32 %v6374_v49, %v5059_v48 }
  0xe1   :  { %2124 = vmatpush.bf16.msra.mxu1 %v4292_v3  ;;  %v1906_v60 = vadd.f32 %v1905_v54, %v8061_v39  ;;  %v1918_v61 = vpop.f32.mrf.mxu1  ;;  %v4365_v39 = vld [vmem:[%s9862_s1 + $0x238] sm:$0xf0]  ;;  %v5132_v6 = vor.u32 %v6392_v63, %v5131_v59  ;;  %v6179_v54 = vld [vmem:[%s9862_s1 + $0x194] sm:$0xf]  ;;  %v6317_v59 = vld [vmem:[%s9862_s1 + $0x5e4] sm:$0xf] }
  0xe2   :  { %2137 = vmatpush.bf16.msra.mxu2 %v4484_v4  ;;  %v4940_v4 = vor.u32 %v6344_v58, %v4939_v57  ;;  %v4368_v13 = vor.u32 %v6197_v2, %v4365_v39  ;;  %v6269_v57 = vld [vmem:[%s9862_s1 + $0x464] sm:$0xf]  ;;  %v4653_v58 = vld [vmem:[%s9862_s1 + $0x478] sm:$0xf0] }
  0xe3   :  { %2150 = vmatpush.bf16.msra.mxu3 %v4676_v9  ;;  %2112 = vmatmul.bf16.vlgmr.msra.gmra.mxu0 %v6995_v19  ;;  %v1919_v3 = vadd.f32 %v1918_v61, %v1906_v60  ;;  %v4915_v9 = vld [vmem:[%s9862_s1 + $0x670] sm:$0xf]  ;;  %v4868_v60 = vor.u32 %v6326_v45, %v4867_v44  ;;  %v4845_v61 = vld [vmem:[%s9862_s1 + $0x5f8] sm:$0xf0]  ;;  %v6413_v2 = vld [vmem:[%s9862_s1 + $0x8e4] sm:$0xf] }
  0xe4   :  { %2156 = vmatpush.bf16.msrb.mxu0 %v5036_v10  ;;  %2125 = vmatmul.bf16.vlgmr.msra.gmra.mxu1 %v6999_v22  ;;  %v6338_v10 = vld [vmem:[%s9862_s1 + $0x684] sm:$0xf0]  ;;  %v5037_v63 = vld [vmem:[%s9862_s1 + $0x778] sm:$0xf0]  ;;  %v6347_v44 = vld [vmem:[%s9862_s1 + $0x6d4] sm:$0xf] }
  0xe5   :  { %2169 = vmatpush.bf16.msrb.mxu1 %v5228_v11  ;;  %2138 = vmatmul.bf16.vlgmr.msra.gmra.mxu2 %v6993_v18  ;;  %v5107_v11 = vld [vmem:[%s9862_s1 + $0x7f0] sm:$0xf]  ;;  %v4916_v25 = vor.u32 %v6338_v10, %v4915_v9  ;;  %v5229_v39 = vld [vmem:[%s9862_s1 + $0x8f8] sm:$0xf0]  ;;  %v6263_v9 = vld [vmem:[%s9862_s1 + $0x434] sm:$0xf] }
  0xe6   :  { %2182 = vmatpush.bf16.msrb.mxu2 %v4272_v12  ;;  %2151 = vmatmul.bf16.vlgmr.msra.gmra.mxu3 %v6997_v20  ;;  %v4629_v10 = vld [vmem:[%s9862_s1 + $0x448] sm:$0xf0] }
  0xe7   :  { %2195 = vmatpush.bf16.msrb.mxu3 %v4464_v16  ;;  %v4149_v16 = vld [vmem:[%s9862_s1 + $0x88] sm:$0xf0] }
  0xe8   :  { %2157 = vmatpush.bf16.msrb.mxu0 %v5012_v26  ;;  %v1931_v12 = vpop.f32.mrf.mxu2  ;;  %v4152_v29 = vor.u32 %v6143_v15, %v4149_v16  ;;  %v5013_v15 = vld [vmem:[%s9862_s1 + $0x748] sm:$0xf0]  ;;  %v6407_v16 = vld [vmem:[%s9862_s1 + $0x8b4] sm:$0xf] }
  0xe9   :  { %2170 = vmatpush.bf16.msrb.mxu1 %v5204_v27  ;;  %v1932_v17 = vadd.f32 %v1931_v12, %v1919_v3  ;;  %v1944_v21 = vpop.f32.mrf.mxu3  ;;  %v1907_v27 = vpop.f32.mrf.mxu0  ;;  %v5232_v12 = vor.u32 %v6413_v2, %v5229_v39  ;;  %v4965_v45 = vld [vmem:[%s9862_s1 + $0x6e8] sm:$0xf0]  ;;  %v6287_v39 = vld [vmem:[%s9862_s1 + $0x4f4] sm:$0xf] }
  0xea   :  { %2183 = vmatpush.bf16.msrb.mxu2 %v4248_v28  ;;  %v5108_v28 = vor.u32 %v6386_v14, %v5107_v11  ;;  %v1920_v33 = vpop.f32.mrf.mxu1  ;;  %v6311_v11 = vld [vmem:[%s9862_s1 + $0x5b4] sm:$0xf]  ;;  %v4605_v27 = vld [vmem:[%s9862_s1 + $0x418] sm:$0xf0]  ;;  %v4533_v2 = vld [vmem:[%s9862_s1 + $0x388] sm:$0xf0] }
  0xeb   :  { %2196 = vmatpush.bf16.msrb.mxu3 %v4440_v32  ;;  %v8251_v26 = vadd.f32 %v1944_v21, %v1932_v17  ;;  %v5083_v32 = vld [vmem:[%s9862_s1 + $0x7c0] sm:$0xf]  ;;  %v6359_v14 = vld [vmem:[%s9862_s1 + $0x734] sm:$0xf]  ;;  %v5205_v17 = vld [vmem:[%s9862_s1 + $0x8c8] sm:$0xf0]  ;;  %v4632_v21 = vor.u32 %v6263_v9, %v4629_v10 }
  0xec   :  { %2158 = vmatpush.bf16.msrb.mxu0 %v4988_v41  ;;  %v6185_v41 = vld [vmem:[%s9862_s1 + $0x1c4] sm:$0xf]  ;;  %v5084_v46 = vor.u32 %v6380_v36, %v5083_v32  ;;  %v5016_v24 = vor.u32 %v6359_v14, %v5013_v15  ;;  %v4989_v32 = vld [vmem:[%s9862_s1 + $0x718] sm:$0xf0]  ;;  %v6383_v10 = vld [vmem:[%s9862_s1 + $0x7f4] sm:$0xf] }
  0xed   :  { %2171 = vmatpush.bf16.msrb.mxu1 %v5180_v42  ;;  %v4317_v42 = vld [vmem:[%s9862_s1 + $0x1d8] sm:$0xf0]  ;;  %v6401_v33 = vld [vmem:[%s9862_s1 + $0x884] sm:$0xf] }
  0xee   :  { %2184 = vmatpush.bf16.msrb.mxu2 %v4224_v43  ;;  %v4892_v43 = vor.u32 %v6332_v31, %v4891_v30  ;;  %v4320_v52 = vor.u32 %v6185_v41, %v4317_v42  ;;  %v4797_v30 = vld [vmem:[%s9862_s1 + $0x598] sm:$0xf0]  ;;  %v6353_v31 = vld [vmem:[%s9862_s1 + $0x704] sm:$0xf]  ;;  %v4581_v41 = vld [vmem:[%s9862_s1 + $0x3e8] sm:$0xf0] }
  0xef   :  { %2197 = vmatpush.bf16.msrb.mxu3 %v4416_v47  ;;  %v4128_v47 = vor.u32 %v6137_v37, %v4125_v40  ;;  %v4992_v40 = vor.u32 %v6353_v31, %v4989_v32  ;;  %v6299_v42 = vld [vmem:[%s9862_s1 + $0x554] sm:$0xf]  ;;  %v5085_v31 = vld [vmem:[%s9862_s1 + $0x7d8] sm:$0xf0] }
  0xf0   :  { %2159 = vmatpush.bf16.msrb.mxu0 %v4964_v53  ;;  %v1933_v51 = vpop.f32.mrf.mxu2  ;;  %v4101_v53 = vld [vmem:[%s9862_s1 + $0x28] sm:$0xf0] }
  0xf1   :  { %2172 = vmatpush.bf16.msrb.mxu1 %v5156_v55  ;;  %v4293_v55 = vld [vmem:[%s9862_s1 + $0x1a8] sm:$0xf0]  ;;  %v4104_v1 = vor.u32 %v6131_v50, %v4101_v53  ;;  %v6245_v53 = vld [vmem:[%s9862_s1 + $0x3a4] sm:$0xf] }
  0xf2   :  { %2185 = vmatpush.bf16.msrb.mxu2 %v4200_v56  ;;  %v1946_v56 = vpop.f32.mrf.mxu3  ;;  %v4296_v3 = vor.u32 %v6179_v54, %v4293_v55  ;;  %v4557_v54 = vld [vmem:[%s9862_s1 + $0x3b8] sm:$0xf0]  ;;  %v6293_v55 = vld [vmem:[%s9862_s1 + $0x524] sm:$0xf] }
  0xf3   :  { %2198 = vmatpush.bf16.msrb.mxu3 %v4392_v62  ;;  %v6365_v62 = vld [vmem:[%s9862_s1 + $0x764] sm:$0xf] }
  0xf4   :  { %2160 = vmatpush.bf16.msrb.mxu0 %v4940_v4  ;;  %v4656_v4 = vor.u32 %v6269_v57, %v4653_v58  ;;  %v4749_v57 = vld [vmem:[%s9862_s1 + $0x538] sm:$0xf0]  ;;  %v6341_v58 = vld [vmem:[%s9862_s1 + $0x6a4] sm:$0xf] }
  0xf5   :  { %2173 = vmatpush.bf16.msrb.mxu1 %v5132_v6  ;;  %v4848_v6 = vor.u32 %v6317_v59, %v4845_v61  ;;  %v4941_v59 = vld [vmem:[%s9862_s1 + $0x6b8] sm:$0xf0] }
  0xf6   :  { %2186 = vmatpush.bf16.msrb.mxu2 %v4176_v8  ;;  %v5040_v8 = vor.u32 %v6365_v62, %v5037_v63  ;;  %v5133_v61 = vld [vmem:[%s9862_s1 + $0x838] sm:$0xf0]  ;;  %v4560_v62 = vor.u32 %v6245_v53, %v4557_v54  ;;  %v4752_v63 = vor.u32 %v6293_v55, %v4749_v57  ;;  %v6479_v53 = vld [vmem:[%s9865_s3 + $0x1ec] sm:$0xf0]  ;;  %v5603_v54 = vld [vmem:[%s9865_s3 + $0x2e0] sm:$0xf] }
  0xf7   :  { %2199 = vmatpush.bf16.msrb.mxu3 %v4368_v13  ;;  %v4821_v13 = vld [vmem:[%s9862_s1 + $0x5c8] sm:$0xf0]  ;;  %v6511_v55 = vld [vmem:[%s9865_s3 + $0x2ec] sm:$0xf0] }
  0xf8   :  { %2161 = vmatpush.bf16.msrb.mxu0 %v4916_v25  ;;  %v4824_v23 = vor.u32 %v6311_v11, %v4821_v13  ;;  %v6257_v25 = vld [vmem:[%s9862_s1 + $0x404] sm:$0xf]  ;;  %v5109_v11 = vld [vmem:[%s9862_s1 + $0x808] sm:$0xf0] }
  0xf9   :  { %2174 = vmatpush.bf16.msrb.mxu1 %v5108_v28  ;;  %v6305_v28 = vld [vmem:[%s9862_s1 + $0x584] sm:$0xf]  ;;  %v4608_v36 = vor.u32 %v6257_v25, %v4605_v27  ;;  %v5112_v25 = vor.u32 %v6383_v10, %v5109_v11  ;;  %v4701_v27 = vld [vmem:[%s9862_s1 + $0x4d8] sm:$0xf0]  ;;  %v5315_v10 = vld [vmem:[%s9865_s3 + $0xa0] sm:$0xf] }
  0xfa   :  { %2187 = vmatpush.bf16.msrb.mxu2 %v4152_v29  ;;  %v5208_v29 = vor.u32 %v6407_v16, %v5205_v17  ;;  %v4800_v37 = vor.u32 %v6305_v28, %v4797_v30  ;;  %v6329_v28 = vld [vmem:[%s9862_s1 + $0x644] sm:$0xf]  ;;  %v6439_v11 = vld [vmem:[%s9865_s3 + $0xac] sm:$0xf0] }
  0xfb   :  { %2200 = vmatpush.bf16.msrb.mxu3 %v4344_v34  ;;  %v5181_v34 = vld [vmem:[%s9862_s1 + $0x898] sm:$0xf0]  ;;  %v6377_v30 = vld [vmem:[%s9862_s1 + $0x7c4] sm:$0xf] }
  0xfc   :  { %2162 = vmatpush.bf16.msrb.mxu0 %v4892_v43  ;;  %v5184_v43 = vor.u32 %v6401_v33, %v5181_v34  ;;  %v6227_v33 = vld [vmem:[%s9862_s1 + $0x314] sm:$0xf]  ;;  %v4485_v34 = vld [vmem:[%s9862_s1 + $0x328] sm:$0xf0] }
  0xfd   :  { %2175 = vmatpush.bf16.msrb.mxu1 %v5084_v46  ;;  %v6395_v46 = vld [vmem:[%s9862_s1 + $0x854] sm:$0xf] }
  0xfe   :  { %2188 = vmatpush.bf16.msrb.mxu2 %v4128_v47  ;;  %v5157_v47 = vld [vmem:[%s9862_s1 + $0x868] sm:$0xf0] }
  0xff   :  { %2201 = vmatpush.bf16.msrb.mxu3 %v4320_v52  ;;  %v4968_v52 = vor.u32 %v6347_v44, %v4965_v45  ;;  %v5160_v56 = vor.u32 %v6395_v46, %v5157_v47  ;;  %v6371_v44 = vld [vmem:[%s9862_s1 + $0x794] sm:$0xf]  ;;  %v5061_v45 = vld [vmem:[%s9862_s1 + $0x7a8] sm:$0xf0]  ;;  %v5347_v47 = vld [vmem:[%s9865_s3 + $0xe0] sm:$0xf] }
 0x100   :  { %2163 = vmatpush.bf16.msrb.mxu0 %v4868_v60  ;;  %v8401_v48 = vpop.f32.mrf.mxu0  ;;  %v6389_v60 = vld [vmem:[%s9862_s1 + $0x824] sm:$0xf] }
 0x101   :  { %2176 = vmatpush.bf16.msrb.mxu1 %v5060_v0  ;;  %v8403_v50 = vpop.f32.mrf.mxu1  ;;  %v4944_v0 = vor.u32 %v6341_v58, %v4941_v59  ;;  %v5064_v59 = vor.u32 %v6371_v44, %v5061_v45  ;;  %v5683_v44 = vld [vmem:[%s9865_s3 + $0x380] sm:$0xf]  ;;  %v6531_v45 = vld [vmem:[%s9865_s3 + $0x38c] sm:$0xf0] }
 0x102   :  { %2189 = vmatpush.bf16.msrb.mxu2 %v4104_v1  ;;  %v6239_v1 = vld [vmem:[%s9862_s1 + $0x374] sm:$0xf] }
 0x103   :  { %2202 = vmatpush.bf16.msrb.mxu3 %v4296_v3  ;;  %2164 = vmatmul.bf16.vlgmr.msrb.gmra.mxu0 %v7146_v35  ;;  %v5136_v3 = vor.u32 %v6389_v60, %v5133_v61  ;;  %v4536_v14 = vor.u32 %v6239_v1, %v4533_v2  ;;  %v5331_v61 = vld [vmem:[%s9865_s3 + $0xc0] sm:$0xf]  ;;  %v6543_v2 = vld [vmem:[%s9865_s3 + $0x3ec] sm:$0xf0] }
 0x104   :  { %2208 = vmatpush.bf16.msra.mxu0 %v4656_v4  ;;  %2177 = vmatmul.bf16.vlgmr.msrb.gmra.mxu1 %v7154_v38  ;;  %v4725_v4 = vld [vmem:[%s9862_s1 + $0x508] sm:$0xf0]  ;;  %v5459_v1 = vld [vmem:[%s9865_s3 + $0x1c0] sm:$0xf] }
 0x105   :  { %2221 = vmatpush.bf16.msra.mxu1 %v4848_v6  ;;  %2190 = vmatmul.bf16.vlgmr.msrb.gmra.mxu2 %v6995_v19  ;;  %v6251_v19 = vld [vmem:[%s9862_s1 + $0x3d4] sm:$0xf]  ;;  %v4728_v16 = vor.u32 %v6287_v39, %v4725_v4  ;;  %v6475_v39 = vld [vmem:[%s9865_s3 + $0x1cc] sm:$0xf0] }
 0x106   :  { %2234 = vmatpush.bf16.msra.mxu2 %v5040_v8  ;;  %2203 = vmatmul.bf16.vlgmr.msrb.gmra.mxu3 %v6999_v22  ;;  %v4773_v22 = vld [vmem:[%s9862_s1 + $0x568] sm:$0xf0]  ;;  %v4584_v49 = vor.u32 %v6251_v19, %v4581_v41  ;;  %v6335_v6 = vld [vmem:[%s9862_s1 + $0x674] sm:$0xf]  ;;  %v6507_v4 = vld [vmem:[%s9865_s3 + $0x2cc] sm:$0xf0] }
 0x107   :  { %2247 = vmatpush.bf16.msra.mxu3 %v5232_v12  ;;  %v4776_v51 = vor.u32 %v6299_v42, %v4773_v22  ;;  %v4917_v8 = vld [vmem:[%s9862_s1 + $0x688] sm:$0xf0]  ;;  %v6323_v41 = vld [vmem:[%s9862_s1 + $0x614] sm:$0xf]  ;;  %v321_v42 = vperm.slane %v7817_v7, 2 }
 0x108   :  { %2209 = vmatpush.bf16.msra.mxu0 %v4632_v21  ;;  %v8447_v9 = vpop.f32.mrf.mxu2  ;;  %v1959_v12 = vpop.f32.mrf.mxu0  ;;  %v4920_v17 = vor.u32 %v6335_v6, %v4917_v8  ;;  %v6233_v21 = vld [vmem:[%s9862_s1 + $0x344] sm:$0xf]  ;;  %v4677_v19 = vld [vmem:[%s9862_s1 + $0x4a8] sm:$0xf0]  ;;  %v6447_v7 = vld [vmem:[%s9865_s3 + $0xec] sm:$0xf0] }
 0x109   :  { %2222 = vmatpush.bf16.msra.mxu1 %v4824_v23  ;;  %v8455_v13 = vpop.f32.mrf.mxu3  ;;  %v1972_v15 = vpop.f32.mrf.mxu1  ;;  %v4509_v23 = vld [vmem:[%s9862_s1 + $0x358] sm:$0xf0]  ;;  %v4869_v22 = vld [vmem:[%s9862_s1 + $0x628] sm:$0xf0]  ;;  %v1958_v58 = vadd.f32 %v8401_v48, %v321_v42  ;;  %v5348_v60 = vor.u32 %v6447_v7, %v5347_v47  ;;  %v5731_v48 = vld [vmem:[%s9865_s3 + $0x3e0] sm:$0xf] }
 0x10a   :  { %2235 = vmatpush.bf16.msra.mxu2 %v5016_v24  ;;  %v6281_v24 = vld [vmem:[%s9862_s1 + $0x4c4] sm:$0xf]  ;;  %v4512_v32 = vor.u32 %v6233_v21, %v4509_v23  ;;  %v4872_v57 = vor.u32 %v6323_v41, %v4869_v22  ;;  %v5732_v12 = vor.u32 %v6543_v2, %v5731_v48  ;;  %v6471_v21 = vld [vmem:[%s9865_s3 + $0x1ac] sm:$0xf0]  ;;  %v5571_v23 = vld [vmem:[%s9865_s3 + $0x2a0] sm:$0xf] }
 0x10b   :  { %2248 = vmatpush.bf16.msra.mxu3 %v5208_v29  ;;  %v4893_v29 = vld [vmem:[%s9862_s1 + $0x658] sm:$0xf0]  ;;  %v1971_v6 = vadd.f32 %v8403_v50, %v1958_v58  ;;  %v5443_v50 = vld [vmem:[%s9865_s3 + $0x1a0] sm:$0xf]  ;;  %v6495_v7 = vld [vmem:[%s9865_s3 + $0x26c] sm:$0xf0] }
 0x10c   :  { %2210 = vmatpush.bf16.msra.mxu0 %v4608_v36  ;;  %v6275_v36 = vld [vmem:[%s9862_s1 + $0x494] sm:$0xf]  ;;  %v5539_v47 = vld [vmem:[%s9865_s3 + $0x260] sm:$0xf] }
 0x10d   :  { %2223 = vmatpush.bf16.msra.mxu1 %v4800_v37  ;;  %v4704_v37 = vor.u32 %v6281_v24, %v4701_v27  ;;  %v6503_v24 = vld [vmem:[%s9865_s3 + $0x2ac] sm:$0xf0]  ;;  %v5667_v58 = vld [vmem:[%s9865_s3 + $0x360] sm:$0xf] }
 0x10e   :  { %2236 = vmatpush.bf16.msra.mxu2 %v4992_v40  ;;  %v4896_v40 = vor.u32 %v6329_v28, %v4893_v29  ;;  %v6435_v27 = vld [vmem:[%s9865_s3 + $0x8c] sm:$0xf0]  ;;  %v5444_v29 = vor.u32 %v6471_v21, %v5443_v50  ;;  %v5507_v50 = vld [vmem:[%s9865_s3 + $0x220] sm:$0xf] }
 0x10f   :  { %2249 = vmatpush.bf16.msra.mxu3 %v5184_v43  ;;  %v5088_v43 = vor.u32 %v6377_v30, %v5085_v31  ;;  %v6535_v30 = vld [vmem:[%s9865_s3 + $0x3ac] sm:$0xf0]  ;;  %v5235_v21 = vld [vmem:[%s9865_s3] sm:$0xf] }
 0x110   :  { %2211 = vmatpush.bf16.msra.mxu0 %v4584_v49  ;;  %v1985_v46 = vpop.f32.mrf.mxu2  ;;  %v5475_v49 = vld [vmem:[%s9865_s3 + $0x1e0] sm:$0xf]  ;;  %v6467_v31 = vld [vmem:[%s9865_s3 + $0x18c] sm:$0xf0] }
 0x111   :  { %2224 = vmatpush.bf16.msra.mxu1 %v4776_v51  ;;  %v1998_v51 = vpop.f32.mrf.mxu3  ;;  %v6463_v46 = vld [vmem:[%s9865_s3 + $0x16c] sm:$0xf0] }
 0x112   :  { %2237 = vmatpush.bf16.msra.mxu2 %v4968_v52  ;;  %v4488_v52 = vor.u32 %v6227_v33, %v4485_v34  ;;  %v6499_v33 = vld [vmem:[%s9865_s3 + $0x28c] sm:$0xf0] }
 0x113   :  { %2250 = vmatpush.bf16.msra.mxu3 %v5160_v56  ;;  %v4680_v56 = vor.u32 %v6275_v36, %v4677_v19  ;;  %v6431_v19 = vld [vmem:[%s9865_s3 + $0x6c] sm:$0xf0] }
 0x114   :  { %2212 = vmatpush.bf16.msra.mxu0 %v4560_v62  ;;  %v6443_v62 = vld [vmem:[%s9865_s3 + $0xcc] sm:$0xf0] }
 0x115   :  { %2225 = vmatpush.bf16.msra.mxu1 %v4752_v63  ;;  %v5476_v63 = vor.u32 %v6479_v53, %v5475_v49  ;;  %v5332_v8 = vor.u32 %v6443_v62, %v5331_v61  ;;  %v6427_v53 = vld [vmem:[%s9865_s3 + $0x4c] sm:$0xf0]  ;;  %v5523_v61 = vld [vmem:[%s9865_s3 + $0x240] sm:$0xf] }
 0x116   :  { %2238 = vmatpush.bf16.msra.mxu2 %v4944_v0  ;;  %v5604_v0 = vor.u32 %v6511_v55, %v5603_v54  ;;  %v5684_v54 = vor.u32 %v6531_v45, %v5683_v44  ;;  %v6491_v62 = vld [vmem:[%s9865_s3 + $0x24c] sm:$0xf0] }
 0x117   :  { %2251 = vmatpush.bf16.msra.mxu3 %v5136_v3  ;;  %v5587_v3 = vld [vmem:[%s9865_s3 + $0x2c0] sm:$0xf]  ;;  %v6515_v44 = vld [vmem:[%s9865_s3 + $0x30c] sm:$0xf0] }
 0x118   :  { %2213 = vmatpush.bf16.msra.mxu0 %v4536_v14  ;;  %v5460_v14 = vor.u32 %v6475_v39, %v5459_v1  ;;  %v5588_v15 = vor.u32 %v6507_v4, %v5587_v3  ;;  %v5251_v39 = vld [vmem:[%s9865_s3 + $0x20] sm:$0xf]  ;;  %v6423_v3 = vld [vmem:[%s9865_s3 + $0x2c] sm:$0xf0] }
 0x119   :  { %2226 = vmatpush.bf16.msra.mxu1 %v4728_v16  ;;  %v5715_v16 = vld [vmem:[%s9865_s3 + $0x3c0] sm:$0xf] }
 0x11a   :  { %2239 = vmatpush.bf16.msra.mxu2 %v4920_v17  ;;  %v6539_v17 = vld [vmem:[%s9865_s3 + $0x3cc] sm:$0xf0] }
 0x11b   :  { %2252 = vmatpush.bf16.msra.mxu3 %v5112_v25  ;;  %v5299_v25 = vld [vmem:[%s9865_s3 + $0x80] sm:$0xf]  ;;  %v5716_v28 = vor.u32 %v6539_v17, %v5715_v16  ;;  %v6487_v16 = vld [vmem:[%s9865_s3 + $0x22c] sm:$0xf0]  ;;  %v5252_v17 = vor.u32 %v6423_v3, %v5251_v39  ;;  %v6433_v3 = vld [vmem:[%s9865_s3 + $0x84] sm:$0xf] }
 0x11c   :  { %2214 = vmatpush.bf16.msra.mxu0 %v4512_v32  ;;  %v5555_v32 = vld [vmem:[%s9865_s3 + $0x280] sm:$0xf] }
 0x11d   :  { %2227 = vmatpush.bf16.msra.mxu1 %v4704_v37  ;;  %v5300_v37 = vor.u32 %v6435_v27, %v5299_v25  ;;  %v5556_v22 = vor.u32 %v6499_v33, %v5555_v32  ;;  %v6451_v25 = vld [vmem:[%s9865_s3 + $0x10c] sm:$0xf0]  ;;  %v5635_v27 = vld [vmem:[%s9865_s3 + $0x320] sm:$0xf] }
 0x11e   :  { %2240 = vmatpush.bf16.msra.mxu2 %v4896_v40  ;;  %v5283_v40 = vld [vmem:[%s9865_s3 + $0x60] sm:$0xf]  ;;  %v6575_v32 = vld [vmem:[%s9865_s3 + $0x4ec] sm:$0xf0] }
 0x11f   :  { %2253 = vmatpush.bf16.msra.mxu3 %v5088_v43  ;;  %v5284_v51 = vor.u32 %v6431_v19, %v5283_v40  ;;  %v8721_v19 = vld [vmem:[%s9864_s2] sm:$0x3f] }
 0x120   :  { %2215 = vmatpush.bf16.msra.mxu0 %v4488_v52  ;;  %v2009_v36 = vpop.f32.mrf.mxu0  ;;  %v5267_v52 = vld [vmem:[%s9865_s3 + $0x40] sm:$0xf] }
 0x121   :  { %2228 = vmatpush.bf16.msra.mxu1 %v4680_v56  ;;  %v2022_v41 = vpop.f32.mrf.mxu1  ;;  %v5540_v56 = vor.u32 %v6495_v7, %v5539_v47  ;;  %v5268_v2 = vor.u32 %v6427_v53, %v5267_v52  ;;  %v5333_v47 = vld [vmem:[%s9865_s3 + $0xd0] sm:$0xf0]  ;;  %v6477_v7 = vld [vmem:[%s9865_s3 + $0x1e4] sm:$0xf]  ;;  %v5843_v52 = vld [vmem:[%s9865_s3 + $0x4c0] sm:$0xf] }
 0x122   :  { %2241 = vmatpush.bf16.msra.mxu2 %v4872_v57  ;;  %v5395_v57 = vld [vmem:[%s9865_s3 + $0x140] sm:$0xf]  ;;  %v6571_v53 = vld [vmem:[%s9865_s3 + $0x4cc] sm:$0xf0] }
 0x123   :  { %2254 = vmatpush.bf16.msra.mxu3 %v5064_v59  ;;  %2216 = vmatmul.bf16.vlgmr.msra.gmra.mxu0 %v6993_v18  ;;  %v1984_v18 = vadd.f32 %v8447_v9, %v1971_v6  ;;  %v5699_v9 = vld [vmem:[%s9865_s3 + $0x3a0] sm:$0xf]  ;;  %v6527_v59 = vld [vmem:[%s9865_s3 + $0x36c] sm:$0xf0] }
 0x124   :  { %3434 = vmatpush.bf16.msrb.mxu0 %v5348_v60  ;;  %2229 = vmatmul.bf16.vlgmr.msra.gmra.mxu1 %v6997_v20  ;;  %v5316_v20 = vor.u32 %v6439_v11, %v5315_v10  ;;  %v5700_v42 = vor.u32 %v6535_v30, %v5699_v9  ;;  %v6459_v60 = vld [vmem:[%s9865_s3 + $0x14c] sm:$0xf0]  ;;  %v5668_v4 = vor.u32 %v6527_v59, %v5667_v58  ;;  %v5379_v11 = vld [vmem:[%s9865_s3 + $0x120] sm:$0xf]  ;;  %v5349_v9 = vld [vmem:[%s9865_s3 + $0xf0] sm:$0xf0] }
 0x125   :  { %3447 = vmatpush.bf16.msrb.mxu1 %v5476_v63  ;;  %2242 = vmatmul.bf16.vlgmr.msra.gmra.mxu2 %v7146_v35  ;;  %v5572_v35 = vor.u32 %v6503_v24, %v5571_v23  ;;  %v1997_v34 = vadd.f32 %v8455_v13, %v1984_v18  ;;  %v5411_v13 = vld [vmem:[%s9865_s3 + $0x160] sm:$0xf]  ;;  %v5524_v10 = vor.u32 %v6491_v62, %v5523_v61  ;;  %v6419_v23 = vld [vmem:[%s9865_s3 + $0xc] sm:$0xf0]  ;;  %v6437_v58 = vld [vmem:[%s9865_s3 + $0xa4] sm:$0xf] }
 0x126   :  { %3460 = vmatpush.bf16.msrb.mxu2 %v5604_v0  ;;  %2255 = vmatmul.bf16.vlgmr.msra.gmra.mxu3 %v7154_v38  ;;  %v5427_v38 = vld [vmem:[%s9865_s3 + $0x180] sm:$0xf]  ;;  %v5412_v55 = vor.u32 %v6463_v46, %v5411_v13  ;;  %v5236_v33 = vor.u32 %v6419_v23, %v5235_v21  ;;  %v5317_v61 = vld [vmem:[%s9865_s3 + $0xb0] sm:$0xf0]  ;;  %v6473_v62 = vld [vmem:[%s9865_s3 + $0x1c4] sm:$0xf] }
 0x127   :  { %3473 = vmatpush.bf16.msrb.mxu3 %v5732_v12  ;;  %v5428_v43 = vor.u32 %v6467_v31, %v5427_v38  ;;  %v2010_v49 = vadd.f32 %v2009_v36, %v1997_v34  ;;  %v5651_v12 = vld [vmem:[%s9865_s3 + $0x340] sm:$0xf]  ;;  %v5320_v39 = vor.u32 %v6437_v58, %v5317_v61  ;;  %v6573_v58 = vld [vmem:[%s9865_s3 + $0x4e4] sm:$0xf] }
 0x128   :  { %3435 = vmatpush.bf16.msrb.mxu0 %v5332_v8  ;;  %v8652_v63 = vpop.f32.mrf.mxu2  ;;  %v2011_v48 = vpop.f32.mrf.mxu0  ;;  %v5396_v8 = vor.u32 %v6459_v60, %v5395_v57  ;;  %v5363_v24 = vld [vmem:[%s9865_s3 + $0x100] sm:$0xf] }
 0x129   :  { %3448 = vmatpush.bf16.msrb.mxu1 %v5460_v14  ;;  %v2023_v0 = vadd.f32 %v2022_v41, %v2010_v49  ;;  %v8654_v1 = vpop.f32.mrf.mxu3  ;;  %v2024_v6 = vpop.f32.mrf.mxu1  ;;  %v6523_v14 = vld [vmem:[%s9865_s3 + $0x34c] sm:$0xf0]  ;;  %v5859_v31 = vld [vmem:[%s9865_s3 + $0x4e0] sm:$0xf]  ;;  %v322_v41 = vperm.slane %v8721_v19, 3  ;;  %v5844_v48 = vor.u32 %v6571_v53, %v5843_v52 }
 0x12a   :  { %3461 = vmatpush.bf16.msrb.mxu2 %v5588_v15  ;;  %v6455_v15 = vld [vmem:[%s9865_s3 + $0x12c] sm:$0xf0]  ;;  %v5652_v18 = vor.u32 %v6523_v14, %v5651_v12  ;;  %v5619_v13 = vld [vmem:[%s9865_s3 + $0x300] sm:$0xf]  ;;  %v5860_v45 = vor.u32 %v6575_v32, %v5859_v31  ;;  %v5477_v49 = vld [vmem:[%s9865_s3 + $0x1f0] sm:$0xf0] }
 0x12b   :  { %3474 = vmatpush.bf16.msrb.mxu3 %v5716_v28  ;;  %6642 = vtanh.f32 %v2023_v0  ;;  %v6519_v28 = vld [vmem:[%s9865_s3 + $0x32c] sm:$0xf0]  ;;  %v5480_v59 = vor.u32 %v6477_v7, %v5477_v49  ;;  %v2036_v60 = vadd.f32 %v8652_v63, %v322_v41  ;;  %v5461_v0 = vld [vmem:[%s9865_s3 + $0x1d0] sm:$0xf0]  ;;  %v5827_v63 = vld [vmem:[%s9865_s3 + $0x4a0] sm:$0xf] }
 0x12c   :  { %3436 = vmatpush.bf16.msrb.mxu0 %v5316_v20  ;;  %6644 = vtanh.f32 %v8019_v5  ;;  %v5380_v5 = vor.u32 %v6455_v15, %v5379_v11  ;;  %v5508_v20 = vor.u32 %v6487_v16, %v5507_v50  ;;  %v5636_v34 = vor.u32 %v6519_v28, %v5635_v27  ;;  %v5445_v11 = vld [vmem:[%s9865_s3 + $0x1b0] sm:$0xf0]  ;;  %v5811_v14 = vld [vmem:[%s9865_s3 + $0x480] sm:$0xf]  ;;  %v6429_v16 = vld [vmem:[%s9865_s3 + $0x64] sm:$0xf] }
 0x12d   :  { %3449 = vmatpush.bf16.msrb.mxu1 %v5444_v29  ;;  %6646 = vtanh.f32 %v8251_v26  ;;  %v5491_v26 = vld [vmem:[%s9865_s3 + $0x200] sm:$0xf]  ;;  %v6483_v29 = vld [vmem:[%s9865_s3 + $0x20c] sm:$0xf0]  ;;  %v2049_v6 = vadd.f32 %v8654_v1, %v2036_v60  ;;  %v5413_v31 = vld [vmem:[%s9865_s3 + $0x170] sm:$0xf0] }
 0x12e   :  { %3462 = vmatpush.bf16.msrb.mxu2 %v5572_v35  ;;  %v6445_v35 = vld [vmem:[%s9865_s3 + $0xe4] sm:$0xf]  ;;  %v5492_v40 = vor.u32 %v6483_v29, %v5491_v26  ;;  %v6563_v1 = vld [vmem:[%s9865_s3 + $0x48c] sm:$0xf0]  ;;  %v5763_v7 = vld [vmem:[%s9865_s3 + $0x420] sm:$0xf] }
 0x12f   :  { %3475 = vmatpush.bf16.msrb.mxu3 %v5700_v42  ;;  %v6559_v27 = vld [vmem:[%s9865_s3 + $0x46c] sm:$0xf0]  ;;  %v6425_v29 = vld [vmem:[%s9865_s3 + $0x44] sm:$0xf]  ;;  %v5381_v60 = vld [vmem:[%s9865_s3 + $0x130] sm:$0xf0] }
 0x130   :  { %3437 = vmatpush.bf16.msrb.mxu0 %v5300_v37  ;;  %v2037_v38 = vpop.f32.mrf.mxu2  ;;  %v5364_v37 = vor.u32 %v6451_v25, %v5363_v24  ;;  %v5285_v24 = vld [vmem:[%s9865_s3 + $0x70] sm:$0xf0]  ;;  %v5795_v25 = vld [vmem:[%s9865_s3 + $0x460] sm:$0xf]  ;;  %v6551_v49 = vld [vmem:[%s9865_s3 + $0x42c] sm:$0xf0] }
 0x131   :  { %3450 = vmatpush.bf16.msrb.mxu1 %v5428_v43  ;;  %v2050_v30 = vpop.f32.mrf.mxu3  ;;  %v6643_v36 = vpop.eup %6642  ;;  %v5352_v43 = vor.u32 %v6445_v35, %v5349_v9  ;;  %v5288_v26 = vor.u32 %v6429_v16, %v5285_v24  ;;  %v5269_v9 = vld [vmem:[%s9865_s3 + $0x50] sm:$0xf0]  ;;  %v5796_v32 = vor.u32 %v6559_v27, %v5795_v25  ;;  %v6417_v53 = vld [vmem:[%s9865_s3 + $0x4] sm:$0xf]  ;;  %v6607_v16 = vld [vmem:[%s9865_s3 + $0x5ec] sm:$0xf0] }
 0x132   :  { %3463 = vmatpush.bf16.msrb.mxu2 %v5556_v22  ;;  %v6645_v42 = vpop.eup %6644  ;;  %v6441_v22 = vld [vmem:[%s9865_s3 + $0xc4] sm:$0xf]  ;;  %v5272_v41 = vor.u32 %v6425_v29, %v5269_v9  ;;  %v5971_v29 = vld [vmem:[%s9865_s3 + $0x5c0] sm:$0xf] }
 0x133   :  { %3476 = vmatpush.bf16.msrb.mxu3 %v5684_v54  ;;  %v6647_v46 = vpop.eup %6646  ;;  %v8750_v54 = vpack.c.bf16 %v6645_v42, %v6645_v42  ;;  %v5336_v57 = vor.u32 %v6441_v22, %v5333_v47  ;;  %v6461_v30 = vld [vmem:[%s9865_s3 + $0x164] sm:$0xf] }
 0x134   :  { %3438 = vmatpush.bf16.msrb.mxu0 %v5284_v51  ;;  %v8742_v51 = vpack.c.bf16 %v6643_v36, %v6643_v36  ;;  %v5779_v36 = vld [vmem:[%s9865_s3 + $0x440] sm:$0xf]  ;;  %v6421_v42 = vld [vmem:[%s9865_s3 + $0x24] sm:$0xf] }
 0x135   :  { %3451 = vmatpush.bf16.msrb.mxu1 %v5412_v55  ;;  %v5620_v55 = vor.u32 %v6515_v44, %v5619_v13  ;;  %v5253_v13 = vld [vmem:[%s9865_s3 + $0x30] sm:$0xf0]  ;;  %v6457_v44 = vld [vmem:[%s9865_s3 + $0x144] sm:$0xf] }
 0x136   :  { %3464 = vmatpush.bf16.msrb.mxu2 %v5540_v56  ;;  %v8752_v56 = vpack.c.bf16 %v6647_v46, %v6647_v46  ;;  %v5256_v52 = vor.u32 %v6421_v42, %v5253_v13  ;;  %v6605_v24 = vld [vmem:[%s9865_s3 + $0x5e4] sm:$0xf]  ;;  %v6599_v42 = vld [vmem:[%s9865_s3 + $0x5ac] sm:$0xf0] }
 0x137   :  { %3477 = vmatpush.bf16.msrb.mxu3 %v5668_v4  ;;  %v5464_v4 = vor.u32 %v6473_v62, %v5461_v0  ;;  %v5764_v62 = vor.u32 %v6551_v49, %v5763_v7  ;;  %v5861_v0 = vld [vmem:[%s9865_s3 + $0x4f0] sm:$0xf0]  ;;  %v6557_v49 = vld [vmem:[%s9865_s3 + $0x464] sm:$0xf] }
 0x138   :  { %3439 = vmatpush.bf16.msrb.mxu0 %v5268_v2  ;;  %v6567_v2 = vld [vmem:[%s9865_s3 + $0x4ac] sm:$0xf0] }
 0x139   :  { %3452 = vmatpush.bf16.msrb.mxu1 %v5396_v8  ;;  %v5301_v8 = vld [vmem:[%s9865_s3 + $0x90] sm:$0xf0]  ;;  %v5828_v12 = vor.u32 %v6567_v2, %v5827_v63  ;;  %v5747_v63 = vld [vmem:[%s9865_s3 + $0x400] sm:$0xf]  ;;  %v6547_v2 = vld [vmem:[%s9865_s3 + $0x40c] sm:$0xf0] }
 0x13a   :  { %3465 = vmatpush.bf16.msrb.mxu2 %v5524_v10  ;;  %v6469_v10 = vld [vmem:[%s9865_s3 + $0x1a4] sm:$0xf]  ;;  %v5304_v15 = vor.u32 %v6433_v3, %v5301_v8  ;;  %v5605_v3 = vld [vmem:[%s9865_s3 + $0x2f0] sm:$0xf0] }
 0x13b   :  { %3478 = vmatpush.bf16.msrb.mxu3 %v5652_v18  ;;  %v6465_v18 = vld [vmem:[%s9865_s3 + $0x184] sm:$0xf] }
 0x13c   :  { %3440 = vmatpush.bf16.msrb.mxu0 %v5252_v17  ;;  %v5448_v17 = vor.u32 %v6469_v10, %v5445_v11  ;;  %v6569_v8 = vld [vmem:[%s9865_s3 + $0x4c4] sm:$0xf] }
 0x13d   :  { %3453 = vmatpush.bf16.msrb.mxu1 %v5380_v5  ;;  %v5429_v5 = vld [vmem:[%s9865_s3 + $0x190] sm:$0xf0]  ;;  %v6449_v11 = vld [vmem:[%s9865_s3 + $0x104] sm:$0xf] }
 0x13e   :  { %3466 = vmatpush.bf16.msrb.mxu2 %v5508_v20  ;;  %v5812_v20 = vor.u32 %v6563_v1, %v5811_v14  ;;  %v5432_v35 = vor.u32 %v6465_v18, %v5429_v5  ;;  %v5864_v14 = vor.u32 %v6573_v58, %v5861_v0  ;;  %v5365_v1 = vld [vmem:[%s9865_s3 + $0x110] sm:$0xf0]  ;;  %v6505_v5 = vld [vmem:[%s9865_s3 + $0x2c4] sm:$0xf] }
 0x13f   :  { %3479 = vmatpush.bf16.msrb.mxu3 %v5636_v34  ;;  %v5989_v18 = vld [vmem:[%s9865_s3 + $0x5f0] sm:$0xf0]  ;;  %v5368_v25 = vor.u32 %v6449_v11, %v5365_v1 }
 0x140   :  { %3441 = vmatpush.bf16.msrb.mxu0 %v5236_v33  ;;  %v2061_v50 = vpop.f32.mrf.mxu0  ;;  %v5797_v58 = vld [vmem:[%s9865_s3 + $0x470] sm:$0xf0] }
 0x141   :  { %3454 = vmatpush.bf16.msrb.mxu1 %v5364_v37  ;;  %v2062_v21 = vadd.f32 %v2061_v50, %v2049_v6  ;;  %v2074_v23 = vpop.f32.mrf.mxu1  ;;  %v6555_v37 = vld [vmem:[%s9865_s3 + $0x44c] sm:$0xf0]  ;;  %v5987_v50 = vld [vmem:[%s9865_s3 + $0x5e0] sm:$0xf]  ;;  %v5941_v0 = vld [vmem:[%s9865_s3 + $0x590] sm:$0xf0] }
 0x142   :  { %3467 = vmatpush.bf16.msrb.mxu2 %v5492_v40  ;;  %v5780_v47 = vor.u32 %v6555_v37, %v5779_v36  ;;  %v6561_v37 = vld [vmem:[%s9865_s3 + $0x484] sm:$0xf]  ;;  %v5925_v1 = vld [vmem:[%s9865_s3 + $0x570] sm:$0xf0] }
 0x143   :  { %3442 = vmatmul.bf16.vlgmr.msrb.gmra.mxu0 %v8750_v54  ;;  %3480 = vmatpush.bf16.msrb.mxu3 %v5620_v55  ;;  %v2075_v28 = vadd.f32 %v2074_v23, %v2062_v21  ;;  %v5237_v55 = vld [vmem:[%s9865_s3 + $0x10] sm:$0xf0]  ;;  %v5988_v23 = vor.u32 %v6607_v16, %v5987_v50 }
 0x144   :  { %3486 = vmatpush.bf16.msra.mxu0 %v5860_v45  ;;  %3455 = vmatmul.bf16.vlgmr.msrb.gmra.mxu1 %v8752_v56  ;;  %v5397_v45 = vld [vmem:[%s9865_s3 + $0x150] sm:$0xf0]  ;;  %v5240_v6 = vor.u32 %v6417_v53, %v5237_v55  ;;  %v5939_v55 = vld [vmem:[%s9865_s3 + $0x580] sm:$0xf] }
 0x145   :  { %3468 = vmatmul.bf16.vlgmr.msrb.gmra.mxu2 %v8742_v51  ;;  %3499 = vmatpush.bf16.msra.mxu1 %v5988_v23  ;;  %v5525_v50 = vld [vmem:[%s9865_s3 + $0x250] sm:$0xf0] }
 0x146   :  { %3512 = vmatpush.bf16.msra.mxu2 %v5352_v43  ;;  %v5416_v43 = vor.u32 %v6461_v30, %v5413_v31  ;;  %v6601_v31 = vld [vmem:[%s9865_s3 + $0x5c4] sm:$0xf] }
 0x147   :  { %3525 = vmatpush.bf16.msra.mxu3 %v5480_v59  ;;  %v6453_v59 = vld [vmem:[%s9865_s3 + $0x124] sm:$0xf] }
 0x148   :  { %3487 = vmatpush.bf16.msra.mxu0 %v5844_v48  ;;  %v2087_v38 = vpop.f32.mrf.mxu2  ;;  %v2063_v22 = vpop.f32.mrf.mxu0  ;;  %v5384_v10 = vor.u32 %v6453_v59, %v5381_v60 }
 0x149   :  { %v2088_v33 = vadd.f32 %v2087_v38, %v2075_v28  ;;  %v2100_v34 = vpop.f32.mrf.mxu3  ;;  %v2076_v46 = vpop.f32.mrf.mxu1  ;;  %v6565_v28 = vld [vmem:[%s9865_s3 + $0x4a4] sm:$0xf]  ;;  %v5829_v38 = vld [vmem:[%s9865_s3 + $0x4b0] sm:$0xf0] }
 0x14a   :  { %3513 = vmatpush.bf16.msra.mxu2 %v5336_v57  ;;  %v5400_v57 = vor.u32 %v6457_v44, %v5397_v45  ;;  %v5832_v36 = vor.u32 %v6565_v28, %v5829_v38  ;;  %v6597_v44 = vld [vmem:[%s9865_s3 + $0x5a4] sm:$0xf]  ;;  %v5957_v45 = vld [vmem:[%s9865_s3 + $0x5b0] sm:$0xf0] }
 0x14b   :  { %3526 = vmatpush.bf16.msra.mxu3 %v5464_v4  ;;  %v2101_v40 = vadd.f32 %v2100_v34, %v2088_v33  ;;  %v6501_v33 = vld [vmem:[%s9865_s3 + $0x2a4] sm:$0xf]  ;;  %v5573_v34 = vld [vmem:[%s9865_s3 + $0x2b0] sm:$0xf0]  ;;  %v5960_v53 = vor.u32 %v6597_v44, %v5957_v45 }
 0x14c   :  { %3488 = vmatpush.bf16.msra.mxu0 %v5828_v12  ;;  %v5576_v22 = vor.u32 %v6501_v33, %v5573_v34  ;;  %v6497_v46 = vld [vmem:[%s9865_s3 + $0x284] sm:$0xf]  ;;  %v5749_v33 = vld [vmem:[%s9865_s3 + $0x410] sm:$0xf0] }
 0x14d   :  { %6648 = vtanh.f32 %v2101_v40  ;;  %v6485_v38 = vld [vmem:[%s9865_s3 + $0x224] sm:$0xf]  ;;  %v5493_v45 = vld [vmem:[%s9865_s3 + $0x210] sm:$0xf0] }
 0x14e   :  { %3514 = vmatpush.bf16.msra.mxu2 %v5320_v39  ;;  %v6509_v39 = vld [vmem:[%s9865_s3 + $0x2e4] sm:$0xf] }
 0x14f   :  { %3527 = vmatpush.bf16.msra.mxu3 %v5448_v17  ;;  %v5845_v17 = vld [vmem:[%s9865_s3 + $0x4d0] sm:$0xf0]  ;;  %v5608_v21 = vor.u32 %v6509_v39, %v5605_v3  ;;  %v6553_v39 = vld [vmem:[%s9865_s3 + $0x444] sm:$0xf] }
 0x150   :  { %3489 = vmatpush.bf16.msra.mxu0 %v5812_v20  ;;  %v2089_v61 = vpop.f32.mrf.mxu2  ;;  %v5589_v20 = vld [vmem:[%s9865_s3 + $0x2d0] sm:$0xf0]  ;;  %v5848_v27 = vor.u32 %v6569_v8, %v5845_v17  ;;  %v6481_v44 = vld [vmem:[%s9865_s3 + $0x204] sm:$0xf] }
 0x151   :  { %v2102_v48 = vpop.f32.mrf.mxu3  ;;  %v5592_v9 = vor.u32 %v6505_v5, %v5589_v20  ;;  %v5781_v8 = vld [vmem:[%s9865_s3 + $0x450] sm:$0xf0]  ;;  %v5907_v5 = vld [vmem:[%s9865_s3 + $0x540] sm:$0xf]  ;;  %v6587_v20 = vld [vmem:[%s9865_s3 + $0x54c] sm:$0xf0] }
 0x152   :  { %3515 = vmatpush.bf16.msra.mxu2 %v5304_v15  ;;  %v5748_v15 = vor.u32 %v6547_v2, %v5747_v63  ;;  %v6493_v48 = vld [vmem:[%s9865_s3 + $0x264] sm:$0xf]  ;;  %v5541_v63 = vld [vmem:[%s9865_s3 + $0x270] sm:$0xf0]  ;;  %v5800_v2 = vor.u32 %v6557_v49, %v5797_v58  ;;  %v5784_v17 = vor.u32 %v6553_v39, %v5781_v8  ;;  %v5595_v49 = vld [vmem:[%s9865_s3 + $0x2c8] sm:$0xf] }
 0x153   :  { %3528 = vmatpush.bf16.msra.mxu3 %v5432_v35  ;;  %v6649_v4 = vpop.eup %6648  ;;  %v6603_v35 = vld [vmem:[%s9865_s3 + $0x5cc] sm:$0xf0]  ;;  %v5875_v58 = vld [vmem:[%s9865_s3 + $0x500] sm:$0xf]  ;;  %v5739_v39 = vld [vmem:[%s9865_s3 + $0x3e8] sm:$0xf] }
 0x154   :  { %3490 = vmatpush.bf16.msra.mxu0 %v5796_v32  ;;  %v8885_v12 = vpack.c.bf16 %v6649_v4, %v6649_v4  ;;  %v5972_v30 = vor.u32 %v6603_v35, %v5971_v29  ;;  %v5973_v32 = vld [vmem:[%s9865_s3 + $0x5d0] sm:$0xf0]  ;;  %v5923_v4 = vld [vmem:[%s9865_s3 + $0x560] sm:$0xf]  ;;  %v6585_v29 = vld [vmem:[%s9865_s3 + $0x544] sm:$0xf] }
 0x155   :  { %v5976_v40 = vor.u32 %v6601_v31, %v5973_v32  ;;  %v5909_v35 = vld [vmem:[%s9865_s3 + $0x550] sm:$0xf0]  ;;  %v6545_v31 = vld [vmem:[%s9865_s3 + $0x404] sm:$0xf] }
 0x156   :  { %3516 = vmatpush.bf16.msra.mxu2 %v5288_v26  ;;  %3481 = vmatmul.bf16.vlgmr.msrb.gmra.mxu3 %v8885_v12  ;;  %v5992_v26 = vor.u32 %v6605_v24, %v5989_v18  ;;  %v5912_v34 = vor.u32 %v6585_v29, %v5909_v35 }
 0x157   :  { %3529 = vmatpush.bf16.msra.mxu3 %v5416_v43  ;;  %v5813_v43 = vld [vmem:[%s9865_s3 + $0x490] sm:$0xf0]  ;;  %3500 = vmatpush.bf16.msra.mxu1 %v5972_v30  ;;  %v323_v30 = vperm.slane %v8721_v19, 4 }
 0x158   :  { %3491 = vmatpush.bf16.msra.mxu0 %v5780_v47  ;;  %v5557_v47 = vld [vmem:[%s9865_s3 + $0x290] sm:$0xf0]  ;;  %v5816_v7 = vor.u32 %v6561_v37, %v5813_v43  ;;  %v6583_v37 = vld [vmem:[%s9865_s3 + $0x52c] sm:$0xf0]  ;;  %v6581_v43 = vld [vmem:[%s9865_s3 + $0x524] sm:$0xf] }
 0x159   :  { %v5560_v60 = vor.u32 %v6497_v46, %v5557_v47 }
 0x15a   :  { %3517 = vmatpush.bf16.msra.mxu2 %v5272_v41  ;;  %v5955_v41 = vld [vmem:[%s9865_s3 + $0x5a0] sm:$0xf] }
 0x15b   :  { %3530 = vmatpush.bf16.msra.mxu3 %v5400_v57  ;;  %v5956_v13 = vor.u32 %v6599_v42, %v5955_v41  ;;  %v6595_v57 = vld [vmem:[%s9865_s3 + $0x58c] sm:$0xf0] }
 0x15c   :  { %3492 = vmatpush.bf16.msra.mxu0 %v5764_v62  ;;  %v5940_v61 = vor.u32 %v6595_v57, %v5939_v55  ;;  %v6593_v62 = vld [vmem:[%s9865_s3 + $0x584] sm:$0xf] }
 0x15d   :  { %3501 = vmatpush.bf16.msra.mxu1 %v5956_v13  ;;  %v5944_v3 = vor.u32 %v6593_v62, %v5941_v0  ;;  %v6512_v13 = vld [vmem:[%s9865_s3 + $0x2f4] sm:$0xf0]  ;;  %v6577_v62 = vld [vmem:[%s9865_s3 + $0x504] sm:$0xf]  ;;  %v5877_v0 = vld [vmem:[%s9865_s3 + $0x510] sm:$0xf0] }
 0x15e   :  { %3518 = vmatpush.bf16.msra.mxu2 %v5256_v52  ;;  %v5880_v8 = vor.u32 %v6577_v62, %v5877_v0  ;;  %v6488_v62 = vld [vmem:[%s9865_s3 + $0x234] sm:$0xf0]  ;;  %v5355_v0 = vld [vmem:[%s9865_s3 + $0xe8] sm:$0xf] }
 0x15f   :  { %3531 = vmatpush.bf16.msra.mxu3 %v5384_v10  ;;  %v5544_v10 = vor.u32 %v6493_v48, %v5541_v63  ;;  %v6541_v48 = vld [vmem:[%s9865_s3 + $0x3e4] sm:$0xf] }
 0x160   :  { %3493 = vmatpush.bf16.msra.mxu0 %v5748_v15  ;;  %v8964_v52 = vpop.f32.mrf.mxu0  ;;  %v6489_v15 = vld [vmem:[%s9865_s3 + $0x244] sm:$0xf] }
 0x161   :  { %v8975_v59 = vpop.f32.mrf.mxu1  ;;  %3502 = vmatpush.bf16.msra.mxu1 %v5940_v61  ;;  %v5528_v28 = vor.u32 %v6489_v15, %v5525_v50  ;;  %v2114_v46 = vadd.f32 %v8964_v52, %v323_v30  ;;  %v6579_v52 = vld [vmem:[%s9865_s3 + $0x50c] sm:$0xf0]  ;;  %v5496_v61 = vor.u32 %v6481_v44, %v5493_v45  ;;  %v6504_v15 = vld [vmem:[%s9865_s3 + $0x2b4] sm:$0xf0]  ;;  %v5723_v50 = vld [vmem:[%s9865_s3 + $0x3c8] sm:$0xf] }
 0x162   :  { %3519 = vmatpush.bf16.msra.mxu2 %v5240_v6  ;;  %v6591_v6 = vld [vmem:[%s9865_s3 + $0x56c] sm:$0xf0]  ;;  %v5876_v63 = vor.u32 %v6579_v52, %v5875_v58  ;;  %v6525_v44 = vld [vmem:[%s9865_s3 + $0x364] sm:$0xf]  ;;  %v5669_v45 = vld [vmem:[%s9865_s3 + $0x370] sm:$0xf0] }
 0x163   :  { %3532 = vmatpush.bf16.msra.mxu3 %v5368_v25  ;;  %v5924_v11 = vor.u32 %v6591_v6, %v5923_v4  ;;  %v5765_v25 = vld [vmem:[%s9865_s3 + $0x430] sm:$0xf0]  ;;  %v2127_v4 = vadd.f32 %v8975_v59, %v2114_v46  ;;  %v6492_v46 = vld [vmem:[%s9865_s3 + $0x254] sm:$0xf0]  ;;  %v6521_v52 = vld [vmem:[%s9865_s3 + $0x344] sm:$0xf] }
 0x164   :  { %3538 = vmatpush.bf16.msrb.mxu0 %v5608_v21  ;;  %v6549_v21 = vld [vmem:[%s9865_s3 + $0x424] sm:$0xf]  ;;  %v5717_v59 = vld [vmem:[%s9865_s3 + $0x3d0] sm:$0xf0] }
 0x165   :  { %3520 = vmatmul.bf16.vlgmr.msra.gmra.mxu2 %v8750_v54  ;;  %3503 = vmatpush.bf16.msra.mxu1 %v5924_v11  ;;  %v5768_v32 = vor.u32 %v6549_v21, %v5765_v25  ;;  %v5579_v11 = vld [vmem:[%s9865_s3 + $0x2a8] sm:$0xf]  ;;  %v6533_v25 = vld [vmem:[%s9865_s3 + $0x3a4] sm:$0xf] }
 0x166   :  { %3564 = vmatpush.bf16.msrb.mxu2 %v5864_v14  ;;  %v6589_v14 = vld [vmem:[%s9865_s3 + $0x564] sm:$0xf]  ;;  %3533 = vmatmul.bf16.vlgmr.msra.gmra.mxu3 %v8752_v56 }
 0x167   :  { %3577 = vmatpush.bf16.msrb.mxu3 %v5992_v26  ;;  %v5928_v18 = vor.u32 %v6589_v14, %v5925_v1  ;;  %v5908_v26 = vor.u32 %v6587_v20, %v5907_v5  ;;  %v6537_v1 = vld [vmem:[%s9865_s3 + $0x3c4] sm:$0xf]  ;;  %v5563_v5 = vld [vmem:[%s9865_s3 + $0x288] sm:$0xf] }
 0x168   :  { %3539 = vmatpush.bf16.msrb.mxu0 %v5592_v9  ;;  %v9014_v16 = vpop.f32.mrf.mxu2  ;;  %v2115_v23 = vpop.f32.mrf.mxu0  ;;  %v5509_v9 = vld [vmem:[%s9865_s3 + $0x230] sm:$0xf0] }
 0x169   :  { %v9019_v24 = vpop.f32.mrf.mxu3  ;;  %v5512_v41 = vor.u32 %v6485_v38, %v5509_v9  ;;  %3504 = vmatpush.bf16.msra.mxu1 %v5908_v26  ;;  %v2140_v21 = vadd.f32 %v9014_v16, %v2127_v4  ;;  %v5720_v23 = vor.u32 %v6537_v1, %v5717_v59  ;;  %v6500_v16 = vld [vmem:[%s9865_s3 + $0x294] sm:$0xf0]  ;;  %v5547_v9 = vld [vmem:[%s9865_s3 + $0x268] sm:$0xf]  ;;  %v6517_v1 = vld [vmem:[%s9865_s3 + $0x324] sm:$0xf] }
 0x16a   :  { %3565 = vmatpush.bf16.msrb.mxu2 %v5848_v27  ;;  %v2128_v27 = vpop.f32.mrf.mxu1  ;;  %v6536_v26 = vld [vmem:[%s9865_s3 + $0x3b4] sm:$0xf0]  ;;  %v5564_v38 = vor.u32 %v6500_v16, %v5563_v5  ;;  %v5637_v59 = vld [vmem:[%s9865_s3 + $0x330] sm:$0xf0] }
 0x16b   :  { %3578 = vmatpush.bf16.msrb.mxu3 %v5976_v40  ;;  %v5611_v40 = vld [vmem:[%s9865_s3 + $0x2e8] sm:$0xf]  ;;  %v5701_v27 = vld [vmem:[%s9865_s3 + $0x3b0] sm:$0xf0]  ;;  %v2153_v29 = vadd.f32 %v9019_v24, %v2140_v21  ;;  %v6496_v24 = vld [vmem:[%s9865_s3 + $0x274] sm:$0xf0]  ;;  %v5640_v5 = vor.u32 %v6517_v1, %v5637_v59 }
 0x16c   :  { %3540 = vmatpush.bf16.msrb.mxu0 %v5576_v22  ;;  %v5893_v22 = vld [vmem:[%s9865_s3 + $0x530] sm:$0xf0]  ;;  %v5704_v35 = vor.u32 %v6533_v25, %v5701_v27  ;;  %v6524_v4 = vld [vmem:[%s9865_s3 + $0x354] sm:$0xf0]  ;;  %v6446_v21 = vld [vmem:[%s9865_s3 + $0xec] sm:$0xf] }
 0x16d   :  { %v5896_v57 = vor.u32 %v6581_v43, %v5893_v22  ;;  %v5548_v43 = vor.u32 %v6496_v24, %v5547_v9  ;;  %v5531_v22 = vld [vmem:[%s9865_s3 + $0x248] sm:$0xf]  ;;  %v6520_v25 = vld [vmem:[%s9865_s3 + $0x334] sm:$0xf0] }
 0x16e   :  { %3566 = vmatpush.bf16.msrb.mxu2 %v5832_v36  ;;  %v5891_v36 = vld [vmem:[%s9865_s3 + $0x520] sm:$0xf]  ;;  %v5323_v9 = vld [vmem:[%s9865_s3 + $0xa8] sm:$0xf]  ;;  %v6420_v59 = vld [vmem:[%s9865_s3 + $0x14] sm:$0xf0] }
 0x16f   :  { %3579 = vmatpush.bf16.msrb.mxu3 %v5960_v53  ;;  %v5892_v42 = vor.u32 %v6583_v37, %v5891_v36  ;;  %v6508_v53 = vld [vmem:[%s9865_s3 + $0x2d4] sm:$0xf0]  ;;  %v5243_v1 = vld [vmem:[%s9865_s3 + $0x8] sm:$0xf] }
 0x170   :  { %3541 = vmatpush.bf16.msrb.mxu0 %v5560_v60  ;;  %v2141_v47 = vpop.f32.mrf.mxu2  ;;  %v5612_v60 = vor.u32 %v6512_v13, %v5611_v40  ;;  %v6532_v36 = vld [vmem:[%s9865_s3 + $0x394] sm:$0xf0] }
 0x171   :  { %v2154_v55 = vpop.f32.mrf.mxu3  ;;  %3505 = vmatpush.bf16.msra.mxu1 %v5892_v42  ;;  %v5675_v47 = vld [vmem:[%s9865_s3 + $0x368] sm:$0xf] }
 0x172   :  { %3567 = vmatpush.bf16.msrb.mxu2 %v5816_v7  ;;  %v5752_v7 = vor.u32 %v6545_v31, %v5749_v33  ;;  %v6529_v31 = vld [vmem:[%s9865_s3 + $0x384] sm:$0xf] }
 0x173   :  { %3580 = vmatpush.bf16.msrb.mxu3 %v5944_v3  ;;  %v6544_v3 = vld [vmem:[%s9865_s3 + $0x3f4] sm:$0xf0] }
 0x174   :  { %3542 = vmatpush.bf16.msrb.mxu0 %v5544_v10  ;;  %v5596_v10 = vor.u32 %v6508_v53, %v5595_v49  ;;  %v5740_v14 = vor.u32 %v6544_v3, %v5739_v39  ;;  %v5672_v49 = vor.u32 %v6525_v44, %v5669_v45  ;;  %v5532_v53 = vor.u32 %v6492_v46, %v5531_v22  ;;  %v5659_v3 = vld [vmem:[%s9865_s3 + $0x348] sm:$0xf]  ;;  %v6438_v22 = vld [vmem:[%s9865_s3 + $0xac] sm:$0xf] }
 0x175   :  { %3506 = vmatpush.bf16.msra.mxu1 %v5876_v63  ;;  %v324_v44 = vperm.slane %v8721_v19, 5  ;;  %v5309_v19 = vld [vmem:[%s9865_s3 + $0x98] sm:$0xf0] }
 0x176   :  { %3568 = vmatpush.bf16.msrb.mxu2 %v5800_v2  ;;  %v5733_v2 = vld [vmem:[%s9865_s3 + $0x3f0] sm:$0xf0] }
 0x177   :  { %3581 = vmatpush.bf16.msrb.mxu3 %v5928_v18  ;;  %v5736_v6 = vor.u32 %v6541_v48, %v5733_v2  ;;  %v5580_v18 = vor.u32 %v6504_v15, %v5579_v11  ;;  %v6448_v48 = vld [vmem:[%s9865_s3 + $0xf4] sm:$0xf0] }
 0x178   :  { %3543 = vmatpush.bf16.msrb.mxu0 %v5528_v28  ;;  %v5707_v28 = vld [vmem:[%s9865_s3 + $0x3a8] sm:$0xf]  ;;  %v5356_v11 = vor.u32 %v6448_v48, %v5355_v0 }
 0x179   :  { %3551 = vmatpush.bf16.msrb.mxu1 %v5736_v6  ;;  %v5708_v30 = vor.u32 %v6536_v26, %v5707_v28  ;;  %v5499_v6 = vld [vmem:[%s9865_s3 + $0x208] sm:$0xf]  ;;  %v6513_v26 = vld [vmem:[%s9865_s3 + $0x304] sm:$0xf] }
 0x17a   :  { %3569 = vmatpush.bf16.msrb.mxu2 %v5784_v17  ;;  %v6540_v17 = vld [vmem:[%s9865_s3 + $0x3d4] sm:$0xf0] }
 0x17b   :  { %3582 = vmatpush.bf16.msrb.mxu3 %v5912_v34  ;;  %v5724_v20 = vor.u32 %v6540_v17, %v5723_v50  ;;  %v5691_v34 = vld [vmem:[%s9865_s3 + $0x388] sm:$0xf]  ;;  %v6444_v17 = vld [vmem:[%s9865_s3 + $0xd4] sm:$0xf0] }
 0x17c   :  { %3544 = vmatpush.bf16.msrb.mxu0 %v5512_v41  ;;  %v5692_v13 = vor.u32 %v6532_v36, %v5691_v34  ;;  %v5339_v50 = vld [vmem:[%s9865_s3 + $0xc8] sm:$0xf]  ;;  %v6516_v36 = vld [vmem:[%s9865_s3 + $0x314] sm:$0xf0] }
 0x17d   :  { %3552 = vmatpush.bf16.msrb.mxu1 %v5720_v23  ;;  %v5660_v23 = vor.u32 %v6524_v4, %v5659_v3  ;;  %v5340_v16 = vor.u32 %v6444_v17, %v5339_v50  ;;  %v5627_v34 = vld [vmem:[%s9865_s3 + $0x308] sm:$0xf]  ;;  %v6422_v50 = vld [vmem:[%s9865_s3 + $0x2c] sm:$0xf] }
 0x17e   :  { %3570 = vmatpush.bf16.msrb.mxu2 %v5768_v32  ;;  %v5685_v32 = vld [vmem:[%s9865_s3 + $0x390] sm:$0xf0]  ;;  %v5259_v4 = vld [vmem:[%s9865_s3 + $0x28] sm:$0xf] }
 0x17f   :  { %3583 = vmatpush.bf16.msrb.mxu3 %v5896_v57  ;;  %v5688_v41 = vor.u32 %v6529_v31, %v5685_v32  ;;  %v5515_v57 = vld [vmem:[%s9865_s3 + $0x228] sm:$0xf]  ;;  %v6442_v31 = vld [vmem:[%s9865_s3 + $0xcc] sm:$0xf] }
 0x180   :  { %3545 = vmatpush.bf16.msrb.mxu0 %v5496_v61  ;;  %v2165_v33 = vpop.f32.mrf.mxu0 }
 0x181   :  { %v2166_v37 = vadd.f32 %v2165_v33, %v2153_v29  ;;  %v2178_v40 = vpop.f32.mrf.mxu1  ;;  %3553 = vmatpush.bf16.msrb.mxu1 %v5704_v35  ;;  %v5621_v29 = vld [vmem:[%s9865_s3 + $0x310] sm:$0xf0]  ;;  %v5341_v33 = vld [vmem:[%s9865_s3 + $0xd8] sm:$0xf0] }
 0x182   :  { %3571 = vmatpush.bf16.msrb.mxu2 %v5752_v7  ;;  %v6528_v7 = vld [vmem:[%s9865_s3 + $0x374] sm:$0xf0]  ;;  %v5624_v24 = vor.u32 %v6513_v26, %v5621_v29 }
 0x183   :  { %3584 = vmatpush.bf16.msrb.mxu3 %v5880_v8  ;;  %v2179_v42 = vadd.f32 %v2178_v40, %v2166_v37  ;;  %v5676_v58 = vor.u32 %v6528_v7, %v5675_v47  ;;  %v5344_v40 = vor.u32 %v6442_v31, %v5341_v33  ;;  %v5291_v47 = vld [vmem:[%s9865_s3 + $0x68] sm:$0xf]  ;;  %v6432_v7 = vld [vmem:[%s9865_s3 + $0x74] sm:$0xf0]  ;;  %v6574_v31 = vld [vmem:[%s9865_s3 + $0x4ec] sm:$0xf] }
 0x185   :  { %6650 = vtanh.f32 %v2179_v42  ;;  %3554 = vmatpush.bf16.msrb.mxu1 %v5688_v41  ;;  %v5307_v41 = vld [vmem:[%s9865_s3 + $0x88] sm:$0xf]  ;;  %v6436_v42 = vld [vmem:[%s9865_s3 + $0x94] sm:$0xf0] }
 0x186   :  { %3616 = vmatpush.bf16.msra.mxu2 %v5612_v60  ;;  %v5653_v60 = vld [vmem:[%s9865_s3 + $0x350] sm:$0xf0]  ;;  %v5308_v45 = vor.u32 %v6436_v42, %v5307_v41  ;;  %v6480_v41 = vld [vmem:[%s9865_s3 + $0x1f4] sm:$0xf0]  ;;  %v6478_v42 = vld [vmem:[%s9865_s3 + $0x1ec] sm:$0xf] }
 0x187   :  { %3629 = vmatpush.bf16.msra.mxu3 %v5740_v14  ;;  %v5656_v39 = vor.u32 %v6521_v52, %v5653_v60  ;;  %v6484_v14 = vld [vmem:[%s9865_s3 + $0x214] sm:$0xf0]  ;;  %v5275_v52 = vld [vmem:[%s9865_s3 + $0x48] sm:$0xf] }
 0x188   :  { %v9179_v55 = vpop.f32.mrf.mxu2  ;;  %v2167_v63 = vpop.f32.mrf.mxu0  ;;  %v5500_v27 = vor.u32 %v6484_v14, %v5499_v6  ;;  %v6428_v60 = vld [vmem:[%s9865_s3 + $0x54] sm:$0xf0] }
 0x189   :  { %v9190_v61 = vpop.f32.mrf.mxu3  ;;  %v2180_v2 = vpop.f32.mrf.mxu1  ;;  %3555 = vmatpush.bf16.msrb.mxu1 %v5672_v49  ;;  %v6434_v49 = vld [vmem:[%s9865_s3 + $0x8c] sm:$0xf]  ;;  %v6424_v6 = vld [vmem:[%s9865_s3 + $0x34] sm:$0xf0] }
 0x18a   :  { %3617 = vmatpush.bf16.msra.mxu2 %v5596_v10  ;;  %v5516_v10 = vor.u32 %v6488_v62, %v5515_v57  ;;  %v5292_v57 = vor.u32 %v6432_v7, %v5291_v47  ;;  %v6430_v62 = vld [vmem:[%s9865_s3 + $0x6c] sm:$0xf]  ;;  %v5276_v2 = vor.u32 %v6428_v60, %v5275_v52  ;;  %v5469_v60 = vld [vmem:[%s9865_s3 + $0x1d8] sm:$0xf0] }
 0x18b   :  { %3630 = vmatpush.bf16.msra.mxu3 %v5724_v20  ;;  %v6651_v8 = vpop.eup %6650  ;;  %v5643_v20 = vld [vmem:[%s9865_s3 + $0x328] sm:$0xf] }
 0x18c   :  { %v9219_v15 = vpack.c.bf16 %v6651_v8, %v6651_v8  ;;  %v5644_v32 = vor.u32 %v6520_v25, %v5643_v20  ;;  %v5277_v8 = vld [vmem:[%s9865_s3 + $0x58] sm:$0xf0] }
 0x18d   :  { %3556 = vmatpush.bf16.msrb.mxu1 %v5656_v39 }
 0x18e   :  { %3618 = vmatpush.bf16.msra.mxu2 %v5580_v18  ;;  %v5357_v18 = vld [vmem:[%s9865_s3 + $0xf8] sm:$0xf0]  ;;  %3494 = vmatmul.bf16.vlgmr.msra.gmra.mxu0 %v9219_v15 }
 0x18f   :  { %3631 = vmatpush.bf16.msra.mxu3 %v5708_v30  ;;  %3572 = vmatmul.bf16.vlgmr.msrb.gmra.mxu2 %v9219_v15  ;;  %v5360_v35 = vor.u32 %v6446_v21, %v5357_v18  ;;  %v6440_v30 = vld [vmem:[%s9865_s3 + $0xb4] sm:$0xf0]  ;;  %v5867_v18 = vld [vmem:[%s9865_s3 + $0x4e8] sm:$0xf] }
 0x190   :  { %3590 = vmatpush.bf16.msra.mxu0 %v5356_v11  ;;  %v2193_v28 = vpop.f32.mrf.mxu2  ;;  %v5324_v37 = vor.u32 %v6440_v30, %v5323_v9  ;;  %v5851_v9 = vld [vmem:[%s9865_s3 + $0x4c8] sm:$0xf]  ;;  %v6572_v30 = vld [vmem:[%s9865_s3 + $0x4d4] sm:$0xf0] }
 0x191   :  { %3557 = vmatpush.bf16.msrb.mxu1 %v5640_v5  ;;  %v6576_v5 = vld [vmem:[%s9865_s3 + $0x4f4] sm:$0xf0] }
 0x192   :  { %3619 = vmatpush.bf16.msra.mxu2 %v5564_v38  ;;  %v2206_v38 = vpop.f32.mrf.mxu3  ;;  %v5868_v29 = vor.u32 %v6576_v5, %v5867_v18  ;;  %v6468_v18 = vld [vmem:[%s9865_s3 + $0x194] sm:$0xf0]  ;;  %v6466_v5 = vld [vmem:[%s9865_s3 + $0x18c] sm:$0xf] }
 0x193   :  { %3632 = vmatpush.bf16.msra.mxu3 %v5692_v13  ;;  %v5325_v13 = vld [vmem:[%s9865_s3 + $0xb8] sm:$0xf0] }
 0x194   :  { %3591 = vmatpush.bf16.msra.mxu0 %v5340_v16  ;;  %v5328_v46 = vor.u32 %v6438_v22, %v5325_v13  ;;  %v5244_v16 = vor.u32 %v6420_v59, %v5243_v1  ;;  %v5245_v38 = vld [vmem:[%s9865_s3 + $0x18] sm:$0xf0]  ;;  %v5835_v22 = vld [vmem:[%s9865_s3 + $0x4a8] sm:$0xf]  ;;  %v6568_v13 = vld [vmem:[%s9865_s3 + $0x4b4] sm:$0xf0] }
 0x195   :  { %3558 = vmatpush.bf16.msrb.mxu1 %v5624_v24  ;;  %v5852_v24 = vor.u32 %v6572_v30, %v5851_v9  ;;  %v5821_v1 = vld [vmem:[%s9865_s3 + $0x498] sm:$0xf0] }
 0x196   :  { %3620 = vmatpush.bf16.msra.mxu2 %v5548_v43  ;;  %v5628_v43 = vor.u32 %v6516_v36, %v5627_v34 }
 0x197   :  { %3633 = vmatpush.bf16.msra.mxu3 %v5676_v58  ;;  %v5312_v58 = vor.u32 %v6434_v49, %v5309_v19  ;;  %v5836_v19 = vor.u32 %v6568_v13, %v5835_v22  ;;  %v5403_v13 = vld [vmem:[%s9865_s3 + $0x148] sm:$0xf] }
 0x198   :  { %3592 = vmatpush.bf16.msra.mxu0 %v5324_v37 }
 0x19a   :  { %3621 = vmatpush.bf16.msra.mxu2 %v5532_v53  ;;  %v2192_v53 = vadd.f32 %v9179_v55, %v324_v44  ;;  %v5293_v55 = vld [vmem:[%s9865_s3 + $0x78] sm:$0xf0]  ;;  %v6570_v44 = vld [vmem:[%s9865_s3 + $0x4cc] sm:$0xf] }
 0x19b   :  { %3634 = vmatpush.bf16.msra.mxu3 %v5660_v23  ;;  %v5296_v3 = vor.u32 %v6430_v62, %v5293_v55  ;;  %v5261_v23 = vld [vmem:[%s9865_s3 + $0x38] sm:$0xf0]  ;;  %v5819_v62 = vld [vmem:[%s9865_s3 + $0x488] sm:$0xf]  ;;  %v6564_v55 = vld [vmem:[%s9865_s3 + $0x494] sm:$0xf0] }
 0x19c   :  { %3593 = vmatpush.bf16.msra.mxu0 %v5308_v45  ;;  %v2205_v0 = vadd.f32 %v9190_v61, %v2192_v53  ;;  %v6426_v61 = vld [vmem:[%s9865_s3 + $0x4c] sm:$0xf]  ;;  %v5264_v26 = vor.u32 %v6422_v50, %v5261_v23  ;;  %v5853_v45 = vld [vmem:[%s9865_s3 + $0x4d8] sm:$0xf0]  ;;  %v5467_v53 = vld [vmem:[%s9865_s3 + $0x1c8] sm:$0xf] }
 0x19d   :  { %v5280_v14 = vor.u32 %v6426_v61, %v5277_v8  ;;  %v5856_v52 = vor.u32 %v6570_v44, %v5853_v45  ;;  %v5453_v8 = vld [vmem:[%s9865_s3 + $0x1b8] sm:$0xf0]  ;;  %v5435_v23 = vld [vmem:[%s9865_s3 + $0x188] sm:$0xf] }
 0x19e   :  { %3622 = vmatpush.bf16.msra.mxu2 %v5516_v10  ;;  %3546 = vmatmul.bf16.vlgmr.msrb.gmra.mxu0 %v8742_v51  ;;  %v5260_v10 = vor.u32 %v6424_v6, %v5259_v4  ;;  %v6472_v4 = vld [vmem:[%s9865_s3 + $0x1b4] sm:$0xf0]  ;;  %v6470_v6 = vld [vmem:[%s9865_s3 + $0x1ac] sm:$0xf]  ;;  %v5436_v9 = vor.u32 %v6468_v18, %v5435_v23  ;;  %v5371_v23 = vld [vmem:[%s9865_s3 + $0x108] sm:$0xf] }
 0x19f   :  { %3635 = vmatpush.bf16.msra.mxu3 %v5644_v32  ;;  %v5869_v32 = vld [vmem:[%s9865_s3 + $0x4f8] sm:$0xf0]  ;;  %v6452_v18 = vld [vmem:[%s9865_s3 + $0x114] sm:$0xf0] }
 0x1a0   :  { %v2217_v48 = vpop.f32.mrf.mxu0  ;;  %3594 = vmatpush.bf16.msra.mxu0 %v5292_v57  ;;  %v5872_v37 = vor.u32 %v6574_v31, %v5869_v32  ;;  %v6476_v57 = vld [vmem:[%s9865_s3 + $0x1d4] sm:$0xf0]  ;;  %v5419_v32 = vld [vmem:[%s9865_s3 + $0x168] sm:$0xf] }
 0x1a1   :  { %v2230_v63 = vpop.f32.mrf.mxu1  ;;  %v2218_v39 = vadd.f32 %v2217_v48, %v2205_v0  ;;  %v6566_v0 = vld [vmem:[%s9865_s3 + $0x4ac] sm:$0xf]  ;;  %v5837_v48 = vld [vmem:[%s9865_s3 + $0x4b8] sm:$0xf0] }
 0x1a2   :  { %3623 = vmatpush.bf16.msra.mxu2 %v5500_v27  ;;  %v5840_v61 = vor.u32 %v6566_v0, %v5837_v48  ;;  %v6510_v0 = vld [vmem:[%s9865_s3 + $0x2ec] sm:$0xf]  ;;  %v5613_v48 = vld [vmem:[%s9865_s3 + $0x2f8] sm:$0xf0] }
 0x1a3   :  { %3636 = vmatpush.bf16.msra.mxu3 %v5628_v43  ;;  %v2231_v11 = vadd.f32 %v2230_v63, %v2218_v39  ;;  %v5485_v43 = vld [vmem:[%s9865_s3 + $0x1f8] sm:$0xf0]  ;;  %v5468_v63 = vor.u32 %v6476_v57, %v5467_v53  ;;  %v5755_v57 = vld [vmem:[%s9865_s3 + $0x408] sm:$0xf] }
 0x1a4   :  { %3595 = vmatpush.bf16.msra.mxu0 %v5276_v2  ;;  %v5488_v49 = vor.u32 %v6478_v42, %v5485_v43  ;;  %v5451_v2 = vld [vmem:[%s9865_s3 + $0x1a8] sm:$0xf]  ;;  %v6554_v42 = vld [vmem:[%s9865_s3 + $0x44c] sm:$0xf]  ;;  %v5789_v43 = vld [vmem:[%s9865_s3 + $0x458] sm:$0xf0] }
 0x1a5   :  { %3624 = vmatmul.bf16.vlgmr.msra.gmra.mxu2 %v8742_v51  ;;  %v5452_v59 = vor.u32 %v6472_v4, %v5451_v2  ;;  %v5792_v53 = vor.u32 %v6554_v42, %v5789_v43  ;;  %v5387_v4 = vld [vmem:[%s9865_s3 + $0x128] sm:$0xf]  ;;  %v5565_v42 = vld [vmem:[%s9865_s3 + $0x298] sm:$0xf0] }
 0x1a6   :  { %3668 = vmatpush.bf16.msrb.mxu2 %v5360_v35  ;;  %v6418_v35 = vld [vmem:[%s9865_s3 + $0xc] sm:$0xf] }
 0x1a7   :  { %v5248_v33 = vor.u32 %v6418_v35, %v5245_v38 }
 0x1a8   :  { %v2243_v17 = vpop.f32.mrf.mxu2  ;;  %v2219_v25 = vpop.f32.mrf.mxu0  ;;  %3596 = vmatpush.bf16.msra.mxu0 %v5260_v10  ;;  %v5803_v10 = vld [vmem:[%s9865_s3 + $0x468] sm:$0xf] }
 0x1a9   :  { %v2256_v21 = vpop.f32.mrf.mxu3  ;;  %v2244_v20 = vadd.f32 %v2243_v17, %v2231_v11  ;;  %v2232_v27 = vpop.f32.mrf.mxu1  ;;  %v6560_v11 = vld [vmem:[%s9865_s3 + $0x474] sm:$0xf0]  ;;  %v5456_v17 = vor.u32 %v6470_v6, %v5453_v8  ;;  %v5437_v25 = vld [vmem:[%s9865_s3 + $0x198] sm:$0xf0]  ;;  %v5616_v8 = vor.u32 %v6510_v0, %v5613_v48 }
 0x1aa   :  { %3669 = vmatpush.bf16.msrb.mxu2 %v5344_v40  ;;  %v5483_v40 = vld [vmem:[%s9865_s3 + $0x1e8] sm:$0xf]  ;;  %v5440_v30 = vor.u32 %v6466_v5, %v5437_v25  ;;  %v6456_v6 = vld [vmem:[%s9865_s3 + $0x134] sm:$0xf0]  ;;  %v6450_v5 = vld [vmem:[%s9865_s3 + $0x10c] sm:$0xf] }
 0x1ab   :  { %v2257_v28 = vadd.f32 %v2256_v21, %v2244_v20  ;;  %v5484_v47 = vor.u32 %v6480_v41, %v5483_v40  ;;  %v5804_v21 = vor.u32 %v6560_v11, %v5803_v10  ;;  %v5787_v27 = vld [vmem:[%s9865_s3 + $0x448] sm:$0xf]  ;;  %v6552_v41 = vld [vmem:[%s9865_s3 + $0x434] sm:$0xf0]  ;;  %v6454_v10 = vld [vmem:[%s9865_s3 + $0x12c] sm:$0xf] }
 0x1ac   :  { %3597 = vmatpush.bf16.msra.mxu0 %v5244_v16  ;;  %v6556_v16 = vld [vmem:[%s9865_s3 + $0x454] sm:$0xf0]  ;;  %v5771_v40 = vld [vmem:[%s9865_s3 + $0x428] sm:$0xf]  ;;  %v5389_v11 = vld [vmem:[%s9865_s3 + $0x138] sm:$0xf0] }
 0x1ad   :  { %6652 = vtanh.f32 %v2257_v28  ;;  %v5788_v31 = vor.u32 %v6556_v16, %v5787_v27  ;;  %v5772_v45 = vor.u32 %v6552_v41, %v5771_v40  ;;  %v5373_v16 = vld [vmem:[%s9865_s3 + $0x118] sm:$0xf0]  ;;  %v6498_v41 = vld [vmem:[%s9865_s3 + $0x28c] sm:$0xf] }
 0x1ae   :  { %3670 = vmatpush.bf16.msrb.mxu2 %v5328_v46  ;;  %v5981_v40 = vld [vmem:[%s9865_s3 + $0x5d8] sm:$0xf0] }
 0x1af   :  { %3598 = vmatmul.bf16.vlgmr.msra.gmra.mxu0 %v8750_v54  ;;  %v5533_v0 = vld [vmem:[%s9865_s3 + $0x258] sm:$0xf0] }
 0x1b0   :  { %3642 = vmatpush.bf16.msrb.mxu0 %v5868_v29  ;;  %v2245_v34 = vpop.f32.mrf.mxu2  ;;  %v5805_v29 = vld [vmem:[%s9865_s3 + $0x478] sm:$0xf0] }
 0x1b1   :  { %v2258_v36 = vpop.f32.mrf.mxu3 }
 0x1b2   :  { %3671 = vmatpush.bf16.msrb.mxu2 %v5312_v58  ;;  %v6474_v58 = vld [vmem:[%s9865_s3 + $0x1cc] sm:$0xf] }
 0x1b3   :  { %v6653_v46 = vpop.eup %6652  ;;  %v5472_v39 = vor.u32 %v6474_v58, %v5469_v60  ;;  %v6548_v58 = vld [vmem:[%s9865_s3 + $0x414] sm:$0xf0] }
 0x1b4   :  { %3643 = vmatpush.bf16.msrb.mxu0 %v5852_v24  ;;  %v9379_v7 = vpack.c.bf16 %v6653_v46, %v6653_v46  ;;  %v6462_v24 = vld [vmem:[%s9865_s3 + $0x16c] sm:$0xf]  ;;  %v6460_v46 = vld [vmem:[%s9865_s3 + $0x154] sm:$0xf0] }
 0x1b5   :  { %v5404_v2 = vor.u32 %v6460_v46, %v5403_v13  ;;  %v5963_v13 = vld [vmem:[%s9865_s3 + $0x5a8] sm:$0xf]  ;;  %v6598_v46 = vld [vmem:[%s9865_s3 + $0x5ac] sm:$0xf] }
 0x1b6   :  { %3672 = vmatpush.bf16.msrb.mxu2 %v5296_v3  ;;  %3507 = vmatmul.bf16.vlgmr.msra.gmra.mxu1 %v9379_v7  ;;  %v5820_v3 = vor.u32 %v6564_v55, %v5819_v62  ;;  %v5773_v55 = vld [vmem:[%s9865_s3 + $0x438] sm:$0xf0] }
 0x1b7   :  { %3585 = vmatmul.bf16.vlgmr.msrb.gmra.mxu3 %v9379_v7  ;;  %3603 = vmatpush.bf16.msra.mxu1 %v5484_v47  ;;  %v6458_v47 = vld [vmem:[%s9865_s3 + $0x14c] sm:$0xf] }
 0x1b8   :  { %3681 = vmatpush.bf16.msrb.mxu3 %v5488_v49  ;;  %3644 = vmatpush.bf16.msrb.mxu0 %v5836_v19  ;;  %v5405_v49 = vld [vmem:[%s9865_s3 + $0x158] sm:$0xf0] }
 0x1ba   :  { %3673 = vmatpush.bf16.msrb.mxu2 %v5280_v14  ;;  %v6562_v14 = vld [vmem:[%s9865_s3 + $0x48c] sm:$0xf] }
 0x1bb   :  { %3604 = vmatpush.bf16.msra.mxu1 %v5468_v63  ;;  %v5824_v20 = vor.u32 %v6562_v14, %v5821_v1  ;;  %v6546_v14 = vld [vmem:[%s9865_s3 + $0x40c] sm:$0xf]  ;;  %v5757_v1 = vld [vmem:[%s9865_s3 + $0x418] sm:$0xf0] }
 0x1bc   :  { %3682 = vmatpush.bf16.msrb.mxu3 %v5472_v39  ;;  %3645 = vmatpush.bf16.msrb.mxu0 %v5820_v3  ;;  %v5408_v39 = vor.u32 %v6458_v47, %v5405_v49  ;;  %v5756_v3 = vor.u32 %v6548_v58, %v5755_v57  ;;  %v5760_v25 = vor.u32 %v6546_v14, %v5757_v1  ;;  %v6494_v47 = vld [vmem:[%s9865_s3 + $0x26c] sm:$0xf]  ;;  %v5549_v49 = vld [vmem:[%s9865_s3 + $0x278] sm:$0xf0]  ;;  %v5947_v57 = vld [vmem:[%s9865_s3 + $0x588] sm:$0xf] }
 0x1bd   :  { %v5552_v58 = vor.u32 %v6494_v47, %v5549_v49 }
 0x1be   :  { %3674 = vmatpush.bf16.msrb.mxu2 %v5264_v26  ;;  %v6558_v26 = vld [vmem:[%s9865_s3 + $0x46c] sm:$0xf] }
 0x1bf   :  { %3605 = vmatpush.bf16.msra.mxu1 %v5452_v59  ;;  %v5808_v36 = vor.u32 %v6558_v26, %v5805_v29  ;;  %v6506_v59 = vld [vmem:[%s9865_s3 + $0x2cc] sm:$0xf]  ;;  %v6608_v26 = vld [vmem:[%s9865_s3 + $0x5f4] sm:$0xf0] }
 0x1c0   :  { %v3443_v28 = vpop.f32.mrf.mxu0  ;;  %3683 = vmatpush.bf16.msrb.mxu3 %v5456_v17  ;;  %3646 = vmatpush.bf16.msrb.mxu0 %v5804_v21  ;;  %v5388_v17 = vor.u32 %v6456_v6, %v5387_v4  ;;  %v5392_v21 = vor.u32 %v6454_v10, %v5389_v11  ;;  %v6606_v29 = vld [vmem:[%s9865_s3 + $0x5ec] sm:$0xf]  ;;  %v5517_v11 = vld [vmem:[%s9865_s3 + $0x238] sm:$0xf0] }
 0x1c1   :  { %v3456_v38 = vpop.f32.mrf.mxu1  ;;  %v6590_v6 = vld [vmem:[%s9865_s3 + $0x56c] sm:$0xf] }
 0x1c2   :  { %3675 = vmatpush.bf16.msrb.mxu2 %v5248_v33  ;;  %v6464_v33 = vld [vmem:[%s9865_s3 + $0x174] sm:$0xf0]  ;;  %v6486_v10 = vld [vmem:[%s9865_s3 + $0x22c] sm:$0xf] }
 0x1c3   :  { %3606 = vmatpush.bf16.msra.mxu1 %v5436_v9  ;;  %v5420_v22 = vor.u32 %v6464_v33, %v5419_v32  ;;  %v6502_v9 = vld [vmem:[%s9865_s3 + $0x2ac] sm:$0xf] }
 0x1c4   :  { %3684 = vmatpush.bf16.msrb.mxu3 %v5440_v30  ;;  %3647 = vmatpush.bf16.msrb.mxu0 %v5788_v31  ;;  %v5581_v30 = vld [vmem:[%s9865_s3 + $0x2b8] sm:$0xf0]  ;;  %v5376_v31 = vor.u32 %v6450_v5, %v5373_v16  ;;  %v6584_v16 = vld [vmem:[%s9865_s3 + $0x534] sm:$0xf0] }
 0x1c5   :  { %3676 = vmatmul.bf16.vlgmr.msrb.gmra.mxu2 %v8750_v54  ;;  %v9420_v54 = vld [vmem:[%s9866_s4] sm:$0xf]  ;;  %v5501_v5 = vld [vmem:[%s9865_s3 + $0x218] sm:$0xf0] }
 0x1c6   :  { %3720 = vmatpush.bf16.msra.mxu2 %v5872_v37  ;;  %v2466_v50 = vperm.slane %v9420_v54, 0  ;;  %v5421_v37 = vld [vmem:[%s9865_s3 + $0x178] sm:$0xf0]  ;;  %3559 = vmatmul.bf16.vlgmr.msrb.gmra.mxu1 %v8885_v12 }
 0x1c7   :  { %v5424_v44 = vor.u32 %v6462_v24, %v5421_v37  ;;  %3637 = vmatmul.bf16.vlgmr.msra.gmra.mxu3 %v8885_v12  ;;  %3607 = vmatpush.bf16.msra.mxu1 %v5420_v22  ;;  %v5979_v24 = vld [vmem:[%s9865_s3 + $0x5c8] sm:$0xf]  ;;  %v6602_v37 = vld [vmem:[%s9865_s3 + $0x5cc] sm:$0xf] }
 0x1c8   :  { %v3444_v35 = vadd.f32 %v3443_v28, %v2466_v50  ;;  %v3469_v19 = vpop.f32.mrf.mxu2  ;;  %v3445_v62 = vpop.f32.mrf.mxu0  ;;  %3648 = vmatpush.bf16.msrb.mxu0 %v5772_v45  ;;  %v5597_v50 = vld [vmem:[%s9865_s3 + $0x2d8] sm:$0xf0]  ;;  %v5995_v28 = vld [vmem:[%s9865_s3 + $0x5e8] sm:$0xf]  ;;  %v5984_v22 = vor.u32 %v6602_v37, %v5981_v40  ;;  %v5568_v45 = vor.u32 %v6498_v41, %v5565_v42 }
 0x1c9   :  { %v3458_v63 = vpop.f32.mrf.mxu1  ;;  %3685 = vmatpush.bf16.msrb.mxu3 %v5424_v44  ;;  %v5600_v27 = vor.u32 %v6506_v59, %v5597_v50  ;;  %v5996_v32 = vor.u32 %v6608_v26, %v5995_v28  ;;  %v6600_v44 = vld [vmem:[%s9865_s3 + $0x5b4] sm:$0xf0]  ;;  %v5949_v62 = vld [vmem:[%s9865_s3 + $0x598] sm:$0xf0]  ;;  %v5915_v59 = vld [vmem:[%s9865_s3 + $0x548] sm:$0xf] }
 0x1ca   :  { %3721 = vmatpush.bf16.msra.mxu2 %v5856_v52  ;;  %v3457_v34 = vadd.f32 %v3456_v38, %v3444_v35  ;;  %v6550_v52 = vld [vmem:[%s9865_s3 + $0x42c] sm:$0xf]  ;;  %v5997_v35 = vld [vmem:[%s9865_s3 + $0x5f8] sm:$0xf0]  ;;  %v5372_v38 = vor.u32 %v6452_v18, %v5371_v23 }
 0x1cb   :  { %3608 = vmatpush.bf16.msra.mxu1 %v5404_v2  ;;  %v6000_v33 = vor.u32 %v6606_v29, %v5997_v35  ;;  %v5931_v2 = vld [vmem:[%s9865_s3 + $0x568] sm:$0xf]  ;;  %v5917_v23 = vld [vmem:[%s9865_s3 + $0x558] sm:$0xf0]  ;;  %v6482_v18 = vld [vmem:[%s9865_s3 + $0x20c] sm:$0xf] }
 0x1cc   :  { %v9507_v60 = vadd.f32 %v3469_v19, %v3457_v34  ;;  %3649 = vmatpush.bf16.msrb.mxu0 %v5756_v3  ;;  %v6604_v34 = vld [vmem:[%s9865_s3 + $0x5d4] sm:$0xf0]  ;;  %v5964_v19 = vor.u32 %v6600_v44, %v5963_v13  ;;  %v5504_v28 = vor.u32 %v6482_v18, %v5501_v5  ;;  %v6582_v29 = vld [vmem:[%s9865_s3 + $0x52c] sm:$0xf]  ;;  %v5901_v35 = vld [vmem:[%s9865_s3 + $0x538] sm:$0xf0] }
 0x1cd   :  { %3686 = vmatpush.bf16.msrb.mxu3 %v5408_v39  ;;  %v5980_v43 = vor.u32 %v6604_v34, %v5979_v24  ;;  %v6592_v39 = vld [vmem:[%s9865_s3 + $0x574] sm:$0xf0]  ;;  %v5885_v34 = vld [vmem:[%s9865_s3 + $0x518] sm:$0xf0]  ;;  %v6538_v13 = vld [vmem:[%s9865_s3 + $0x3cc] sm:$0xf] }
 0x1ce   :  { %3722 = vmatpush.bf16.msra.mxu2 %v5840_v61  ;;  %v5776_v61 = vor.u32 %v6550_v52, %v5773_v55  ;;  %v6594_v52 = vld [vmem:[%s9865_s3 + $0x58c] sm:$0xf]  ;;  %v5932_v14 = vor.u32 %v6592_v39, %v5931_v2  ;;  %v5741_v37 = vld [vmem:[%s9865_s3 + $0x3f8] sm:$0xf0]  ;;  %v6621_v18 = vld [vmem:[%s9867_s5 + $0x60] sm:$0xff] }
 0x1cf   :  { %3609 = vmatpush.bf16.msra.mxu1 %v5388_v17  ;;  %3650 = vmatmul.bf16.vlgmr.msrb.gmra.mxu0 %v9219_v15  ;;  %v6490_v55 = vld [vmem:[%s9865_s3 + $0x24c] sm:$0xf]  ;;  %v5952_v63 = vor.u32 %v6594_v52, %v5949_v62  ;;  %v5520_v17 = vor.u32 %v6486_v10, %v5517_v11  ;;  %v5725_v44 = vld [vmem:[%s9865_s3 + $0x3d8] sm:$0xf0]  ;;  %v6615_v52 = vld [vmem:[%s9867_s5 + $0x30] sm:$0xff] }
 0x1d0   :  { %3694 = vmatpush.bf16.msra.mxu0 %v5616_v8  ;;  %v5536_v3 = vor.u32 %v6490_v55, %v5533_v0  ;;  %v6522_v55 = vld [vmem:[%s9865_s3 + $0x34c] sm:$0xf]  ;;  %v5661_v0 = vld [vmem:[%s9865_s3 + $0x358] sm:$0xf0] }
 0x1d1   :  { %3687 = vmatpush.bf16.msrb.mxu3 %v5392_v21  ;;  %v6586_v21 = vld [vmem:[%s9865_s3 + $0x54c] sm:$0xf]  ;;  %v5645_v39 = vld [vmem:[%s9865_s3 + $0x338] sm:$0xf0] }
 0x1d2   :  { %3723 = vmatpush.bf16.msra.mxu2 %v5824_v20  ;;  %v3471_v20 = vpop.f32.mrf.mxu2  ;;  %v6518_v2 = vld [vmem:[%s9865_s3 + $0x32c] sm:$0xf]  ;;  %v6612_v10 = vld [vmem:[%s9867_s5 + $0x18] sm:$0xff] }
 0x1d3   :  { %3610 = vmatpush.bf16.msra.mxu1 %v5372_v38  ;;  %v2467_v38 = vperm.slane %v9420_v54, 1 }
 0x1d4   :  { %3695 = vmatpush.bf16.msra.mxu0 %v5600_v27  ;;  %v5899_v27 = vld [vmem:[%s9865_s3 + $0x528] sm:$0xf] }
 0x1d5   :  { %3688 = vmatpush.bf16.msrb.mxu3 %v5376_v31  ;;  %v5883_v31 = vld [vmem:[%s9865_s3 + $0x508] sm:$0xf] }
 0x1d6   :  { %3724 = vmatpush.bf16.msra.mxu2 %v5808_v36  ;;  %v5584_v36 = vor.u32 %v6502_v9, %v5581_v30  ;;  %3611 = vmatmul.bf16.vlgmr.msra.gmra.mxu1 %v8752_v56  ;;  %v5900_v9 = vor.u32 %v6584_v16, %v5899_v27  ;;  %v5904_v30 = vor.u32 %v6582_v29, %v5901_v35  ;;  %v6619_v27 = vld [vmem:[%s9867_s5 + $0x50] sm:$0xff]  ;;  %v6617_v29 = vld [vmem:[%s9867_s5 + $0x40] sm:$0xff] }
 0x1d7   :  { %3655 = vmatpush.bf16.msrb.mxu1 %v5996_v32  ;;  %v6580_v32 = vld [vmem:[%s9865_s3 + $0x514] sm:$0xf0] }
 0x1d8   :  { %3696 = vmatpush.bf16.msra.mxu0 %v5584_v36  ;;  %3689 = vmatmul.bf16.vlgmr.msrb.gmra.mxu3 %v8752_v56  ;;  %v6596_v56 = vld [vmem:[%s9865_s3 + $0x594] sm:$0xf0]  ;;  %v6542_v36 = vld [vmem:[%s9865_s3 + $0x3ec] sm:$0xf]  ;;  %v5884_v40 = vor.u32 %v6580_v32, %v5883_v31 }
 0x1d9   :  { %3733 = vmatpush.bf16.msra.mxu3 %v6000_v33  ;;  %v5948_v48 = vor.u32 %v6596_v56, %v5947_v57  ;;  %v3482_v4 = vpop.f32.mrf.mxu3  ;;  %v6578_v33 = vld [vmem:[%s9865_s3 + $0x50c] sm:$0xf]  ;;  %v6616_v57 = vld [vmem:[%s9867_s5 + $0x38] sm:$0xff] }
 0x1da   :  { %3725 = vmatpush.bf16.msra.mxu2 %v5792_v53  ;;  %v9645_v8 = vadd.f32 %v3482_v4, %v9507_v60  ;;  %v6588_v60 = vld [vmem:[%s9865_s3 + $0x554] sm:$0xf0]  ;;  %v5888_v42 = vor.u32 %v6578_v33, %v5885_v34  ;;  %v5648_v4 = vor.u32 %v6518_v2, %v5645_v39  ;;  %v6639_v2 = vld [vmem:[%s9867_s5 + $0xf0] sm:$0xff] }
 0x1db   :  { %3656 = vmatpush.bf16.msrb.mxu1 %v5980_v43  ;;  %v5916_v20 = vor.u32 %v6588_v60, %v5915_v59  ;;  %v5744_v43 = vor.u32 %v6542_v36, %v5741_v37  ;;  %v6610_v60 = vld [vmem:[%s9867_s5 + $0x8] sm:$0xff] }
 0x1dc   :  { %3697 = vmatpush.bf16.msra.mxu0 %v5568_v45 }
 0x1dd   :  { %3734 = vmatpush.bf16.msra.mxu3 %v5984_v22 }
 0x1de   :  { %3726 = vmatpush.bf16.msra.mxu2 %v5776_v61  ;;  %v5933_v61 = vld [vmem:[%s9865_s3 + $0x578] sm:$0xf0] }
 0x1df   :  { %3657 = vmatpush.bf16.msrb.mxu1 %v5964_v19  ;;  %v5936_v1 = vor.u32 %v6590_v6, %v5933_v61  ;;  %v6530_v19 = vld [vmem:[%s9865_s3 + $0x38c] sm:$0xf]  ;;  %v5629_v61 = vld [vmem:[%s9865_s3 + $0x318] sm:$0xf0] }
 0x1e0   :  { %3698 = vmatpush.bf16.msra.mxu0 %v5552_v58  ;;  %v5677_v58 = vld [vmem:[%s9865_s3 + $0x378] sm:$0xf0]  ;;  %v6514_v6 = vld [vmem:[%s9865_s3 + $0x30c] sm:$0xf] }
 0x1e1   :  { %v3484_v26 = vpop.f32.mrf.mxu3  ;;  %v5632_v11 = vor.u32 %v6514_v6, %v5629_v61 }
 0x1e2   :  { %3727 = vmatpush.bf16.msra.mxu2 %v5760_v25  ;;  %v5920_v25 = vor.u32 %v6586_v21, %v5917_v23  ;;  %v6609_v23 = vld [vmem:[%s9867_s5] sm:$0xff]  ;;  %v6618_v26 = vld [vmem:[%s9867_s5 + $0x48] sm:$0xff] }
 0x1e3   :  { %3658 = vmatpush.bf16.msrb.mxu1 %v5948_v48  ;;  %v6614_v48 = vld [vmem:[%s9867_s5 + $0x28] sm:$0xff] }
 0x1e4   :  { %3699 = vmatpush.bf16.msra.mxu0 %v5536_v3  ;;  %v6613_v3 = vld [vmem:[%s9867_s5 + $0x20] sm:$0xff] }
 0x1e5   :  { %3728 = vmatmul.bf16.vlgmr.msra.gmra.mxu2 %v9219_v15  ;;  %v5965_v15 = vld [vmem:[%s9865_s3 + $0x5b8] sm:$0xf0] }
 0x1e6   :  { %v5968_v53 = vor.u32 %v6598_v46, %v5965_v15  ;;  %v5728_v46 = vor.u32 %v6538_v13, %v5725_v44  ;;  %v5709_v15 = vld [vmem:[%s9865_s3 + $0x3b8] sm:$0xf0]  ;;  %v6629_v13 = vld [vmem:[%s9867_s5 + $0xa0] sm:$0xff] }
 0x1e7   :  { %3659 = vmatpush.bf16.msrb.mxu1 %v5932_v14  ;;  %v6611_v14 = vld [vmem:[%s9867_s5 + $0x10] sm:$0xff] }
 0x1e8   :  { %3735 = vmatpush.bf16.msra.mxu3 %v5968_v53  ;;  %v3521_v50 = vpop.f32.mrf.mxu2  ;;  %3700 = vmatpush.bf16.msra.mxu0 %v5520_v17  ;;  %v5693_v53 = vld [vmem:[%s9865_s3 + $0x398] sm:$0xf0] }
 0x1e9   :  { %v3522_v41 = vadd.f32 %v3521_v50, %v2467_v38  ;;  %v3534_v22 = vpop.f32.mrf.mxu3  ;;  %v5696_v56 = vor.u32 %v6530_v19, %v5693_v53  ;;  %v6623_v50 = vld [vmem:[%s9867_s5 + $0x70] sm:$0xff] }
 0x1eb   :  { %3660 = vmatpush.bf16.msrb.mxu1 %v5916_v20  ;;  %v9709_v45 = vadd.f32 %v3534_v22, %v3522_v41  ;;  %v6620_v20 = vld [vmem:[%s9867_s5 + $0x58] sm:$0xff]  ;;  %v6631_v41 = vld [vmem:[%s9867_s5 + $0xb0] sm:$0xff] }
 0x1ec   :  { %3736 = vmatpush.bf16.msra.mxu3 %v5952_v63  ;;  %3701 = vmatpush.bf16.msra.mxu0 %v5504_v28  ;;  %v5664_v63 = vor.u32 %v6522_v55, %v5661_v0 }
 0x1ef   :  { %3661 = vmatpush.bf16.msrb.mxu1 %v5900_v9  ;;  %3702 = vmatmul.bf16.vlgmr.msra.gmra.mxu0 %v8742_v51  ;;  %v6534_v51 = vld [vmem:[%s9865_s3 + $0x3ac] sm:$0xf] }
 0x1f0   :  { %3737 = vmatpush.bf16.msra.mxu3 %v5936_v1  ;;  %v3523_v24 = vpop.f32.mrf.mxu2  ;;  %v5712_v47 = vor.u32 %v6534_v51, %v5709_v15  ;;  %4014 = vmatpush.bf16.msrb.mxu0 %v6616_v57  ;;  %v6624_v1 = vld [vmem:[%s9867_s5 + $0x78] sm:$0xff] }
 0x1f1   :  { %v3536_v49 = vpop.f32.mrf.mxu3  ;;  %v6632_v24 = vld [vmem:[%s9867_s5 + $0xb8] sm:$0xff] }
 0x1f2   :  { %4040 = vmatpush.bf16.msrb.mxu2 %v6632_v24  ;;  %v6628_v51 = vld [vmem:[%s9867_s5 + $0x98] sm:$0xff] }
 0x1f3   :  { %3662 = vmatpush.bf16.msrb.mxu1 %v5884_v40 }
 0x1f4   :  { %3738 = vmatpush.bf16.msra.mxu3 %v5920_v25  ;;  %4015 = vmatpush.bf16.msrb.mxu0 %v6615_v52 }
 0x1f6   :  { %3663 = vmatmul.bf16.vlgmr.msrb.gmra.mxu1 %v9379_v7  ;;  %4041 = vmatpush.bf16.msrb.mxu2 %v6631_v41 }
 0x1f7   :  { %3707 = vmatpush.bf16.msra.mxu1 %v5744_v43 }
 0x1f8   :  { %3739 = vmatpush.bf16.msra.mxu3 %v5904_v30  ;;  %4016 = vmatpush.bf16.msrb.mxu0 %v6614_v48  ;;  %v6640_v48 = vld [vmem:[%s9867_s5 + $0xf8] sm:$0xff] }
 0x1fb   :  { %3708 = vmatpush.bf16.msra.mxu1 %v5728_v46 }
 0x1fc   :  { %3740 = vmatpush.bf16.msra.mxu3 %v5888_v42  ;;  %4017 = vmatpush.bf16.msrb.mxu0 %v6613_v3  ;;  %v2468_v3 = vperm.slane %v9420_v54, 2 }
 0x1ff   :  { %3741 = vmatmul.bf16.vlgmr.msra.gmra.mxu3 %v9379_v7  ;;  %3709 = vmatpush.bf16.msra.mxu1 %v5712_v47  ;;  %v6526_v7 = vld [vmem:[%s9865_s3 + $0x36c] sm:$0xf] }
 0x200   :  { %v5680_v62 = vor.u32 %v6526_v7, %v5677_v58  ;;  %4018 = vmatpush.bf16.msrb.mxu0 %v6612_v10  ;;  %v6626_v7 = vld [vmem:[%s9867_s5 + $0x88] sm:$0xff]  ;;  %4053 = vmatpush.bf16.msrb.mxu3 %v6640_v48 }
 0x203   :  { %3710 = vmatpush.bf16.msra.mxu1 %v5696_v56 }
 0x204   :  { %4019 = vmatpush.bf16.msrb.mxu0 %v6611_v14  ;;  %4054 = vmatpush.bf16.msrb.mxu3 %v6639_v2 }
 0x207   :  { %3711 = vmatpush.bf16.msra.mxu1 %v5680_v62  ;;  %v6625_v62 = vld [vmem:[%s9867_s5 + $0x80] sm:$0xff] }
 0x208   :  { %4020 = vmatpush.bf16.msrb.mxu0 %v6610_v60 }
 0x20b   :  { %3712 = vmatpush.bf16.msra.mxu1 %v5664_v63  ;;  %v3495_v59 = vpop.f32.mrf.mxu0 }
 0x20c   :  { %4021 = vmatpush.bf16.msrb.mxu0 %v6609_v23  ;;  %v3496_v9 = vadd.f32 %v3495_v59, %v9645_v8  ;;  %v6630_v8 = vld [vmem:[%s9867_s5 + $0xa8] sm:$0xff] }
 0x20d   :  { %4042 = vmatpush.bf16.msrb.mxu2 %v6630_v8  ;;  %v6641_v8 = vld [vmem:[%s9868_s6] ss:$0 sm:$0xff] }
 0x20f   :  { %3713 = vmatpush.bf16.msra.mxu1 %v5648_v4  ;;  %v6638_v4 = vld [vmem:[%s9867_s5 + $0xe8] sm:$0xff] }
 0x210   :  { %4055 = vmatpush.bf16.msrb.mxu3 %v6638_v4 }
 0x211   :  { %4043 = vmatpush.bf16.msrb.mxu2 %v6629_v13 }
 0x212   :  { %v3573_v17 = vpop.f32.mrf.mxu2 }
 0x213   :  { %3714 = vmatpush.bf16.msra.mxu1 %v5632_v11  ;;  %v3497_v21 = vpop.f32.mrf.mxu0  ;;  %v6637_v11 = vld [vmem:[%s9867_s5 + $0xe0] sm:$0xff] }
 0x214   :  { %4056 = vmatpush.bf16.msrb.mxu3 %v6637_v11 }
 0x215   :  { %4044 = vmatpush.bf16.msrb.mxu2 %v6628_v51 }
 0x216   :  { %3715 = vmatmul.bf16.vlgmr.msra.gmra.mxu1 %v8885_v12  ;;  %v6622_v12 = vld [vmem:[%s9867_s5 + $0x68] sm:$0xff] }
 0x217   :  { %4027 = vmatpush.bf16.msrb.mxu1 %v6624_v1  ;;  %v6636_v1 = vld [vmem:[%s9867_s5 + $0xd8] sm:$0xff] }
 0x218   :  { %4057 = vmatpush.bf16.msrb.mxu3 %v6636_v1 }
 0x21a   :  { %v3575_v5 = vpop.f32.mrf.mxu2 }
 0x21b   :  { %4028 = vmatpush.bf16.msrb.mxu1 %v6623_v50  ;;  %v3547_v25 = vpop.f32.mrf.mxu0 }
 0x21c   :  { %v3548_v43 = vadd.f32 %v3547_v25, %v9709_v45  ;;  %v6627_v45 = vld [vmem:[%s9867_s5 + $0x90] sm:$0xff]  ;;  %v6633_v25 = vld [vmem:[%s9867_s5 + $0xc0] sm:$0xff] }
 0x21d   :  { %4045 = vmatpush.bf16.msrb.mxu2 %v6627_v45 }
 0x21f   :  { %4029 = vmatpush.bf16.msrb.mxu1 %v6622_v12  ;;  %v6634_v12 = vld [vmem:[%s9867_s5 + $0xc8] sm:$0xff] }
 0x221   :  { %4046 = vmatpush.bf16.msrb.mxu2 %v6626_v7 }
 0x223   :  { %4030 = vmatpush.bf16.msrb.mxu1 %v6621_v18  ;;  %v3549_v28 = vpop.f32.mrf.mxu0 }
 0x225   :  { %4047 = vmatpush.bf16.msrb.mxu2 %v6625_v62 }
 0x227   :  { %4031 = vmatpush.bf16.msrb.mxu1 %v6620_v20 }
 0x228   :  { %v9792_v16 = vpop.f32.mrf.mxu2 }
 0x22b   :  { %4032 = vmatpush.bf16.msrb.mxu1 %v6619_v27 }
 0x22c   :  { %v3599_v38 = vpop.f32.mrf.mxu0 }
 0x22d   :  { %v3600_v61 = vadd.f32 %v3599_v38, %v2468_v3 }
 0x22f   :  { %4033 = vmatpush.bf16.msrb.mxu1 %v6618_v26 }
 0x230   :  { %v3627_v35 = vpop.f32.mrf.mxu2 }
 0x233   :  { %4034 = vmatpush.bf16.msrb.mxu1 %v6617_v29  ;;  %v3508_v30 = vpop.f32.mrf.mxu1  ;;  %v2469_v29 = vperm.slane %v9420_v54, 3 }
 0x234   :  { %v3509_v31 = vadd.f32 %v3508_v30, %v3496_v9  ;;  %v3601_v33 = vpop.f32.mrf.mxu0 }
 0x236   :  { %v3746_v32 = vmax.f32 %v3509_v31, 0.0 }
 0x238   :  { %v3750_v34 = vpack.c.bf16 %v3746_v32, %v3746_v32 }
 0x23a   :  { %v3586_v36 = vpop.f32.mrf.mxu3  ;;  %4022 = vmatmul.bf16.vlgmr.msrb.gmra.mxu0 %v3750_v34 }
 0x23b   :  { %v3510_v40 = vpop.f32.mrf.mxu1 }
 0x242   :  { %v3588_v42 = vpop.f32.mrf.mxu3 }
 0x243   :  { %v3560_v44 = vpop.f32.mrf.mxu1 }
 0x244   :  { %v3561_v46 = vadd.f32 %v3560_v44, %v3548_v43 }
 0x246   :  { %v3574_v15 = vadd.f32 %v3573_v17, %v3561_v46  ;;  %v6635_v17 = vld [vmem:[%s9867_s5 + $0xd0] sm:$0xff] }
 0x247   :  { %4058 = vmatpush.bf16.msrb.mxu3 %v6635_v17 }
 0x248   :  { %v9804_v37 = vpop.f32.mrf.mxu2  ;;  %v3587_v47 = vadd.f32 %v3586_v36, %v3574_v15 }
 0x249   :  { %v3678_v35 = vadd.f32 %v9804_v37, %v2469_v29 }
 0x24a   :  { %v3638_v49 = vpop.f32.mrf.mxu3  ;;  %v3747_v19 = vmax.f32 %v3587_v47, 0.0 }
 0x24b   :  { %v3562_v53 = vpop.f32.mrf.mxu1  ;;  %4059 = vmatpush.bf16.msrb.mxu3 %v6634_v12 }
 0x24c   :  { %v3751_v57 = vpack.c.bf16 %v3747_v19, %v3747_v19  ;;  %v3651_v56 = vpop.f32.mrf.mxu0 }
 0x24e   :  { %4035 = vmatmul.bf16.vlgmr.msrb.gmra.mxu1 %v3751_v57 }
 0x24f   :  { %4060 = vmatpush.bf16.msrb.mxu3 %v6633_v25 }
 0x250   :  { %v3679_v22 = vpop.f32.mrf.mxu2 }
 0x252   :  { %v3640_v58 = vpop.f32.mrf.mxu3 }
 0x253   :  { %v3612_v52 = vpop.f32.mrf.mxu1 }
 0x254   :  { %v3653_v55 = vpop.f32.mrf.mxu0  ;;  %v3613_v14 = vadd.f32 %v3612_v52, %v3600_v61 }
 0x256   :  { %v3626_v59 = vadd.f32 %v9792_v16, %v3613_v14 }
 0x258   :  { %v3639_v50 = vadd.f32 %v3638_v49, %v3626_v59 }
 0x25a   :  { %v3652_v21 = vadd.f32 %v3651_v56, %v3639_v50 }
 0x25b   :  { %v3690_v63 = vpop.f32.mrf.mxu3  ;;  %v3614_v39 = vpop.f32.mrf.mxu1 }
 0x25c   :  { %v3691_v38 = vadd.f32 %v3690_v63, %v3678_v35 }
 0x263   :  { %v3692_v10 = vpop.f32.mrf.mxu3 }
 0x268   :  { %v3729_v0 = vpop.f32.mrf.mxu2 }
 0x26c   :  { %v3703_v60 = vpop.f32.mrf.mxu0 }
 0x26d   :  { %v3704_v9 = vadd.f32 %v3703_v60, %v3691_v38 }
 0x270   :  { %v3731_v6 = vpop.f32.mrf.mxu2 }
 0x273   :  { %v3664_v23 = vpop.f32.mrf.mxu1 }
 0x274   :  { %v3665_v18 = vadd.f32 %v3664_v23, %v3652_v21  ;;  %v3705_v5 = vpop.f32.mrf.mxu0 }
 0x276   :  { %v3748_v20 = vmax.f32 %v3665_v18, 0.0 }
 0x278   :  { %v3752_v27 = vpack.c.bf16 %v3748_v20, %v3748_v20 }
 0x27a   :  { %4048 = vmatmul.bf16.vlgmr.msrb.gmra.mxu2 %v3752_v27 }
 0x27b   :  { %v3666_v28 = vpop.f32.mrf.mxu1 }
 0x282   :  { %v3742_v16 = vpop.f32.mrf.mxu3 }
 0x28a   :  { %v3744_v26 = vpop.f32.mrf.mxu3 }
 0x293   :  { %v3716_v30 = vpop.f32.mrf.mxu1 }
 0x294   :  { %v3717_v31 = vadd.f32 %v3716_v30, %v3704_v9 }
 0x296   :  { %v3730_v32 = vadd.f32 %v3729_v0, %v3717_v31 }
 0x298   :  { %v3743_v33 = vadd.f32 %v3742_v16, %v3730_v32 }
 0x29a   :  { %v3749_v24 = vmax.f32 %v3743_v33, 0.0 }
 0x29b   :  { %v3718_v34 = vpop.f32.mrf.mxu1 }
 0x29c   :  { %v3753_v36 = vpack.c.bf16 %v3749_v24, %v3749_v24 }
 0x29e   :  { %4061 = vmatmul.bf16.vlgmr.msrb.gmra.mxu3 %v3753_v36 }
 0x2b7   :  { %v4023_v40 = vpop.f32.mrf.mxu0 }
 0x2b8   :  { %v4024_v42 = vadd.f32 %v6641_v8, %v4023_v40 }
 0x2bf   :  { %v4025_v41 = vpop.f32.mrf.mxu0 }
 0x2cb   :  { %v4036_v54 = vpop.f32.mrf.mxu1 }
 0x2cc   :  { %v4037_v43 = vadd.f32 %v4036_v54, %v4024_v42 }
 0x2d3   :  { %v4038_v37 = vpop.f32.mrf.mxu1 }
 0x2fd   :  { %v4049_v22 = vpop.f32.mrf.mxu2 }
 0x2fe   :  { %v4050_v44 = vadd.f32 %v4049_v22, %v4037_v43 }
 0x305   :  { %v4051_v13 = vpop.f32.mrf.mxu2 }
 0x321   :  { %v4062_v46 = vpop.f32.mrf.mxu3 }
 0x322   :  { %v4063_v51 = vadd.f32 %v4062_v46, %v4050_v44 }
 0x324   :  { %4066 = vmax.xlane.f32.xlu0 %v4063_v51 }
 0x329   :  { %v4064_v15 = vpop.f32.mrf.mxu3 }
 0x397   :  { %v4067_v47 = vpop.xlane.xlu0 %4066 }
 0x398   :  { %v4068_v49 = vsub.f32 %v4063_v51, %v4067_v47 }
 0x39a   :  { %v4069_v19 = vmul.f32 1.442695, %v4068_v49 }
 0x39c   :  { %6654 = vpow2.f32 %v4069_v19 }
 0x3a2   :  { %v6655_v53 = vpop.eup %6654 }
 0x3a3   :  { %4071 = vadd.xlane.f32.xlu0 %v6655_v53 }
 0x416   :  { %v4072_v45 = vpop.xlane.xlu0 %4071 }
 0x417   :  { %6656 = vlog2.f32 %v4072_v45 }
 0x41d   :  { %v6657_v57 = vpop.eup %6656 }
 0x41e   :  { %v4074_v56 = vmul.f32 0.6931472, %v6657_v57 }
 0x420   :  { %v4075_v7 = vsub.f32 %v4068_v49, %v4074_v56 }
 0x422   :  { %4076 = vst [vmem:[%s9869_s7] sm:$0xff] %v4075_v7 }

</bundles_post_ra>
